<compile_context>
chip_gen: v7x
topology: tpu7x:2x2x1
jax: 0.10.0
libtpu: 0.0.40
codegen_flags: <defaults>
</compile_context>

<pallas_src>
import functools

import jax
import jax.numpy as jnp
from jax.experimental import pallas as pl
from jax.experimental.pallas import tpu as pltpu

KSIZE = 7  # kernel_size in the reference PyTorch code
M_BLK = 256  # lane-block width (multiple of 128; feeds megacore via grid)


def _round_up(x, m):
    return (x + m - 1) // m * m


# ----------------------------------------------------------------------------
# Pallas kernel: one fused matmul + bias (+ PReLU) (+ IRUnit residual)
#   w_ref : (Cout_pad, Kc_pad)   bf16   (Kc = K*K*Cin, zero padded)
#   b_ref : (Cout_pad, 1)        f32
#   a_ref : (Cout_pad, 1)        f32    (only if has_alpha)
#   p_ref : (Kc_pad, M_BLK)      bf16   (im2col patches, lane-dense block)
#   r_ref : (Cout_pad, M_BLK)    f32    (only if has_residual)
#   o_ref : (Cout_pad, M_BLK)    f32
# ----------------------------------------------------------------------------
def _conv_kernel(*refs, has_alpha, has_residual):
    idx = 0
    w_ref = refs[idx]; idx += 1
    b_ref = refs[idx]; idx += 1
    a_ref = None
    if has_alpha:
        a_ref = refs[idx]; idx += 1
    p_ref = refs[idx]; idx += 1
    r_ref = None
    if has_residual:
        r_ref = refs[idx]; idx += 1
    o_ref = refs[idx]

    # Single MXU matmul with the taps folded into the contraction dim.
    y = jnp.dot(w_ref[...], p_ref[...], preferred_element_type=jnp.float32)
    y = y + b_ref[...]                       # bias, broadcast along lanes
    if has_alpha:                            # PReLU (single shared parameter)
        y = jnp.where(y >= 0.0, y, a_ref[...] * y)
    if has_residual:                         # IRUnit tail: x - H H^T x
        y = r_ref[...] - y
    o_ref[...] = y


# ----------------------------------------------------------------------------
# Conv wrapper: im2col in XLA, one pallas_call per conv.
# ----------------------------------------------------------------------------
def conv2d(x, w, b, alpha=None, *, padding=0, residual=None):
    """NHWC conv. x (N,H,W,Cin), w (K,K,Cin,Cout) HWIO, b (Cout,).

    If `alpha` is given, PReLU(alpha) is applied to the output.
    If `residual` is given, returns residual - conv(x) (IRUnit tail).
    """
    n = x.shape[0]
    k, _, cin, cout = w.shape

    xb = x.astype(jnp.bfloat16)
    if padding:
        xb = jnp.pad(xb, ((0, 0), (padding, padding), (padding, padding), (0, 0)))
    hp, wp = xb.shape[1], xb.shape[2]
    ho, wo = hp - k + 1, wp - k + 1
    hw = ho * wo
    m_total = n * hw

    # im2col -> RHS of shape (K*K*Cin, N*HW), contraction order (dy, dx, ci)
    # matching w.reshape(K*K*Cin, Cout).
    taps = []
    for dy in range(k):
        for dx in range(k):
            taps.append(xb[:, dy:dy + ho, dx:dx + wo, :].reshape(n, hw, cin))
    pt = jnp.stack(taps, axis=0)                           # (KK, N, HW, Cin)
    rhs = pt.transpose(0, 3, 1, 2).reshape(k * k * cin, m_total)

    # Pad contraction dim (lane dim of LHS) to a multiple of 128 and the
    # column dim (lane dim of RHS / output) to a multiple of M_BLK so every
    # store is full-lane; pad Cout (sublane dim of the output) to 8.
    kc = k * k * cin
    kc_pad = _round_up(kc, 128)
    m_pad = _round_up(m_total, M_BLK)
    cout_pad = _round_up(cout, 8)

    rhs = jnp.pad(rhs, ((0, kc_pad - kc), (0, m_pad - m_total)))

    lhs = w.reshape(kc, cout).T.astype(jnp.bfloat16)       # (Cout, Kc)
    lhs = jnp.pad(lhs, ((0, cout_pad - cout), (0, kc_pad - kc)))
    b2 = jnp.pad(jnp.reshape(b, (cout, 1)).astype(jnp.float32),
                 ((0, cout_pad - cout), (0, 0)))

    grid = (m_pad // M_BLK,)

    args = [lhs, b2]
    in_specs = [
        pl.BlockSpec((cout_pad, kc_pad), lambda i: (0, 0)),   # full weight, 1 DMA
        pl.BlockSpec((cout_pad, 1), lambda i: (0, 0)),
    ]
    has_alpha = alpha is not None
    if has_alpha:
        a2 = jnp.broadcast_to(
            jnp.asarray(alpha, jnp.float32).reshape(1, 1), (cout_pad, 1))
        args.append(a2)
        in_specs.append(pl.BlockSpec((cout_pad, 1), lambda i: (0, 0)))
    args.append(rhs)
    in_specs.append(pl.BlockSpec((kc_pad, M_BLK), lambda i: (0, i)))
    has_res = residual is not None
    if has_res:
        r2 = residual.reshape(n * hw, cout).T.astype(jnp.float32)  # (Cout, M)
        r2 = jnp.pad(r2, ((0, cout_pad - cout), (0, m_pad - m_total)))
        args.append(r2)
        in_specs.append(pl.BlockSpec((cout_pad, M_BLK), lambda i: (0, i)))

    out = pl.pallas_call(
        functools.partial(_conv_kernel, has_alpha=has_alpha, has_residual=has_res),
        out_shape=jax.ShapeDtypeStruct((cout_pad, m_pad), jnp.float32),
        grid=grid,
        in_specs=in_specs,
        out_specs=pl.BlockSpec((cout_pad, M_BLK), lambda i: (0, i)),
        compiler_params=pltpu.CompilerParams(
            dimension_semantics=("parallel",),
            vmem_limit_bytes=32 * 1024 * 1024,
        ),
    )(*args)

    # (Cout_pad, M_pad) -> (N, Ho, Wo, Cout)
    out = out[:cout, :m_total]
    return out.T.reshape(n, ho, wo, cout)


# ----------------------------------------------------------------------------
# Parameter initialization (deterministic, synthetic)
# ----------------------------------------------------------------------------
def init_params(key):
    keys = iter(jax.random.split(key, 64))

    def nrm(shape, scale=0.05):
        return scale * jax.random.normal(next(keys), shape, jnp.float32)

    params = {
        "up_w": nrm((1, 1, 1, 10), 0.1),     # Conv2d(1, 10, 1), HWIO
        "up_b": nrm((10,), 0.1),
        "ir": [],
    }
    for _ in range(10):  # A1..A10 : IRUnit(10)
        conv_w = nrm((KSIZE, KSIZE, 10, 10))        # Conv2d(10,10,7), HWIO
        conv_b = nrm((10,))
        alpha = jnp.float32(0.25)                   # nn.PReLU() default init
        # ConvTranspose2d(10,10,7) weight in PyTorch layout (in, out, K, K);
        # equivalent valid-conv weight = spatial flip + channel swap, HWIO.
        tw_torch = nrm((10, 10, KSIZE, KSIZE))
        tconv_w = jnp.flip(tw_torch, axis=(2, 3)).transpose(2, 3, 0, 1)
        tconv_b = nrm((10,))
        params["ir"].append((conv_w, conv_b, alpha, tconv_w, tconv_b))

    # IntegrateUnit(101, 1)
    params["s1_w"] = nrm((KSIZE, KSIZE, 101, 50), 0.02)
    params["s1_b"] = nrm((50,), 0.02)
    params["sa1"] = jnp.float32(0.25)
    params["s2_w"] = nrm((KSIZE, KSIZE, 50, 25), 0.02)
    params["s2_b"] = nrm((25,), 0.02)
    params["sa2"] = jnp.float32(0.25)
    params["s3_w"] = nrm((KSIZE, KSIZE, 25, 12), 0.02)
    params["s3_b"] = nrm((12,), 0.02)
    params["sa3"] = jnp.float32(0.25)
    params["s4_w"] = nrm((1, 1, 12, 1), 0.1)
    params["s4_b"] = nrm((1,), 0.1)
    return params


# ----------------------------------------------------------------------------
# CRCNet forward
# ----------------------------------------------------------------------------
def crcnet_forward(params, x_nchw):
    x = jnp.transpose(x_nchw, (0, 2, 3, 1))          # NCHW -> NHWC, (N,H,W,1)

    current = conv2d(x, params["up_w"], params["up_b"])   # up: 1x1 conv -> 10ch

    feats = [x]
    for conv_w, conv_b, alpha, tconv_w, tconv_b in params["ir"]:
        # IRUnit: HTx = PReLU(conv(x)); HHTx = tconv(HTx); return x - HHTx
        htx = conv2d(current, conv_w, conv_b, alpha=alpha)          # valid conv
        current = conv2d(htx, tconv_w, tconv_b,
                         padding=KSIZE - 1, residual=current)       # x - HHTx
        feats.append(current)

    s = jnp.concatenate(feats, axis=-1)               # (N, H, W, 101)

    h = conv2d(s, params["s1_w"], params["s1_b"], alpha=params["sa1"], padding=3)
    h = conv2d(h, params["s2_w"], params["s2_b"], alpha=params["sa2"], padding=3)
    h = conv2d(h, params["s3_w"], params["s3_b"], alpha=params["sa3"], padding=3)
    out = conv2d(h, params["s4_w"], params["s4_b"])   # 1x1 conv -> 1 channel

    return jnp.transpose(out, (0, 3, 1, 2))           # NHWC -> NCHW


if __name__ == "__main__":
    key = jax.random.PRNGKey(0)
    x = jax.random.normal(key, (2, 1, 16, 16), jnp.float32)   # NCHW input
    params = init_params(jax.random.PRNGKey(42))

    fwd = jax.jit(crcnet_forward)
    y = fwd(params, x)
    jax.block_until_ready(y)

    assert y.shape == (2, 1, 16, 16), y.shape
    assert jnp.all(jnp.isfinite(y))
    print("KERNEL_OK")
</pallas_src>

<mosaic_0001>
module attributes {stable_mosaic.version = 11 : i64} {
  func.func @_conv_kernel(%arg0: i32, %arg1: memref<16x128xbf16, #tpu.memory_space<vmem>>, %arg2: memref<16x1xf32, #tpu.memory_space<vmem>>, %arg3: memref<128x256xbf16, #tpu.memory_space<vmem>>, %arg4: memref<16x256xf32, #tpu.memory_space<vmem>>) attributes {dimension_semantics = [#tpu.dimension_semantics<parallel>], iteration_bounds = array<i64: 2>, scalar_prefetch = 0 : i64, scratch_operands = 0 : i64, tpu.core_type = #tpu.core_type<tc>, window_params = [{pipeline_mode = #tpu.pipeline_mode<synchronous>, transform_indices = @transform_0, window_bounds = array<i64: 16, 128>}, {pipeline_mode = #tpu.pipeline_mode<synchronous>, transform_indices = @transform_1, window_bounds = array<i64: 16, 1>}, {transform_indices = @transform_2, window_bounds = array<i64: 128, 256>}, {transform_indices = @transform_3, window_bounds = array<i64: 16, 256>}]} {
    %c0 = arith.constant 0 : index
    %c0_0 = arith.constant 0 : index
    %0 = vector.load %arg1[%c0, %c0_0] : memref<16x128xbf16, #tpu.memory_space<vmem>>, vector<16x128xbf16>
    %c0_1 = arith.constant 0 : index
    %c0_2 = arith.constant 0 : index
    %1 = vector.load %arg3[%c0_1, %c0_2] : memref<128x256xbf16, #tpu.memory_space<vmem>>, vector<128x256xbf16>
    %cst = arith.constant dense<0.000000e+00> : vector<16x256xf32>
    %2 = tpu.matmul %0, %1, %cst {dimension_numbers = #tpu.dot_dimension_numbers<[1], [0], [0], [1], [0, 0, 1, 1], [], []>} : vector<16x128xbf16>, vector<128x256xbf16>, vector<16x256xf32> -> vector<16x256xf32>
    %c0_3 = arith.constant 0 : index
    %c0_4 = arith.constant 0 : index
    %3 = vector.load %arg2[%c0_3, %c0_4] : memref<16x1xf32, #tpu.memory_space<vmem>>, vector<16x1xf32>
    %4 = vector.broadcast %3 : vector<16x1xf32> to vector<16x256xf32>
    %5 = arith.addf %2, %4 : vector<16x256xf32>
    %c0_5 = arith.constant 0 : index
    %c0_6 = arith.constant 0 : index
    %6 = vector.load %arg4[%c0_5, %c0_6] : memref<16x256xf32, #tpu.memory_space<vmem>>, vector<16x256xf32>
    tpu.vector_store %arg4[%c0_5, %c0_6], %5 {strides = array<i32>} : memref<16x256xf32, #tpu.memory_space<vmem>>, vector<16x256xf32>,
    return
  }
  func.func @transform_0(%arg0: i32) -> (i32, i32) {
    %c0_i32 = arith.constant 0 : i32
    %c0_i32_0 = arith.constant 0 : i32
    %c0_i32_1 = arith.constant 0 : i32
    return %c0_i32, %c0_i32_0 : i32, i32
  }
  func.func @transform_1(%arg0: i32) -> (i32, i32) {
    %c0_i32 = arith.constant 0 : i32
    %c0_i32_0 = arith.constant 0 : i32
    %c0_i32_1 = arith.constant 0 : i32
    return %c0_i32, %c0_i32_0 : i32, i32
  }
  func.func @transform_2(%arg0: i32) -> (i32, i32) {
    %c0_i32 = arith.constant 0 : i32
    %c0_i32_0 = arith.constant 0 : i32
    return %c0_i32, %arg0 : i32, i32
  }
  func.func @transform_3(%arg0: i32) -> (i32, i32) {
    %c0_i32 = arith.constant 0 : i32
    %c0_i32_0 = arith.constant 0 : i32
    return %c0_i32, %arg0 : i32, i32
  }
}

module attributes {stable_mosaic.version = 11 : i64} {
  func.func @_conv_kernel(%arg0: i32, %arg1: memref<16x512xbf16, #tpu.memory_space<vmem>>, %arg2: memref<16x1xf32, #tpu.memory_space<vmem>>, %arg3: memref<16x1xf32, #tpu.memory_space<vmem>>, %arg4: memref<512x256xbf16, #tpu.memory_space<vmem>>, %arg5: memref<16x256xf32, #tpu.memory_space<vmem>>) attributes {dimension_semantics = [#tpu.dimension_semantics<parallel>], iteration_bounds = array<i64: 1>, scalar_prefetch = 0 : i64, scratch_operands = 0 : i64, tpu.core_type = #tpu.core_type<tc>, window_params = [{pipeline_mode = #tpu.pipeline_mode<synchronous>, transform_indices = @transform_0, window_bounds = array<i64: 16, 512>}, {pipeline_mode = #tpu.pipeline_mode<synchronous>, transform_indices = @transform_1, window_bounds = array<i64: 16, 1>}, {pipeline_mode = #tpu.pipeline_mode<synchronous>, transform_indices = @transform_2, window_bounds = array<i64: 16, 1>}, {transform_indices = @transform_3, window_bounds = array<i64: 512, 256>}, {transform_indices = @transform_4, window_bounds = array<i64: 16, 256>}]} {
    %c0 = arith.constant 0 : index
    %c0_0 = arith.constant 0 : index
    %0 = vector.load %arg1[%c0, %c0_0] : memref<16x512xbf16, #tpu.memory_space<vmem>>, vector<16x512xbf16>
    %c0_1 = arith.constant 0 : index
    %c0_2 = arith.constant 0 : index
    %1 = vector.load %arg4[%c0_1, %c0_2] : memref<512x256xbf16, #tpu.memory_space<vmem>>, vector<512x256xbf16>
    %cst = arith.constant dense<0.000000e+00> : vector<16x256xf32>
    %2 = tpu.matmul %0, %1, %cst {dimension_numbers = #tpu.dot_dimension_numbers<[1], [0], [0], [1], [0, 0, 1, 1], [], []>} : vector<16x512xbf16>, vector<512x256xbf16>, vector<16x256xf32> -> vector<16x256xf32>
    %c0_3 = arith.constant 0 : index
    %c0_4 = arith.constant 0 : index
    %3 = vector.load %arg2[%c0_3, %c0_4] : memref<16x1xf32, #tpu.memory_space<vmem>>, vector<16x1xf32>
    %4 = vector.broadcast %3 : vector<16x1xf32> to vector<16x256xf32>
    %5 = arith.addf %2, %4 : vector<16x256xf32>
    %cst_5 = arith.constant 0.000000e+00 : f32
    %6 = vector.broadcast %cst_5 : f32 to vector<16x256xf32>
    %7 = arith.cmpf oge, %5, %6 : vector<16x256xf32>
    %c0_6 = arith.constant 0 : index
    %c0_7 = arith.constant 0 : index
    %8 = vector.load %arg3[%c0_6, %c0_7] : memref<16x1xf32, #tpu.memory_space<vmem>>, vector<16x1xf32>
    %9 = vector.broadcast %8 : vector<16x1xf32> to vector<16x256xf32>
    %10 = arith.mulf %9, %5 : vector<16x256xf32>
    %11 = arith.select %7, %5, %10 : vector<16x256xi1>, vector<16x256xf32>
    %c0_8 = arith.constant 0 : index
    %c0_9 = arith.constant 0 : index
    %12 = vector.load %arg5[%c0_8, %c0_9] : memref<16x256xf32, #tpu.memory_space<vmem>>, vector<16x256xf32>
    tpu.vector_store %arg5[%c0_8, %c0_9], %11 {strides = array<i32>} : memref<16x256xf32, #tpu.memory_space<vmem>>, vector<16x256xf32>,
    return
  }
  func.func @transform_0(%arg0: i32) -> (i32, i32) {
    %c0_i32 = arith.constant 0 : i32
    %c0_i32_0 = arith.constant 0 : i32
    %c0_i32_1 = arith.constant 0 : i32
    return %c0_i32, %c0_i32_0 : i32, i32
  }
  func.func @transform_1(%arg0: i32) -> (i32, i32) {
    %c0_i32 = arith.constant 0 : i32
    %c0_i32_0 = arith.constant 0 : i32
    %c0_i32_1 = arith.constant 0 : i32
    return %c0_i32, %c0_i32_0 : i32, i32
  }
  func.func @transform_2(%arg0: i32) -> (i32, i32) {
    %c0_i32 = arith.constant 0 : i32
    %c0_i32_0 = arith.constant 0 : i32
    %c0_i32_1 = arith.constant 0 : i32
    return %c0_i32, %c0_i32_0 : i32, i32
  }
  func.func @transform_3(%arg0: i32) -> (i32, i32) {
    %c0_i32 = arith.constant 0 : i32
    %c0_i32_0 = arith.constant 0 : i32
    return %c0_i32, %arg0 : i32, i32
  }
  func.func @transform_4(%arg0: i32) -> (i32, i32) {
    %c0_i32 = arith.constant 0 : i32
    %c0_i32_0 = arith.constant 0 : i32
    return %c0_i32, %arg0 : i32, i32
  }
}

module attributes {stable_mosaic.version = 11 : i64} {
  func.func @_conv_kernel(%arg0: i32, %arg1: memref<16x512xbf16, #tpu.memory_space<vmem>>, %arg2: memref<16x1xf32, #tpu.memory_space<vmem>>, %arg3: memref<512x256xbf16, #tpu.memory_space<vmem>>, %arg4: memref<16x256xf32, #tpu.memory_space<vmem>>, %arg5: memref<16x256xf32, #tpu.memory_space<vmem>>) attributes {dimension_semantics = [#tpu.dimension_semantics<parallel>], iteration_bounds = array<i64: 2>, scalar_prefetch = 0 : i64, scratch_operands = 0 : i64, tpu.core_type = #tpu.core_type<tc>, window_params = [{pipeline_mode = #tpu.pipeline_mode<synchronous>, transform_indices = @transform_0, window_bounds = array<i64: 16, 512>}, {pipeline_mode = #tpu.pipeline_mode<synchronous>, transform_indices = @transform_1, window_bounds = array<i64: 16, 1>}, {transform_indices = @transform_2, window_bounds = array<i64: 512, 256>}, {transform_indices = @transform_3, window_bounds = array<i64: 16, 256>}, {transform_indices = @transform_4, window_bounds = array<i64: 16, 256>}]} {
    %c0 = arith.constant 0 : index
    %c0_0 = arith.constant 0 : index
    %0 = vector.load %arg1[%c0, %c0_0] : memref<16x512xbf16, #tpu.memory_space<vmem>>, vector<16x512xbf16>
    %c0_1 = arith.constant 0 : index
    %c0_2 = arith.constant 0 : index
    %1 = vector.load %arg3[%c0_1, %c0_2] : memref<512x256xbf16, #tpu.memory_space<vmem>>, vector<512x256xbf16>
    %cst = arith.constant dense<0.000000e+00> : vector<16x256xf32>
    %2 = tpu.matmul %0, %1, %cst {dimension_numbers = #tpu.dot_dimension_numbers<[1], [0], [0], [1], [0, 0, 1, 1], [], []>} : vector<16x512xbf16>, vector<512x256xbf16>, vector<16x256xf32> -> vector<16x256xf32>
    %c0_3 = arith.constant 0 : index
    %c0_4 = arith.constant 0 : index
    %3 = vector.load %arg2[%c0_3, %c0_4] : memref<16x1xf32, #tpu.memory_space<vmem>>, vector<16x1xf32>
    %4 = vector.broadcast %3 : vector<16x1xf32> to vector<16x256xf32>
    %5 = arith.addf %2, %4 : vector<16x256xf32>
    %c0_5 = arith.constant 0 : index
    %c0_6 = arith.constant 0 : index
    %6 = vector.load %arg4[%c0_5, %c0_6] : memref<16x256xf32, #tpu.memory_space<vmem>>, vector<16x256xf32>
    %7 = arith.subf %6, %5 : vector<16x256xf32>
    %c0_7 = arith.constant 0 : index
    %c0_8 = arith.constant 0 : index
    %8 = vector.load %arg5[%c0_7, %c0_8] : memref<16x256xf32, #tpu.memory_space<vmem>>, vector<16x256xf32>
    tpu.vector_store %arg5[%c0_7, %c0_8], %7 {strides = array<i32>} : memref<16x256xf32, #tpu.memory_space<vmem>>, vector<16x256xf32>,
    return
  }
  func.func @transform_0(%arg0: i32) -> (i32, i32) {
    %c0_i32 = arith.constant 0 : i32
    %c0_i32_0 = arith.constant 0 : i32
    %c0_i32_1 = arith.constant 0 : i32
    return %c0_i32, %c0_i32_0 : i32, i32
  }
  func.func @transform_1(%arg0: i32) -> (i32, i32) {
    %c0_i32 = arith.constant 0 : i32
    %c0_i32_0 = arith.constant 0 : i32
    %c0_i32_1 = arith.constant 0 : i32
    return %c0_i32, %c0_i32_0 : i32, i32
  }
  func.func @transform_2(%arg0: i32) -> (i32, i32) {
    %c0_i32 = arith.constant 0 : i32
    %c0_i32_0 = arith.constant 0 : i32
    return %c0_i32, %arg0 : i32, i32
  }
  func.func @transform_3(%arg0: i32) -> (i32, i32) {
    %c0_i32 = arith.constant 0 : i32
    %c0_i32_0 = arith.constant 0 : i32
    return %c0_i32, %arg0 : i32, i32
  }
  func.func @transform_4(%arg0: i32) -> (i32, i32) {
    %c0_i32 = arith.constant 0 : i32
    %c0_i32_0 = arith.constant 0 : i32
    return %c0_i32, %arg0 : i32, i32
  }
}

module attributes {stable_mosaic.version = 11 : i64} {
  func.func @_conv_kernel(%arg0: i32, %arg1: memref<56x4992xbf16, #tpu.memory_space<vmem>>, %arg2: memref<56x1xf32, #tpu.memory_space<vmem>>, %arg3: memref<56x1xf32, #tpu.memory_space<vmem>>, %arg4: memref<4992x256xbf16, #tpu.memory_space<vmem>>, %arg5: memref<56x256xf32, #tpu.memory_space<vmem>>) attributes {dimension_semantics = [#tpu.dimension_semantics<parallel>], iteration_bounds = array<i64: 2>, scalar_prefetch = 0 : i64, scratch_operands = 0 : i64, tpu.core_type = #tpu.core_type<tc>, window_params = [{pipeline_mode = #tpu.pipeline_mode<synchronous>, transform_indices = @transform_0, window_bounds = array<i64: 56, 4992>}, {pipeline_mode = #tpu.pipeline_mode<synchronous>, transform_indices = @transform_1, window_bounds = array<i64: 56, 1>}, {pipeline_mode = #tpu.pipeline_mode<synchronous>, transform_indices = @transform_2, window_bounds = array<i64: 56, 1>}, {transform_indices = @transform_3, window_bounds = array<i64: 4992, 256>}, {transform_indices = @transform_4, window_bounds = array<i64: 56, 256>}]} {
    %c0 = arith.constant 0 : index
    %c0_0 = arith.constant 0 : index
    %0 = vector.load %arg1[%c0, %c0_0] : memref<56x4992xbf16, #tpu.memory_space<vmem>>, vector<56x4992xbf16>
    %c0_1 = arith.constant 0 : index
    %c0_2 = arith.constant 0 : index
    %1 = vector.load %arg4[%c0_1, %c0_2] : memref<4992x256xbf16, #tpu.memory_space<vmem>>, vector<4992x256xbf16>
    %cst = arith.constant dense<0.000000e+00> : vector<56x256xf32>
    %2 = tpu.matmul %0, %1, %cst {dimension_numbers = #tpu.dot_dimension_numbers<[1], [0], [0], [1], [0, 0, 1, 1], [], []>} : vector<56x4992xbf16>, vector<4992x256xbf16>, vector<56x256xf32> -> vector<56x256xf32>
    %c0_3 = arith.constant 0 : index
    %c0_4 = arith.constant 0 : index
    %3 = vector.load %arg2[%c0_3, %c0_4] : memref<56x1xf32, #tpu.memory_space<vmem>>, vector<56x1xf32>
    %4 = vector.broadcast %3 : vector<56x1xf32> to vector<56x256xf32>
    %5 = arith.addf %2, %4 : vector<56x256xf32>
    %cst_5 = arith.constant 0.000000e+00 : f32
    %6 = vector.broadcast %cst_5 : f32 to vector<56x256xf32>
    %7 = arith.cmpf oge, %5, %6 : vector<56x256xf32>
    %c0_6 = arith.constant 0 : index
    %c0_7 = arith.constant 0 : index
    %8 = vector.load %arg3[%c0_6, %c0_7] : memref<56x1xf32, #tpu.memory_space<vmem>>, vector<56x1xf32>
    %9 = vector.broadcast %8 : vector<56x1xf32> to vector<56x256xf32>
    %10 = arith.mulf %9, %5 : vector<56x256xf32>
    %11 = arith.select %7, %5, %10 : vector<56x256xi1>, vector<56x256xf32>
    %c0_8 = arith.constant 0 : index
    %c0_9 = arith.constant 0 : index
    %12 = vector.load %arg5[%c0_8, %c0_9] : memref<56x256xf32, #tpu.memory_space<vmem>>, vector<56x256xf32>
    tpu.vector_store %arg5[%c0_8, %c0_9], %11 {strides = array<i32>} : memref<56x256xf32, #tpu.memory_space<vmem>>, vector<56x256xf32>,
    return
  }
  func.func @transform_0(%arg0: i32) -> (i32, i32) {
    %c0_i32 = arith.constant 0 : i32
    %c0_i32_0 = arith.constant 0 : i32
    %c0_i32_1 = arith.constant 0 : i32
    return %c0_i32, %c0_i32_0 : i32, i32
  }
  func.func @transform_1(%arg0: i32) -> (i32, i32) {
    %c0_i32 = arith.constant 0 : i32
    %c0_i32_0 = arith.constant 0 : i32
    %c0_i32_1 = arith.constant 0 : i32
    return %c0_i32, %c0_i32_0 : i32, i32
  }
  func.func @transform_2(%arg0: i32) -> (i32, i32) {
    %c0_i32 = arith.constant 0 : i32
    %c0_i32_0 = arith.constant 0 : i32
    %c0_i32_1 = arith.constant 0 : i32
    return %c0_i32, %c0_i32_0 : i32, i32
  }
  func.func @transform_3(%arg0: i32) -> (i32, i32) {
    %c0_i32 = arith.constant 0 : i32
    %c0_i32_0 = arith.constant 0 : i32
    return %c0_i32, %arg0 : i32, i32
  }
  func.func @transform_4(%arg0: i32) -> (i32, i32) {
    %c0_i32 = arith.constant 0 : i32
    %c0_i32_0 = arith.constant 0 : i32
    return %c0_i32, %arg0 : i32, i32
  }
}

module attributes {stable_mosaic.version = 11 : i64} {
  func.func @_conv_kernel(%arg0: i32, %arg1: memref<32x2560xbf16, #tpu.memory_space<vmem>>, %arg2: memref<32x1xf32, #tpu.memory_space<vmem>>, %arg3: memref<32x1xf32, #tpu.memory_space<vmem>>, %arg4: memref<2560x256xbf16, #tpu.memory_space<vmem>>, %arg5: memref<32x256xf32, #tpu.memory_space<vmem>>) attributes {dimension_semantics = [#tpu.dimension_semantics<parallel>], iteration_bounds = array<i64: 2>, scalar_prefetch = 0 : i64, scratch_operands = 0 : i64, tpu.core_type = #tpu.core_type<tc>, window_params = [{pipeline_mode = #tpu.pipeline_mode<synchronous>, transform_indices = @transform_0, window_bounds = array<i64: 32, 2560>}, {pipeline_mode = #tpu.pipeline_mode<synchronous>, transform_indices = @transform_1, window_bounds = array<i64: 32, 1>}, {pipeline_mode = #tpu.pipeline_mode<synchronous>, transform_indices = @transform_2, window_bounds = array<i64: 32, 1>}, {transform_indices = @transform_3, window_bounds = array<i64: 2560, 256>}, {transform_indices = @transform_4, window_bounds = array<i64: 32, 256>}]} {
    %c0 = arith.constant 0 : index
    %c0_0 = arith.constant 0 : index
    %0 = vector.load %arg1[%c0, %c0_0] : memref<32x2560xbf16, #tpu.memory_space<vmem>>, vector<32x2560xbf16>
    %c0_1 = arith.constant 0 : index
    %c0_2 = arith.constant 0 : index
    %1 = vector.load %arg4[%c0_1, %c0_2] : memref<2560x256xbf16, #tpu.memory_space<vmem>>, vector<2560x256xbf16>
    %cst = arith.constant dense<0.000000e+00> : vector<32x256xf32>
    %2 = tpu.matmul %0, %1, %cst {dimension_numbers = #tpu.dot_dimension_numbers<[1], [0], [0], [1], [0, 0, 1, 1], [], []>} : vector<32x2560xbf16>, vector<2560x256xbf16>, vector<32x256xf32> -> vector<32x256xf32>
    %c0_3 = arith.constant 0 : index
    %c0_4 = arith.constant 0 : index
    %3 = vector.load %arg2[%c0_3, %c0_4] : memref<32x1xf32, #tpu.memory_space<vmem>>, vector<32x1xf32>
    %4 = vector.broadcast %3 : vector<32x1xf32> to vector<32x256xf32>
    %5 = arith.addf %2, %4 : vector<32x256xf32>
    %cst_5 = arith.constant 0.000000e+00 : f32
    %6 = vector.broadcast %cst_5 : f32 to vector<32x256xf32>
    %7 = arith.cmpf oge, %5, %6 : vector<32x256xf32>
    %c0_6 = arith.constant 0 : index
    %c0_7 = arith.constant 0 : index
    %8 = vector.load %arg3[%c0_6, %c0_7] : memref<32x1xf32, #tpu.memory_space<vmem>>, vector<32x1xf32>
    %9 = vector.broadcast %8 : vector<32x1xf32> to vector<32x256xf32>
    %10 = arith.mulf %9, %5 : vector<32x256xf32>
    %11 = arith.select %7, %5, %10 : vector<32x256xi1>, vector<32x256xf32>
    %c0_8 = arith.constant 0 : index
    %c0_9 = arith.constant 0 : index
    %12 = vector.load %arg5[%c0_8, %c0_9] : memref<32x256xf32, #tpu.memory_space<vmem>>, vector<32x256xf32>
    tpu.vector_store %arg5[%c0_8, %c0_9], %11 {strides = array<i32>} : memref<32x256xf32, #tpu.memory_space<vmem>>, vector<32x256xf32>,
    return
  }
  func.func @transform_0(%arg0: i32) -> (i32, i32) {
    %c0_i32 = arith.constant 0 : i32
    %c0_i32_0 = arith.constant 0 : i32
    %c0_i32_1 = arith.constant 0 : i32
    return %c0_i32, %c0_i32_0 : i32, i32
  }
  func.func @transform_1(%arg0: i32) -> (i32, i32) {
    %c0_i32 = arith.constant 0 : i32
    %c0_i32_0 = arith.constant 0 : i32
    %c0_i32_1 = arith.constant 0 : i32
    return %c0_i32, %c0_i32_0 : i32, i32
  }
  func.func @transform_2(%arg0: i32) -> (i32, i32) {
    %c0_i32 = arith.constant 0 : i32
    %c0_i32_0 = arith.constant 0 : i32
    %c0_i32_1 = arith.constant 0 : i32
    return %c0_i32, %c0_i32_0 : i32, i32
  }
  func.func @transform_3(%arg0: i32) -> (i32, i32) {
    %c0_i32 = arith.constant 0 : i32
    %c0_i32_0 = arith.constant 0 : i32
    return %c0_i32, %arg0 : i32, i32
  }
  func.func @transform_4(%arg0: i32) -> (i32, i32) {
    %c0_i32 = arith.constant 0 : i32
    %c0_i32_0 = arith.constant 0 : i32
    return %c0_i32, %arg0 : i32, i32
  }
}

module attributes {stable_mosaic.version = 11 : i64} {
  func.func @_conv_kernel(%arg0: i32, %arg1: memref<16x1280xbf16, #tpu.memory_space<vmem>>, %arg2: memref<16x1xf32, #tpu.memory_space<vmem>>, %arg3: memref<16x1xf32, #tpu.memory_space<vmem>>, %arg4: memref<1280x256xbf16, #tpu.memory_space<vmem>>, %arg5: memref<16x256xf32, #tpu.memory_space<vmem>>) attributes {dimension_semantics = [#tpu.dimension_semantics<parallel>], iteration_bounds = array<i64: 2>, scalar_prefetch = 0 : i64, scratch_operands = 0 : i64, tpu.core_type = #tpu.core_type<tc>, window_params = [{pipeline_mode = #tpu.pipeline_mode<synchronous>, transform_indices = @transform_0, window_bounds = array<i64: 16, 1280>}, {pipeline_mode = #tpu.pipeline_mode<synchronous>, transform_indices = @transform_1, window_bounds = array<i64: 16, 1>}, {pipeline_mode = #tpu.pipeline_mode<synchronous>, transform_indices = @transform_2, window_bounds = array<i64: 16, 1>}, {transform_indices = @transform_3, window_bounds = array<i64: 1280, 256>}, {transform_indices = @transform_4, window_bounds = array<i64: 16, 256>}]} {
    %c0 = arith.constant 0 : index
    %c0_0 = arith.constant 0 : index
    %0 = vector.load %arg1[%c0, %c0_0] : memref<16x1280xbf16, #tpu.memory_space<vmem>>, vector<16x1280xbf16>
    %c0_1 = arith.constant 0 : index
    %c0_2 = arith.constant 0 : index
    %1 = vector.load %arg4[%c0_1, %c0_2] : memref<1280x256xbf16, #tpu.memory_space<vmem>>, vector<1280x256xbf16>
    %cst = arith.constant dense<0.000000e+00> : vector<16x256xf32>
    %2 = tpu.matmul %0, %1, %cst {dimension_numbers = #tpu.dot_dimension_numbers<[1], [0], [0], [1], [0, 0, 1, 1], [], []>} : vector<16x1280xbf16>, vector<1280x256xbf16>, vector<16x256xf32> -> vector<16x256xf32>
    %c0_3 = arith.constant 0 : index
    %c0_4 = arith.constant 0 : index
    %3 = vector.load %arg2[%c0_3, %c0_4] : memref<16x1xf32, #tpu.memory_space<vmem>>, vector<16x1xf32>
    %4 = vector.broadcast %3 : vector<16x1xf32> to vector<16x256xf32>
    %5 = arith.addf %2, %4 : vector<16x256xf32>
    %cst_5 = arith.constant 0.000000e+00 : f32
    %6 = vector.broadcast %cst_5 : f32 to vector<16x256xf32>
    %7 = arith.cmpf oge, %5, %6 : vector<16x256xf32>
    %c0_6 = arith.constant 0 : index
    %c0_7 = arith.constant 0 : index
    %8 = vector.load %arg3[%c0_6, %c0_7] : memref<16x1xf32, #tpu.memory_space<vmem>>, vector<16x1xf32>
    %9 = vector.broadcast %8 : vector<16x1xf32> to vector<16x256xf32>
    %10 = arith.mulf %9, %5 : vector<16x256xf32>
    %11 = arith.select %7, %5, %10 : vector<16x256xi1>, vector<16x256xf32>
    %c0_8 = arith.constant 0 : index
    %c0_9 = arith.constant 0 : index
    %12 = vector.load %arg5[%c0_8, %c0_9] : memref<16x256xf32, #tpu.memory_space<vmem>>, vector<16x256xf32>
    tpu.vector_store %arg5[%c0_8, %c0_9], %11 {strides = array<i32>} : memref<16x256xf32, #tpu.memory_space<vmem>>, vector<16x256xf32>,
    return
  }
  func.func @transform_0(%arg0: i32) -> (i32, i32) {
    %c0_i32 = arith.constant 0 : i32
    %c0_i32_0 = arith.constant 0 : i32
    %c0_i32_1 = arith.constant 0 : i32
    return %c0_i32, %c0_i32_0 : i32, i32
  }
  func.func @transform_1(%arg0: i32) -> (i32, i32) {
    %c0_i32 = arith.constant 0 : i32
    %c0_i32_0 = arith.constant 0 : i32
    %c0_i32_1 = arith.constant 0 : i32
    return %c0_i32, %c0_i32_0 : i32, i32
  }
  func.func @transform_2(%arg0: i32) -> (i32, i32) {
    %c0_i32 = arith.constant 0 : i32
    %c0_i32_0 = arith.constant 0 : i32
    %c0_i32_1 = arith.constant 0 : i32
    return %c0_i32, %c0_i32_0 : i32, i32
  }
  func.func @transform_3(%arg0: i32) -> (i32, i32) {
    %c0_i32 = arith.constant 0 : i32
    %c0_i32_0 = arith.constant 0 : i32
    return %c0_i32, %arg0 : i32, i32
  }
  func.func @transform_4(%arg0: i32) -> (i32, i32) {
    %c0_i32 = arith.constant 0 : i32
    %c0_i32_0 = arith.constant 0 : i32
    return %c0_i32, %arg0 : i32, i32
  }
}

module attributes {stable_mosaic.version = 11 : i64} {
  func.func @_conv_kernel(%arg0: i32, %arg1: memref<8x128xbf16, #tpu.memory_space<vmem>>, %arg2: memref<8x1xf32, #tpu.memory_space<vmem>>, %arg3: memref<128x256xbf16, #tpu.memory_space<vmem>>, %arg4: memref<8x256xf32, #tpu.memory_space<vmem>>) attributes {dimension_semantics = [#tpu.dimension_semantics<parallel>], iteration_bounds = array<i64: 2>, scalar_prefetch = 0 : i64, scratch_operands = 0 : i64, tpu.core_type = #tpu.core_type<tc>, window_params = [{pipeline_mode = #tpu.pipeline_mode<synchronous>, transform_indices = @transform_0, window_bounds = array<i64: 8, 128>}, {pipeline_mode = #tpu.pipeline_mode<synchronous>, transform_indices = @transform_1, window_bounds = array<i64: 8, 1>}, {transform_indices = @transform_2, window_bounds = array<i64: 128, 256>}, {transform_indices = @transform_3, window_bounds = array<i64: 8, 256>}]} {
    %c0 = arith.constant 0 : index
    %c0_0 = arith.constant 0 : index
    %0 = vector.load %arg1[%c0, %c0_0] : memref<8x128xbf16, #tpu.memory_space<vmem>>, vector<8x128xbf16>
    %c0_1 = arith.constant 0 : index
    %c0_2 = arith.constant 0 : index
    %1 = vector.load %arg3[%c0_1, %c0_2] : memref<128x256xbf16, #tpu.memory_space<vmem>>, vector<128x256xbf16>
    %cst = arith.constant dense<0.000000e+00> : vector<8x256xf32>
    %2 = tpu.matmul %0, %1, %cst {dimension_numbers = #tpu.dot_dimension_numbers<[1], [0], [0], [1], [0, 0, 1, 1], [], []>} : vector<8x128xbf16>, vector<128x256xbf16>, vector<8x256xf32> -> vector<8x256xf32>
    %c0_3 = arith.constant 0 : index
    %c0_4 = arith.constant 0 : index
    %3 = vector.load %arg2[%c0_3, %c0_4] : memref<8x1xf32, #tpu.memory_space<vmem>>, vector<8x1xf32>
    %4 = vector.broadcast %3 : vector<8x1xf32> to vector<8x256xf32>
    %5 = arith.addf %2, %4 : vector<8x256xf32>
    %c0_5 = arith.constant 0 : index
    %c0_6 = arith.constant 0 : index
    %6 = vector.load %arg4[%c0_5, %c0_6] : memref<8x256xf32, #tpu.memory_space<vmem>>, vector<8x256xf32>
    tpu.vector_store %arg4[%c0_5, %c0_6], %5 {strides = array<i32>} : memref<8x256xf32, #tpu.memory_space<vmem>>, vector<8x256xf32>,
    return
  }
  func.func @transform_0(%arg0: i32) -> (i32, i32) {
    %c0_i32 = arith.constant 0 : i32
    %c0_i32_0 = arith.constant 0 : i32
    %c0_i32_1 = arith.constant 0 : i32
    return %c0_i32, %c0_i32_0 : i32, i32
  }
  func.func @transform_1(%arg0: i32) -> (i32, i32) {
    %c0_i32 = arith.constant 0 : i32
    %c0_i32_0 = arith.constant 0 : i32
    %c0_i32_1 = arith.constant 0 : i32
    return %c0_i32, %c0_i32_0 : i32, i32
  }
  func.func @transform_2(%arg0: i32) -> (i32, i32) {
    %c0_i32 = arith.constant 0 : i32
    %c0_i32_0 = arith.constant 0 : i32
    return %c0_i32, %arg0 : i32, i32
  }
  func.func @transform_3(%arg0: i32) -> (i32, i32) {
    %c0_i32 = arith.constant 0 : i32
    %c0_i32_0 = arith.constant 0 : i32
    return %c0_i32, %arg0 : i32, i32
  }
}

</mosaic_0001>

<bundles_post_ra>
// kernel: crcnet_forward.25
= control target key start
LH: loop header
LB: loop body
LE: loop exit
PB: predicated region body
PF: predicated region fallthrough
CT: control target
= control target key end

     0   :  { %s645_s12 = smov 0   ;;  %s647_s13 = smov 0   ;;  %s754_s0 = inlined_call_operand.vmem [shape: bf16[16,128], index: 0, kind: input, shape index: {}]   ;;  %s755_s1 = inlined_call_operand.vmem [shape: f32[16,1], index: 1, kind: input, shape index: {}]   ;;  %s756_s2 = inlined_call_operand.vmem [shape: bf16[128,512], index: 2, kind: input, shape index: {}]   ;;  %s757_s3 = inlined_call_operand.vmem [shape: f32[16,512], index: 3, kind: output, shape index: {}]  }
   0x1   :  { %s649_s14 = smov 0  }
   0x2 LB: > { %s515_s15 = sadd.s32 4294967295, %s622_s14   ;;  %s662_s16 = sadd.s32 1, %s622_s14   ;;  %s622_s14 = sphi %s649_s14, %s761_s14   ;;  %s618_s13 = sphi %s647_s13, %s760_s13   ;;  %s614_s12 = sphi %s645_s12, %s759_s12  }
   0x3   : > { %s59_s17 = ssub.s32 %s622_s14, %s662_s16  ;;  %s62_s18 = sadd.s32 1, %s618_s13 }
   0x4   : > { %p60_p0 = scmp.eq.s32.totalorder %s59_s17, 0  ;;  %p69_p1 = scmp.ne.s32.totalorder %s618_s13, %s614_s12 }
   0x5   : > { %p70_p2 = scmp.eq.s32.totalorder %s622_s14, 0  ;;  %p99_p3 = scmp.eq.s32.totalorder %s515_s15, 1 }
   0x6   : > { %s673_s19 = scalar_select %p60_p0, %s618_s13, %s62_s18  }
   0x7   : > { %p71_p4 = por %p70_p2, %p69_p1  ;;  %p675_p5 = por %p99_p3, %p69_p1 }
   0x8   : > { %p518_p6 = scmp.ge.s32.totalorder %s622_s14, 2 }
   0xa   : > { %127 = sbr.rel (%p518_p6) target bundleno = 29 (0x1d), region = 24 }
  0x11   : > { %130 = sbr.rel (!%p71_p4) target bundleno = 29 (0x1d), region = 28  ;;  %s132_s21 = sand.u32 (%p71_p4), 1, %s618_s13  }
  0x12   : > { %s547_s22 = sshll.u32 (%p71_p4), %s622_s14, 3  ;;  %s519_s23 = sshll.u32 (%p71_p4), %s132_s21, 7 }
  0x13   : > { %s685_s26 = scalar_lea.vmem (%p71_p4), %s756_s2, %s547_s22  ;;  %s134_s27 = scalar_lea.vmem (%p71_p4), [#allocation2], %s519_s23 }
  0x14   : > { %v195_v0 = vld [vmem:[%s685_s26] sm:$0xff] (%p71_p4)  ;;  %v197_v1 = vld [vmem:[%s685_s26 + $0x10] sm:$0xff] (%p71_p4) }
  0x15   : > { %v199_v2 = vld [vmem:[%s685_s26 + $0x20] sm:$0xff] (%p71_p4)  ;;  %196 = vst [vmem:[%s134_s27] sm:$0xff] (%p71_p4), %v195_v0  ;;  %198 = vst [vmem:[%s134_s27 + $0x8] sm:$0xff] (%p71_p4), %v197_v1  ;;  %v201_v3 = vld [vmem:[%s685_s26 + $0x30] sm:$0xff] (%p71_p4) }
  0x16   : > { %200 = vst [vmem:[%s134_s27 + $0x10] sm:$0xff] (%p71_p4), %v199_v2  ;;  %v203_v4 = vld [vmem:[%s685_s26 + $0x40] sm:$0xff] (%p71_p4)  ;;  %v205_v5 = vld [vmem:[%s685_s26 + $0x50] sm:$0xff] (%p71_p4)  ;;  %202 = vst [vmem:[%s134_s27 + $0x18] sm:$0xff] (%p71_p4), %v201_v3 }
  0x17   : > { %204 = vst [vmem:[%s134_s27 + $0x20] sm:$0xff] (%p71_p4), %v203_v4  ;;  %206 = vst [vmem:[%s134_s27 + $0x28] sm:$0xff] (%p71_p4), %v205_v5  ;;  %v207_v6 = vld [vmem:[%s685_s26 + $0x60] sm:$0xff] (%p71_p4)  ;;  %v209_v7 = vld [vmem:[%s685_s26 + $0x70] sm:$0xff] (%p71_p4) }
  0x18   : > { %v211_v8 = vld [vmem:[%s685_s26 + $0x80] sm:$0xff]  ;;  %208 = vst [vmem:[%s134_s27 + $0x30] sm:$0xff] %v207_v6  ;;  %210 = vst [vmem:[%s134_s27 + $0x38] sm:$0xff] %v209_v7  ;;  %v213_v9 = vld [vmem:[%s685_s26 + $0x90] sm:$0xff] }
  0x19   : > { %212 = vst [vmem:[%s134_s27 + $0x40] sm:$0xff] %v211_v8  ;;  %v215_v10 = vld [vmem:[%s685_s26 + $0xa0] sm:$0xff]  ;;  %v217_v11 = vld [vmem:[%s685_s26 + $0xb0] sm:$0xff]  ;;  %214 = vst [vmem:[%s134_s27 + $0x48] sm:$0xff] %v213_v9 }
  0x1a   : > { %216 = vst [vmem:[%s134_s27 + $0x50] sm:$0xff] %v215_v10  ;;  %218 = vst [vmem:[%s134_s27 + $0x58] sm:$0xff] %v217_v11  ;;  %v219_v12 = vld [vmem:[%s685_s26 + $0xc0] sm:$0xff]  ;;  %v221_v13 = vld [vmem:[%s685_s26 + $0xd0] sm:$0xff] }
  0x1b   : > { %v223_v14 = vld [vmem:[%s685_s26 + $0xe0] sm:$0xff]  ;;  %220 = vst [vmem:[%s134_s27 + $0x60] sm:$0xff] %v219_v12  ;;  %222 = vst [vmem:[%s134_s27 + $0x68] sm:$0xff] %v221_v13  ;;  %v225_v15 = vld [vmem:[%s685_s26 + $0xf0] sm:$0xff] }
  0x1c   : > { %224 = vst [vmem:[%s134_s27 + $0x70] sm:$0xff] %v223_v14  ;;  %226 = vst [vmem:[%s134_s27 + $0x78] sm:$0xff] %v225_v15 }
  0x1d PF: > { %p522_p7 = scmp.ge.s32.totalorder %s622_s14, 1  ;;  %p231_p8 = scmp.lt.s32.totalorder %s622_s14, 3 }
  0x1f   : > { %p232_p9 = pnand %p522_p7, %p231_p8 }
  0x20   : > { %s238_s28 = sand.u32 (!%p232_p9), 1, %s614_s12   ;;  %v624_v16 = vmov (!%p232_p9), 0   ;;  %v281_v17 = vld [vmem:[%s755_s1] sm:$0xff] (!%p232_p9)  ;;  %v282_v18 = vld [vmem:[%s755_s1 + $0x8] sm:$0xff] (!%p232_p9) }
  0x21   : > { %235 = sbr.rel (%p232_p9) target bundleno = 294 (0x126), region = 66  ;;  %s523_s29 = sshll.u32 (!%p232_p9), %s238_s28, 7  ;;  %411 = vmatprep.mubr.bf16.mxu0 (!%p232_p9), %v624_v16  ;;  %574 = vset.pattern.permute.xlu0 (!%p232_p9), %v624_v16  ;;  %v599_v35 = vld [vmem:[%s754_s0] sm:$0xff] (!%p232_p9)  }
  0x22   : > { %285 = vperm.xlu0 (!%p232_p9), %574, %v281_v17   ;;  %s714_s7 = scalar_lea.vmem (!%p232_p9), [#allocation2], %s523_s29  ;;  %s524_s10 = sshll.u32 (!%p232_p9), %s238_s28, 5 }
  0x23   : > { %v575_v19 = vld [vmem:[%s714_s7 + $0x4] ss:$8 sps:$4 sm:$0xff] (!%p232_p9)   ;;  %v577_v20 = vld [vmem:[%s714_s7] ss:$8 sps:$4 sm:$0xff] (!%p232_p9)   ;;  %v578_v21 = vld [vmem:[%s714_s7 + $0x14] ss:$8 sps:$4 sm:$0xff] (!%p232_p9)  }
  0x24   : > { %379 = vmatprep.subr.bf16.mxu0 (!%p232_p9), %v575_v19  ;;  %v580_v22 = vld [vmem:[%s714_s7 + $0x10] ss:$8 sps:$4 sm:$0xff] (!%p232_p9)   ;;  %v581_v23 = vld [vmem:[%s714_s7 + $0x24] ss:$8 sps:$4 sm:$0xff] (!%p232_p9)   ;;  %v583_v24 = vld [vmem:[%s714_s7 + $0x20] ss:$8 sps:$4 sm:$0xff] (!%p232_p9)  }
  0x25   : > { %380 = vmatpush1.bf16.msra.mxu0 (!%p232_p9), %v577_v20  ;;  %v584_v25 = vld [vmem:[%s714_s7 + $0x34] ss:$8 sps:$4 sm:$0xff] (!%p232_p9)   ;;  %v586_v26 = vld [vmem:[%s714_s7 + $0x30] ss:$8 sps:$4 sm:$0xff] (!%p232_p9)   ;;  %v587_v27 = vld [vmem:[%s714_s7 + $0x44] ss:$8 sps:$4 sm:$0xff] (!%p232_p9)  }
  0x26   : > { %290 = vperm.xlu0 (!%p232_p9), %574, %v282_v18   ;;  %381 = vmatprep.subr.bf16.mxu0 (!%p232_p9), %v578_v21  ;;  %v589_v28 = vld [vmem:[%s714_s7 + $0x40] ss:$8 sps:$4 sm:$0xff] (!%p232_p9)   ;;  %v590_v29 = vld [vmem:[%s714_s7 + $0x54] ss:$8 sps:$4 sm:$0xff] (!%p232_p9)   ;;  %v592_v30 = vld [vmem:[%s714_s7 + $0x50] ss:$8 sps:$4 sm:$0xff] (!%p232_p9)  }
  0x27   : > { %v593_v31 = vld [vmem:[%s714_s7 + $0x64] ss:$8 sps:$4 sm:$0xff] (!%p232_p9)   ;;  %v595_v32 = vld [vmem:[%s714_s7 + $0x60] ss:$8 sps:$4 sm:$0xff] (!%p232_p9)   ;;  %v596_v33 = vld [vmem:[%s714_s7 + $0x74] ss:$8 sps:$4 sm:$0xff] (!%p232_p9)  }
  0x28   : > { %v598_v34 = vld [vmem:[%s714_s7 + $0x70] ss:$8 sps:$4 sm:$0xff]   ;;  %s259_s11 = scalar_lea.vmem [#allocation3], %s524_s10  ;;  %s548_s12 = sshll.u32 (%p675_p5), %s515_s15, 4 }
  0x29   : > { %382 = vmatpush1.bf16.msra.mxu0 %v580_v22  ;;  %s435_s21 = scalar_lea.vmem (%p675_p5), %s757_s3, %s548_s12 }
  0x2a   : > { %383 = vmatprep.subr.bf16.mxu0 %v581_v23 }
  0x2d   : > { %384 = vmatpush1.bf16.msra.mxu0 %v583_v24 }
  0x2e   : > { %385 = vmatprep.subr.bf16.mxu0 %v584_v25 }
  0x31   : > { %386 = vmatpush1.bf16.msra.mxu0 %v586_v26 }
  0x32   : > { %387 = vmatprep.subr.bf16.mxu0 %v587_v27 }
  0x35   : > { %388 = vmatpush1.bf16.msra.mxu0 %v589_v28 }
  0x36   : > { %389 = vmatprep.subr.bf16.mxu0 %v590_v29 }
  0x39   : > { %390 = vmatpush1.bf16.msra.mxu0 %v592_v30 }
  0x3a   : > { %391 = vmatprep.subr.bf16.mxu0 %v593_v31 }
  0x3d   : > { %392 = vmatpush1.bf16.msra.mxu0 %v595_v32 }
  0x3e   : > { %393 = vmatprep.subr.bf16.mxu0 %v596_v33 }
  0x41   : > { %394 = vmatpush1.bf16.msra.mxu0 %v598_v34 }
  0x44   : > { %412 = vmatmul.mubr.bf16.vlgmr.msra.gmra.mrb[0].mxu0 %v599_v35 }
  0xa1   : > { %v286_v36 = vpop.permute.xlu0 %285 }
  0xa5   : > { %v291_v40 = vpop.permute.xlu0 %290 }
 0x117   : > { %v413_v37 = vpop.f32.mrb[0].mxu0  ;;  %432 = sbr.rel (!%p675_p5) target bundleno = 294 (0x126), region = 74 }
 0x118   : > { %v414_v38 = vadd.f32 %v413_v37, %v286_v36  ;;  %v415_v39 = vpop.f32.mrb[1].mxu0 }
 0x119   : > { %v416_v41 = vadd.f32 %v415_v39, %v286_v36  ;;  %v417_v42 = vpop.f32.mrb[2].mxu0 }
 0x11a   : > { %422 = vst [vmem:[%s259_s11] sm:$0xff] %v414_v38  ;;  %v418_v43 = vadd.f32 %v417_v42, %v291_v40  ;;  %v419_v44 = vpop.f32.mrb[3].mxu0 }
 0x11b   : > { %423 = vst [vmem:[%s259_s11 + $0x8] sm:$0xff] %v416_v41  ;;  %v420_v45 = vadd.f32 %v419_v44, %v291_v40 }
 0x11c   : > { %424 = vst [vmem:[%s259_s11 + $0x10] sm:$0xff] %v418_v43 }
 0x11d   : > { %425 = vst [vmem:[%s259_s11 + $0x18] sm:$0xff] %v420_v45 }
 0x121   : > { %v448_v46 = vld [vmem:[%s259_s11] sm:$0xff] }
 0x122   : > { %v450_v47 = vld [vmem:[%s259_s11 + $0x8] sm:$0xff]  ;;  %449 = vst [vmem:[%s435_s21] sm:$0xff] %v448_v46 }
 0x123   : > { %v452_v48 = vld [vmem:[%s259_s11 + $0x10] sm:$0xff]  ;;  %451 = vst [vmem:[%s435_s21 + $0x8] sm:$0xff] %v450_v47 }
 0x124   : > { %v454_v49 = vld [vmem:[%s259_s11 + $0x18] sm:$0xff]  ;;  %453 = vst [vmem:[%s435_s21 + $0x20] sm:$0xff] %v452_v48 }
 0x125   : > { %455 = vst [vmem:[%s435_s21 + $0x28] sm:$0xff] %v454_v49 }
 0x126 PF: > { %p10_p10 = scmp.ge.s32.totalorder %s662_s16, 4   ;;  %s759_s12 = smov %s618_s13 }
 0x127   : > { %s760_s13 = smov %s673_s19  ;;  %s761_s14 = smov %s662_s16 }
 0x128   :  { %12 = sbr.rel (!%p10_p10) target bundleno = 2 (0x2), region = 128 }

// kernel: crcnet_forward.26
= control target key start
LH: loop header
LB: loop body
LE: loop exit
PB: predicated region body
PF: predicated region fallthrough
CT: control target
= control target key end

     0   :  { %v736_v1 = vmov 0   ;;  %s990_s3 = inlined_call_operand.vmem [shape: bf16[512,256], index: 3, kind: input, shape index: {}]   ;;  %s991_s0 = inlined_call_operand.vmem [shape: bf16[16,512], index: 0, kind: input, shape index: {}]   ;;  %s992_s1 = inlined_call_operand.vmem [shape: f32[16,1], index: 1, kind: input, shape index: {}]   ;;  %s993_s2 = inlined_call_operand.vmem [shape: f32[16,1], index: 2, kind: input, shape index: {}]   ;;  %s994_s4 = inlined_call_operand.vmem [shape: f32[16,256], index: 4, kind: output, shape index: {}]  }
   0x1   :  { %v634_v0 = vld [vmem:[%s990_s3 + $0x4] ss:$8 sps:$4 sm:$0xff]   ;;  %632 = vset.pattern.permute.xlu0 %v736_v1  ;;  %633 = vset.pattern.permute.xlu1 %v736_v1  ;;  %v638_v3 = vld [vmem:[%s990_s3] ss:$8 sps:$4 sm:$0xff]   ;;  %v640_v5 = vld [vmem:[%s990_s3 + $0x14] ss:$8 sps:$4 sm:$0xff]  }
   0x2   :  { %v636_v2 = vld [vmem:[%s990_s3 + $0x104] ss:$8 sps:$4 sm:$0xff]   ;;  %437 = vmatprep.subr.bf16.mxu1 %v634_v0  ;;  %v639_v4 = vld [vmem:[%s990_s3 + $0x100] ss:$8 sps:$4 sm:$0xff]   ;;  %v642_v6 = vld [vmem:[%s990_s3 + $0x114] ss:$8 sps:$4 sm:$0xff]  }
   0x3   :  { %480 = vmatprep.subr.bf16.mxu0 %v636_v2  ;;  %438 = vmatpush1.bf16.msra.mxu1 %v638_v3  ;;  %v644_v7 = vld [vmem:[%s990_s3 + $0x10] ss:$8 sps:$4 sm:$0xff]   ;;  %v646_v9 = vld [vmem:[%s990_s3 + $0x24] ss:$8 sps:$4 sm:$0xff]   ;;  %v650_v11 = vld [vmem:[%s990_s3 + $0x20] ss:$8 sps:$4 sm:$0xff]  }
   0x4   :  { %481 = vmatpush1.bf16.msra.mxu0 %v639_v4  ;;  %439 = vmatprep.subr.bf16.mxu1 %v640_v5  ;;  %v645_v8 = vld [vmem:[%s990_s3 + $0x110] ss:$8 sps:$4 sm:$0xff]   ;;  %v648_v10 = vld [vmem:[%s990_s3 + $0x124] ss:$8 sps:$4 sm:$0xff]   ;;  %v651_v12 = vld [vmem:[%s990_s3 + $0x120] ss:$8 sps:$4 sm:$0xff]  }
   0x5   :  { %482 = vmatprep.subr.bf16.mxu0 %v642_v6  ;;  %v652_v13 = vld [vmem:[%s990_s3 + $0x34] ss:$8 sps:$4 sm:$0xff]   ;;  %v656_v15 = vld [vmem:[%s990_s3 + $0x30] ss:$8 sps:$4 sm:$0xff]   ;;  %v658_v17 = vld [vmem:[%s990_s3 + $0x44] ss:$8 sps:$4 sm:$0xff]  }
   0x6   :  { %v654_v14 = vld [vmem:[%s990_s3 + $0x134] ss:$8 sps:$4 sm:$0xff]   ;;  %v657_v16 = vld [vmem:[%s990_s3 + $0x130] ss:$8 sps:$4 sm:$0xff]   ;;  %v660_v18 = vld [vmem:[%s990_s3 + $0x144] ss:$8 sps:$4 sm:$0xff]  }
   0x7   :  { %440 = vmatpush1.bf16.msra.mxu1 %v644_v7  ;;  %v662_v19 = vld [vmem:[%s990_s3 + $0x40] ss:$8 sps:$4 sm:$0xff]   ;;  %v664_v21 = vld [vmem:[%s990_s3 + $0x54] ss:$8 sps:$4 sm:$0xff]   ;;  %v668_v23 = vld [vmem:[%s990_s3 + $0x50] ss:$8 sps:$4 sm:$0xff]  }
   0x8   :  { %483 = vmatpush1.bf16.msra.mxu0 %v645_v8  ;;  %441 = vmatprep.subr.bf16.mxu1 %v646_v9  ;;  %v663_v20 = vld [vmem:[%s990_s3 + $0x140] ss:$8 sps:$4 sm:$0xff]   ;;  %v666_v22 = vld [vmem:[%s990_s3 + $0x154] ss:$8 sps:$4 sm:$0xff]   ;;  %v669_v24 = vld [vmem:[%s990_s3 + $0x150] ss:$8 sps:$4 sm:$0xff]  }
   0x9   :  { %484 = vmatprep.subr.bf16.mxu0 %v648_v10  ;;  %v670_v25 = vld [vmem:[%s990_s3 + $0x64] ss:$8 sps:$4 sm:$0xff]   ;;  %v674_v27 = vld [vmem:[%s990_s3 + $0x60] ss:$8 sps:$4 sm:$0xff]   ;;  %v676_v29 = vld [vmem:[%s990_s3 + $0x74] ss:$8 sps:$4 sm:$0xff]  }
   0xa   :  { %v672_v26 = vld [vmem:[%s990_s3 + $0x164] ss:$8 sps:$4 sm:$0xff]   ;;  %v675_v28 = vld [vmem:[%s990_s3 + $0x160] ss:$8 sps:$4 sm:$0xff]   ;;  %v678_v30 = vld [vmem:[%s990_s3 + $0x174] ss:$8 sps:$4 sm:$0xff]  }
   0xb   :  { %442 = vmatpush1.bf16.msra.mxu1 %v650_v11  ;;  %v680_v31 = vld [vmem:[%s990_s3 + $0x70] ss:$8 sps:$4 sm:$0xff]   ;;  %v682_v33 = vld [vmem:[%s990_s3 + $0x84] ss:$8 sps:$4 sm:$0xff]   ;;  %v686_v35 = vld [vmem:[%s990_s3 + $0x80] ss:$8 sps:$4 sm:$0xff]  }
   0xc   :  { %485 = vmatpush1.bf16.msra.mxu0 %v651_v12  ;;  %443 = vmatprep.subr.bf16.mxu1 %v652_v13  ;;  %v681_v32 = vld [vmem:[%s990_s3 + $0x170] ss:$8 sps:$4 sm:$0xff]   ;;  %v684_v34 = vld [vmem:[%s990_s3 + $0x184] ss:$8 sps:$4 sm:$0xff]   ;;  %v687_v36 = vld [vmem:[%s990_s3 + $0x180] ss:$8 sps:$4 sm:$0xff]  }
   0xd   :  { %486 = vmatprep.subr.bf16.mxu0 %v654_v14  ;;  %v688_v37 = vld [vmem:[%s990_s3 + $0x94] ss:$8 sps:$4 sm:$0xff]   ;;  %v692_v39 = vld [vmem:[%s990_s3 + $0x90] ss:$8 sps:$4 sm:$0xff]   ;;  %v694_v41 = vld [vmem:[%s990_s3 + $0xa4] ss:$8 sps:$4 sm:$0xff]  }
   0xe   :  { %v690_v38 = vld [vmem:[%s990_s3 + $0x194] ss:$8 sps:$4 sm:$0xff]   ;;  %v693_v40 = vld [vmem:[%s990_s3 + $0x190] ss:$8 sps:$4 sm:$0xff]   ;;  %v696_v42 = vld [vmem:[%s990_s3 + $0x1a4] ss:$8 sps:$4 sm:$0xff]  }
   0xf   :  { %444 = vmatpush1.bf16.msra.mxu1 %v656_v15  ;;  %v698_v43 = vld [vmem:[%s990_s3 + $0xa0] ss:$8 sps:$4 sm:$0xff]   ;;  %v700_v45 = vld [vmem:[%s990_s3 + $0xb4] ss:$8 sps:$4 sm:$0xff]   ;;  %v704_v47 = vld [vmem:[%s990_s3 + $0xb0] ss:$8 sps:$4 sm:$0xff]  }
  0x10   :  { %487 = vmatpush1.bf16.msra.mxu0 %v657_v16  ;;  %445 = vmatprep.subr.bf16.mxu1 %v658_v17  ;;  %v699_v44 = vld [vmem:[%s990_s3 + $0x1a0] ss:$8 sps:$4 sm:$0xff]   ;;  %v702_v46 = vld [vmem:[%s990_s3 + $0x1b4] ss:$8 sps:$4 sm:$0xff]   ;;  %v705_v48 = vld [vmem:[%s990_s3 + $0x1b0] ss:$8 sps:$4 sm:$0xff]  }
  0x11   :  { %488 = vmatprep.subr.bf16.mxu0 %v660_v18  ;;  %v706_v49 = vld [vmem:[%s990_s3 + $0xc4] ss:$8 sps:$4 sm:$0xff]   ;;  %v710_v56 = vld [vmem:[%s990_s3 + $0xc0] ss:$8 sps:$4 sm:$0xff]   ;;  %v712_v59 = vld [vmem:[%s990_s3 + $0xd4] ss:$8 sps:$4 sm:$0xff]  }
  0x12   :  { %v732_v50 = vld [vmem:[%s991_s0 + $0x4] ss:$16 sps:$4 sm:$0xff]   ;;  %v735_v52 = vld [vmem:[%s991_s0 + $0xc] ss:$16 sps:$4 sm:$0xff]   ;;  %v711_v57 = vld [vmem:[%s990_s3 + $0x1c0] ss:$8 sps:$4 sm:$0xff]  }
  0x13   :  { %446 = vmatpush1.bf16.msra.mxu1 %v662_v19  ;;  %v708_v51 = vld [vmem:[%s990_s3 + $0x1c4] ss:$8 sps:$4 sm:$0xff]   ;;  %469 = vmatprep.mubr.bf16.mxu1 %v732_v50  ;;  %v714_v60 = vld [vmem:[%s990_s3 + $0x1d4] ss:$8 sps:$4 sm:$0xff]   ;;  %v716_v61 = vld [vmem:[%s990_s3 + $0xd0] ss:$8 sps:$4 sm:$0xff]  }
  0x14   :  { %489 = vmatpush1.bf16.msra.mxu0 %v663_v20  ;;  %447 = vmatprep.subr.bf16.mxu1 %v664_v21  ;;  %v85_v53 = vld [vmem:[%s992_s1] sm:$0xff]  ;;  %v86_v55 = vld [vmem:[%s992_s1 + $0x8] sm:$0xff]  ;;  %v717_v62 = vld [vmem:[%s990_s3 + $0x1d0] ss:$8 sps:$4 sm:$0xff]  }
  0x15   :  { %490 = vmatprep.subr.bf16.mxu0 %v666_v22  ;;  %v527_v54 = vld [vmem:[%s993_s2] sm:$0xff]  ;;  %89 = vperm.xlu0 %632, %v85_v53   ;;  %v528_v58 = vld [vmem:[%s993_s2 + $0x8] sm:$0xff]  ;;  %v724_v3 = vld [vmem:[%s990_s3 + $0xf4] ss:$8 sps:$4 sm:$0xff]  }
  0x16   :  { %512 = vmatprep.mubr.bf16.mxu0 %v735_v52  ;;  %531 = vperm.xlu1 %633, %v527_v54   ;;  %v718_v63 = vld [vmem:[%s990_s3 + $0xe4] ss:$8 sps:$4 sm:$0xff]   ;;  %v722_v1 = vld [vmem:[%s990_s3 + $0xe0] ss:$8 sps:$4 sm:$0xff]   ;;  %v726_v4 = vld [vmem:[%s990_s3 + $0x1f4] ss:$8 sps:$4 sm:$0xff]  }
  0x17   :  { %448 = vmatpush1.bf16.msra.mxu1 %v668_v23  ;;  %v720_v0 = vld [vmem:[%s990_s3 + $0x1e4] ss:$8 sps:$4 sm:$0xff]   ;;  %v723_v2 = vld [vmem:[%s990_s3 + $0x1e0] ss:$8 sps:$4 sm:$0xff]   ;;  %v728_v5 = vld [vmem:[%s990_s3 + $0xf0] ss:$8 sps:$4 sm:$0xff]  }
  0x18   :  { %491 = vmatpush1.bf16.msra.mxu0 %v669_v24  ;;  %449 = vmatprep.subr.bf16.mxu1 %v670_v25  ;;  %v729_v6 = vld [vmem:[%s990_s3 + $0x1f0] ss:$8 sps:$4 sm:$0xff]  }
  0x19   :  { %492 = vmatprep.subr.bf16.mxu0 %v672_v26  ;;  %94 = vperm.xlu0 %632, %v86_v55   ;;  %v730_v7 = vld [vmem:[%s991_s0] ss:$16 sps:$4 sm:$0xff]   ;;  %v733_v8 = vld [vmem:[%s991_s0 + $0x8] ss:$16 sps:$4 sm:$0xff]  }
  0x1a   :  { %536 = vperm.xlu1 %633, %v528_v58  }
  0x1b   :  { %450 = vmatpush1.bf16.msra.mxu1 %v674_v27 }
  0x1c   :  { %493 = vmatpush1.bf16.msra.mxu0 %v675_v28  ;;  %451 = vmatprep.subr.bf16.mxu1 %v676_v29 }
  0x1d   :  { %494 = vmatprep.subr.bf16.mxu0 %v678_v30 }
  0x1f   :  { %452 = vmatpush1.bf16.msra.mxu1 %v680_v31 }
  0x20   :  { %495 = vmatpush1.bf16.msra.mxu0 %v681_v32  ;;  %453 = vmatprep.subr.bf16.mxu1 %v682_v33 }
  0x21   :  { %496 = vmatprep.subr.bf16.mxu0 %v684_v34 }
  0x23   :  { %454 = vmatpush1.bf16.msra.mxu1 %v686_v35 }
  0x24   :  { %497 = vmatpush1.bf16.msra.mxu0 %v687_v36  ;;  %455 = vmatprep.subr.bf16.mxu1 %v688_v37 }
  0x25   :  { %498 = vmatprep.subr.bf16.mxu0 %v690_v38 }
  0x27   :  { %456 = vmatpush1.bf16.msra.mxu1 %v692_v39 }
  0x28   :  { %499 = vmatpush1.bf16.msra.mxu0 %v693_v40  ;;  %457 = vmatprep.subr.bf16.mxu1 %v694_v41 }
  0x29   :  { %500 = vmatprep.subr.bf16.mxu0 %v696_v42 }
  0x2b   :  { %458 = vmatpush1.bf16.msra.mxu1 %v698_v43 }
  0x2c   :  { %501 = vmatpush1.bf16.msra.mxu0 %v699_v44  ;;  %459 = vmatprep.subr.bf16.mxu1 %v700_v45 }
  0x2d   :  { %502 = vmatprep.subr.bf16.mxu0 %v702_v46 }
  0x2f   :  { %460 = vmatpush1.bf16.msra.mxu1 %v704_v47 }
  0x30   :  { %503 = vmatpush1.bf16.msra.mxu0 %v705_v48  ;;  %461 = vmatprep.subr.bf16.mxu1 %v706_v49 }
  0x31   :  { %504 = vmatprep.subr.bf16.mxu0 %v708_v51 }
  0x33   :  { %462 = vmatpush1.bf16.msra.mxu1 %v710_v56 }
  0x34   :  { %505 = vmatpush1.bf16.msra.mxu0 %v711_v57  ;;  %463 = vmatprep.subr.bf16.mxu1 %v712_v59 }
  0x35   :  { %506 = vmatprep.subr.bf16.mxu0 %v714_v60 }
  0x37   :  { %464 = vmatpush1.bf16.msra.mxu1 %v716_v61 }
  0x38   :  { %507 = vmatpush1.bf16.msra.mxu0 %v717_v62  ;;  %465 = vmatprep.subr.bf16.mxu1 %v718_v63 }
  0x39   :  { %508 = vmatprep.subr.bf16.mxu0 %v720_v0 }
  0x3b   :  { %466 = vmatpush1.bf16.msra.mxu1 %v722_v1 }
  0x3c   :  { %509 = vmatpush1.bf16.msra.mxu0 %v723_v2  ;;  %467 = vmatprep.subr.bf16.mxu1 %v724_v3 }
  0x3d   :  { %510 = vmatprep.subr.bf16.mxu0 %v726_v4 }
  0x3f   :  { %468 = vmatpush1.bf16.msra.mxu1 %v728_v5 }
  0x40   :  { %511 = vmatpush1.bf16.msra.mxu0 %v729_v6 }
  0x42   :  { %470 = vmatmul.mubr.bf16.vlgmr.msra.gmra.mrb[0].mxu1 %v730_v7 }
  0x43   :  { %513 = vmatmul.mubr.bf16.vlgmr.msra.gmra.mrb[0].mxu0 %v733_v8 }
  0x94   :  { %v90_v9 = vpop.permute.xlu0 %89 }
  0x95   :  { %v532_v10 = vpop.permute.xlu1 %531 }
  0x98   :  { %v95_v11 = vpop.permute.xlu0 %94 }
  0x99   :  { %v537_v29 = vpop.permute.xlu1 %536 }
 0x115   :  { %v471_v12 = vpop.f32.mrb[0].mxu1 }
 0x116   :  { %v514_v13 = vpop.f32.mrb[0].mxu0  ;;  %v472_v14 = vadd.f32 %v471_v12, %v90_v9  ;;  %v473_v15 = vpop.f32.mrb[1].mxu1 }
 0x117   :  { %v516_v16 = vpop.f32.mrb[1].mxu0  ;;  %v474_v17 = vadd.f32 %v473_v15, %v90_v9  ;;  %v475_v18 = vpop.f32.mrb[2].mxu1 }
 0x118   :  { %v518_v19 = vpop.f32.mrb[2].mxu0  ;;  %v515_v20 = vadd.f32 %v514_v13, %v472_v14  ;;  %v476_v21 = vadd.f32 %v475_v18, %v95_v11  ;;  %v477_v22 = vpop.f32.mrb[3].mxu1 }
 0x119   :  { %v520_v23 = vpop.f32.mrb[3].mxu0  ;;  %v517_v24 = vadd.f32 %v516_v16, %v474_v17  ;;  %v478_v25 = vadd.f32 %v477_v22, %v95_v11 }
 0x11a   :  { %vm523_vm0 = vcmp.ge.f32.partialorder %v515_v20, 0.0  ;;  %v539_v26 = vmul.f32 %v532_v10, %v515_v20  ;;  %v519_v27 = vadd.f32 %v518_v19, %v476_v21 }
 0x11b   :  { %vm524_vm1 = vcmp.ge.f32.partialorder %v517_v24, 0.0  ;;  %v540_v28 = vmul.f32 %v532_v10, %v517_v24  ;;  %v521_v30 = vadd.f32 %v520_v23, %v478_v25 }
 0x11c   :  { %v543_v31 = vsel %vm523_vm0, %v515_v20, %v539_v26  ;;  %vm525_vm2 = vcmp.ge.f32.partialorder %v519_v27, 0.0  ;;  %v541_v32 = vmul.f32 %v537_v29, %v519_v27 }
 0x11d   :  { %547 = vst [vmem:[%s994_s4] sm:$0xff] %v543_v31  ;;  %v544_v33 = vsel %vm524_vm1, %v517_v24, %v540_v28  ;;  %vm526_vm3 = vcmp.ge.f32.partialorder %v521_v30, 0.0  ;;  %v542_v34 = vmul.f32 %v537_v29, %v521_v30 }
 0x11e   :  { %548 = vst [vmem:[%s994_s4 + $0x8] sm:$0xff] %v544_v33  ;;  %v545_v35 = vsel %vm525_vm2, %v519_v27, %v541_v32 }
 0x11f   :  { %549 = vst [vmem:[%s994_s4 + $0x10] sm:$0xff] %v545_v35  ;;  %v546_v36 = vsel %vm526_vm3, %v521_v30, %v542_v34 }
 0x120   :  { %550 = vst [vmem:[%s994_s4 + $0x18] sm:$0xff] %v546_v36 }

// kernel: crcnet_forward.27
= control target key start
LH: loop header
LB: loop body
LE: loop exit
PB: predicated region body
PF: predicated region fallthrough
CT: control target
= control target key end

     0   :  { %s1429_s15 = smov 0   ;;  %s1431_s16 = smov 0   ;;  %s1722_s0 = inlined_call_operand.vmem [shape: bf16[16,512], index: 0, kind: input, shape index: {}]   ;;  %s1723_s1 = inlined_call_operand.vmem [shape: f32[16,1], index: 1, kind: input, shape index: {}]   ;;  %s1724_s2 = inlined_call_operand.vmem [shape: bf16[512,512], index: 2, kind: input, shape index: {}]   ;;  %s1725_s3 = inlined_call_operand.vmem [shape: f32[16,512], index: 3, kind: input, shape index: {}]   ;;  %s1726_s4 = inlined_call_operand.vmem [shape: f32[16,512], index: 4, kind: output, shape index: {}]  }
   0x1   :  { %s1433_s17 = smov 0  }
   0x2 LB: > { %s1153_s18 = sadd.s32 4294967295, %s1401_s17   ;;  %s1446_s19 = sadd.s32 1, %s1401_s17   ;;  %s1401_s17 = sphi %s1433_s17, %s1731_s17   ;;  %s1397_s16 = sphi %s1431_s16, %s1730_s16   ;;  %s1393_s15 = sphi %s1429_s15, %s1729_s15  }
   0x3   : > { %s60_s20 = ssub.s32 %s1401_s17, %s1446_s19  ;;  %s63_s21 = sadd.s32 1, %s1397_s16 }
   0x4   : > { %p61_p0 = scmp.eq.s32.totalorder %s60_s20, 0  ;;  %p70_p1 = scmp.ne.s32.totalorder %s1397_s16, %s1393_s15 }
   0x5   : > { %p71_p2 = scmp.eq.s32.totalorder %s1401_s17, 0  ;;  %p126_p3 = scmp.eq.s32.totalorder %s1153_s18, 1 }
   0x6   : > { %s1457_s22 = scalar_select %p61_p0, %s1397_s16, %s63_s21  }
   0x7   : > { %p1459_p4 = por %p71_p2, %p70_p1  ;;  %p1463_p5 = por %p126_p3, %p70_p1 }
   0x8   : > { %p1156_p6 = scmp.ge.s32.totalorder %s1401_s17, 2 }
   0xa   : > { %154 = sbr.rel (%p1156_p6) target bundleno = 60 (0x3c), region = 24 }
  0x11   : > { %157 = sbr.rel (!%p1459_p4) target bundleno = 53 (0x35), region = 28  ;;  %s159_s25 = sand.u32 (%p1459_p4), 1, %s1397_s16  }
  0x12   : > { %s1240_s26 = sshll.u32 (%p1459_p4), %s1401_s17, 3  ;;  %s1157_s27 = sshll.u32 (%p1459_p4), %s159_s25, 9 }
  0x13   : > { %s1475_s30 = scalar_lea.vmem (%p1459_p4), %s1724_s2, %s1240_s26  ;;  %s1480_s5 = scalar_lea.vmem (%p1459_p4), [#allocation2], %s1157_s27 }
  0x14   : > { %v318_v0 = vld [vmem:[%s1475_s30] sm:$0xff] (%p1459_p4)  ;;  %v320_v1 = vld [vmem:[%s1475_s30 + $0x10] sm:$0xff] (%p1459_p4) }
  0x15   : > { %v322_v2 = vld [vmem:[%s1475_s30 + $0x20] sm:$0xff] (%p1459_p4)  ;;  %319 = vst [vmem:[%s1480_s5] sm:$0xff] (%p1459_p4), %v318_v0  ;;  %321 = vst [vmem:[%s1480_s5 + $0x8] sm:$0xff] (%p1459_p4), %v320_v1  ;;  %v324_v3 = vld [vmem:[%s1475_s30 + $0x30] sm:$0xff] (%p1459_p4) }
  0x16   : > { %323 = vst [vmem:[%s1480_s5 + $0x10] sm:$0xff] (%p1459_p4), %v322_v2  ;;  %v326_v4 = vld [vmem:[%s1475_s30 + $0x40] sm:$0xff] (%p1459_p4)  ;;  %v328_v5 = vld [vmem:[%s1475_s30 + $0x50] sm:$0xff] (%p1459_p4)  ;;  %325 = vst [vmem:[%s1480_s5 + $0x18] sm:$0xff] (%p1459_p4), %v324_v3 }
  0x17   : > { %327 = vst [vmem:[%s1480_s5 + $0x20] sm:$0xff] (%p1459_p4), %v326_v4  ;;  %329 = vst [vmem:[%s1480_s5 + $0x28] sm:$0xff] (%p1459_p4), %v328_v5  ;;  %v330_v6 = vld [vmem:[%s1475_s30 + $0x60] sm:$0xff] (%p1459_p4)  ;;  %v332_v7 = vld [vmem:[%s1475_s30 + $0x70] sm:$0xff] (%p1459_p4) }
  0x18   : > { %v334_v8 = vld [vmem:[%s1475_s30 + $0x80] sm:$0xff]  ;;  %331 = vst [vmem:[%s1480_s5 + $0x30] sm:$0xff] %v330_v6  ;;  %333 = vst [vmem:[%s1480_s5 + $0x38] sm:$0xff] %v332_v7  ;;  %v336_v9 = vld [vmem:[%s1475_s30 + $0x90] sm:$0xff] }
  0x19   : > { %335 = vst [vmem:[%s1480_s5 + $0x40] sm:$0xff] %v334_v8  ;;  %v338_v10 = vld [vmem:[%s1475_s30 + $0xa0] sm:$0xff]  ;;  %v340_v11 = vld [vmem:[%s1475_s30 + $0xb0] sm:$0xff]  ;;  %337 = vst [vmem:[%s1480_s5 + $0x48] sm:$0xff] %v336_v9 }
  0x1a   : > { %339 = vst [vmem:[%s1480_s5 + $0x50] sm:$0xff] %v338_v10  ;;  %341 = vst [vmem:[%s1480_s5 + $0x58] sm:$0xff] %v340_v11  ;;  %v342_v12 = vld [vmem:[%s1475_s30 + $0xc0] sm:$0xff]  ;;  %v344_v13 = vld [vmem:[%s1475_s30 + $0xd0] sm:$0xff] }
  0x1b   : > { %v346_v14 = vld [vmem:[%s1475_s30 + $0xe0] sm:$0xff]  ;;  %343 = vst [vmem:[%s1480_s5 + $0x60] sm:$0xff] %v342_v12  ;;  %345 = vst [vmem:[%s1480_s5 + $0x68] sm:$0xff] %v344_v13  ;;  %v348_v15 = vld [vmem:[%s1475_s30 + $0xf0] sm:$0xff] }
  0x1c   : > { %347 = vst [vmem:[%s1480_s5 + $0x70] sm:$0xff] %v346_v14  ;;  %v350_v16 = vld [vmem:[%s1475_s30 + $0x100] sm:$0xff]  ;;  %v352_v17 = vld [vmem:[%s1475_s30 + $0x110] sm:$0xff]  ;;  %349 = vst [vmem:[%s1480_s5 + $0x78] sm:$0xff] %v348_v15 }
  0x1d   : > { %351 = vst [vmem:[%s1480_s5 + $0x80] sm:$0xff] %v350_v16  ;;  %353 = vst [vmem:[%s1480_s5 + $0x88] sm:$0xff] %v352_v17  ;;  %v354_v18 = vld [vmem:[%s1475_s30 + $0x120] sm:$0xff]  ;;  %v356_v19 = vld [vmem:[%s1475_s30 + $0x130] sm:$0xff] }
  0x1e   : > { %v358_v20 = vld [vmem:[%s1475_s30 + $0x140] sm:$0xff]  ;;  %355 = vst [vmem:[%s1480_s5 + $0x90] sm:$0xff] %v354_v18  ;;  %357 = vst [vmem:[%s1480_s5 + $0x98] sm:$0xff] %v356_v19  ;;  %v360_v21 = vld [vmem:[%s1475_s30 + $0x150] sm:$0xff] }
  0x1f   : > { %359 = vst [vmem:[%s1480_s5 + $0xa0] sm:$0xff] %v358_v20  ;;  %v362_v22 = vld [vmem:[%s1475_s30 + $0x160] sm:$0xff]  ;;  %v364_v23 = vld [vmem:[%s1475_s30 + $0x170] sm:$0xff]  ;;  %361 = vst [vmem:[%s1480_s5 + $0xa8] sm:$0xff] %v360_v21 }
  0x20   : > { %363 = vst [vmem:[%s1480_s5 + $0xb0] sm:$0xff] %v362_v22  ;;  %365 = vst [vmem:[%s1480_s5 + $0xb8] sm:$0xff] %v364_v23  ;;  %v366_v24 = vld [vmem:[%s1475_s30 + $0x180] sm:$0xff]  ;;  %v368_v25 = vld [vmem:[%s1475_s30 + $0x190] sm:$0xff] }
  0x21   : > { %v370_v26 = vld [vmem:[%s1475_s30 + $0x1a0] sm:$0xff]  ;;  %367 = vst [vmem:[%s1480_s5 + $0xc0] sm:$0xff] %v366_v24  ;;  %369 = vst [vmem:[%s1480_s5 + $0xc8] sm:$0xff] %v368_v25  ;;  %v372_v27 = vld [vmem:[%s1475_s30 + $0x1b0] sm:$0xff] }
  0x22   : > { %371 = vst [vmem:[%s1480_s5 + $0xd0] sm:$0xff] %v370_v26  ;;  %v374_v28 = vld [vmem:[%s1475_s30 + $0x1c0] sm:$0xff]  ;;  %v376_v29 = vld [vmem:[%s1475_s30 + $0x1d0] sm:$0xff]  ;;  %373 = vst [vmem:[%s1480_s5 + $0xd8] sm:$0xff] %v372_v27 }
  0x23   : > { %375 = vst [vmem:[%s1480_s5 + $0xe0] sm:$0xff] %v374_v28  ;;  %377 = vst [vmem:[%s1480_s5 + $0xe8] sm:$0xff] %v376_v29  ;;  %v378_v30 = vld [vmem:[%s1475_s30 + $0x1e0] sm:$0xff]  ;;  %v380_v31 = vld [vmem:[%s1475_s30 + $0x1f0] sm:$0xff] }
  0x24   : > { %v382_v32 = vld [vmem:[%s1475_s30 + $0x200] sm:$0xff]  ;;  %379 = vst [vmem:[%s1480_s5 + $0xf0] sm:$0xff] %v378_v30  ;;  %381 = vst [vmem:[%s1480_s5 + $0xf8] sm:$0xff] %v380_v31  ;;  %v384_v33 = vld [vmem:[%s1475_s30 + $0x210] sm:$0xff] }
  0x25   : > { %383 = vst [vmem:[%s1480_s5 + $0x100] sm:$0xff] %v382_v32  ;;  %v386_v34 = vld [vmem:[%s1475_s30 + $0x220] sm:$0xff]  ;;  %v388_v35 = vld [vmem:[%s1475_s30 + $0x230] sm:$0xff]  ;;  %385 = vst [vmem:[%s1480_s5 + $0x108] sm:$0xff] %v384_v33 }
  0x26   : > { %387 = vst [vmem:[%s1480_s5 + $0x110] sm:$0xff] %v386_v34  ;;  %389 = vst [vmem:[%s1480_s5 + $0x118] sm:$0xff] %v388_v35  ;;  %v390_v36 = vld [vmem:[%s1475_s30 + $0x240] sm:$0xff]  ;;  %v392_v37 = vld [vmem:[%s1475_s30 + $0x250] sm:$0xff] }
  0x27   : > { %v394_v38 = vld [vmem:[%s1475_s30 + $0x260] sm:$0xff]  ;;  %391 = vst [vmem:[%s1480_s5 + $0x120] sm:$0xff] %v390_v36  ;;  %393 = vst [vmem:[%s1480_s5 + $0x128] sm:$0xff] %v392_v37  ;;  %v396_v39 = vld [vmem:[%s1475_s30 + $0x270] sm:$0xff] }
  0x28   : > { %395 = vst [vmem:[%s1480_s5 + $0x130] sm:$0xff] %v394_v38  ;;  %v398_v40 = vld [vmem:[%s1475_s30 + $0x280] sm:$0xff]  ;;  %v400_v41 = vld [vmem:[%s1475_s30 + $0x290] sm:$0xff]  ;;  %397 = vst [vmem:[%s1480_s5 + $0x138] sm:$0xff] %v396_v39 }
  0x29   : > { %399 = vst [vmem:[%s1480_s5 + $0x140] sm:$0xff] %v398_v40  ;;  %401 = vst [vmem:[%s1480_s5 + $0x148] sm:$0xff] %v400_v41  ;;  %v402_v42 = vld [vmem:[%s1475_s30 + $0x2a0] sm:$0xff]  ;;  %v404_v43 = vld [vmem:[%s1475_s30 + $0x2b0] sm:$0xff] }
  0x2a   : > { %v406_v44 = vld [vmem:[%s1475_s30 + $0x2c0] sm:$0xff]  ;;  %403 = vst [vmem:[%s1480_s5 + $0x150] sm:$0xff] %v402_v42  ;;  %405 = vst [vmem:[%s1480_s5 + $0x158] sm:$0xff] %v404_v43  ;;  %v408_v45 = vld [vmem:[%s1475_s30 + $0x2d0] sm:$0xff] }
  0x2b   : > { %407 = vst [vmem:[%s1480_s5 + $0x160] sm:$0xff] %v406_v44  ;;  %v410_v46 = vld [vmem:[%s1475_s30 + $0x2e0] sm:$0xff]  ;;  %v412_v47 = vld [vmem:[%s1475_s30 + $0x2f0] sm:$0xff]  ;;  %409 = vst [vmem:[%s1480_s5 + $0x168] sm:$0xff] %v408_v45 }
  0x2c   : > { %411 = vst [vmem:[%s1480_s5 + $0x170] sm:$0xff] %v410_v46  ;;  %413 = vst [vmem:[%s1480_s5 + $0x178] sm:$0xff] %v412_v47  ;;  %v414_v48 = vld [vmem:[%s1475_s30 + $0x300] sm:$0xff]  ;;  %v416_v49 = vld [vmem:[%s1475_s30 + $0x310] sm:$0xff] }
  0x2d   : > { %v418_v50 = vld [vmem:[%s1475_s30 + $0x320] sm:$0xff]  ;;  %415 = vst [vmem:[%s1480_s5 + $0x180] sm:$0xff] %v414_v48  ;;  %417 = vst [vmem:[%s1480_s5 + $0x188] sm:$0xff] %v416_v49  ;;  %v420_v51 = vld [vmem:[%s1475_s30 + $0x330] sm:$0xff] }
  0x2e   : > { %419 = vst [vmem:[%s1480_s5 + $0x190] sm:$0xff] %v418_v50  ;;  %v422_v52 = vld [vmem:[%s1475_s30 + $0x340] sm:$0xff]  ;;  %v424_v53 = vld [vmem:[%s1475_s30 + $0x350] sm:$0xff]  ;;  %421 = vst [vmem:[%s1480_s5 + $0x198] sm:$0xff] %v420_v51 }
  0x2f   : > { %423 = vst [vmem:[%s1480_s5 + $0x1a0] sm:$0xff] %v422_v52  ;;  %425 = vst [vmem:[%s1480_s5 + $0x1a8] sm:$0xff] %v424_v53  ;;  %v426_v54 = vld [vmem:[%s1475_s30 + $0x360] sm:$0xff]  ;;  %v428_v55 = vld [vmem:[%s1475_s30 + $0x370] sm:$0xff] }
  0x30   : > { %v430_v56 = vld [vmem:[%s1475_s30 + $0x380] sm:$0xff]  ;;  %427 = vst [vmem:[%s1480_s5 + $0x1b0] sm:$0xff] %v426_v54  ;;  %429 = vst [vmem:[%s1480_s5 + $0x1b8] sm:$0xff] %v428_v55  ;;  %v432_v57 = vld [vmem:[%s1475_s30 + $0x390] sm:$0xff] }
  0x31   : > { %431 = vst [vmem:[%s1480_s5 + $0x1c0] sm:$0xff] %v430_v56  ;;  %v434_v58 = vld [vmem:[%s1475_s30 + $0x3a0] sm:$0xff]  ;;  %v436_v59 = vld [vmem:[%s1475_s30 + $0x3b0] sm:$0xff]  ;;  %433 = vst [vmem:[%s1480_s5 + $0x1c8] sm:$0xff] %v432_v57 }
  0x32   : > { %435 = vst [vmem:[%s1480_s5 + $0x1d0] sm:$0xff] %v434_v58  ;;  %437 = vst [vmem:[%s1480_s5 + $0x1d8] sm:$0xff] %v436_v59  ;;  %v438_v60 = vld [vmem:[%s1475_s30 + $0x3c0] sm:$0xff]  ;;  %v440_v61 = vld [vmem:[%s1475_s30 + $0x3d0] sm:$0xff] }
  0x33   : > { %v442_v62 = vld [vmem:[%s1475_s30 + $0x3e0] sm:$0xff]  ;;  %439 = vst [vmem:[%s1480_s5 + $0x1e0] sm:$0xff] %v438_v60  ;;  %441 = vst [vmem:[%s1480_s5 + $0x1e8] sm:$0xff] %v440_v61  ;;  %v444_v63 = vld [vmem:[%s1475_s30 + $0x3f0] sm:$0xff] }
  0x34   : > { %443 = vst [vmem:[%s1480_s5 + $0x1f0] sm:$0xff] %v442_v62  ;;  %445 = vst [vmem:[%s1480_s5 + $0x1f8] sm:$0xff] %v444_v63 }
  0x35 PF: > { %451 = sbr.rel (!%p1459_p4) target bundleno = 60 (0x3c), region = 66  ;;  %s453_s6 = sand.u32 (%p1459_p4), 1, %s1397_s16  }
  0x36   : > { %s1241_s7 = sshll.u32 (%p1459_p4), %s1401_s17, 4  ;;  %s1160_s8 = sshll.u32 (%p1459_p4), %s453_s6, 5 }
  0x37   : > { %s458_s11 = scalar_lea.vmem (%p1459_p4), %s1725_s3, %s1241_s7  ;;  %s455_s12 = scalar_lea.vmem (%p1459_p4), [#allocation3], %s1160_s8 }
  0x38   : > { %v471_v0 = vld [vmem:[%s458_s11] sm:$0xff] (%p1459_p4)  ;;  %v473_v1 = vld [vmem:[%s458_s11 + $0x8] sm:$0xff] (%p1459_p4) }
  0x39   : > { %v475_v2 = vld [vmem:[%s458_s11 + $0x20] sm:$0xff] (%p1459_p4)  ;;  %472 = vst [vmem:[%s455_s12] sm:$0xff] (%p1459_p4), %v471_v0  ;;  %474 = vst [vmem:[%s455_s12 + $0x8] sm:$0xff] (%p1459_p4), %v473_v1  ;;  %v477_v3 = vld [vmem:[%s458_s11 + $0x28] sm:$0xff] (%p1459_p4) }
  0x3a   : > { %476 = vst [vmem:[%s455_s12 + $0x10] sm:$0xff] (%p1459_p4), %v475_v2  ;;  %478 = vst [vmem:[%s455_s12 + $0x18] sm:$0xff] (%p1459_p4), %v477_v3 }
  0x3c PF: > { %p1163_p7 = scmp.ge.s32.totalorder %s1401_s17, 1  ;;  %p483_p8 = scmp.lt.s32.totalorder %s1401_s17, 3 }
  0x3e   : > { %p484_p9 = pnand %p1163_p7, %p483_p8 }
  0x3f   : > { %s490_s13 = sand.u32 (!%p484_p9), 1, %s1393_s15   ;;  %v1375_v4 = vld [vmem:[%s1722_s0 + $0x4] ss:$16 sps:$4 sm:$0xff] (!%p484_p9)   ;;  %v1403_v5 = vmov (!%p484_p9), 0   ;;  %v1378_v6 = vld [vmem:[%s1722_s0 + $0xc] ss:$16 sps:$4 sm:$0xff] (!%p484_p9)  }
  0x40   : > { %487 = sbr.rel (%p484_p9) target bundleno = 361 (0x169), region = 89  ;;  %s1164_s14 = sshll.u32 (!%p484_p9), %s490_s13, 9  ;;  %1276 = vset.pattern.permute.xlu0 (!%p484_p9), %v1403_v5  ;;  %v596_v7 = vld [vmem:[%s1723_s1] sm:$0xff] (!%p484_p9)  ;;  %980 = vmatprep.mubr.bf16.mxu1 (!%p484_p9), %v1375_v4  ;;  %v597_v54 = vld [vmem:[%s1723_s1 + $0x8] sm:$0xff] (!%p484_p9) }
  0x41   : > { %s1628_s28 = scalar_lea.vmem (!%p484_p9), [#allocation2], %s1164_s14  ;;  %600 = vperm.xlu0 (!%p484_p9), %1276, %v596_v7   ;;  %1023 = vmatprep.mubr.bf16.mxu0 (!%p484_p9), %v1378_v6  ;;  %s1165_s9 = sshll.u32 (!%p484_p9), %s490_s13, 5 }
  0x42   : > { %v1277_v8 = vld [vmem:[%s1628_s28 + $0x4] ss:$8 sps:$4 sm:$0xff] (!%p484_p9)   ;;  %v1281_v10 = vld [vmem:[%s1628_s28] ss:$8 sps:$4 sm:$0xff] (!%p484_p9)   ;;  %v1283_v12 = vld [vmem:[%s1628_s28 + $0x14] ss:$8 sps:$4 sm:$0xff] (!%p484_p9)  }
  0x43   : > { %v1279_v9 = vld [vmem:[%s1628_s28 + $0x104] ss:$8 sps:$4 sm:$0xff] (!%p484_p9)   ;;  %948 = vmatprep.subr.bf16.mxu1 (!%p484_p9), %v1277_v8  ;;  %v1282_v11 = vld [vmem:[%s1628_s28 + $0x100] ss:$8 sps:$4 sm:$0xff] (!%p484_p9)   ;;  %v1285_v13 = vld [vmem:[%s1628_s28 + $0x114] ss:$8 sps:$4 sm:$0xff] (!%p484_p9)  }
  0x44   : > { %991 = vmatprep.subr.bf16.mxu0 (!%p484_p9), %v1279_v9  ;;  %949 = vmatpush1.bf16.msra.mxu1 (!%p484_p9), %v1281_v10  ;;  %v1287_v14 = vld [vmem:[%s1628_s28 + $0x10] ss:$8 sps:$4 sm:$0xff] (!%p484_p9)   ;;  %v1289_v16 = vld [vmem:[%s1628_s28 + $0x24] ss:$8 sps:$4 sm:$0xff] (!%p484_p9)   ;;  %v1293_v18 = vld [vmem:[%s1628_s28 + $0x20] ss:$8 sps:$4 sm:$0xff] (!%p484_p9)  }
  0x45   : > { %992 = vmatpush1.bf16.msra.mxu0 (!%p484_p9), %v1282_v11  ;;  %950 = vmatprep.subr.bf16.mxu1 (!%p484_p9), %v1283_v12  ;;  %v1288_v15 = vld [vmem:[%s1628_s28 + $0x110] ss:$8 sps:$4 sm:$0xff] (!%p484_p9)   ;;  %v1291_v17 = vld [vmem:[%s1628_s28 + $0x124] ss:$8 sps:$4 sm:$0xff] (!%p484_p9)   ;;  %v1294_v19 = vld [vmem:[%s1628_s28 + $0x120] ss:$8 sps:$4 sm:$0xff] (!%p484_p9)  }
  0x46   : > { %993 = vmatprep.subr.bf16.mxu0 (!%p484_p9), %v1285_v13  ;;  %v1295_v20 = vld [vmem:[%s1628_s28 + $0x34] ss:$8 sps:$4 sm:$0xff] (!%p484_p9)   ;;  %v1299_v22 = vld [vmem:[%s1628_s28 + $0x30] ss:$8 sps:$4 sm:$0xff] (!%p484_p9)   ;;  %v1301_v24 = vld [vmem:[%s1628_s28 + $0x44] ss:$8 sps:$4 sm:$0xff] (!%p484_p9)   ;;  %605 = vperm.xlu0 (!%p484_p9), %1276, %v597_v54  }
  0x47   : > { %v1297_v21 = vld [vmem:[%s1628_s28 + $0x134] ss:$8 sps:$4 sm:$0xff]   ;;  %v1300_v23 = vld [vmem:[%s1628_s28 + $0x130] ss:$8 sps:$4 sm:$0xff]   ;;  %v1303_v25 = vld [vmem:[%s1628_s28 + $0x144] ss:$8 sps:$4 sm:$0xff]  }
  0x48   : > { %951 = vmatpush1.bf16.msra.mxu1 %v1287_v14  ;;  %v1305_v26 = vld [vmem:[%s1628_s28 + $0x40] ss:$8 sps:$4 sm:$0xff]   ;;  %v1307_v28 = vld [vmem:[%s1628_s28 + $0x54] ss:$8 sps:$4 sm:$0xff]   ;;  %v1311_v30 = vld [vmem:[%s1628_s28 + $0x50] ss:$8 sps:$4 sm:$0xff]  }
  0x49   : > { %994 = vmatpush1.bf16.msra.mxu0 %v1288_v15  ;;  %952 = vmatprep.subr.bf16.mxu1 %v1289_v16  ;;  %v1306_v27 = vld [vmem:[%s1628_s28 + $0x140] ss:$8 sps:$4 sm:$0xff]   ;;  %v1309_v29 = vld [vmem:[%s1628_s28 + $0x154] ss:$8 sps:$4 sm:$0xff]   ;;  %v1312_v31 = vld [vmem:[%s1628_s28 + $0x150] ss:$8 sps:$4 sm:$0xff]  }
  0x4a   : > { %995 = vmatprep.subr.bf16.mxu0 %v1291_v17  ;;  %v1313_v32 = vld [vmem:[%s1628_s28 + $0x64] ss:$8 sps:$4 sm:$0xff]   ;;  %v1317_v34 = vld [vmem:[%s1628_s28 + $0x60] ss:$8 sps:$4 sm:$0xff]   ;;  %v1319_v36 = vld [vmem:[%s1628_s28 + $0x74] ss:$8 sps:$4 sm:$0xff]  }
  0x4b   : > { %v1315_v33 = vld [vmem:[%s1628_s28 + $0x164] ss:$8 sps:$4 sm:$0xff]   ;;  %v1318_v35 = vld [vmem:[%s1628_s28 + $0x160] ss:$8 sps:$4 sm:$0xff]   ;;  %v1321_v37 = vld [vmem:[%s1628_s28 + $0x174] ss:$8 sps:$4 sm:$0xff]  }
  0x4c   : > { %953 = vmatpush1.bf16.msra.mxu1 %v1293_v18  ;;  %v1323_v38 = vld [vmem:[%s1628_s28 + $0x70] ss:$8 sps:$4 sm:$0xff]   ;;  %v1325_v40 = vld [vmem:[%s1628_s28 + $0x84] ss:$8 sps:$4 sm:$0xff]   ;;  %v1329_v42 = vld [vmem:[%s1628_s28 + $0x80] ss:$8 sps:$4 sm:$0xff]  }
  0x4d   : > { %996 = vmatpush1.bf16.msra.mxu0 %v1294_v19  ;;  %954 = vmatprep.subr.bf16.mxu1 %v1295_v20  ;;  %v1324_v39 = vld [vmem:[%s1628_s28 + $0x170] ss:$8 sps:$4 sm:$0xff]   ;;  %v1327_v41 = vld [vmem:[%s1628_s28 + $0x184] ss:$8 sps:$4 sm:$0xff]   ;;  %v1330_v43 = vld [vmem:[%s1628_s28 + $0x180] ss:$8 sps:$4 sm:$0xff]  }
  0x4e   : > { %997 = vmatprep.subr.bf16.mxu0 %v1297_v21  ;;  %v1331_v44 = vld [vmem:[%s1628_s28 + $0x94] ss:$8 sps:$4 sm:$0xff]   ;;  %v1335_v46 = vld [vmem:[%s1628_s28 + $0x90] ss:$8 sps:$4 sm:$0xff]   ;;  %v1337_v48 = vld [vmem:[%s1628_s28 + $0xa4] ss:$8 sps:$4 sm:$0xff]  }
  0x4f   : > { %v1333_v45 = vld [vmem:[%s1628_s28 + $0x194] ss:$8 sps:$4 sm:$0xff]   ;;  %v1336_v47 = vld [vmem:[%s1628_s28 + $0x190] ss:$8 sps:$4 sm:$0xff]   ;;  %v1339_v49 = vld [vmem:[%s1628_s28 + $0x1a4] ss:$8 sps:$4 sm:$0xff]  }
  0x50   : > { %955 = vmatpush1.bf16.msra.mxu1 %v1299_v22  ;;  %v1341_v50 = vld [vmem:[%s1628_s28 + $0xa0] ss:$8 sps:$4 sm:$0xff]   ;;  %v1343_v52 = vld [vmem:[%s1628_s28 + $0xb4] ss:$8 sps:$4 sm:$0xff]   ;;  %v1347_v55 = vld [vmem:[%s1628_s28 + $0xb0] ss:$8 sps:$4 sm:$0xff]  }
  0x51   : > { %998 = vmatpush1.bf16.msra.mxu0 %v1300_v23  ;;  %956 = vmatprep.subr.bf16.mxu1 %v1301_v24  ;;  %v1342_v51 = vld [vmem:[%s1628_s28 + $0x1a0] ss:$8 sps:$4 sm:$0xff]   ;;  %v1345_v53 = vld [vmem:[%s1628_s28 + $0x1b4] ss:$8 sps:$4 sm:$0xff]   ;;  %v1348_v56 = vld [vmem:[%s1628_s28 + $0x1b0] ss:$8 sps:$4 sm:$0xff]  }
  0x52   : > { %999 = vmatprep.subr.bf16.mxu0 %v1303_v25  ;;  %v1349_v57 = vld [vmem:[%s1628_s28 + $0xc4] ss:$8 sps:$4 sm:$0xff]   ;;  %v1353_v59 = vld [vmem:[%s1628_s28 + $0xc0] ss:$8 sps:$4 sm:$0xff]   ;;  %v1355_v61 = vld [vmem:[%s1628_s28 + $0xd4] ss:$8 sps:$4 sm:$0xff]  }
  0x53   : > { %v1351_v58 = vld [vmem:[%s1628_s28 + $0x1c4] ss:$8 sps:$4 sm:$0xff]   ;;  %v1354_v60 = vld [vmem:[%s1628_s28 + $0x1c0] ss:$8 sps:$4 sm:$0xff]   ;;  %v1357_v62 = vld [vmem:[%s1628_s28 + $0x1d4] ss:$8 sps:$4 sm:$0xff]  }
  0x54   : > { %957 = vmatpush1.bf16.msra.mxu1 %v1305_v26  ;;  %v1359_v63 = vld [vmem:[%s1628_s28 + $0xd0] ss:$8 sps:$4 sm:$0xff]   ;;  %v1361_v1 = vld [vmem:[%s1628_s28 + $0xe4] ss:$8 sps:$4 sm:$0xff]   ;;  %v1365_v3 = vld [vmem:[%s1628_s28 + $0xe0] ss:$8 sps:$4 sm:$0xff]  }
  0x55   : > { %1000 = vmatpush1.bf16.msra.mxu0 %v1306_v27  ;;  %958 = vmatprep.subr.bf16.mxu1 %v1307_v28  ;;  %v1360_v0 = vld [vmem:[%s1628_s28 + $0x1d0] ss:$8 sps:$4 sm:$0xff]   ;;  %v1363_v2 = vld [vmem:[%s1628_s28 + $0x1e4] ss:$8 sps:$4 sm:$0xff]   ;;  %v1366_v4 = vld [vmem:[%s1628_s28 + $0x1e0] ss:$8 sps:$4 sm:$0xff]  }
  0x56   : > { %1001 = vmatprep.subr.bf16.mxu0 %v1309_v29  ;;  %v1367_v5 = vld [vmem:[%s1628_s28 + $0xf4] ss:$8 sps:$4 sm:$0xff]   ;;  %v1371_v7 = vld [vmem:[%s1628_s28 + $0xf0] ss:$8 sps:$4 sm:$0xff]   ;;  %s499_s10 = scalar_lea.vmem [#allocation3], %s1165_s9  ;;  %s524_s15 = scalar_lea.vmem [#allocation4], %s1165_s9 }
  0x57   : > { %v1369_v6 = vld [vmem:[%s1628_s28 + $0x1f4] ss:$8 sps:$4 sm:$0xff]   ;;  %v1372_v8 = vld [vmem:[%s1628_s28 + $0x1f0] ss:$8 sps:$4 sm:$0xff]   ;;  %v1034_v18 = vld [vmem:[%s499_s10] sm:$0xff]  ;;  %s1242_s11 = sshll.u32 (%p1463_p5), %s1153_s18, 4 }
  0x58   : > { %959 = vmatpush1.bf16.msra.mxu1 %v1311_v30  ;;  %v1373_v9 = vld [vmem:[%s1722_s0] ss:$16 sps:$4 sm:$0xff]   ;;  %v1376_v10 = vld [vmem:[%s1722_s0 + $0x8] ss:$16 sps:$4 sm:$0xff]   ;;  %s1055_s14 = scalar_lea.vmem (%p1463_p5), %s1726_s4, %s1242_s11 }
  0x59   : > { %1002 = vmatpush1.bf16.msra.mxu0 %v1312_v31  ;;  %960 = vmatprep.subr.bf16.mxu1 %v1313_v32  ;;  %v1035_v23 = vld [vmem:[%s499_s10 + $0x8] sm:$0xff]  ;;  %v1036_v28 = vld [vmem:[%s499_s10 + $0x10] sm:$0xff]  ;;  %v1037_v32 = vld [vmem:[%s499_s10 + $0x18] sm:$0xff] }
  0x5a   : > { %1003 = vmatprep.subr.bf16.mxu0 %v1315_v33 }
  0x5c   : > { %961 = vmatpush1.bf16.msra.mxu1 %v1317_v34 }
  0x5d   : > { %1004 = vmatpush1.bf16.msra.mxu0 %v1318_v35  ;;  %962 = vmatprep.subr.bf16.mxu1 %v1319_v36 }
  0x5e   : > { %1005 = vmatprep.subr.bf16.mxu0 %v1321_v37 }
  0x60   : > { %963 = vmatpush1.bf16.msra.mxu1 %v1323_v38 }
  0x61   : > { %1006 = vmatpush1.bf16.msra.mxu0 %v1324_v39  ;;  %964 = vmatprep.subr.bf16.mxu1 %v1325_v40 }
  0x62   : > { %1007 = vmatprep.subr.bf16.mxu0 %v1327_v41 }
  0x64   : > { %965 = vmatpush1.bf16.msra.mxu1 %v1329_v42 }
  0x65   : > { %1008 = vmatpush1.bf16.msra.mxu0 %v1330_v43  ;;  %966 = vmatprep.subr.bf16.mxu1 %v1331_v44 }
  0x66   : > { %1009 = vmatprep.subr.bf16.mxu0 %v1333_v45 }
  0x68   : > { %967 = vmatpush1.bf16.msra.mxu1 %v1335_v46 }
  0x69   : > { %1010 = vmatpush1.bf16.msra.mxu0 %v1336_v47  ;;  %968 = vmatprep.subr.bf16.mxu1 %v1337_v48 }
  0x6a   : > { %1011 = vmatprep.subr.bf16.mxu0 %v1339_v49 }
  0x6c   : > { %969 = vmatpush1.bf16.msra.mxu1 %v1341_v50 }
  0x6d   : > { %1012 = vmatpush1.bf16.msra.mxu0 %v1342_v51  ;;  %970 = vmatprep.subr.bf16.mxu1 %v1343_v52 }
  0x6e   : > { %1013 = vmatprep.subr.bf16.mxu0 %v1345_v53 }
  0x70   : > { %971 = vmatpush1.bf16.msra.mxu1 %v1347_v55 }
  0x71   : > { %1014 = vmatpush1.bf16.msra.mxu0 %v1348_v56  ;;  %972 = vmatprep.subr.bf16.mxu1 %v1349_v57 }
  0x72   : > { %1015 = vmatprep.subr.bf16.mxu0 %v1351_v58 }
  0x74   : > { %973 = vmatpush1.bf16.msra.mxu1 %v1353_v59 }
  0x75   : > { %1016 = vmatpush1.bf16.msra.mxu0 %v1354_v60  ;;  %974 = vmatprep.subr.bf16.mxu1 %v1355_v61 }
  0x76   : > { %1017 = vmatprep.subr.bf16.mxu0 %v1357_v62 }
  0x78   : > { %975 = vmatpush1.bf16.msra.mxu1 %v1359_v63 }
  0x79   : > { %1018 = vmatpush1.bf16.msra.mxu0 %v1360_v0  ;;  %976 = vmatprep.subr.bf16.mxu1 %v1361_v1 }
  0x7a   : > { %1019 = vmatprep.subr.bf16.mxu0 %v1363_v2 }
  0x7c   : > { %977 = vmatpush1.bf16.msra.mxu1 %v1365_v3 }
  0x7d   : > { %1020 = vmatpush1.bf16.msra.mxu0 %v1366_v4  ;;  %978 = vmatprep.subr.bf16.mxu1 %v1367_v5 }
  0x7e   : > { %1021 = vmatprep.subr.bf16.mxu0 %v1369_v6 }
  0x80   : > { %979 = vmatpush1.bf16.msra.mxu1 %v1371_v7 }
  0x81   : > { %1022 = vmatpush1.bf16.msra.mxu0 %v1372_v8 }
  0x83   : > { %981 = vmatmul.mubr.bf16.vlgmr.msra.gmra.mrb[0].mxu1 %v1373_v9 }
  0x84   : > { %1024 = vmatmul.mubr.bf16.vlgmr.msra.gmra.mrb[0].mxu0 %v1376_v10 }
  0xc0   : > { %v601_v11 = vpop.permute.xlu0 %600 }
  0xc5   : > { %v606_v12 = vpop.permute.xlu0 %605 }
 0x156   : > { %v982_v13 = vpop.f32.mrb[0].mxu1 }
 0x157   : > { %v1025_v14 = vpop.f32.mrb[0].mxu0  ;;  %v983_v15 = vadd.f32 %v982_v13, %v601_v11  ;;  %v984_v16 = vpop.f32.mrb[1].mxu1 }
 0x158   : > { %v1027_v17 = vpop.f32.mrb[1].mxu0  ;;  %v985_v19 = vadd.f32 %v984_v16, %v601_v11  ;;  %v986_v20 = vpop.f32.mrb[2].mxu1 }
 0x159   : > { %v1029_v21 = vpop.f32.mrb[2].mxu0  ;;  %v1026_v22 = vadd.f32 %v1025_v14, %v983_v15  ;;  %v987_v24 = vadd.f32 %v986_v20, %v606_v12  ;;  %v988_v25 = vpop.f32.mrb[3].mxu1 }
 0x15a   : > { %v1031_v26 = vpop.f32.mrb[3].mxu0  ;;  %v1028_v27 = vadd.f32 %v1027_v17, %v985_v19  ;;  %v989_v29 = vadd.f32 %v988_v25, %v606_v12  ;;  %1052 = sbr.rel (!%p1463_p5) target bundleno = 361 (0x169), region = 101 }
 0x15b   : > { %v1038_v30 = vsub.f32 %v1034_v18, %v1026_v22  ;;  %v1030_v31 = vadd.f32 %v1029_v21, %v987_v24 }
 0x15c   : > { %v1039_v33 = vsub.f32 %v1035_v23, %v1028_v27  ;;  %v1032_v34 = vadd.f32 %v1031_v26, %v989_v29 }
 0x15d   : > { %1042 = vst [vmem:[%s524_s15] sm:$0xff] %v1038_v30  ;;  %v1040_v35 = vsub.f32 %v1036_v28, %v1030_v31 }
 0x15e   : > { %1043 = vst [vmem:[%s524_s15 + $0x8] sm:$0xff] %v1039_v33  ;;  %v1041_v36 = vsub.f32 %v1037_v32, %v1032_v34 }
 0x15f   : > { %1044 = vst [vmem:[%s524_s15 + $0x10] sm:$0xff] %v1040_v35 }
 0x160   : > { %1045 = vst [vmem:[%s524_s15 + $0x18] sm:$0xff] %v1041_v36 }
 0x164   : > { %v1068_v37 = vld [vmem:[%s524_s15] sm:$0xff] }
 0x165   : > { %v1070_v38 = vld [vmem:[%s524_s15 + $0x8] sm:$0xff]  ;;  %1069 = vst [vmem:[%s1055_s14] sm:$0xff] %v1068_v37 }
 0x166   : > { %v1072_v39 = vld [vmem:[%s524_s15 + $0x10] sm:$0xff]  ;;  %1071 = vst [vmem:[%s1055_s14 + $0x8] sm:$0xff] %v1070_v38 }
 0x167   : > { %v1074_v40 = vld [vmem:[%s524_s15 + $0x18] sm:$0xff]  ;;  %1073 = vst [vmem:[%s1055_s14 + $0x20] sm:$0xff] %v1072_v39 }
 0x168   : > { %1075 = vst [vmem:[%s1055_s14 + $0x28] sm:$0xff] %v1074_v40 }
 0x169 PF: > { %p11_p10 = scmp.ge.s32.totalorder %s1446_s19, 4   ;;  %s1729_s15 = smov %s1397_s16 }
 0x16a   : > { %s1730_s16 = smov %s1457_s22  ;;  %s1731_s17 = smov %s1446_s19 }
 0x16b   :  { %13 = sbr.rel (!%p11_p10) target bundleno = 2 (0x2), region = 163 }

// kernel: crcnet_forward.46
= control target key start
LH: loop header
LB: loop body
LE: loop exit
PB: predicated region body
PF: predicated region fallthrough
CT: control target
= control target key end

     0   :  { %s13882_s15 = smov 0   ;;  %s13884_s16 = smov 0   ;;  %s16346_s0 = inlined_call_operand.vmem [shape: bf16[56,4992], index: 0, kind: input, shape index: {}]   ;;  %s16347_s1 = inlined_call_operand.vmem [shape: f32[56,1], index: 1, kind: input, shape index: {}]   ;;  %s16348_s2 = inlined_call_operand.vmem [shape: f32[56,1], index: 2, kind: input, shape index: {}]   ;;  %s16349_s3 = inlined_call_operand.vmem [shape: bf16[4992,512], index: 3, kind: input, shape index: {}]   ;;  %s16350_s4 = inlined_call_operand.vmem [shape: f32[56,512], index: 4, kind: output, shape index: {}]  }
   0x1   :  { %s13886_s17 = smov 0  }
   0x2 LB: > { %s11544_s18 = sadd.s32 4294967295, %s13854_s17   ;;  %s13899_s19 = sadd.s32 1, %s13854_s17   ;;  %s13854_s17 = sphi %s13886_s17, %s16354_s17   ;;  %s13850_s16 = sphi %s13884_s16, %s16353_s16   ;;  %s13846_s15 = sphi %s13882_s15, %s16352_s15  }
   0x3   : > { %s81_s20 = ssub.s32 %s13854_s17, %s13899_s19  ;;  %s84_s21 = sadd.s32 1, %s13850_s16 }
   0x4   : > { %p82_p0 = scmp.eq.s32.totalorder %s81_s20, 0  ;;  %p91_p1 = scmp.ne.s32.totalorder %s13850_s16, %s13846_s15 }
   0x5   : > { %p92_p2 = scmp.eq.s32.totalorder %s13854_s17, 0  ;;  %p121_p3 = scmp.eq.s32.totalorder %s11544_s18, 1 }
   0x6   : > { %s13910_s22 = scalar_select %p82_p0, %s13850_s16, %s84_s21  }
   0x7   : > { %p93_p4 = por %p92_p2, %p91_p1  ;;  %p13912_p5 = por %p121_p3, %p91_p1 }
   0x8   : > { %p11547_p6 = scmp.ge.s32.totalorder %s13854_s17, 2 }
   0xa   : > { %152 = sbr.rel (%p11547_p6) target bundleno = 333 (0x14d), region = 28 }
  0x11   : > { %155 = sbr.rel (!%p93_p4) target bundleno = 333 (0x14d), region = 32  ;;  %s157_s24 = sand.u32 (%p93_p4), 1, %s13850_s16  }
  0x12   : > { %s12335_s25 = sshll.u32 (%p93_p4), %s13854_s17, 3  ;;  %s12653_s26 = smul.u32 (%p93_p4), 4992, %s157_s24 }
  0x13   : > { %s13922_s29 = scalar_lea.vmem (%p93_p4), %s16349_s3, %s12335_s25 }
  0x14   : > { %v1439_v0 = vld [vmem:[%s13922_s29] sm:$0xff] (%p93_p4)  ;;  %v1441_v1 = vld [vmem:[%s13922_s29 + $0x10] sm:$0xff] (%p93_p4)  ;;  %s13930_s30 = scalar_lea.vmem (%p93_p4), [#allocation2], %s12653_s26 }
  0x15   : > { %v1443_v2 = vld [vmem:[%s13922_s29 + $0x20] sm:$0xff] (%p93_p4)  ;;  %v1445_v3 = vld [vmem:[%s13922_s29 + $0x30] sm:$0xff] (%p93_p4)  ;;  %1440 = vst [vmem:[%s13930_s30] sm:$0xff] (%p93_p4), %v1439_v0  ;;  %1442 = vst [vmem:[%s13930_s30 + $0x8] sm:$0xff] (%p93_p4), %v1441_v1 }
  0x16   : > { %v1447_v4 = vld [vmem:[%s13922_s29 + $0x40] sm:$0xff] (%p93_p4)  ;;  %v1449_v5 = vld [vmem:[%s13922_s29 + $0x50] sm:$0xff] (%p93_p4)  ;;  %1444 = vst [vmem:[%s13930_s30 + $0x10] sm:$0xff] (%p93_p4), %v1443_v2  ;;  %1446 = vst [vmem:[%s13930_s30 + $0x18] sm:$0xff] (%p93_p4), %v1445_v3 }
  0x17   : > { %1448 = vst [vmem:[%s13930_s30 + $0x20] sm:$0xff] (%p93_p4), %v1447_v4  ;;  %1450 = vst [vmem:[%s13930_s30 + $0x28] sm:$0xff] (%p93_p4), %v1449_v5  ;;  %v1451_v6 = vld [vmem:[%s13922_s29 + $0x60] sm:$0xff] (%p93_p4)  ;;  %v1453_v7 = vld [vmem:[%s13922_s29 + $0x70] sm:$0xff] (%p93_p4) }
  0x18   : > { %v1455_v8 = vld [vmem:[%s13922_s29 + $0x80] sm:$0xff]  ;;  %1452 = vst [vmem:[%s13930_s30 + $0x30] sm:$0xff] %v1451_v6  ;;  %1454 = vst [vmem:[%s13930_s30 + $0x38] sm:$0xff] %v1453_v7  ;;  %v1457_v9 = vld [vmem:[%s13922_s29 + $0x90] sm:$0xff] }
  0x19   : > { %1456 = vst [vmem:[%s13930_s30 + $0x40] sm:$0xff] %v1455_v8  ;;  %v1459_v10 = vld [vmem:[%s13922_s29 + $0xa0] sm:$0xff]  ;;  %v1461_v11 = vld [vmem:[%s13922_s29 + $0xb0] sm:$0xff]  ;;  %1458 = vst [vmem:[%s13930_s30 + $0x48] sm:$0xff] %v1457_v9 }
  0x1a   : > { %1460 = vst [vmem:[%s13930_s30 + $0x50] sm:$0xff] %v1459_v10  ;;  %1462 = vst [vmem:[%s13930_s30 + $0x58] sm:$0xff] %v1461_v11  ;;  %v1463_v12 = vld [vmem:[%s13922_s29 + $0xc0] sm:$0xff]  ;;  %v1465_v13 = vld [vmem:[%s13922_s29 + $0xd0] sm:$0xff] }
  0x1b   : > { %v1467_v14 = vld [vmem:[%s13922_s29 + $0xe0] sm:$0xff]  ;;  %1464 = vst [vmem:[%s13930_s30 + $0x60] sm:$0xff] %v1463_v12  ;;  %1466 = vst [vmem:[%s13930_s30 + $0x68] sm:$0xff] %v1465_v13  ;;  %v1469_v15 = vld [vmem:[%s13922_s29 + $0xf0] sm:$0xff] }
  0x1c   : > { %1468 = vst [vmem:[%s13930_s30 + $0x70] sm:$0xff] %v1467_v14  ;;  %v1471_v16 = vld [vmem:[%s13922_s29 + $0x100] sm:$0xff]  ;;  %v1473_v17 = vld [vmem:[%s13922_s29 + $0x110] sm:$0xff]  ;;  %1470 = vst [vmem:[%s13930_s30 + $0x78] sm:$0xff] %v1469_v15 }
  0x1d   : > { %1472 = vst [vmem:[%s13930_s30 + $0x80] sm:$0xff] %v1471_v16  ;;  %1474 = vst [vmem:[%s13930_s30 + $0x88] sm:$0xff] %v1473_v17  ;;  %v1475_v18 = vld [vmem:[%s13922_s29 + $0x120] sm:$0xff]  ;;  %v1477_v19 = vld [vmem:[%s13922_s29 + $0x130] sm:$0xff] }
  0x1e   : > { %v1479_v20 = vld [vmem:[%s13922_s29 + $0x140] sm:$0xff]  ;;  %1476 = vst [vmem:[%s13930_s30 + $0x90] sm:$0xff] %v1475_v18  ;;  %1478 = vst [vmem:[%s13930_s30 + $0x98] sm:$0xff] %v1477_v19  ;;  %v1481_v21 = vld [vmem:[%s13922_s29 + $0x150] sm:$0xff] }
  0x1f   : > { %1480 = vst [vmem:[%s13930_s30 + $0xa0] sm:$0xff] %v1479_v20  ;;  %v1483_v22 = vld [vmem:[%s13922_s29 + $0x160] sm:$0xff]  ;;  %v1485_v23 = vld [vmem:[%s13922_s29 + $0x170] sm:$0xff]  ;;  %1482 = vst [vmem:[%s13930_s30 + $0xa8] sm:$0xff] %v1481_v21 }
  0x20   : > { %1484 = vst [vmem:[%s13930_s30 + $0xb0] sm:$0xff] %v1483_v22  ;;  %1486 = vst [vmem:[%s13930_s30 + $0xb8] sm:$0xff] %v1485_v23  ;;  %v1487_v24 = vld [vmem:[%s13922_s29 + $0x180] sm:$0xff]  ;;  %v1489_v25 = vld [vmem:[%s13922_s29 + $0x190] sm:$0xff] }
  0x21   : > { %v1491_v26 = vld [vmem:[%s13922_s29 + $0x1a0] sm:$0xff]  ;;  %1488 = vst [vmem:[%s13930_s30 + $0xc0] sm:$0xff] %v1487_v24  ;;  %1490 = vst [vmem:[%s13930_s30 + $0xc8] sm:$0xff] %v1489_v25  ;;  %v1493_v27 = vld [vmem:[%s13922_s29 + $0x1b0] sm:$0xff] }
  0x22   : > { %1492 = vst [vmem:[%s13930_s30 + $0xd0] sm:$0xff] %v1491_v26  ;;  %v1495_v28 = vld [vmem:[%s13922_s29 + $0x1c0] sm:$0xff]  ;;  %v1497_v29 = vld [vmem:[%s13922_s29 + $0x1d0] sm:$0xff]  ;;  %1494 = vst [vmem:[%s13930_s30 + $0xd8] sm:$0xff] %v1493_v27 }
  0x23   : > { %1496 = vst [vmem:[%s13930_s30 + $0xe0] sm:$0xff] %v1495_v28  ;;  %1498 = vst [vmem:[%s13930_s30 + $0xe8] sm:$0xff] %v1497_v29  ;;  %v1499_v30 = vld [vmem:[%s13922_s29 + $0x1e0] sm:$0xff]  ;;  %v1501_v31 = vld [vmem:[%s13922_s29 + $0x1f0] sm:$0xff] }
  0x24   : > { %v1503_v32 = vld [vmem:[%s13922_s29 + $0x200] sm:$0xff]  ;;  %1500 = vst [vmem:[%s13930_s30 + $0xf0] sm:$0xff] %v1499_v30  ;;  %1502 = vst [vmem:[%s13930_s30 + $0xf8] sm:$0xff] %v1501_v31  ;;  %v1505_v33 = vld [vmem:[%s13922_s29 + $0x210] sm:$0xff] }
  0x25   : > { %1504 = vst [vmem:[%s13930_s30 + $0x100] sm:$0xff] %v1503_v32  ;;  %v1507_v34 = vld [vmem:[%s13922_s29 + $0x220] sm:$0xff]  ;;  %v1509_v35 = vld [vmem:[%s13922_s29 + $0x230] sm:$0xff]  ;;  %1506 = vst [vmem:[%s13930_s30 + $0x108] sm:$0xff] %v1505_v33 }
  0x26   : > { %1508 = vst [vmem:[%s13930_s30 + $0x110] sm:$0xff] %v1507_v34  ;;  %1510 = vst [vmem:[%s13930_s30 + $0x118] sm:$0xff] %v1509_v35  ;;  %v1511_v36 = vld [vmem:[%s13922_s29 + $0x240] sm:$0xff]  ;;  %v1513_v37 = vld [vmem:[%s13922_s29 + $0x250] sm:$0xff] }
  0x27   : > { %v1515_v38 = vld [vmem:[%s13922_s29 + $0x260] sm:$0xff]  ;;  %1512 = vst [vmem:[%s13930_s30 + $0x120] sm:$0xff] %v1511_v36  ;;  %1514 = vst [vmem:[%s13930_s30 + $0x128] sm:$0xff] %v1513_v37  ;;  %v1517_v39 = vld [vmem:[%s13922_s29 + $0x270] sm:$0xff] }
  0x28   : > { %1516 = vst [vmem:[%s13930_s30 + $0x130] sm:$0xff] %v1515_v38  ;;  %v1519_v40 = vld [vmem:[%s13922_s29 + $0x280] sm:$0xff]  ;;  %v1521_v41 = vld [vmem:[%s13922_s29 + $0x290] sm:$0xff]  ;;  %1518 = vst [vmem:[%s13930_s30 + $0x138] sm:$0xff] %v1517_v39 }
  0x29   : > { %1520 = vst [vmem:[%s13930_s30 + $0x140] sm:$0xff] %v1519_v40  ;;  %1522 = vst [vmem:[%s13930_s30 + $0x148] sm:$0xff] %v1521_v41  ;;  %v1523_v42 = vld [vmem:[%s13922_s29 + $0x2a0] sm:$0xff]  ;;  %v1525_v43 = vld [vmem:[%s13922_s29 + $0x2b0] sm:$0xff] }
  0x2a   : > { %v1527_v44 = vld [vmem:[%s13922_s29 + $0x2c0] sm:$0xff]  ;;  %1524 = vst [vmem:[%s13930_s30 + $0x150] sm:$0xff] %v1523_v42  ;;  %1526 = vst [vmem:[%s13930_s30 + $0x158] sm:$0xff] %v1525_v43  ;;  %v1529_v45 = vld [vmem:[%s13922_s29 + $0x2d0] sm:$0xff] }
  0x2b   : > { %1528 = vst [vmem:[%s13930_s30 + $0x160] sm:$0xff] %v1527_v44  ;;  %v1531_v46 = vld [vmem:[%s13922_s29 + $0x2e0] sm:$0xff]  ;;  %v1533_v47 = vld [vmem:[%s13922_s29 + $0x2f0] sm:$0xff]  ;;  %1530 = vst [vmem:[%s13930_s30 + $0x168] sm:$0xff] %v1529_v45 }
  0x2c   : > { %1532 = vst [vmem:[%s13930_s30 + $0x170] sm:$0xff] %v1531_v46  ;;  %1534 = vst [vmem:[%s13930_s30 + $0x178] sm:$0xff] %v1533_v47  ;;  %v1535_v48 = vld [vmem:[%s13922_s29 + $0x300] sm:$0xff]  ;;  %v1537_v49 = vld [vmem:[%s13922_s29 + $0x310] sm:$0xff] }
  0x2d   : > { %v1539_v50 = vld [vmem:[%s13922_s29 + $0x320] sm:$0xff]  ;;  %1536 = vst [vmem:[%s13930_s30 + $0x180] sm:$0xff] %v1535_v48  ;;  %1538 = vst [vmem:[%s13930_s30 + $0x188] sm:$0xff] %v1537_v49  ;;  %v1541_v51 = vld [vmem:[%s13922_s29 + $0x330] sm:$0xff] }
  0x2e   : > { %1540 = vst [vmem:[%s13930_s30 + $0x190] sm:$0xff] %v1539_v50  ;;  %v1543_v52 = vld [vmem:[%s13922_s29 + $0x340] sm:$0xff]  ;;  %v1545_v53 = vld [vmem:[%s13922_s29 + $0x350] sm:$0xff]  ;;  %1542 = vst [vmem:[%s13930_s30 + $0x198] sm:$0xff] %v1541_v51 }
  0x2f   : > { %1544 = vst [vmem:[%s13930_s30 + $0x1a0] sm:$0xff] %v1543_v52  ;;  %1546 = vst [vmem:[%s13930_s30 + $0x1a8] sm:$0xff] %v1545_v53  ;;  %v1547_v54 = vld [vmem:[%s13922_s29 + $0x360] sm:$0xff]  ;;  %v1549_v55 = vld [vmem:[%s13922_s29 + $0x370] sm:$0xff] }
  0x30   : > { %v1551_v56 = vld [vmem:[%s13922_s29 + $0x380] sm:$0xff]  ;;  %1548 = vst [vmem:[%s13930_s30 + $0x1b0] sm:$0xff] %v1547_v54  ;;  %1550 = vst [vmem:[%s13930_s30 + $0x1b8] sm:$0xff] %v1549_v55  ;;  %v1553_v57 = vld [vmem:[%s13922_s29 + $0x390] sm:$0xff] }
  0x31   : > { %1552 = vst [vmem:[%s13930_s30 + $0x1c0] sm:$0xff] %v1551_v56  ;;  %v1555_v58 = vld [vmem:[%s13922_s29 + $0x3a0] sm:$0xff]  ;;  %v1557_v59 = vld [vmem:[%s13922_s29 + $0x3b0] sm:$0xff]  ;;  %1554 = vst [vmem:[%s13930_s30 + $0x1c8] sm:$0xff] %v1553_v57 }
  0x32   : > { %1556 = vst [vmem:[%s13930_s30 + $0x1d0] sm:$0xff] %v1555_v58  ;;  %1558 = vst [vmem:[%s13930_s30 + $0x1d8] sm:$0xff] %v1557_v59  ;;  %v1559_v60 = vld [vmem:[%s13922_s29 + $0x3c0] sm:$0xff]  ;;  %v1561_v61 = vld [vmem:[%s13922_s29 + $0x3d0] sm:$0xff] }
  0x33   : > { %v1563_v62 = vld [vmem:[%s13922_s29 + $0x3e0] sm:$0xff]  ;;  %1560 = vst [vmem:[%s13930_s30 + $0x1e0] sm:$0xff] %v1559_v60  ;;  %1562 = vst [vmem:[%s13930_s30 + $0x1e8] sm:$0xff] %v1561_v61  ;;  %v1565_v63 = vld [vmem:[%s13922_s29 + $0x3f0] sm:$0xff] }
  0x34   : > { %1564 = vst [vmem:[%s13930_s30 + $0x1f0] sm:$0xff] %v1563_v62  ;;  %v1567_v0 = vld [vmem:[%s13922_s29 + $0x400] sm:$0xff]  ;;  %v1569_v1 = vld [vmem:[%s13922_s29 + $0x410] sm:$0xff]  ;;  %1566 = vst [vmem:[%s13930_s30 + $0x1f8] sm:$0xff] %v1565_v63 }
  0x35   : > { %1568 = vst [vmem:[%s13930_s30 + $0x200] sm:$0xff] %v1567_v0  ;;  %1570 = vst [vmem:[%s13930_s30 + $0x208] sm:$0xff] %v1569_v1  ;;  %v1571_v2 = vld [vmem:[%s13922_s29 + $0x420] sm:$0xff]  ;;  %v1573_v3 = vld [vmem:[%s13922_s29 + $0x430] sm:$0xff] }
  0x36   : > { %v1575_v4 = vld [vmem:[%s13922_s29 + $0x440] sm:$0xff]  ;;  %1572 = vst [vmem:[%s13930_s30 + $0x210] sm:$0xff] %v1571_v2  ;;  %1574 = vst [vmem:[%s13930_s30 + $0x218] sm:$0xff] %v1573_v3  ;;  %v1577_v5 = vld [vmem:[%s13922_s29 + $0x450] sm:$0xff] }
  0x37   : > { %1576 = vst [vmem:[%s13930_s30 + $0x220] sm:$0xff] %v1575_v4  ;;  %v1579_v6 = vld [vmem:[%s13922_s29 + $0x460] sm:$0xff]  ;;  %v1581_v7 = vld [vmem:[%s13922_s29 + $0x470] sm:$0xff]  ;;  %1578 = vst [vmem:[%s13930_s30 + $0x228] sm:$0xff] %v1577_v5 }
  0x38   : > { %1580 = vst [vmem:[%s13930_s30 + $0x230] sm:$0xff] %v1579_v6  ;;  %1582 = vst [vmem:[%s13930_s30 + $0x238] sm:$0xff] %v1581_v7  ;;  %v1583_v8 = vld [vmem:[%s13922_s29 + $0x480] sm:$0xff]  ;;  %v1585_v9 = vld [vmem:[%s13922_s29 + $0x490] sm:$0xff] }
  0x39   : > { %v1587_v10 = vld [vmem:[%s13922_s29 + $0x4a0] sm:$0xff]  ;;  %1584 = vst [vmem:[%s13930_s30 + $0x240] sm:$0xff] %v1583_v8  ;;  %1586 = vst [vmem:[%s13930_s30 + $0x248] sm:$0xff] %v1585_v9  ;;  %v1589_v11 = vld [vmem:[%s13922_s29 + $0x4b0] sm:$0xff] }
  0x3a   : > { %1588 = vst [vmem:[%s13930_s30 + $0x250] sm:$0xff] %v1587_v10  ;;  %v1591_v12 = vld [vmem:[%s13922_s29 + $0x4c0] sm:$0xff]  ;;  %v1593_v13 = vld [vmem:[%s13922_s29 + $0x4d0] sm:$0xff]  ;;  %1590 = vst [vmem:[%s13930_s30 + $0x258] sm:$0xff] %v1589_v11 }
  0x3b   : > { %1592 = vst [vmem:[%s13930_s30 + $0x260] sm:$0xff] %v1591_v12  ;;  %1594 = vst [vmem:[%s13930_s30 + $0x268] sm:$0xff] %v1593_v13  ;;  %v1595_v14 = vld [vmem:[%s13922_s29 + $0x4e0] sm:$0xff]  ;;  %v1597_v15 = vld [vmem:[%s13922_s29 + $0x4f0] sm:$0xff] }
  0x3c   : > { %v1599_v16 = vld [vmem:[%s13922_s29 + $0x500] sm:$0xff]  ;;  %1596 = vst [vmem:[%s13930_s30 + $0x270] sm:$0xff] %v1595_v14  ;;  %1598 = vst [vmem:[%s13930_s30 + $0x278] sm:$0xff] %v1597_v15  ;;  %v1601_v17 = vld [vmem:[%s13922_s29 + $0x510] sm:$0xff] }
  0x3d   : > { %1600 = vst [vmem:[%s13930_s30 + $0x280] sm:$0xff] %v1599_v16  ;;  %v1603_v18 = vld [vmem:[%s13922_s29 + $0x520] sm:$0xff]  ;;  %v1605_v19 = vld [vmem:[%s13922_s29 + $0x530] sm:$0xff]  ;;  %1602 = vst [vmem:[%s13930_s30 + $0x288] sm:$0xff] %v1601_v17 }
  0x3e   : > { %1604 = vst [vmem:[%s13930_s30 + $0x290] sm:$0xff] %v1603_v18  ;;  %1606 = vst [vmem:[%s13930_s30 + $0x298] sm:$0xff] %v1605_v19  ;;  %v1607_v20 = vld [vmem:[%s13922_s29 + $0x540] sm:$0xff]  ;;  %v1609_v21 = vld [vmem:[%s13922_s29 + $0x550] sm:$0xff] }
  0x3f   : > { %v1611_v22 = vld [vmem:[%s13922_s29 + $0x560] sm:$0xff]  ;;  %1608 = vst [vmem:[%s13930_s30 + $0x2a0] sm:$0xff] %v1607_v20  ;;  %1610 = vst [vmem:[%s13930_s30 + $0x2a8] sm:$0xff] %v1609_v21  ;;  %v1613_v23 = vld [vmem:[%s13922_s29 + $0x570] sm:$0xff] }
  0x40   : > { %1612 = vst [vmem:[%s13930_s30 + $0x2b0] sm:$0xff] %v1611_v22  ;;  %v1615_v24 = vld [vmem:[%s13922_s29 + $0x580] sm:$0xff]  ;;  %v1617_v25 = vld [vmem:[%s13922_s29 + $0x590] sm:$0xff]  ;;  %1614 = vst [vmem:[%s13930_s30 + $0x2b8] sm:$0xff] %v1613_v23 }
  0x41   : > { %1616 = vst [vmem:[%s13930_s30 + $0x2c0] sm:$0xff] %v1615_v24  ;;  %1618 = vst [vmem:[%s13930_s30 + $0x2c8] sm:$0xff] %v1617_v25  ;;  %v1619_v26 = vld [vmem:[%s13922_s29 + $0x5a0] sm:$0xff]  ;;  %v1621_v27 = vld [vmem:[%s13922_s29 + $0x5b0] sm:$0xff] }
  0x42   : > { %v1623_v28 = vld [vmem:[%s13922_s29 + $0x5c0] sm:$0xff]  ;;  %1620 = vst [vmem:[%s13930_s30 + $0x2d0] sm:$0xff] %v1619_v26  ;;  %1622 = vst [vmem:[%s13930_s30 + $0x2d8] sm:$0xff] %v1621_v27  ;;  %v1625_v29 = vld [vmem:[%s13922_s29 + $0x5d0] sm:$0xff] }
  0x43   : > { %1624 = vst [vmem:[%s13930_s30 + $0x2e0] sm:$0xff] %v1623_v28  ;;  %v1627_v30 = vld [vmem:[%s13922_s29 + $0x5e0] sm:$0xff]  ;;  %v1629_v31 = vld [vmem:[%s13922_s29 + $0x5f0] sm:$0xff]  ;;  %1626 = vst [vmem:[%s13930_s30 + $0x2e8] sm:$0xff] %v1625_v29 }
  0x44   : > { %1628 = vst [vmem:[%s13930_s30 + $0x2f0] sm:$0xff] %v1627_v30  ;;  %1630 = vst [vmem:[%s13930_s30 + $0x2f8] sm:$0xff] %v1629_v31  ;;  %v1631_v32 = vld [vmem:[%s13922_s29 + $0x600] sm:$0xff]  ;;  %v1633_v33 = vld [vmem:[%s13922_s29 + $0x610] sm:$0xff] }
  0x45   : > { %v1635_v34 = vld [vmem:[%s13922_s29 + $0x620] sm:$0xff]  ;;  %1632 = vst [vmem:[%s13930_s30 + $0x300] sm:$0xff] %v1631_v32  ;;  %1634 = vst [vmem:[%s13930_s30 + $0x308] sm:$0xff] %v1633_v33  ;;  %v1637_v35 = vld [vmem:[%s13922_s29 + $0x630] sm:$0xff] }
  0x46   : > { %1636 = vst [vmem:[%s13930_s30 + $0x310] sm:$0xff] %v1635_v34  ;;  %v1639_v36 = vld [vmem:[%s13922_s29 + $0x640] sm:$0xff]  ;;  %v1641_v37 = vld [vmem:[%s13922_s29 + $0x650] sm:$0xff]  ;;  %1638 = vst [vmem:[%s13930_s30 + $0x318] sm:$0xff] %v1637_v35 }
  0x47   : > { %1640 = vst [vmem:[%s13930_s30 + $0x320] sm:$0xff] %v1639_v36  ;;  %1642 = vst [vmem:[%s13930_s30 + $0x328] sm:$0xff] %v1641_v37  ;;  %v1643_v38 = vld [vmem:[%s13922_s29 + $0x660] sm:$0xff]  ;;  %v1645_v39 = vld [vmem:[%s13922_s29 + $0x670] sm:$0xff] }
  0x48   : > { %v1647_v40 = vld [vmem:[%s13922_s29 + $0x680] sm:$0xff]  ;;  %1644 = vst [vmem:[%s13930_s30 + $0x330] sm:$0xff] %v1643_v38  ;;  %1646 = vst [vmem:[%s13930_s30 + $0x338] sm:$0xff] %v1645_v39  ;;  %v1649_v41 = vld [vmem:[%s13922_s29 + $0x690] sm:$0xff] }
  0x49   : > { %1648 = vst [vmem:[%s13930_s30 + $0x340] sm:$0xff] %v1647_v40  ;;  %v1651_v42 = vld [vmem:[%s13922_s29 + $0x6a0] sm:$0xff]  ;;  %v1653_v43 = vld [vmem:[%s13922_s29 + $0x6b0] sm:$0xff]  ;;  %1650 = vst [vmem:[%s13930_s30 + $0x348] sm:$0xff] %v1649_v41 }
  0x4a   : > { %1652 = vst [vmem:[%s13930_s30 + $0x350] sm:$0xff] %v1651_v42  ;;  %1654 = vst [vmem:[%s13930_s30 + $0x358] sm:$0xff] %v1653_v43  ;;  %v1655_v44 = vld [vmem:[%s13922_s29 + $0x6c0] sm:$0xff]  ;;  %v1657_v45 = vld [vmem:[%s13922_s29 + $0x6d0] sm:$0xff] }
  0x4b   : > { %v1659_v46 = vld [vmem:[%s13922_s29 + $0x6e0] sm:$0xff]  ;;  %1656 = vst [vmem:[%s13930_s30 + $0x360] sm:$0xff] %v1655_v44  ;;  %1658 = vst [vmem:[%s13930_s30 + $0x368] sm:$0xff] %v1657_v45  ;;  %v1661_v47 = vld [vmem:[%s13922_s29 + $0x6f0] sm:$0xff] }
  0x4c   : > { %1660 = vst [vmem:[%s13930_s30 + $0x370] sm:$0xff] %v1659_v46  ;;  %v1663_v48 = vld [vmem:[%s13922_s29 + $0x700] sm:$0xff]  ;;  %v1665_v49 = vld [vmem:[%s13922_s29 + $0x710] sm:$0xff]  ;;  %1662 = vst [vmem:[%s13930_s30 + $0x378] sm:$0xff] %v1661_v47 }
  0x4d   : > { %1664 = vst [vmem:[%s13930_s30 + $0x380] sm:$0xff] %v1663_v48  ;;  %1666 = vst [vmem:[%s13930_s30 + $0x388] sm:$0xff] %v1665_v49  ;;  %v1667_v50 = vld [vmem:[%s13922_s29 + $0x720] sm:$0xff]  ;;  %v1669_v51 = vld [vmem:[%s13922_s29 + $0x730] sm:$0xff] }
  0x4e   : > { %v1671_v52 = vld [vmem:[%s13922_s29 + $0x740] sm:$0xff]  ;;  %1668 = vst [vmem:[%s13930_s30 + $0x390] sm:$0xff] %v1667_v50  ;;  %1670 = vst [vmem:[%s13930_s30 + $0x398] sm:$0xff] %v1669_v51  ;;  %v1673_v53 = vld [vmem:[%s13922_s29 + $0x750] sm:$0xff] }
  0x4f   : > { %1672 = vst [vmem:[%s13930_s30 + $0x3a0] sm:$0xff] %v1671_v52  ;;  %v1675_v54 = vld [vmem:[%s13922_s29 + $0x760] sm:$0xff]  ;;  %v1677_v55 = vld [vmem:[%s13922_s29 + $0x770] sm:$0xff]  ;;  %1674 = vst [vmem:[%s13930_s30 + $0x3a8] sm:$0xff] %v1673_v53 }
  0x50   : > { %1676 = vst [vmem:[%s13930_s30 + $0x3b0] sm:$0xff] %v1675_v54  ;;  %1678 = vst [vmem:[%s13930_s30 + $0x3b8] sm:$0xff] %v1677_v55  ;;  %v1679_v56 = vld [vmem:[%s13922_s29 + $0x780] sm:$0xff]  ;;  %v1681_v57 = vld [vmem:[%s13922_s29 + $0x790] sm:$0xff] }
  0x51   : > { %v1683_v58 = vld [vmem:[%s13922_s29 + $0x7a0] sm:$0xff]  ;;  %1680 = vst [vmem:[%s13930_s30 + $0x3c0] sm:$0xff] %v1679_v56  ;;  %1682 = vst [vmem:[%s13930_s30 + $0x3c8] sm:$0xff] %v1681_v57  ;;  %v1685_v59 = vld [vmem:[%s13922_s29 + $0x7b0] sm:$0xff] }
  0x52   : > { %1684 = vst [vmem:[%s13930_s30 + $0x3d0] sm:$0xff] %v1683_v58  ;;  %v1687_v60 = vld [vmem:[%s13922_s29 + $0x7c0] sm:$0xff]  ;;  %v1689_v61 = vld [vmem:[%s13922_s29 + $0x7d0] sm:$0xff]  ;;  %1686 = vst [vmem:[%s13930_s30 + $0x3d8] sm:$0xff] %v1685_v59 }
  0x53   : > { %1688 = vst [vmem:[%s13930_s30 + $0x3e0] sm:$0xff] %v1687_v60  ;;  %1690 = vst [vmem:[%s13930_s30 + $0x3e8] sm:$0xff] %v1689_v61  ;;  %v1691_v62 = vld [vmem:[%s13922_s29 + $0x7e0] sm:$0xff]  ;;  %v1693_v63 = vld [vmem:[%s13922_s29 + $0x7f0] sm:$0xff] }
  0x54   : > { %v1695_v0 = vld [vmem:[%s13922_s29 + $0x800] sm:$0xff]  ;;  %1692 = vst [vmem:[%s13930_s30 + $0x3f0] sm:$0xff] %v1691_v62  ;;  %1694 = vst [vmem:[%s13930_s30 + $0x3f8] sm:$0xff] %v1693_v63  ;;  %v1697_v1 = vld [vmem:[%s13922_s29 + $0x810] sm:$0xff] }
  0x55   : > { %1696 = vst [vmem:[%s13930_s30 + $0x400] sm:$0xff] %v1695_v0  ;;  %v1699_v2 = vld [vmem:[%s13922_s29 + $0x820] sm:$0xff]  ;;  %v1701_v3 = vld [vmem:[%s13922_s29 + $0x830] sm:$0xff]  ;;  %1698 = vst [vmem:[%s13930_s30 + $0x408] sm:$0xff] %v1697_v1 }
  0x56   : > { %1700 = vst [vmem:[%s13930_s30 + $0x410] sm:$0xff] %v1699_v2  ;;  %1702 = vst [vmem:[%s13930_s30 + $0x418] sm:$0xff] %v1701_v3  ;;  %v1703_v4 = vld [vmem:[%s13922_s29 + $0x840] sm:$0xff]  ;;  %v1705_v5 = vld [vmem:[%s13922_s29 + $0x850] sm:$0xff] }
  0x57   : > { %v1707_v6 = vld [vmem:[%s13922_s29 + $0x860] sm:$0xff]  ;;  %1704 = vst [vmem:[%s13930_s30 + $0x420] sm:$0xff] %v1703_v4  ;;  %1706 = vst [vmem:[%s13930_s30 + $0x428] sm:$0xff] %v1705_v5  ;;  %v1709_v7 = vld [vmem:[%s13922_s29 + $0x870] sm:$0xff] }
  0x58   : > { %1708 = vst [vmem:[%s13930_s30 + $0x430] sm:$0xff] %v1707_v6  ;;  %v1711_v8 = vld [vmem:[%s13922_s29 + $0x880] sm:$0xff]  ;;  %v1713_v9 = vld [vmem:[%s13922_s29 + $0x890] sm:$0xff]  ;;  %1710 = vst [vmem:[%s13930_s30 + $0x438] sm:$0xff] %v1709_v7 }
  0x59   : > { %1712 = vst [vmem:[%s13930_s30 + $0x440] sm:$0xff] %v1711_v8  ;;  %1714 = vst [vmem:[%s13930_s30 + $0x448] sm:$0xff] %v1713_v9  ;;  %v1715_v10 = vld [vmem:[%s13922_s29 + $0x8a0] sm:$0xff]  ;;  %v1717_v11 = vld [vmem:[%s13922_s29 + $0x8b0] sm:$0xff] }
  0x5a   : > { %v1719_v12 = vld [vmem:[%s13922_s29 + $0x8c0] sm:$0xff]  ;;  %1716 = vst [vmem:[%s13930_s30 + $0x450] sm:$0xff] %v1715_v10  ;;  %1718 = vst [vmem:[%s13930_s30 + $0x458] sm:$0xff] %v1717_v11  ;;  %v1721_v13 = vld [vmem:[%s13922_s29 + $0x8d0] sm:$0xff] }
  0x5b   : > { %1720 = vst [vmem:[%s13930_s30 + $0x460] sm:$0xff] %v1719_v12  ;;  %v1723_v14 = vld [vmem:[%s13922_s29 + $0x8e0] sm:$0xff]  ;;  %v1725_v15 = vld [vmem:[%s13922_s29 + $0x8f0] sm:$0xff]  ;;  %1722 = vst [vmem:[%s13930_s30 + $0x468] sm:$0xff] %v1721_v13 }
  0x5c   : > { %1724 = vst [vmem:[%s13930_s30 + $0x470] sm:$0xff] %v1723_v14  ;;  %1726 = vst [vmem:[%s13930_s30 + $0x478] sm:$0xff] %v1725_v15  ;;  %v1727_v16 = vld [vmem:[%s13922_s29 + $0x900] sm:$0xff]  ;;  %v1729_v17 = vld [vmem:[%s13922_s29 + $0x910] sm:$0xff] }
  0x5d   : > { %v1731_v18 = vld [vmem:[%s13922_s29 + $0x920] sm:$0xff]  ;;  %1728 = vst [vmem:[%s13930_s30 + $0x480] sm:$0xff] %v1727_v16  ;;  %1730 = vst [vmem:[%s13930_s30 + $0x488] sm:$0xff] %v1729_v17  ;;  %v1733_v19 = vld [vmem:[%s13922_s29 + $0x930] sm:$0xff] }
  0x5e   : > { %1732 = vst [vmem:[%s13930_s30 + $0x490] sm:$0xff] %v1731_v18  ;;  %v1735_v20 = vld [vmem:[%s13922_s29 + $0x940] sm:$0xff]  ;;  %v1737_v21 = vld [vmem:[%s13922_s29 + $0x950] sm:$0xff]  ;;  %1734 = vst [vmem:[%s13930_s30 + $0x498] sm:$0xff] %v1733_v19 }
  0x5f   : > { %1736 = vst [vmem:[%s13930_s30 + $0x4a0] sm:$0xff] %v1735_v20  ;;  %1738 = vst [vmem:[%s13930_s30 + $0x4a8] sm:$0xff] %v1737_v21  ;;  %v1739_v22 = vld [vmem:[%s13922_s29 + $0x960] sm:$0xff]  ;;  %v1741_v23 = vld [vmem:[%s13922_s29 + $0x970] sm:$0xff] }
  0x60   : > { %v1743_v24 = vld [vmem:[%s13922_s29 + $0x980] sm:$0xff]  ;;  %1740 = vst [vmem:[%s13930_s30 + $0x4b0] sm:$0xff] %v1739_v22  ;;  %1742 = vst [vmem:[%s13930_s30 + $0x4b8] sm:$0xff] %v1741_v23  ;;  %v1745_v25 = vld [vmem:[%s13922_s29 + $0x990] sm:$0xff] }
  0x61   : > { %1744 = vst [vmem:[%s13930_s30 + $0x4c0] sm:$0xff] %v1743_v24  ;;  %v1747_v26 = vld [vmem:[%s13922_s29 + $0x9a0] sm:$0xff]  ;;  %v1749_v27 = vld [vmem:[%s13922_s29 + $0x9b0] sm:$0xff]  ;;  %1746 = vst [vmem:[%s13930_s30 + $0x4c8] sm:$0xff] %v1745_v25 }
  0x62   : > { %1748 = vst [vmem:[%s13930_s30 + $0x4d0] sm:$0xff] %v1747_v26  ;;  %1750 = vst [vmem:[%s13930_s30 + $0x4d8] sm:$0xff] %v1749_v27  ;;  %v1751_v28 = vld [vmem:[%s13922_s29 + $0x9c0] sm:$0xff]  ;;  %v1753_v29 = vld [vmem:[%s13922_s29 + $0x9d0] sm:$0xff] }
  0x63   : > { %v1755_v30 = vld [vmem:[%s13922_s29 + $0x9e0] sm:$0xff]  ;;  %1752 = vst [vmem:[%s13930_s30 + $0x4e0] sm:$0xff] %v1751_v28  ;;  %1754 = vst [vmem:[%s13930_s30 + $0x4e8] sm:$0xff] %v1753_v29  ;;  %v1757_v31 = vld [vmem:[%s13922_s29 + $0x9f0] sm:$0xff] }
  0x64   : > { %1756 = vst [vmem:[%s13930_s30 + $0x4f0] sm:$0xff] %v1755_v30  ;;  %v1759_v32 = vld [vmem:[%s13922_s29 + $0xa00] sm:$0xff]  ;;  %v1761_v33 = vld [vmem:[%s13922_s29 + $0xa10] sm:$0xff]  ;;  %1758 = vst [vmem:[%s13930_s30 + $0x4f8] sm:$0xff] %v1757_v31 }
  0x65   : > { %1760 = vst [vmem:[%s13930_s30 + $0x500] sm:$0xff] %v1759_v32  ;;  %1762 = vst [vmem:[%s13930_s30 + $0x508] sm:$0xff] %v1761_v33  ;;  %v1763_v34 = vld [vmem:[%s13922_s29 + $0xa20] sm:$0xff]  ;;  %v1765_v35 = vld [vmem:[%s13922_s29 + $0xa30] sm:$0xff] }
  0x66   : > { %v1767_v36 = vld [vmem:[%s13922_s29 + $0xa40] sm:$0xff]  ;;  %1764 = vst [vmem:[%s13930_s30 + $0x510] sm:$0xff] %v1763_v34  ;;  %1766 = vst [vmem:[%s13930_s30 + $0x518] sm:$0xff] %v1765_v35  ;;  %v1769_v37 = vld [vmem:[%s13922_s29 + $0xa50] sm:$0xff] }
  0x67   : > { %1768 = vst [vmem:[%s13930_s30 + $0x520] sm:$0xff] %v1767_v36  ;;  %v1771_v38 = vld [vmem:[%s13922_s29 + $0xa60] sm:$0xff]  ;;  %v1773_v39 = vld [vmem:[%s13922_s29 + $0xa70] sm:$0xff]  ;;  %1770 = vst [vmem:[%s13930_s30 + $0x528] sm:$0xff] %v1769_v37 }
  0x68   : > { %1772 = vst [vmem:[%s13930_s30 + $0x530] sm:$0xff] %v1771_v38  ;;  %1774 = vst [vmem:[%s13930_s30 + $0x538] sm:$0xff] %v1773_v39  ;;  %v1775_v40 = vld [vmem:[%s13922_s29 + $0xa80] sm:$0xff]  ;;  %v1777_v41 = vld [vmem:[%s13922_s29 + $0xa90] sm:$0xff] }
  0x69   : > { %v1779_v42 = vld [vmem:[%s13922_s29 + $0xaa0] sm:$0xff]  ;;  %1776 = vst [vmem:[%s13930_s30 + $0x540] sm:$0xff] %v1775_v40  ;;  %1778 = vst [vmem:[%s13930_s30 + $0x548] sm:$0xff] %v1777_v41  ;;  %v1781_v43 = vld [vmem:[%s13922_s29 + $0xab0] sm:$0xff] }
  0x6a   : > { %1780 = vst [vmem:[%s13930_s30 + $0x550] sm:$0xff] %v1779_v42  ;;  %v1783_v44 = vld [vmem:[%s13922_s29 + $0xac0] sm:$0xff]  ;;  %v1785_v45 = vld [vmem:[%s13922_s29 + $0xad0] sm:$0xff]  ;;  %1782 = vst [vmem:[%s13930_s30 + $0x558] sm:$0xff] %v1781_v43 }
  0x6b   : > { %1784 = vst [vmem:[%s13930_s30 + $0x560] sm:$0xff] %v1783_v44  ;;  %1786 = vst [vmem:[%s13930_s30 + $0x568] sm:$0xff] %v1785_v45  ;;  %v1787_v46 = vld [vmem:[%s13922_s29 + $0xae0] sm:$0xff]  ;;  %v1789_v47 = vld [vmem:[%s13922_s29 + $0xaf0] sm:$0xff] }
  0x6c   : > { %v1791_v48 = vld [vmem:[%s13922_s29 + $0xb00] sm:$0xff]  ;;  %1788 = vst [vmem:[%s13930_s30 + $0x570] sm:$0xff] %v1787_v46  ;;  %1790 = vst [vmem:[%s13930_s30 + $0x578] sm:$0xff] %v1789_v47  ;;  %v1793_v49 = vld [vmem:[%s13922_s29 + $0xb10] sm:$0xff] }
  0x6d   : > { %1792 = vst [vmem:[%s13930_s30 + $0x580] sm:$0xff] %v1791_v48  ;;  %v1795_v50 = vld [vmem:[%s13922_s29 + $0xb20] sm:$0xff]  ;;  %v1797_v51 = vld [vmem:[%s13922_s29 + $0xb30] sm:$0xff]  ;;  %1794 = vst [vmem:[%s13930_s30 + $0x588] sm:$0xff] %v1793_v49 }
  0x6e   : > { %1796 = vst [vmem:[%s13930_s30 + $0x590] sm:$0xff] %v1795_v50  ;;  %1798 = vst [vmem:[%s13930_s30 + $0x598] sm:$0xff] %v1797_v51  ;;  %v1799_v52 = vld [vmem:[%s13922_s29 + $0xb40] sm:$0xff]  ;;  %v1801_v53 = vld [vmem:[%s13922_s29 + $0xb50] sm:$0xff] }
  0x6f   : > { %v1803_v54 = vld [vmem:[%s13922_s29 + $0xb60] sm:$0xff]  ;;  %1800 = vst [vmem:[%s13930_s30 + $0x5a0] sm:$0xff] %v1799_v52  ;;  %1802 = vst [vmem:[%s13930_s30 + $0x5a8] sm:$0xff] %v1801_v53  ;;  %v1805_v55 = vld [vmem:[%s13922_s29 + $0xb70] sm:$0xff] }
  0x70   : > { %1804 = vst [vmem:[%s13930_s30 + $0x5b0] sm:$0xff] %v1803_v54  ;;  %v1807_v56 = vld [vmem:[%s13922_s29 + $0xb80] sm:$0xff]  ;;  %v1809_v57 = vld [vmem:[%s13922_s29 + $0xb90] sm:$0xff]  ;;  %1806 = vst [vmem:[%s13930_s30 + $0x5b8] sm:$0xff] %v1805_v55 }
  0x71   : > { %1808 = vst [vmem:[%s13930_s30 + $0x5c0] sm:$0xff] %v1807_v56  ;;  %1810 = vst [vmem:[%s13930_s30 + $0x5c8] sm:$0xff] %v1809_v57  ;;  %v1811_v58 = vld [vmem:[%s13922_s29 + $0xba0] sm:$0xff]  ;;  %v1813_v59 = vld [vmem:[%s13922_s29 + $0xbb0] sm:$0xff] }
  0x72   : > { %v1815_v60 = vld [vmem:[%s13922_s29 + $0xbc0] sm:$0xff]  ;;  %1812 = vst [vmem:[%s13930_s30 + $0x5d0] sm:$0xff] %v1811_v58  ;;  %1814 = vst [vmem:[%s13930_s30 + $0x5d8] sm:$0xff] %v1813_v59  ;;  %v1817_v61 = vld [vmem:[%s13922_s29 + $0xbd0] sm:$0xff] }
  0x73   : > { %1816 = vst [vmem:[%s13930_s30 + $0x5e0] sm:$0xff] %v1815_v60  ;;  %v1819_v62 = vld [vmem:[%s13922_s29 + $0xbe0] sm:$0xff]  ;;  %v1821_v63 = vld [vmem:[%s13922_s29 + $0xbf0] sm:$0xff]  ;;  %1818 = vst [vmem:[%s13930_s30 + $0x5e8] sm:$0xff] %v1817_v61 }
  0x74   : > { %1820 = vst [vmem:[%s13930_s30 + $0x5f0] sm:$0xff] %v1819_v62  ;;  %1822 = vst [vmem:[%s13930_s30 + $0x5f8] sm:$0xff] %v1821_v63  ;;  %v1823_v0 = vld [vmem:[%s13922_s29 + $0xc00] sm:$0xff]  ;;  %v1825_v1 = vld [vmem:[%s13922_s29 + $0xc10] sm:$0xff] }
  0x75   : > { %v1827_v2 = vld [vmem:[%s13922_s29 + $0xc20] sm:$0xff]  ;;  %1824 = vst [vmem:[%s13930_s30 + $0x600] sm:$0xff] %v1823_v0  ;;  %1826 = vst [vmem:[%s13930_s30 + $0x608] sm:$0xff] %v1825_v1  ;;  %v1829_v3 = vld [vmem:[%s13922_s29 + $0xc30] sm:$0xff] }
  0x76   : > { %1828 = vst [vmem:[%s13930_s30 + $0x610] sm:$0xff] %v1827_v2  ;;  %v1831_v4 = vld [vmem:[%s13922_s29 + $0xc40] sm:$0xff]  ;;  %v1833_v5 = vld [vmem:[%s13922_s29 + $0xc50] sm:$0xff]  ;;  %1830 = vst [vmem:[%s13930_s30 + $0x618] sm:$0xff] %v1829_v3 }
  0x77   : > { %1832 = vst [vmem:[%s13930_s30 + $0x620] sm:$0xff] %v1831_v4  ;;  %1834 = vst [vmem:[%s13930_s30 + $0x628] sm:$0xff] %v1833_v5  ;;  %v1835_v6 = vld [vmem:[%s13922_s29 + $0xc60] sm:$0xff]  ;;  %v1837_v7 = vld [vmem:[%s13922_s29 + $0xc70] sm:$0xff] }
  0x78   : > { %v1839_v8 = vld [vmem:[%s13922_s29 + $0xc80] sm:$0xff]  ;;  %1836 = vst [vmem:[%s13930_s30 + $0x630] sm:$0xff] %v1835_v6  ;;  %1838 = vst [vmem:[%s13930_s30 + $0x638] sm:$0xff] %v1837_v7  ;;  %v1841_v9 = vld [vmem:[%s13922_s29 + $0xc90] sm:$0xff] }
  0x79   : > { %1840 = vst [vmem:[%s13930_s30 + $0x640] sm:$0xff] %v1839_v8  ;;  %v1843_v10 = vld [vmem:[%s13922_s29 + $0xca0] sm:$0xff]  ;;  %v1845_v11 = vld [vmem:[%s13922_s29 + $0xcb0] sm:$0xff]  ;;  %1842 = vst [vmem:[%s13930_s30 + $0x648] sm:$0xff] %v1841_v9 }
  0x7a   : > { %1844 = vst [vmem:[%s13930_s30 + $0x650] sm:$0xff] %v1843_v10  ;;  %1846 = vst [vmem:[%s13930_s30 + $0x658] sm:$0xff] %v1845_v11  ;;  %v1847_v12 = vld [vmem:[%s13922_s29 + $0xcc0] sm:$0xff]  ;;  %v1849_v13 = vld [vmem:[%s13922_s29 + $0xcd0] sm:$0xff] }
  0x7b   : > { %v1851_v14 = vld [vmem:[%s13922_s29 + $0xce0] sm:$0xff]  ;;  %1848 = vst [vmem:[%s13930_s30 + $0x660] sm:$0xff] %v1847_v12  ;;  %1850 = vst [vmem:[%s13930_s30 + $0x668] sm:$0xff] %v1849_v13  ;;  %v1853_v15 = vld [vmem:[%s13922_s29 + $0xcf0] sm:$0xff] }
  0x7c   : > { %1852 = vst [vmem:[%s13930_s30 + $0x670] sm:$0xff] %v1851_v14  ;;  %v1855_v16 = vld [vmem:[%s13922_s29 + $0xd00] sm:$0xff]  ;;  %v1857_v17 = vld [vmem:[%s13922_s29 + $0xd10] sm:$0xff]  ;;  %1854 = vst [vmem:[%s13930_s30 + $0x678] sm:$0xff] %v1853_v15 }
  0x7d   : > { %1856 = vst [vmem:[%s13930_s30 + $0x680] sm:$0xff] %v1855_v16  ;;  %1858 = vst [vmem:[%s13930_s30 + $0x688] sm:$0xff] %v1857_v17  ;;  %v1859_v18 = vld [vmem:[%s13922_s29 + $0xd20] sm:$0xff]  ;;  %v1861_v19 = vld [vmem:[%s13922_s29 + $0xd30] sm:$0xff] }
  0x7e   : > { %v1863_v20 = vld [vmem:[%s13922_s29 + $0xd40] sm:$0xff]  ;;  %1860 = vst [vmem:[%s13930_s30 + $0x690] sm:$0xff] %v1859_v18  ;;  %1862 = vst [vmem:[%s13930_s30 + $0x698] sm:$0xff] %v1861_v19  ;;  %v1865_v21 = vld [vmem:[%s13922_s29 + $0xd50] sm:$0xff] }
  0x7f   : > { %1864 = vst [vmem:[%s13930_s30 + $0x6a0] sm:$0xff] %v1863_v20  ;;  %v1867_v22 = vld [vmem:[%s13922_s29 + $0xd60] sm:$0xff]  ;;  %v1869_v23 = vld [vmem:[%s13922_s29 + $0xd70] sm:$0xff]  ;;  %1866 = vst [vmem:[%s13930_s30 + $0x6a8] sm:$0xff] %v1865_v21 }
  0x80   : > { %1868 = vst [vmem:[%s13930_s30 + $0x6b0] sm:$0xff] %v1867_v22  ;;  %1870 = vst [vmem:[%s13930_s30 + $0x6b8] sm:$0xff] %v1869_v23  ;;  %v1871_v24 = vld [vmem:[%s13922_s29 + $0xd80] sm:$0xff]  ;;  %v1873_v25 = vld [vmem:[%s13922_s29 + $0xd90] sm:$0xff] }
  0x81   : > { %v1875_v26 = vld [vmem:[%s13922_s29 + $0xda0] sm:$0xff]  ;;  %1872 = vst [vmem:[%s13930_s30 + $0x6c0] sm:$0xff] %v1871_v24  ;;  %1874 = vst [vmem:[%s13930_s30 + $0x6c8] sm:$0xff] %v1873_v25  ;;  %v1877_v27 = vld [vmem:[%s13922_s29 + $0xdb0] sm:$0xff] }
  0x82   : > { %1876 = vst [vmem:[%s13930_s30 + $0x6d0] sm:$0xff] %v1875_v26  ;;  %v1879_v28 = vld [vmem:[%s13922_s29 + $0xdc0] sm:$0xff]  ;;  %v1881_v29 = vld [vmem:[%s13922_s29 + $0xdd0] sm:$0xff]  ;;  %1878 = vst [vmem:[%s13930_s30 + $0x6d8] sm:$0xff] %v1877_v27 }
  0x83   : > { %1880 = vst [vmem:[%s13930_s30 + $0x6e0] sm:$0xff] %v1879_v28  ;;  %1882 = vst [vmem:[%s13930_s30 + $0x6e8] sm:$0xff] %v1881_v29  ;;  %v1883_v30 = vld [vmem:[%s13922_s29 + $0xde0] sm:$0xff]  ;;  %v1885_v31 = vld [vmem:[%s13922_s29 + $0xdf0] sm:$0xff] }
  0x84   : > { %v1887_v32 = vld [vmem:[%s13922_s29 + $0xe00] sm:$0xff]  ;;  %1884 = vst [vmem:[%s13930_s30 + $0x6f0] sm:$0xff] %v1883_v30  ;;  %1886 = vst [vmem:[%s13930_s30 + $0x6f8] sm:$0xff] %v1885_v31  ;;  %v1889_v33 = vld [vmem:[%s13922_s29 + $0xe10] sm:$0xff] }
  0x85   : > { %1888 = vst [vmem:[%s13930_s30 + $0x700] sm:$0xff] %v1887_v32  ;;  %v1891_v34 = vld [vmem:[%s13922_s29 + $0xe20] sm:$0xff]  ;;  %v1893_v35 = vld [vmem:[%s13922_s29 + $0xe30] sm:$0xff]  ;;  %1890 = vst [vmem:[%s13930_s30 + $0x708] sm:$0xff] %v1889_v33 }
  0x86   : > { %1892 = vst [vmem:[%s13930_s30 + $0x710] sm:$0xff] %v1891_v34  ;;  %1894 = vst [vmem:[%s13930_s30 + $0x718] sm:$0xff] %v1893_v35  ;;  %v1895_v36 = vld [vmem:[%s13922_s29 + $0xe40] sm:$0xff]  ;;  %v1897_v37 = vld [vmem:[%s13922_s29 + $0xe50] sm:$0xff] }
  0x87   : > { %v1899_v38 = vld [vmem:[%s13922_s29 + $0xe60] sm:$0xff]  ;;  %1896 = vst [vmem:[%s13930_s30 + $0x720] sm:$0xff] %v1895_v36  ;;  %1898 = vst [vmem:[%s13930_s30 + $0x728] sm:$0xff] %v1897_v37  ;;  %v1901_v39 = vld [vmem:[%s13922_s29 + $0xe70] sm:$0xff] }
  0x88   : > { %1900 = vst [vmem:[%s13930_s30 + $0x730] sm:$0xff] %v1899_v38  ;;  %v1903_v40 = vld [vmem:[%s13922_s29 + $0xe80] sm:$0xff]  ;;  %v1905_v41 = vld [vmem:[%s13922_s29 + $0xe90] sm:$0xff]  ;;  %1902 = vst [vmem:[%s13930_s30 + $0x738] sm:$0xff] %v1901_v39 }
  0x89   : > { %1904 = vst [vmem:[%s13930_s30 + $0x740] sm:$0xff] %v1903_v40  ;;  %1906 = vst [vmem:[%s13930_s30 + $0x748] sm:$0xff] %v1905_v41  ;;  %v1907_v42 = vld [vmem:[%s13922_s29 + $0xea0] sm:$0xff]  ;;  %v1909_v43 = vld [vmem:[%s13922_s29 + $0xeb0] sm:$0xff] }
  0x8a   : > { %v1911_v44 = vld [vmem:[%s13922_s29 + $0xec0] sm:$0xff]  ;;  %1908 = vst [vmem:[%s13930_s30 + $0x750] sm:$0xff] %v1907_v42  ;;  %1910 = vst [vmem:[%s13930_s30 + $0x758] sm:$0xff] %v1909_v43  ;;  %v1913_v45 = vld [vmem:[%s13922_s29 + $0xed0] sm:$0xff] }
  0x8b   : > { %1912 = vst [vmem:[%s13930_s30 + $0x760] sm:$0xff] %v1911_v44  ;;  %v1915_v46 = vld [vmem:[%s13922_s29 + $0xee0] sm:$0xff]  ;;  %v1917_v47 = vld [vmem:[%s13922_s29 + $0xef0] sm:$0xff]  ;;  %1914 = vst [vmem:[%s13930_s30 + $0x768] sm:$0xff] %v1913_v45 }
  0x8c   : > { %1916 = vst [vmem:[%s13930_s30 + $0x770] sm:$0xff] %v1915_v46  ;;  %1918 = vst [vmem:[%s13930_s30 + $0x778] sm:$0xff] %v1917_v47  ;;  %v1919_v48 = vld [vmem:[%s13922_s29 + $0xf00] sm:$0xff]  ;;  %v1921_v49 = vld [vmem:[%s13922_s29 + $0xf10] sm:$0xff] }
  0x8d   : > { %v1923_v50 = vld [vmem:[%s13922_s29 + $0xf20] sm:$0xff]  ;;  %1920 = vst [vmem:[%s13930_s30 + $0x780] sm:$0xff] %v1919_v48  ;;  %1922 = vst [vmem:[%s13930_s30 + $0x788] sm:$0xff] %v1921_v49  ;;  %v1925_v51 = vld [vmem:[%s13922_s29 + $0xf30] sm:$0xff] }
  0x8e   : > { %1924 = vst [vmem:[%s13930_s30 + $0x790] sm:$0xff] %v1923_v50  ;;  %v1927_v52 = vld [vmem:[%s13922_s29 + $0xf40] sm:$0xff]  ;;  %v1929_v53 = vld [vmem:[%s13922_s29 + $0xf50] sm:$0xff]  ;;  %1926 = vst [vmem:[%s13930_s30 + $0x798] sm:$0xff] %v1925_v51 }
  0x8f   : > { %1928 = vst [vmem:[%s13930_s30 + $0x7a0] sm:$0xff] %v1927_v52  ;;  %1930 = vst [vmem:[%s13930_s30 + $0x7a8] sm:$0xff] %v1929_v53  ;;  %v1931_v54 = vld [vmem:[%s13922_s29 + $0xf60] sm:$0xff]  ;;  %v1933_v55 = vld [vmem:[%s13922_s29 + $0xf70] sm:$0xff] }
  0x90   : > { %v1935_v56 = vld [vmem:[%s13922_s29 + $0xf80] sm:$0xff]  ;;  %1932 = vst [vmem:[%s13930_s30 + $0x7b0] sm:$0xff] %v1931_v54  ;;  %1934 = vst [vmem:[%s13930_s30 + $0x7b8] sm:$0xff] %v1933_v55  ;;  %v1937_v57 = vld [vmem:[%s13922_s29 + $0xf90] sm:$0xff] }
  0x91   : > { %1936 = vst [vmem:[%s13930_s30 + $0x7c0] sm:$0xff] %v1935_v56  ;;  %v1939_v58 = vld [vmem:[%s13922_s29 + $0xfa0] sm:$0xff]  ;;  %v1941_v59 = vld [vmem:[%s13922_s29 + $0xfb0] sm:$0xff]  ;;  %1938 = vst [vmem:[%s13930_s30 + $0x7c8] sm:$0xff] %v1937_v57 }
  0x92   : > { %1940 = vst [vmem:[%s13930_s30 + $0x7d0] sm:$0xff] %v1939_v58  ;;  %1942 = vst [vmem:[%s13930_s30 + $0x7d8] sm:$0xff] %v1941_v59  ;;  %v1943_v60 = vld [vmem:[%s13922_s29 + $0xfc0] sm:$0xff]  ;;  %v1945_v61 = vld [vmem:[%s13922_s29 + $0xfd0] sm:$0xff] }
  0x93   : > { %v1947_v62 = vld [vmem:[%s13922_s29 + $0xfe0] sm:$0xff]  ;;  %1944 = vst [vmem:[%s13930_s30 + $0x7e0] sm:$0xff] %v1943_v60  ;;  %1946 = vst [vmem:[%s13930_s30 + $0x7e8] sm:$0xff] %v1945_v61  ;;  %v1949_v63 = vld [vmem:[%s13922_s29 + $0xff0] sm:$0xff] }
  0x94   : > { %1948 = vst [vmem:[%s13930_s30 + $0x7f0] sm:$0xff] %v1947_v62  ;;  %v1951_v0 = vld [vmem:[%s13922_s29 + $0x1000] sm:$0xff]  ;;  %v1953_v1 = vld [vmem:[%s13922_s29 + $0x1010] sm:$0xff]  ;;  %1950 = vst [vmem:[%s13930_s30 + $0x7f8] sm:$0xff] %v1949_v63 }
  0x95   : > { %1952 = vst [vmem:[%s13930_s30 + $0x800] sm:$0xff] %v1951_v0  ;;  %1954 = vst [vmem:[%s13930_s30 + $0x808] sm:$0xff] %v1953_v1  ;;  %v1955_v2 = vld [vmem:[%s13922_s29 + $0x1020] sm:$0xff]  ;;  %v1957_v3 = vld [vmem:[%s13922_s29 + $0x1030] sm:$0xff] }
  0x96   : > { %v1959_v4 = vld [vmem:[%s13922_s29 + $0x1040] sm:$0xff]  ;;  %1956 = vst [vmem:[%s13930_s30 + $0x810] sm:$0xff] %v1955_v2  ;;  %1958 = vst [vmem:[%s13930_s30 + $0x818] sm:$0xff] %v1957_v3  ;;  %v1961_v5 = vld [vmem:[%s13922_s29 + $0x1050] sm:$0xff] }
  0x97   : > { %1960 = vst [vmem:[%s13930_s30 + $0x820] sm:$0xff] %v1959_v4  ;;  %v1963_v6 = vld [vmem:[%s13922_s29 + $0x1060] sm:$0xff]  ;;  %v1965_v7 = vld [vmem:[%s13922_s29 + $0x1070] sm:$0xff]  ;;  %1962 = vst [vmem:[%s13930_s30 + $0x828] sm:$0xff] %v1961_v5 }
  0x98   : > { %1964 = vst [vmem:[%s13930_s30 + $0x830] sm:$0xff] %v1963_v6  ;;  %1966 = vst [vmem:[%s13930_s30 + $0x838] sm:$0xff] %v1965_v7  ;;  %v1967_v8 = vld [vmem:[%s13922_s29 + $0x1080] sm:$0xff]  ;;  %v1969_v9 = vld [vmem:[%s13922_s29 + $0x1090] sm:$0xff] }
  0x99   : > { %v1971_v10 = vld [vmem:[%s13922_s29 + $0x10a0] sm:$0xff]  ;;  %1968 = vst [vmem:[%s13930_s30 + $0x840] sm:$0xff] %v1967_v8  ;;  %1970 = vst [vmem:[%s13930_s30 + $0x848] sm:$0xff] %v1969_v9  ;;  %v1973_v11 = vld [vmem:[%s13922_s29 + $0x10b0] sm:$0xff] }
  0x9a   : > { %1972 = vst [vmem:[%s13930_s30 + $0x850] sm:$0xff] %v1971_v10  ;;  %v1975_v12 = vld [vmem:[%s13922_s29 + $0x10c0] sm:$0xff]  ;;  %v1977_v13 = vld [vmem:[%s13922_s29 + $0x10d0] sm:$0xff]  ;;  %1974 = vst [vmem:[%s13930_s30 + $0x858] sm:$0xff] %v1973_v11 }
  0x9b   : > { %1976 = vst [vmem:[%s13930_s30 + $0x860] sm:$0xff] %v1975_v12  ;;  %1978 = vst [vmem:[%s13930_s30 + $0x868] sm:$0xff] %v1977_v13  ;;  %v1979_v14 = vld [vmem:[%s13922_s29 + $0x10e0] sm:$0xff]  ;;  %v1981_v15 = vld [vmem:[%s13922_s29 + $0x10f0] sm:$0xff] }
  0x9c   : > { %v1983_v16 = vld [vmem:[%s13922_s29 + $0x1100] sm:$0xff]  ;;  %1980 = vst [vmem:[%s13930_s30 + $0x870] sm:$0xff] %v1979_v14  ;;  %1982 = vst [vmem:[%s13930_s30 + $0x878] sm:$0xff] %v1981_v15  ;;  %v1985_v17 = vld [vmem:[%s13922_s29 + $0x1110] sm:$0xff] }
  0x9d   : > { %1984 = vst [vmem:[%s13930_s30 + $0x880] sm:$0xff] %v1983_v16  ;;  %v1987_v18 = vld [vmem:[%s13922_s29 + $0x1120] sm:$0xff]  ;;  %v1989_v19 = vld [vmem:[%s13922_s29 + $0x1130] sm:$0xff]  ;;  %1986 = vst [vmem:[%s13930_s30 + $0x888] sm:$0xff] %v1985_v17 }
  0x9e   : > { %1988 = vst [vmem:[%s13930_s30 + $0x890] sm:$0xff] %v1987_v18  ;;  %1990 = vst [vmem:[%s13930_s30 + $0x898] sm:$0xff] %v1989_v19  ;;  %v1991_v20 = vld [vmem:[%s13922_s29 + $0x1140] sm:$0xff]  ;;  %v1993_v21 = vld [vmem:[%s13922_s29 + $0x1150] sm:$0xff] }
  0x9f   : > { %v1995_v22 = vld [vmem:[%s13922_s29 + $0x1160] sm:$0xff]  ;;  %1992 = vst [vmem:[%s13930_s30 + $0x8a0] sm:$0xff] %v1991_v20  ;;  %1994 = vst [vmem:[%s13930_s30 + $0x8a8] sm:$0xff] %v1993_v21  ;;  %v1997_v23 = vld [vmem:[%s13922_s29 + $0x1170] sm:$0xff] }
  0xa0   : > { %1996 = vst [vmem:[%s13930_s30 + $0x8b0] sm:$0xff] %v1995_v22  ;;  %v1999_v24 = vld [vmem:[%s13922_s29 + $0x1180] sm:$0xff]  ;;  %v2001_v25 = vld [vmem:[%s13922_s29 + $0x1190] sm:$0xff]  ;;  %1998 = vst [vmem:[%s13930_s30 + $0x8b8] sm:$0xff] %v1997_v23 }
  0xa1   : > { %2000 = vst [vmem:[%s13930_s30 + $0x8c0] sm:$0xff] %v1999_v24  ;;  %2002 = vst [vmem:[%s13930_s30 + $0x8c8] sm:$0xff] %v2001_v25  ;;  %v2003_v26 = vld [vmem:[%s13922_s29 + $0x11a0] sm:$0xff]  ;;  %v2005_v27 = vld [vmem:[%s13922_s29 + $0x11b0] sm:$0xff] }
  0xa2   : > { %v2007_v28 = vld [vmem:[%s13922_s29 + $0x11c0] sm:$0xff]  ;;  %2004 = vst [vmem:[%s13930_s30 + $0x8d0] sm:$0xff] %v2003_v26  ;;  %2006 = vst [vmem:[%s13930_s30 + $0x8d8] sm:$0xff] %v2005_v27  ;;  %v2009_v29 = vld [vmem:[%s13922_s29 + $0x11d0] sm:$0xff] }
  0xa3   : > { %2008 = vst [vmem:[%s13930_s30 + $0x8e0] sm:$0xff] %v2007_v28  ;;  %v2011_v30 = vld [vmem:[%s13922_s29 + $0x11e0] sm:$0xff]  ;;  %v2013_v31 = vld [vmem:[%s13922_s29 + $0x11f0] sm:$0xff]  ;;  %2010 = vst [vmem:[%s13930_s30 + $0x8e8] sm:$0xff] %v2009_v29 }
  0xa4   : > { %2012 = vst [vmem:[%s13930_s30 + $0x8f0] sm:$0xff] %v2011_v30  ;;  %2014 = vst [vmem:[%s13930_s30 + $0x8f8] sm:$0xff] %v2013_v31  ;;  %v2015_v32 = vld [vmem:[%s13922_s29 + $0x1200] sm:$0xff]  ;;  %v2017_v33 = vld [vmem:[%s13922_s29 + $0x1210] sm:$0xff] }
  0xa5   : > { %v2019_v34 = vld [vmem:[%s13922_s29 + $0x1220] sm:$0xff]  ;;  %2016 = vst [vmem:[%s13930_s30 + $0x900] sm:$0xff] %v2015_v32  ;;  %2018 = vst [vmem:[%s13930_s30 + $0x908] sm:$0xff] %v2017_v33  ;;  %v2021_v35 = vld [vmem:[%s13922_s29 + $0x1230] sm:$0xff] }
  0xa6   : > { %2020 = vst [vmem:[%s13930_s30 + $0x910] sm:$0xff] %v2019_v34  ;;  %v2023_v36 = vld [vmem:[%s13922_s29 + $0x1240] sm:$0xff]  ;;  %v2025_v37 = vld [vmem:[%s13922_s29 + $0x1250] sm:$0xff]  ;;  %2022 = vst [vmem:[%s13930_s30 + $0x918] sm:$0xff] %v2021_v35 }
  0xa7   : > { %2024 = vst [vmem:[%s13930_s30 + $0x920] sm:$0xff] %v2023_v36  ;;  %2026 = vst [vmem:[%s13930_s30 + $0x928] sm:$0xff] %v2025_v37  ;;  %v2027_v38 = vld [vmem:[%s13922_s29 + $0x1260] sm:$0xff]  ;;  %v2029_v39 = vld [vmem:[%s13922_s29 + $0x1270] sm:$0xff] }
  0xa8   : > { %v2031_v40 = vld [vmem:[%s13922_s29 + $0x1280] sm:$0xff]  ;;  %2028 = vst [vmem:[%s13930_s30 + $0x930] sm:$0xff] %v2027_v38  ;;  %2030 = vst [vmem:[%s13930_s30 + $0x938] sm:$0xff] %v2029_v39  ;;  %v2033_v41 = vld [vmem:[%s13922_s29 + $0x1290] sm:$0xff] }
  0xa9   : > { %2032 = vst [vmem:[%s13930_s30 + $0x940] sm:$0xff] %v2031_v40  ;;  %v2035_v42 = vld [vmem:[%s13922_s29 + $0x12a0] sm:$0xff]  ;;  %v2037_v43 = vld [vmem:[%s13922_s29 + $0x12b0] sm:$0xff]  ;;  %2034 = vst [vmem:[%s13930_s30 + $0x948] sm:$0xff] %v2033_v41 }
  0xaa   : > { %2036 = vst [vmem:[%s13930_s30 + $0x950] sm:$0xff] %v2035_v42  ;;  %2038 = vst [vmem:[%s13930_s30 + $0x958] sm:$0xff] %v2037_v43  ;;  %v2039_v44 = vld [vmem:[%s13922_s29 + $0x12c0] sm:$0xff]  ;;  %v2041_v45 = vld [vmem:[%s13922_s29 + $0x12d0] sm:$0xff] }
  0xab   : > { %v2043_v46 = vld [vmem:[%s13922_s29 + $0x12e0] sm:$0xff]  ;;  %2040 = vst [vmem:[%s13930_s30 + $0x960] sm:$0xff] %v2039_v44  ;;  %2042 = vst [vmem:[%s13930_s30 + $0x968] sm:$0xff] %v2041_v45  ;;  %v2045_v47 = vld [vmem:[%s13922_s29 + $0x12f0] sm:$0xff] }
  0xac   : > { %2044 = vst [vmem:[%s13930_s30 + $0x970] sm:$0xff] %v2043_v46  ;;  %v2047_v48 = vld [vmem:[%s13922_s29 + $0x1300] sm:$0xff]  ;;  %v2049_v49 = vld [vmem:[%s13922_s29 + $0x1310] sm:$0xff]  ;;  %2046 = vst [vmem:[%s13930_s30 + $0x978] sm:$0xff] %v2045_v47 }
  0xad   : > { %2048 = vst [vmem:[%s13930_s30 + $0x980] sm:$0xff] %v2047_v48  ;;  %2050 = vst [vmem:[%s13930_s30 + $0x988] sm:$0xff] %v2049_v49  ;;  %v2051_v50 = vld [vmem:[%s13922_s29 + $0x1320] sm:$0xff]  ;;  %v2053_v51 = vld [vmem:[%s13922_s29 + $0x1330] sm:$0xff] }
  0xae   : > { %v2055_v52 = vld [vmem:[%s13922_s29 + $0x1340] sm:$0xff]  ;;  %2052 = vst [vmem:[%s13930_s30 + $0x990] sm:$0xff] %v2051_v50  ;;  %2054 = vst [vmem:[%s13930_s30 + $0x998] sm:$0xff] %v2053_v51  ;;  %v2057_v53 = vld [vmem:[%s13922_s29 + $0x1350] sm:$0xff] }
  0xaf   : > { %2056 = vst [vmem:[%s13930_s30 + $0x9a0] sm:$0xff] %v2055_v52  ;;  %v2059_v54 = vld [vmem:[%s13922_s29 + $0x1360] sm:$0xff]  ;;  %v2061_v55 = vld [vmem:[%s13922_s29 + $0x1370] sm:$0xff]  ;;  %2058 = vst [vmem:[%s13930_s30 + $0x9a8] sm:$0xff] %v2057_v53 }
  0xb0   : > { %2060 = vst [vmem:[%s13930_s30 + $0x9b0] sm:$0xff] %v2059_v54  ;;  %2062 = vst [vmem:[%s13930_s30 + $0x9b8] sm:$0xff] %v2061_v55  ;;  %v2063_v56 = vld [vmem:[%s13922_s29 + $0x1380] sm:$0xff]  ;;  %v2065_v57 = vld [vmem:[%s13922_s29 + $0x1390] sm:$0xff] }
  0xb1   : > { %v2067_v58 = vld [vmem:[%s13922_s29 + $0x13a0] sm:$0xff]  ;;  %2064 = vst [vmem:[%s13930_s30 + $0x9c0] sm:$0xff] %v2063_v56  ;;  %2066 = vst [vmem:[%s13930_s30 + $0x9c8] sm:$0xff] %v2065_v57  ;;  %v2069_v59 = vld [vmem:[%s13922_s29 + $0x13b0] sm:$0xff] }
  0xb2   : > { %2068 = vst [vmem:[%s13930_s30 + $0x9d0] sm:$0xff] %v2067_v58  ;;  %v2071_v60 = vld [vmem:[%s13922_s29 + $0x13c0] sm:$0xff]  ;;  %v2073_v61 = vld [vmem:[%s13922_s29 + $0x13d0] sm:$0xff]  ;;  %2070 = vst [vmem:[%s13930_s30 + $0x9d8] sm:$0xff] %v2069_v59 }
  0xb3   : > { %2072 = vst [vmem:[%s13930_s30 + $0x9e0] sm:$0xff] %v2071_v60  ;;  %2074 = vst [vmem:[%s13930_s30 + $0x9e8] sm:$0xff] %v2073_v61  ;;  %v2075_v62 = vld [vmem:[%s13922_s29 + $0x13e0] sm:$0xff]  ;;  %v2077_v63 = vld [vmem:[%s13922_s29 + $0x13f0] sm:$0xff] }
  0xb4   : > { %v2079_v0 = vld [vmem:[%s13922_s29 + $0x1400] sm:$0xff]  ;;  %2076 = vst [vmem:[%s13930_s30 + $0x9f0] sm:$0xff] %v2075_v62  ;;  %2078 = vst [vmem:[%s13930_s30 + $0x9f8] sm:$0xff] %v2077_v63  ;;  %v2081_v1 = vld [vmem:[%s13922_s29 + $0x1410] sm:$0xff] }
  0xb5   : > { %2080 = vst [vmem:[%s13930_s30 + $0xa00] sm:$0xff] %v2079_v0  ;;  %v2083_v2 = vld [vmem:[%s13922_s29 + $0x1420] sm:$0xff]  ;;  %v2085_v3 = vld [vmem:[%s13922_s29 + $0x1430] sm:$0xff]  ;;  %2082 = vst [vmem:[%s13930_s30 + $0xa08] sm:$0xff] %v2081_v1 }
  0xb6   : > { %2084 = vst [vmem:[%s13930_s30 + $0xa10] sm:$0xff] %v2083_v2  ;;  %2086 = vst [vmem:[%s13930_s30 + $0xa18] sm:$0xff] %v2085_v3  ;;  %v2087_v4 = vld [vmem:[%s13922_s29 + $0x1440] sm:$0xff]  ;;  %v2089_v5 = vld [vmem:[%s13922_s29 + $0x1450] sm:$0xff] }
  0xb7   : > { %v2091_v6 = vld [vmem:[%s13922_s29 + $0x1460] sm:$0xff]  ;;  %2088 = vst [vmem:[%s13930_s30 + $0xa20] sm:$0xff] %v2087_v4  ;;  %2090 = vst [vmem:[%s13930_s30 + $0xa28] sm:$0xff] %v2089_v5  ;;  %v2093_v7 = vld [vmem:[%s13922_s29 + $0x1470] sm:$0xff] }
  0xb8   : > { %2092 = vst [vmem:[%s13930_s30 + $0xa30] sm:$0xff] %v2091_v6  ;;  %v2095_v8 = vld [vmem:[%s13922_s29 + $0x1480] sm:$0xff]  ;;  %v2097_v9 = vld [vmem:[%s13922_s29 + $0x1490] sm:$0xff]  ;;  %2094 = vst [vmem:[%s13930_s30 + $0xa38] sm:$0xff] %v2093_v7 }
  0xb9   : > { %2096 = vst [vmem:[%s13930_s30 + $0xa40] sm:$0xff] %v2095_v8  ;;  %2098 = vst [vmem:[%s13930_s30 + $0xa48] sm:$0xff] %v2097_v9  ;;  %v2099_v10 = vld [vmem:[%s13922_s29 + $0x14a0] sm:$0xff]  ;;  %v2101_v11 = vld [vmem:[%s13922_s29 + $0x14b0] sm:$0xff] }
  0xba   : > { %v2103_v12 = vld [vmem:[%s13922_s29 + $0x14c0] sm:$0xff]  ;;  %2100 = vst [vmem:[%s13930_s30 + $0xa50] sm:$0xff] %v2099_v10  ;;  %2102 = vst [vmem:[%s13930_s30 + $0xa58] sm:$0xff] %v2101_v11  ;;  %v2105_v13 = vld [vmem:[%s13922_s29 + $0x14d0] sm:$0xff] }
  0xbb   : > { %2104 = vst [vmem:[%s13930_s30 + $0xa60] sm:$0xff] %v2103_v12  ;;  %v2107_v14 = vld [vmem:[%s13922_s29 + $0x14e0] sm:$0xff]  ;;  %v2109_v15 = vld [vmem:[%s13922_s29 + $0x14f0] sm:$0xff]  ;;  %2106 = vst [vmem:[%s13930_s30 + $0xa68] sm:$0xff] %v2105_v13 }
  0xbc   : > { %2108 = vst [vmem:[%s13930_s30 + $0xa70] sm:$0xff] %v2107_v14  ;;  %2110 = vst [vmem:[%s13930_s30 + $0xa78] sm:$0xff] %v2109_v15  ;;  %v2111_v16 = vld [vmem:[%s13922_s29 + $0x1500] sm:$0xff]  ;;  %v2113_v17 = vld [vmem:[%s13922_s29 + $0x1510] sm:$0xff] }
  0xbd   : > { %v2115_v18 = vld [vmem:[%s13922_s29 + $0x1520] sm:$0xff]  ;;  %2112 = vst [vmem:[%s13930_s30 + $0xa80] sm:$0xff] %v2111_v16  ;;  %2114 = vst [vmem:[%s13930_s30 + $0xa88] sm:$0xff] %v2113_v17  ;;  %v2117_v19 = vld [vmem:[%s13922_s29 + $0x1530] sm:$0xff] }
  0xbe   : > { %2116 = vst [vmem:[%s13930_s30 + $0xa90] sm:$0xff] %v2115_v18  ;;  %v2119_v20 = vld [vmem:[%s13922_s29 + $0x1540] sm:$0xff]  ;;  %v2121_v21 = vld [vmem:[%s13922_s29 + $0x1550] sm:$0xff]  ;;  %2118 = vst [vmem:[%s13930_s30 + $0xa98] sm:$0xff] %v2117_v19 }
  0xbf   : > { %2120 = vst [vmem:[%s13930_s30 + $0xaa0] sm:$0xff] %v2119_v20  ;;  %2122 = vst [vmem:[%s13930_s30 + $0xaa8] sm:$0xff] %v2121_v21  ;;  %v2123_v22 = vld [vmem:[%s13922_s29 + $0x1560] sm:$0xff]  ;;  %v2125_v23 = vld [vmem:[%s13922_s29 + $0x1570] sm:$0xff] }
  0xc0   : > { %v2127_v24 = vld [vmem:[%s13922_s29 + $0x1580] sm:$0xff]  ;;  %2124 = vst [vmem:[%s13930_s30 + $0xab0] sm:$0xff] %v2123_v22  ;;  %2126 = vst [vmem:[%s13930_s30 + $0xab8] sm:$0xff] %v2125_v23  ;;  %v2129_v25 = vld [vmem:[%s13922_s29 + $0x1590] sm:$0xff] }
  0xc1   : > { %2128 = vst [vmem:[%s13930_s30 + $0xac0] sm:$0xff] %v2127_v24  ;;  %v2131_v26 = vld [vmem:[%s13922_s29 + $0x15a0] sm:$0xff]  ;;  %v2133_v27 = vld [vmem:[%s13922_s29 + $0x15b0] sm:$0xff]  ;;  %2130 = vst [vmem:[%s13930_s30 + $0xac8] sm:$0xff] %v2129_v25 }
  0xc2   : > { %2132 = vst [vmem:[%s13930_s30 + $0xad0] sm:$0xff] %v2131_v26  ;;  %2134 = vst [vmem:[%s13930_s30 + $0xad8] sm:$0xff] %v2133_v27  ;;  %v2135_v28 = vld [vmem:[%s13922_s29 + $0x15c0] sm:$0xff]  ;;  %v2137_v29 = vld [vmem:[%s13922_s29 + $0x15d0] sm:$0xff] }
  0xc3   : > { %v2139_v30 = vld [vmem:[%s13922_s29 + $0x15e0] sm:$0xff]  ;;  %2136 = vst [vmem:[%s13930_s30 + $0xae0] sm:$0xff] %v2135_v28  ;;  %2138 = vst [vmem:[%s13930_s30 + $0xae8] sm:$0xff] %v2137_v29  ;;  %v2141_v31 = vld [vmem:[%s13922_s29 + $0x15f0] sm:$0xff] }
  0xc4   : > { %2140 = vst [vmem:[%s13930_s30 + $0xaf0] sm:$0xff] %v2139_v30  ;;  %v2143_v32 = vld [vmem:[%s13922_s29 + $0x1600] sm:$0xff]  ;;  %v2145_v33 = vld [vmem:[%s13922_s29 + $0x1610] sm:$0xff]  ;;  %2142 = vst [vmem:[%s13930_s30 + $0xaf8] sm:$0xff] %v2141_v31 }
  0xc5   : > { %2144 = vst [vmem:[%s13930_s30 + $0xb00] sm:$0xff] %v2143_v32  ;;  %2146 = vst [vmem:[%s13930_s30 + $0xb08] sm:$0xff] %v2145_v33  ;;  %v2147_v34 = vld [vmem:[%s13922_s29 + $0x1620] sm:$0xff]  ;;  %v2149_v35 = vld [vmem:[%s13922_s29 + $0x1630] sm:$0xff] }
  0xc6   : > { %v2151_v36 = vld [vmem:[%s13922_s29 + $0x1640] sm:$0xff]  ;;  %2148 = vst [vmem:[%s13930_s30 + $0xb10] sm:$0xff] %v2147_v34  ;;  %2150 = vst [vmem:[%s13930_s30 + $0xb18] sm:$0xff] %v2149_v35  ;;  %v2153_v37 = vld [vmem:[%s13922_s29 + $0x1650] sm:$0xff] }
  0xc7   : > { %2152 = vst [vmem:[%s13930_s30 + $0xb20] sm:$0xff] %v2151_v36  ;;  %v2155_v38 = vld [vmem:[%s13922_s29 + $0x1660] sm:$0xff]  ;;  %v2157_v39 = vld [vmem:[%s13922_s29 + $0x1670] sm:$0xff]  ;;  %2154 = vst [vmem:[%s13930_s30 + $0xb28] sm:$0xff] %v2153_v37 }
  0xc8   : > { %2156 = vst [vmem:[%s13930_s30 + $0xb30] sm:$0xff] %v2155_v38  ;;  %2158 = vst [vmem:[%s13930_s30 + $0xb38] sm:$0xff] %v2157_v39  ;;  %v2159_v40 = vld [vmem:[%s13922_s29 + $0x1680] sm:$0xff]  ;;  %v2161_v41 = vld [vmem:[%s13922_s29 + $0x1690] sm:$0xff] }
  0xc9   : > { %v2163_v42 = vld [vmem:[%s13922_s29 + $0x16a0] sm:$0xff]  ;;  %2160 = vst [vmem:[%s13930_s30 + $0xb40] sm:$0xff] %v2159_v40  ;;  %2162 = vst [vmem:[%s13930_s30 + $0xb48] sm:$0xff] %v2161_v41  ;;  %v2165_v43 = vld [vmem:[%s13922_s29 + $0x16b0] sm:$0xff] }
  0xca   : > { %2164 = vst [vmem:[%s13930_s30 + $0xb50] sm:$0xff] %v2163_v42  ;;  %v2167_v44 = vld [vmem:[%s13922_s29 + $0x16c0] sm:$0xff]  ;;  %v2169_v45 = vld [vmem:[%s13922_s29 + $0x16d0] sm:$0xff]  ;;  %2166 = vst [vmem:[%s13930_s30 + $0xb58] sm:$0xff] %v2165_v43 }
  0xcb   : > { %2168 = vst [vmem:[%s13930_s30 + $0xb60] sm:$0xff] %v2167_v44  ;;  %2170 = vst [vmem:[%s13930_s30 + $0xb68] sm:$0xff] %v2169_v45  ;;  %v2171_v46 = vld [vmem:[%s13922_s29 + $0x16e0] sm:$0xff]  ;;  %v2173_v47 = vld [vmem:[%s13922_s29 + $0x16f0] sm:$0xff] }
  0xcc   : > { %v2175_v48 = vld [vmem:[%s13922_s29 + $0x1700] sm:$0xff]  ;;  %2172 = vst [vmem:[%s13930_s30 + $0xb70] sm:$0xff] %v2171_v46  ;;  %2174 = vst [vmem:[%s13930_s30 + $0xb78] sm:$0xff] %v2173_v47  ;;  %v2177_v49 = vld [vmem:[%s13922_s29 + $0x1710] sm:$0xff] }
  0xcd   : > { %2176 = vst [vmem:[%s13930_s30 + $0xb80] sm:$0xff] %v2175_v48  ;;  %v2179_v50 = vld [vmem:[%s13922_s29 + $0x1720] sm:$0xff]  ;;  %v2181_v51 = vld [vmem:[%s13922_s29 + $0x1730] sm:$0xff]  ;;  %2178 = vst [vmem:[%s13930_s30 + $0xb88] sm:$0xff] %v2177_v49 }
  0xce   : > { %2180 = vst [vmem:[%s13930_s30 + $0xb90] sm:$0xff] %v2179_v50  ;;  %2182 = vst [vmem:[%s13930_s30 + $0xb98] sm:$0xff] %v2181_v51  ;;  %v2183_v52 = vld [vmem:[%s13922_s29 + $0x1740] sm:$0xff]  ;;  %v2185_v53 = vld [vmem:[%s13922_s29 + $0x1750] sm:$0xff] }
  0xcf   : > { %v2187_v54 = vld [vmem:[%s13922_s29 + $0x1760] sm:$0xff]  ;;  %2184 = vst [vmem:[%s13930_s30 + $0xba0] sm:$0xff] %v2183_v52  ;;  %2186 = vst [vmem:[%s13930_s30 + $0xba8] sm:$0xff] %v2185_v53  ;;  %v2189_v55 = vld [vmem:[%s13922_s29 + $0x1770] sm:$0xff] }
  0xd0   : > { %2188 = vst [vmem:[%s13930_s30 + $0xbb0] sm:$0xff] %v2187_v54  ;;  %v2191_v56 = vld [vmem:[%s13922_s29 + $0x1780] sm:$0xff]  ;;  %v2193_v57 = vld [vmem:[%s13922_s29 + $0x1790] sm:$0xff]  ;;  %2190 = vst [vmem:[%s13930_s30 + $0xbb8] sm:$0xff] %v2189_v55 }
  0xd1   : > { %2192 = vst [vmem:[%s13930_s30 + $0xbc0] sm:$0xff] %v2191_v56  ;;  %2194 = vst [vmem:[%s13930_s30 + $0xbc8] sm:$0xff] %v2193_v57  ;;  %v2195_v58 = vld [vmem:[%s13922_s29 + $0x17a0] sm:$0xff]  ;;  %v2197_v59 = vld [vmem:[%s13922_s29 + $0x17b0] sm:$0xff] }
  0xd2   : > { %v2199_v60 = vld [vmem:[%s13922_s29 + $0x17c0] sm:$0xff]  ;;  %2196 = vst [vmem:[%s13930_s30 + $0xbd0] sm:$0xff] %v2195_v58  ;;  %2198 = vst [vmem:[%s13930_s30 + $0xbd8] sm:$0xff] %v2197_v59  ;;  %v2201_v61 = vld [vmem:[%s13922_s29 + $0x17d0] sm:$0xff] }
  0xd3   : > { %2200 = vst [vmem:[%s13930_s30 + $0xbe0] sm:$0xff] %v2199_v60  ;;  %v2203_v62 = vld [vmem:[%s13922_s29 + $0x17e0] sm:$0xff]  ;;  %v2205_v63 = vld [vmem:[%s13922_s29 + $0x17f0] sm:$0xff]  ;;  %2202 = vst [vmem:[%s13930_s30 + $0xbe8] sm:$0xff] %v2201_v61 }
  0xd4   : > { %2204 = vst [vmem:[%s13930_s30 + $0xbf0] sm:$0xff] %v2203_v62  ;;  %2206 = vst [vmem:[%s13930_s30 + $0xbf8] sm:$0xff] %v2205_v63  ;;  %v2207_v0 = vld [vmem:[%s13922_s29 + $0x1800] sm:$0xff]  ;;  %v2209_v1 = vld [vmem:[%s13922_s29 + $0x1810] sm:$0xff] }
  0xd5   : > { %v2211_v2 = vld [vmem:[%s13922_s29 + $0x1820] sm:$0xff]  ;;  %2208 = vst [vmem:[%s13930_s30 + $0xc00] sm:$0xff] %v2207_v0  ;;  %2210 = vst [vmem:[%s13930_s30 + $0xc08] sm:$0xff] %v2209_v1  ;;  %v2213_v3 = vld [vmem:[%s13922_s29 + $0x1830] sm:$0xff] }
  0xd6   : > { %2212 = vst [vmem:[%s13930_s30 + $0xc10] sm:$0xff] %v2211_v2  ;;  %v2215_v4 = vld [vmem:[%s13922_s29 + $0x1840] sm:$0xff]  ;;  %v2217_v5 = vld [vmem:[%s13922_s29 + $0x1850] sm:$0xff]  ;;  %2214 = vst [vmem:[%s13930_s30 + $0xc18] sm:$0xff] %v2213_v3 }
  0xd7   : > { %2216 = vst [vmem:[%s13930_s30 + $0xc20] sm:$0xff] %v2215_v4  ;;  %2218 = vst [vmem:[%s13930_s30 + $0xc28] sm:$0xff] %v2217_v5  ;;  %v2219_v6 = vld [vmem:[%s13922_s29 + $0x1860] sm:$0xff]  ;;  %v2221_v7 = vld [vmem:[%s13922_s29 + $0x1870] sm:$0xff] }
  0xd8   : > { %v2223_v8 = vld [vmem:[%s13922_s29 + $0x1880] sm:$0xff]  ;;  %2220 = vst [vmem:[%s13930_s30 + $0xc30] sm:$0xff] %v2219_v6  ;;  %2222 = vst [vmem:[%s13930_s30 + $0xc38] sm:$0xff] %v2221_v7  ;;  %v2225_v9 = vld [vmem:[%s13922_s29 + $0x1890] sm:$0xff] }
  0xd9   : > { %2224 = vst [vmem:[%s13930_s30 + $0xc40] sm:$0xff] %v2223_v8  ;;  %v2227_v10 = vld [vmem:[%s13922_s29 + $0x18a0] sm:$0xff]  ;;  %v2229_v11 = vld [vmem:[%s13922_s29 + $0x18b0] sm:$0xff]  ;;  %2226 = vst [vmem:[%s13930_s30 + $0xc48] sm:$0xff] %v2225_v9 }
  0xda   : > { %2228 = vst [vmem:[%s13930_s30 + $0xc50] sm:$0xff] %v2227_v10  ;;  %2230 = vst [vmem:[%s13930_s30 + $0xc58] sm:$0xff] %v2229_v11  ;;  %v2231_v12 = vld [vmem:[%s13922_s29 + $0x18c0] sm:$0xff]  ;;  %v2233_v13 = vld [vmem:[%s13922_s29 + $0x18d0] sm:$0xff] }
  0xdb   : > { %v2235_v14 = vld [vmem:[%s13922_s29 + $0x18e0] sm:$0xff]  ;;  %2232 = vst [vmem:[%s13930_s30 + $0xc60] sm:$0xff] %v2231_v12  ;;  %2234 = vst [vmem:[%s13930_s30 + $0xc68] sm:$0xff] %v2233_v13  ;;  %v2237_v15 = vld [vmem:[%s13922_s29 + $0x18f0] sm:$0xff] }
  0xdc   : > { %2236 = vst [vmem:[%s13930_s30 + $0xc70] sm:$0xff] %v2235_v14  ;;  %v2239_v16 = vld [vmem:[%s13922_s29 + $0x1900] sm:$0xff]  ;;  %v2241_v17 = vld [vmem:[%s13922_s29 + $0x1910] sm:$0xff]  ;;  %2238 = vst [vmem:[%s13930_s30 + $0xc78] sm:$0xff] %v2237_v15 }
  0xdd   : > { %2240 = vst [vmem:[%s13930_s30 + $0xc80] sm:$0xff] %v2239_v16  ;;  %2242 = vst [vmem:[%s13930_s30 + $0xc88] sm:$0xff] %v2241_v17  ;;  %v2243_v18 = vld [vmem:[%s13922_s29 + $0x1920] sm:$0xff]  ;;  %v2245_v19 = vld [vmem:[%s13922_s29 + $0x1930] sm:$0xff] }
  0xde   : > { %v2247_v20 = vld [vmem:[%s13922_s29 + $0x1940] sm:$0xff]  ;;  %2244 = vst [vmem:[%s13930_s30 + $0xc90] sm:$0xff] %v2243_v18  ;;  %2246 = vst [vmem:[%s13930_s30 + $0xc98] sm:$0xff] %v2245_v19  ;;  %v2249_v21 = vld [vmem:[%s13922_s29 + $0x1950] sm:$0xff] }
  0xdf   : > { %2248 = vst [vmem:[%s13930_s30 + $0xca0] sm:$0xff] %v2247_v20  ;;  %v2251_v22 = vld [vmem:[%s13922_s29 + $0x1960] sm:$0xff]  ;;  %v2253_v23 = vld [vmem:[%s13922_s29 + $0x1970] sm:$0xff]  ;;  %2250 = vst [vmem:[%s13930_s30 + $0xca8] sm:$0xff] %v2249_v21 }
  0xe0   : > { %2252 = vst [vmem:[%s13930_s30 + $0xcb0] sm:$0xff] %v2251_v22  ;;  %2254 = vst [vmem:[%s13930_s30 + $0xcb8] sm:$0xff] %v2253_v23  ;;  %v2255_v24 = vld [vmem:[%s13922_s29 + $0x1980] sm:$0xff]  ;;  %v2257_v25 = vld [vmem:[%s13922_s29 + $0x1990] sm:$0xff] }
  0xe1   : > { %v2259_v26 = vld [vmem:[%s13922_s29 + $0x19a0] sm:$0xff]  ;;  %2256 = vst [vmem:[%s13930_s30 + $0xcc0] sm:$0xff] %v2255_v24  ;;  %2258 = vst [vmem:[%s13930_s30 + $0xcc8] sm:$0xff] %v2257_v25  ;;  %v2261_v27 = vld [vmem:[%s13922_s29 + $0x19b0] sm:$0xff] }
  0xe2   : > { %2260 = vst [vmem:[%s13930_s30 + $0xcd0] sm:$0xff] %v2259_v26  ;;  %v2263_v28 = vld [vmem:[%s13922_s29 + $0x19c0] sm:$0xff]  ;;  %v2265_v29 = vld [vmem:[%s13922_s29 + $0x19d0] sm:$0xff]  ;;  %2262 = vst [vmem:[%s13930_s30 + $0xcd8] sm:$0xff] %v2261_v27 }
  0xe3   : > { %2264 = vst [vmem:[%s13930_s30 + $0xce0] sm:$0xff] %v2263_v28  ;;  %2266 = vst [vmem:[%s13930_s30 + $0xce8] sm:$0xff] %v2265_v29  ;;  %v2267_v30 = vld [vmem:[%s13922_s29 + $0x19e0] sm:$0xff]  ;;  %v2269_v31 = vld [vmem:[%s13922_s29 + $0x19f0] sm:$0xff] }
  0xe4   : > { %v2271_v32 = vld [vmem:[%s13922_s29 + $0x1a00] sm:$0xff]  ;;  %2268 = vst [vmem:[%s13930_s30 + $0xcf0] sm:$0xff] %v2267_v30  ;;  %2270 = vst [vmem:[%s13930_s30 + $0xcf8] sm:$0xff] %v2269_v31  ;;  %v2273_v33 = vld [vmem:[%s13922_s29 + $0x1a10] sm:$0xff] }
  0xe5   : > { %2272 = vst [vmem:[%s13930_s30 + $0xd00] sm:$0xff] %v2271_v32  ;;  %v2275_v34 = vld [vmem:[%s13922_s29 + $0x1a20] sm:$0xff]  ;;  %v2277_v35 = vld [vmem:[%s13922_s29 + $0x1a30] sm:$0xff]  ;;  %2274 = vst [vmem:[%s13930_s30 + $0xd08] sm:$0xff] %v2273_v33 }
  0xe6   : > { %2276 = vst [vmem:[%s13930_s30 + $0xd10] sm:$0xff] %v2275_v34  ;;  %2278 = vst [vmem:[%s13930_s30 + $0xd18] sm:$0xff] %v2277_v35  ;;  %v2279_v36 = vld [vmem:[%s13922_s29 + $0x1a40] sm:$0xff]  ;;  %v2281_v37 = vld [vmem:[%s13922_s29 + $0x1a50] sm:$0xff] }
  0xe7   : > { %v2283_v38 = vld [vmem:[%s13922_s29 + $0x1a60] sm:$0xff]  ;;  %2280 = vst [vmem:[%s13930_s30 + $0xd20] sm:$0xff] %v2279_v36  ;;  %2282 = vst [vmem:[%s13930_s30 + $0xd28] sm:$0xff] %v2281_v37  ;;  %v2285_v39 = vld [vmem:[%s13922_s29 + $0x1a70] sm:$0xff] }
  0xe8   : > { %2284 = vst [vmem:[%s13930_s30 + $0xd30] sm:$0xff] %v2283_v38  ;;  %v2287_v40 = vld [vmem:[%s13922_s29 + $0x1a80] sm:$0xff]  ;;  %v2289_v41 = vld [vmem:[%s13922_s29 + $0x1a90] sm:$0xff]  ;;  %2286 = vst [vmem:[%s13930_s30 + $0xd38] sm:$0xff] %v2285_v39 }
  0xe9   : > { %2288 = vst [vmem:[%s13930_s30 + $0xd40] sm:$0xff] %v2287_v40  ;;  %2290 = vst [vmem:[%s13930_s30 + $0xd48] sm:$0xff] %v2289_v41  ;;  %v2291_v42 = vld [vmem:[%s13922_s29 + $0x1aa0] sm:$0xff]  ;;  %v2293_v43 = vld [vmem:[%s13922_s29 + $0x1ab0] sm:$0xff] }
  0xea   : > { %v2295_v44 = vld [vmem:[%s13922_s29 + $0x1ac0] sm:$0xff]  ;;  %2292 = vst [vmem:[%s13930_s30 + $0xd50] sm:$0xff] %v2291_v42  ;;  %2294 = vst [vmem:[%s13930_s30 + $0xd58] sm:$0xff] %v2293_v43  ;;  %v2297_v45 = vld [vmem:[%s13922_s29 + $0x1ad0] sm:$0xff] }
  0xeb   : > { %2296 = vst [vmem:[%s13930_s30 + $0xd60] sm:$0xff] %v2295_v44  ;;  %v2299_v46 = vld [vmem:[%s13922_s29 + $0x1ae0] sm:$0xff]  ;;  %v2301_v47 = vld [vmem:[%s13922_s29 + $0x1af0] sm:$0xff]  ;;  %2298 = vst [vmem:[%s13930_s30 + $0xd68] sm:$0xff] %v2297_v45 }
  0xec   : > { %2300 = vst [vmem:[%s13930_s30 + $0xd70] sm:$0xff] %v2299_v46  ;;  %2302 = vst [vmem:[%s13930_s30 + $0xd78] sm:$0xff] %v2301_v47  ;;  %v2303_v48 = vld [vmem:[%s13922_s29 + $0x1b00] sm:$0xff]  ;;  %v2305_v49 = vld [vmem:[%s13922_s29 + $0x1b10] sm:$0xff] }
  0xed   : > { %v2307_v50 = vld [vmem:[%s13922_s29 + $0x1b20] sm:$0xff]  ;;  %2304 = vst [vmem:[%s13930_s30 + $0xd80] sm:$0xff] %v2303_v48  ;;  %2306 = vst [vmem:[%s13930_s30 + $0xd88] sm:$0xff] %v2305_v49  ;;  %v2309_v51 = vld [vmem:[%s13922_s29 + $0x1b30] sm:$0xff] }
  0xee   : > { %2308 = vst [vmem:[%s13930_s30 + $0xd90] sm:$0xff] %v2307_v50  ;;  %v2311_v52 = vld [vmem:[%s13922_s29 + $0x1b40] sm:$0xff]  ;;  %v2313_v53 = vld [vmem:[%s13922_s29 + $0x1b50] sm:$0xff]  ;;  %2310 = vst [vmem:[%s13930_s30 + $0xd98] sm:$0xff] %v2309_v51 }
  0xef   : > { %2312 = vst [vmem:[%s13930_s30 + $0xda0] sm:$0xff] %v2311_v52  ;;  %2314 = vst [vmem:[%s13930_s30 + $0xda8] sm:$0xff] %v2313_v53  ;;  %v2315_v54 = vld [vmem:[%s13922_s29 + $0x1b60] sm:$0xff]  ;;  %v2317_v55 = vld [vmem:[%s13922_s29 + $0x1b70] sm:$0xff] }
  0xf0   : > { %v2319_v56 = vld [vmem:[%s13922_s29 + $0x1b80] sm:$0xff]  ;;  %2316 = vst [vmem:[%s13930_s30 + $0xdb0] sm:$0xff] %v2315_v54  ;;  %2318 = vst [vmem:[%s13930_s30 + $0xdb8] sm:$0xff] %v2317_v55  ;;  %v2321_v57 = vld [vmem:[%s13922_s29 + $0x1b90] sm:$0xff] }
  0xf1   : > { %2320 = vst [vmem:[%s13930_s30 + $0xdc0] sm:$0xff] %v2319_v56  ;;  %v2323_v58 = vld [vmem:[%s13922_s29 + $0x1ba0] sm:$0xff]  ;;  %v2325_v59 = vld [vmem:[%s13922_s29 + $0x1bb0] sm:$0xff]  ;;  %2322 = vst [vmem:[%s13930_s30 + $0xdc8] sm:$0xff] %v2321_v57 }
  0xf2   : > { %2324 = vst [vmem:[%s13930_s30 + $0xdd0] sm:$0xff] %v2323_v58  ;;  %2326 = vst [vmem:[%s13930_s30 + $0xdd8] sm:$0xff] %v2325_v59  ;;  %v2327_v60 = vld [vmem:[%s13922_s29 + $0x1bc0] sm:$0xff]  ;;  %v2329_v61 = vld [vmem:[%s13922_s29 + $0x1bd0] sm:$0xff] }
  0xf3   : > { %v2331_v62 = vld [vmem:[%s13922_s29 + $0x1be0] sm:$0xff]  ;;  %2328 = vst [vmem:[%s13930_s30 + $0xde0] sm:$0xff] %v2327_v60  ;;  %2330 = vst [vmem:[%s13930_s30 + $0xde8] sm:$0xff] %v2329_v61  ;;  %v2333_v63 = vld [vmem:[%s13922_s29 + $0x1bf0] sm:$0xff] }
  0xf4   : > { %2332 = vst [vmem:[%s13930_s30 + $0xdf0] sm:$0xff] %v2331_v62  ;;  %v2335_v0 = vld [vmem:[%s13922_s29 + $0x1c00] sm:$0xff]  ;;  %v2337_v1 = vld [vmem:[%s13922_s29 + $0x1c10] sm:$0xff]  ;;  %2334 = vst [vmem:[%s13930_s30 + $0xdf8] sm:$0xff] %v2333_v63 }
  0xf5   : > { %2336 = vst [vmem:[%s13930_s30 + $0xe00] sm:$0xff] %v2335_v0  ;;  %2338 = vst [vmem:[%s13930_s30 + $0xe08] sm:$0xff] %v2337_v1  ;;  %v2339_v2 = vld [vmem:[%s13922_s29 + $0x1c20] sm:$0xff]  ;;  %v2341_v3 = vld [vmem:[%s13922_s29 + $0x1c30] sm:$0xff] }
  0xf6   : > { %v2343_v4 = vld [vmem:[%s13922_s29 + $0x1c40] sm:$0xff]  ;;  %2340 = vst [vmem:[%s13930_s30 + $0xe10] sm:$0xff] %v2339_v2  ;;  %2342 = vst [vmem:[%s13930_s30 + $0xe18] sm:$0xff] %v2341_v3  ;;  %v2345_v5 = vld [vmem:[%s13922_s29 + $0x1c50] sm:$0xff] }
  0xf7   : > { %2344 = vst [vmem:[%s13930_s30 + $0xe20] sm:$0xff] %v2343_v4  ;;  %v2347_v6 = vld [vmem:[%s13922_s29 + $0x1c60] sm:$0xff]  ;;  %v2349_v7 = vld [vmem:[%s13922_s29 + $0x1c70] sm:$0xff]  ;;  %2346 = vst [vmem:[%s13930_s30 + $0xe28] sm:$0xff] %v2345_v5 }
  0xf8   : > { %2348 = vst [vmem:[%s13930_s30 + $0xe30] sm:$0xff] %v2347_v6  ;;  %2350 = vst [vmem:[%s13930_s30 + $0xe38] sm:$0xff] %v2349_v7  ;;  %v2351_v8 = vld [vmem:[%s13922_s29 + $0x1c80] sm:$0xff]  ;;  %v2353_v9 = vld [vmem:[%s13922_s29 + $0x1c90] sm:$0xff] }
  0xf9   : > { %v2355_v10 = vld [vmem:[%s13922_s29 + $0x1ca0] sm:$0xff]  ;;  %2352 = vst [vmem:[%s13930_s30 + $0xe40] sm:$0xff] %v2351_v8  ;;  %2354 = vst [vmem:[%s13930_s30 + $0xe48] sm:$0xff] %v2353_v9  ;;  %v2357_v11 = vld [vmem:[%s13922_s29 + $0x1cb0] sm:$0xff] }
  0xfa   : > { %2356 = vst [vmem:[%s13930_s30 + $0xe50] sm:$0xff] %v2355_v10  ;;  %v2359_v12 = vld [vmem:[%s13922_s29 + $0x1cc0] sm:$0xff]  ;;  %v2361_v13 = vld [vmem:[%s13922_s29 + $0x1cd0] sm:$0xff]  ;;  %2358 = vst [vmem:[%s13930_s30 + $0xe58] sm:$0xff] %v2357_v11 }
  0xfb   : > { %2360 = vst [vmem:[%s13930_s30 + $0xe60] sm:$0xff] %v2359_v12  ;;  %2362 = vst [vmem:[%s13930_s30 + $0xe68] sm:$0xff] %v2361_v13  ;;  %v2363_v14 = vld [vmem:[%s13922_s29 + $0x1ce0] sm:$0xff]  ;;  %v2365_v15 = vld [vmem:[%s13922_s29 + $0x1cf0] sm:$0xff] }
  0xfc   : > { %v2367_v16 = vld [vmem:[%s13922_s29 + $0x1d00] sm:$0xff]  ;;  %2364 = vst [vmem:[%s13930_s30 + $0xe70] sm:$0xff] %v2363_v14  ;;  %2366 = vst [vmem:[%s13930_s30 + $0xe78] sm:$0xff] %v2365_v15  ;;  %v2369_v17 = vld [vmem:[%s13922_s29 + $0x1d10] sm:$0xff] }
  0xfd   : > { %2368 = vst [vmem:[%s13930_s30 + $0xe80] sm:$0xff] %v2367_v16  ;;  %v2371_v18 = vld [vmem:[%s13922_s29 + $0x1d20] sm:$0xff]  ;;  %v2373_v19 = vld [vmem:[%s13922_s29 + $0x1d30] sm:$0xff]  ;;  %2370 = vst [vmem:[%s13930_s30 + $0xe88] sm:$0xff] %v2369_v17 }
  0xfe   : > { %2372 = vst [vmem:[%s13930_s30 + $0xe90] sm:$0xff] %v2371_v18  ;;  %2374 = vst [vmem:[%s13930_s30 + $0xe98] sm:$0xff] %v2373_v19  ;;  %v2375_v20 = vld [vmem:[%s13922_s29 + $0x1d40] sm:$0xff]  ;;  %v2377_v21 = vld [vmem:[%s13922_s29 + $0x1d50] sm:$0xff] }
  0xff   : > { %v2379_v22 = vld [vmem:[%s13922_s29 + $0x1d60] sm:$0xff]  ;;  %2376 = vst [vmem:[%s13930_s30 + $0xea0] sm:$0xff] %v2375_v20  ;;  %2378 = vst [vmem:[%s13930_s30 + $0xea8] sm:$0xff] %v2377_v21  ;;  %v2381_v23 = vld [vmem:[%s13922_s29 + $0x1d70] sm:$0xff] }
 0x100   : > { %2380 = vst [vmem:[%s13930_s30 + $0xeb0] sm:$0xff] %v2379_v22  ;;  %v2383_v24 = vld [vmem:[%s13922_s29 + $0x1d80] sm:$0xff]  ;;  %v2385_v25 = vld [vmem:[%s13922_s29 + $0x1d90] sm:$0xff]  ;;  %2382 = vst [vmem:[%s13930_s30 + $0xeb8] sm:$0xff] %v2381_v23 }
 0x101   : > { %2384 = vst [vmem:[%s13930_s30 + $0xec0] sm:$0xff] %v2383_v24  ;;  %2386 = vst [vmem:[%s13930_s30 + $0xec8] sm:$0xff] %v2385_v25  ;;  %v2387_v26 = vld [vmem:[%s13922_s29 + $0x1da0] sm:$0xff]  ;;  %v2389_v27 = vld [vmem:[%s13922_s29 + $0x1db0] sm:$0xff] }
 0x102   : > { %v2391_v28 = vld [vmem:[%s13922_s29 + $0x1dc0] sm:$0xff]  ;;  %2388 = vst [vmem:[%s13930_s30 + $0xed0] sm:$0xff] %v2387_v26  ;;  %2390 = vst [vmem:[%s13930_s30 + $0xed8] sm:$0xff] %v2389_v27  ;;  %v2393_v29 = vld [vmem:[%s13922_s29 + $0x1dd0] sm:$0xff] }
 0x103   : > { %2392 = vst [vmem:[%s13930_s30 + $0xee0] sm:$0xff] %v2391_v28  ;;  %v2395_v30 = vld [vmem:[%s13922_s29 + $0x1de0] sm:$0xff]  ;;  %v2397_v31 = vld [vmem:[%s13922_s29 + $0x1df0] sm:$0xff]  ;;  %2394 = vst [vmem:[%s13930_s30 + $0xee8] sm:$0xff] %v2393_v29 }
 0x104   : > { %2396 = vst [vmem:[%s13930_s30 + $0xef0] sm:$0xff] %v2395_v30  ;;  %2398 = vst [vmem:[%s13930_s30 + $0xef8] sm:$0xff] %v2397_v31  ;;  %v2399_v32 = vld [vmem:[%s13922_s29 + $0x1e00] sm:$0xff]  ;;  %v2401_v33 = vld [vmem:[%s13922_s29 + $0x1e10] sm:$0xff] }
 0x105   : > { %v2403_v34 = vld [vmem:[%s13922_s29 + $0x1e20] sm:$0xff]  ;;  %2400 = vst [vmem:[%s13930_s30 + $0xf00] sm:$0xff] %v2399_v32  ;;  %2402 = vst [vmem:[%s13930_s30 + $0xf08] sm:$0xff] %v2401_v33  ;;  %v2405_v35 = vld [vmem:[%s13922_s29 + $0x1e30] sm:$0xff] }
 0x106   : > { %2404 = vst [vmem:[%s13930_s30 + $0xf10] sm:$0xff] %v2403_v34  ;;  %v2407_v36 = vld [vmem:[%s13922_s29 + $0x1e40] sm:$0xff]  ;;  %v2409_v37 = vld [vmem:[%s13922_s29 + $0x1e50] sm:$0xff]  ;;  %2406 = vst [vmem:[%s13930_s30 + $0xf18] sm:$0xff] %v2405_v35 }
 0x107   : > { %2408 = vst [vmem:[%s13930_s30 + $0xf20] sm:$0xff] %v2407_v36  ;;  %2410 = vst [vmem:[%s13930_s30 + $0xf28] sm:$0xff] %v2409_v37  ;;  %v2411_v38 = vld [vmem:[%s13922_s29 + $0x1e60] sm:$0xff]  ;;  %v2413_v39 = vld [vmem:[%s13922_s29 + $0x1e70] sm:$0xff] }
 0x108   : > { %v2415_v40 = vld [vmem:[%s13922_s29 + $0x1e80] sm:$0xff]  ;;  %2412 = vst [vmem:[%s13930_s30 + $0xf30] sm:$0xff] %v2411_v38  ;;  %2414 = vst [vmem:[%s13930_s30 + $0xf38] sm:$0xff] %v2413_v39  ;;  %v2417_v41 = vld [vmem:[%s13922_s29 + $0x1e90] sm:$0xff] }
 0x109   : > { %2416 = vst [vmem:[%s13930_s30 + $0xf40] sm:$0xff] %v2415_v40  ;;  %v2419_v42 = vld [vmem:[%s13922_s29 + $0x1ea0] sm:$0xff]  ;;  %v2421_v43 = vld [vmem:[%s13922_s29 + $0x1eb0] sm:$0xff]  ;;  %2418 = vst [vmem:[%s13930_s30 + $0xf48] sm:$0xff] %v2417_v41 }
 0x10a   : > { %2420 = vst [vmem:[%s13930_s30 + $0xf50] sm:$0xff] %v2419_v42  ;;  %2422 = vst [vmem:[%s13930_s30 + $0xf58] sm:$0xff] %v2421_v43  ;;  %v2423_v44 = vld [vmem:[%s13922_s29 + $0x1ec0] sm:$0xff]  ;;  %v2425_v45 = vld [vmem:[%s13922_s29 + $0x1ed0] sm:$0xff] }
 0x10b   : > { %v2427_v46 = vld [vmem:[%s13922_s29 + $0x1ee0] sm:$0xff]  ;;  %2424 = vst [vmem:[%s13930_s30 + $0xf60] sm:$0xff] %v2423_v44  ;;  %2426 = vst [vmem:[%s13930_s30 + $0xf68] sm:$0xff] %v2425_v45  ;;  %v2429_v47 = vld [vmem:[%s13922_s29 + $0x1ef0] sm:$0xff] }
 0x10c   : > { %2428 = vst [vmem:[%s13930_s30 + $0xf70] sm:$0xff] %v2427_v46  ;;  %v2431_v48 = vld [vmem:[%s13922_s29 + $0x1f00] sm:$0xff]  ;;  %v2433_v49 = vld [vmem:[%s13922_s29 + $0x1f10] sm:$0xff]  ;;  %2430 = vst [vmem:[%s13930_s30 + $0xf78] sm:$0xff] %v2429_v47 }
 0x10d   : > { %2432 = vst [vmem:[%s13930_s30 + $0xf80] sm:$0xff] %v2431_v48  ;;  %2434 = vst [vmem:[%s13930_s30 + $0xf88] sm:$0xff] %v2433_v49  ;;  %v2435_v50 = vld [vmem:[%s13922_s29 + $0x1f20] sm:$0xff]  ;;  %v2437_v51 = vld [vmem:[%s13922_s29 + $0x1f30] sm:$0xff] }
 0x10e   : > { %v2439_v52 = vld [vmem:[%s13922_s29 + $0x1f40] sm:$0xff]  ;;  %2436 = vst [vmem:[%s13930_s30 + $0xf90] sm:$0xff] %v2435_v50  ;;  %2438 = vst [vmem:[%s13930_s30 + $0xf98] sm:$0xff] %v2437_v51  ;;  %v2441_v53 = vld [vmem:[%s13922_s29 + $0x1f50] sm:$0xff] }
 0x10f   : > { %2440 = vst [vmem:[%s13930_s30 + $0xfa0] sm:$0xff] %v2439_v52  ;;  %v2443_v54 = vld [vmem:[%s13922_s29 + $0x1f60] sm:$0xff]  ;;  %v2445_v55 = vld [vmem:[%s13922_s29 + $0x1f70] sm:$0xff]  ;;  %2442 = vst [vmem:[%s13930_s30 + $0xfa8] sm:$0xff] %v2441_v53 }
 0x110   : > { %2444 = vst [vmem:[%s13930_s30 + $0xfb0] sm:$0xff] %v2443_v54  ;;  %2446 = vst [vmem:[%s13930_s30 + $0xfb8] sm:$0xff] %v2445_v55  ;;  %v2447_v56 = vld [vmem:[%s13922_s29 + $0x1f80] sm:$0xff]  ;;  %v2449_v57 = vld [vmem:[%s13922_s29 + $0x1f90] sm:$0xff] }
 0x111   : > { %v2451_v58 = vld [vmem:[%s13922_s29 + $0x1fa0] sm:$0xff]  ;;  %2448 = vst [vmem:[%s13930_s30 + $0xfc0] sm:$0xff] %v2447_v56  ;;  %2450 = vst [vmem:[%s13930_s30 + $0xfc8] sm:$0xff] %v2449_v57  ;;  %v2453_v59 = vld [vmem:[%s13922_s29 + $0x1fb0] sm:$0xff] }
 0x112   : > { %2452 = vst [vmem:[%s13930_s30 + $0xfd0] sm:$0xff] %v2451_v58  ;;  %v2455_v60 = vld [vmem:[%s13922_s29 + $0x1fc0] sm:$0xff]  ;;  %v2457_v61 = vld [vmem:[%s13922_s29 + $0x1fd0] sm:$0xff]  ;;  %2454 = vst [vmem:[%s13930_s30 + $0xfd8] sm:$0xff] %v2453_v59 }
 0x113   : > { %2456 = vst [vmem:[%s13930_s30 + $0xfe0] sm:$0xff] %v2455_v60  ;;  %2458 = vst [vmem:[%s13930_s30 + $0xfe8] sm:$0xff] %v2457_v61  ;;  %v2459_v62 = vld [vmem:[%s13922_s29 + $0x1fe0] sm:$0xff]  ;;  %v2461_v63 = vld [vmem:[%s13922_s29 + $0x1ff0] sm:$0xff] }
 0x114   : > { %v2463_v0 = vld [vmem:[%s13922_s29 + $0x2000] sm:$0xff]  ;;  %2460 = vst [vmem:[%s13930_s30 + $0xff0] sm:$0xff] %v2459_v62  ;;  %2462 = vst [vmem:[%s13930_s30 + $0xff8] sm:$0xff] %v2461_v63  ;;  %v2465_v1 = vld [vmem:[%s13922_s29 + $0x2010] sm:$0xff] }
 0x115   : > { %2464 = vst [vmem:[%s13930_s30 + $0x1000] sm:$0xff] %v2463_v0  ;;  %v2467_v2 = vld [vmem:[%s13922_s29 + $0x2020] sm:$0xff]  ;;  %v2469_v3 = vld [vmem:[%s13922_s29 + $0x2030] sm:$0xff]  ;;  %2466 = vst [vmem:[%s13930_s30 + $0x1008] sm:$0xff] %v2465_v1 }
 0x116   : > { %2468 = vst [vmem:[%s13930_s30 + $0x1010] sm:$0xff] %v2467_v2  ;;  %2470 = vst [vmem:[%s13930_s30 + $0x1018] sm:$0xff] %v2469_v3  ;;  %v2471_v4 = vld [vmem:[%s13922_s29 + $0x2040] sm:$0xff]  ;;  %v2473_v5 = vld [vmem:[%s13922_s29 + $0x2050] sm:$0xff] }
 0x117   : > { %v2475_v6 = vld [vmem:[%s13922_s29 + $0x2060] sm:$0xff]  ;;  %2472 = vst [vmem:[%s13930_s30 + $0x1020] sm:$0xff] %v2471_v4  ;;  %2474 = vst [vmem:[%s13930_s30 + $0x1028] sm:$0xff] %v2473_v5  ;;  %v2477_v7 = vld [vmem:[%s13922_s29 + $0x2070] sm:$0xff] }
 0x118   : > { %2476 = vst [vmem:[%s13930_s30 + $0x1030] sm:$0xff] %v2475_v6  ;;  %v2479_v8 = vld [vmem:[%s13922_s29 + $0x2080] sm:$0xff]  ;;  %v2481_v9 = vld [vmem:[%s13922_s29 + $0x2090] sm:$0xff]  ;;  %2478 = vst [vmem:[%s13930_s30 + $0x1038] sm:$0xff] %v2477_v7 }
 0x119   : > { %2480 = vst [vmem:[%s13930_s30 + $0x1040] sm:$0xff] %v2479_v8  ;;  %2482 = vst [vmem:[%s13930_s30 + $0x1048] sm:$0xff] %v2481_v9  ;;  %v2483_v10 = vld [vmem:[%s13922_s29 + $0x20a0] sm:$0xff]  ;;  %v2485_v11 = vld [vmem:[%s13922_s29 + $0x20b0] sm:$0xff] }
 0x11a   : > { %v2487_v12 = vld [vmem:[%s13922_s29 + $0x20c0] sm:$0xff]  ;;  %2484 = vst [vmem:[%s13930_s30 + $0x1050] sm:$0xff] %v2483_v10  ;;  %2486 = vst [vmem:[%s13930_s30 + $0x1058] sm:$0xff] %v2485_v11  ;;  %v2489_v13 = vld [vmem:[%s13922_s29 + $0x20d0] sm:$0xff] }
 0x11b   : > { %2488 = vst [vmem:[%s13930_s30 + $0x1060] sm:$0xff] %v2487_v12  ;;  %v2491_v14 = vld [vmem:[%s13922_s29 + $0x20e0] sm:$0xff]  ;;  %v2493_v15 = vld [vmem:[%s13922_s29 + $0x20f0] sm:$0xff]  ;;  %2490 = vst [vmem:[%s13930_s30 + $0x1068] sm:$0xff] %v2489_v13 }
 0x11c   : > { %2492 = vst [vmem:[%s13930_s30 + $0x1070] sm:$0xff] %v2491_v14  ;;  %2494 = vst [vmem:[%s13930_s30 + $0x1078] sm:$0xff] %v2493_v15  ;;  %v2495_v16 = vld [vmem:[%s13922_s29 + $0x2100] sm:$0xff]  ;;  %v2497_v17 = vld [vmem:[%s13922_s29 + $0x2110] sm:$0xff] }
 0x11d   : > { %v2499_v18 = vld [vmem:[%s13922_s29 + $0x2120] sm:$0xff]  ;;  %2496 = vst [vmem:[%s13930_s30 + $0x1080] sm:$0xff] %v2495_v16  ;;  %2498 = vst [vmem:[%s13930_s30 + $0x1088] sm:$0xff] %v2497_v17  ;;  %v2501_v19 = vld [vmem:[%s13922_s29 + $0x2130] sm:$0xff] }
 0x11e   : > { %2500 = vst [vmem:[%s13930_s30 + $0x1090] sm:$0xff] %v2499_v18  ;;  %v2503_v20 = vld [vmem:[%s13922_s29 + $0x2140] sm:$0xff]  ;;  %v2505_v21 = vld [vmem:[%s13922_s29 + $0x2150] sm:$0xff]  ;;  %2502 = vst [vmem:[%s13930_s30 + $0x1098] sm:$0xff] %v2501_v19 }
 0x11f   : > { %2504 = vst [vmem:[%s13930_s30 + $0x10a0] sm:$0xff] %v2503_v20  ;;  %2506 = vst [vmem:[%s13930_s30 + $0x10a8] sm:$0xff] %v2505_v21  ;;  %v2507_v22 = vld [vmem:[%s13922_s29 + $0x2160] sm:$0xff]  ;;  %v2509_v23 = vld [vmem:[%s13922_s29 + $0x2170] sm:$0xff] }
 0x120   : > { %v2511_v24 = vld [vmem:[%s13922_s29 + $0x2180] sm:$0xff]  ;;  %2508 = vst [vmem:[%s13930_s30 + $0x10b0] sm:$0xff] %v2507_v22  ;;  %2510 = vst [vmem:[%s13930_s30 + $0x10b8] sm:$0xff] %v2509_v23  ;;  %v2513_v25 = vld [vmem:[%s13922_s29 + $0x2190] sm:$0xff] }
 0x121   : > { %2512 = vst [vmem:[%s13930_s30 + $0x10c0] sm:$0xff] %v2511_v24  ;;  %v2515_v26 = vld [vmem:[%s13922_s29 + $0x21a0] sm:$0xff]  ;;  %v2517_v27 = vld [vmem:[%s13922_s29 + $0x21b0] sm:$0xff]  ;;  %2514 = vst [vmem:[%s13930_s30 + $0x10c8] sm:$0xff] %v2513_v25 }
 0x122   : > { %2516 = vst [vmem:[%s13930_s30 + $0x10d0] sm:$0xff] %v2515_v26  ;;  %2518 = vst [vmem:[%s13930_s30 + $0x10d8] sm:$0xff] %v2517_v27  ;;  %v2519_v28 = vld [vmem:[%s13922_s29 + $0x21c0] sm:$0xff]  ;;  %v2521_v29 = vld [vmem:[%s13922_s29 + $0x21d0] sm:$0xff] }
 0x123   : > { %v2523_v30 = vld [vmem:[%s13922_s29 + $0x21e0] sm:$0xff]  ;;  %2520 = vst [vmem:[%s13930_s30 + $0x10e0] sm:$0xff] %v2519_v28  ;;  %2522 = vst [vmem:[%s13930_s30 + $0x10e8] sm:$0xff] %v2521_v29  ;;  %v2525_v31 = vld [vmem:[%s13922_s29 + $0x21f0] sm:$0xff] }
 0x124   : > { %2524 = vst [vmem:[%s13930_s30 + $0x10f0] sm:$0xff] %v2523_v30  ;;  %v2527_v32 = vld [vmem:[%s13922_s29 + $0x2200] sm:$0xff]  ;;  %v2529_v33 = vld [vmem:[%s13922_s29 + $0x2210] sm:$0xff]  ;;  %2526 = vst [vmem:[%s13930_s30 + $0x10f8] sm:$0xff] %v2525_v31 }
 0x125   : > { %2528 = vst [vmem:[%s13930_s30 + $0x1100] sm:$0xff] %v2527_v32  ;;  %2530 = vst [vmem:[%s13930_s30 + $0x1108] sm:$0xff] %v2529_v33  ;;  %v2531_v34 = vld [vmem:[%s13922_s29 + $0x2220] sm:$0xff]  ;;  %v2533_v35 = vld [vmem:[%s13922_s29 + $0x2230] sm:$0xff] }
 0x126   : > { %v2535_v36 = vld [vmem:[%s13922_s29 + $0x2240] sm:$0xff]  ;;  %2532 = vst [vmem:[%s13930_s30 + $0x1110] sm:$0xff] %v2531_v34  ;;  %2534 = vst [vmem:[%s13930_s30 + $0x1118] sm:$0xff] %v2533_v35  ;;  %v2537_v37 = vld [vmem:[%s13922_s29 + $0x2250] sm:$0xff] }
 0x127   : > { %2536 = vst [vmem:[%s13930_s30 + $0x1120] sm:$0xff] %v2535_v36  ;;  %v2539_v38 = vld [vmem:[%s13922_s29 + $0x2260] sm:$0xff]  ;;  %v2541_v39 = vld [vmem:[%s13922_s29 + $0x2270] sm:$0xff]  ;;  %2538 = vst [vmem:[%s13930_s30 + $0x1128] sm:$0xff] %v2537_v37 }
 0x128   : > { %2540 = vst [vmem:[%s13930_s30 + $0x1130] sm:$0xff] %v2539_v38  ;;  %2542 = vst [vmem:[%s13930_s30 + $0x1138] sm:$0xff] %v2541_v39  ;;  %v2543_v40 = vld [vmem:[%s13922_s29 + $0x2280] sm:$0xff]  ;;  %v2545_v41 = vld [vmem:[%s13922_s29 + $0x2290] sm:$0xff] }
 0x129   : > { %v2547_v42 = vld [vmem:[%s13922_s29 + $0x22a0] sm:$0xff]  ;;  %2544 = vst [vmem:[%s13930_s30 + $0x1140] sm:$0xff] %v2543_v40  ;;  %2546 = vst [vmem:[%s13930_s30 + $0x1148] sm:$0xff] %v2545_v41  ;;  %v2549_v43 = vld [vmem:[%s13922_s29 + $0x22b0] sm:$0xff] }
 0x12a   : > { %2548 = vst [vmem:[%s13930_s30 + $0x1150] sm:$0xff] %v2547_v42  ;;  %v2551_v44 = vld [vmem:[%s13922_s29 + $0x22c0] sm:$0xff]  ;;  %v2553_v45 = vld [vmem:[%s13922_s29 + $0x22d0] sm:$0xff]  ;;  %2550 = vst [vmem:[%s13930_s30 + $0x1158] sm:$0xff] %v2549_v43 }
 0x12b   : > { %2552 = vst [vmem:[%s13930_s30 + $0x1160] sm:$0xff] %v2551_v44  ;;  %2554 = vst [vmem:[%s13930_s30 + $0x1168] sm:$0xff] %v2553_v45  ;;  %v2555_v46 = vld [vmem:[%s13922_s29 + $0x22e0] sm:$0xff]  ;;  %v2557_v47 = vld [vmem:[%s13922_s29 + $0x22f0] sm:$0xff] }
 0x12c   : > { %v2559_v48 = vld [vmem:[%s13922_s29 + $0x2300] sm:$0xff]  ;;  %2556 = vst [vmem:[%s13930_s30 + $0x1170] sm:$0xff] %v2555_v46  ;;  %2558 = vst [vmem:[%s13930_s30 + $0x1178] sm:$0xff] %v2557_v47  ;;  %v2561_v49 = vld [vmem:[%s13922_s29 + $0x2310] sm:$0xff] }
 0x12d   : > { %2560 = vst [vmem:[%s13930_s30 + $0x1180] sm:$0xff] %v2559_v48  ;;  %v2563_v50 = vld [vmem:[%s13922_s29 + $0x2320] sm:$0xff]  ;;  %v2565_v51 = vld [vmem:[%s13922_s29 + $0x2330] sm:$0xff]  ;;  %2562 = vst [vmem:[%s13930_s30 + $0x1188] sm:$0xff] %v2561_v49 }
 0x12e   : > { %2564 = vst [vmem:[%s13930_s30 + $0x1190] sm:$0xff] %v2563_v50  ;;  %2566 = vst [vmem:[%s13930_s30 + $0x1198] sm:$0xff] %v2565_v51  ;;  %v2567_v52 = vld [vmem:[%s13922_s29 + $0x2340] sm:$0xff]  ;;  %v2569_v53 = vld [vmem:[%s13922_s29 + $0x2350] sm:$0xff] }
 0x12f   : > { %v2571_v54 = vld [vmem:[%s13922_s29 + $0x2360] sm:$0xff]  ;;  %2568 = vst [vmem:[%s13930_s30 + $0x11a0] sm:$0xff] %v2567_v52  ;;  %2570 = vst [vmem:[%s13930_s30 + $0x11a8] sm:$0xff] %v2569_v53  ;;  %v2573_v55 = vld [vmem:[%s13922_s29 + $0x2370] sm:$0xff] }
 0x130   : > { %2572 = vst [vmem:[%s13930_s30 + $0x11b0] sm:$0xff] %v2571_v54  ;;  %v2575_v56 = vld [vmem:[%s13922_s29 + $0x2380] sm:$0xff]  ;;  %v2577_v57 = vld [vmem:[%s13922_s29 + $0x2390] sm:$0xff]  ;;  %2574 = vst [vmem:[%s13930_s30 + $0x11b8] sm:$0xff] %v2573_v55 }
 0x131   : > { %2576 = vst [vmem:[%s13930_s30 + $0x11c0] sm:$0xff] %v2575_v56  ;;  %2578 = vst [vmem:[%s13930_s30 + $0x11c8] sm:$0xff] %v2577_v57  ;;  %v2579_v58 = vld [vmem:[%s13922_s29 + $0x23a0] sm:$0xff]  ;;  %v2581_v59 = vld [vmem:[%s13922_s29 + $0x23b0] sm:$0xff] }
 0x132   : > { %v2583_v60 = vld [vmem:[%s13922_s29 + $0x23c0] sm:$0xff]  ;;  %2580 = vst [vmem:[%s13930_s30 + $0x11d0] sm:$0xff] %v2579_v58  ;;  %2582 = vst [vmem:[%s13930_s30 + $0x11d8] sm:$0xff] %v2581_v59  ;;  %v2585_v61 = vld [vmem:[%s13922_s29 + $0x23d0] sm:$0xff] }
 0x133   : > { %2584 = vst [vmem:[%s13930_s30 + $0x11e0] sm:$0xff] %v2583_v60  ;;  %v2587_v62 = vld [vmem:[%s13922_s29 + $0x23e0] sm:$0xff]  ;;  %v2589_v63 = vld [vmem:[%s13922_s29 + $0x23f0] sm:$0xff]  ;;  %2586 = vst [vmem:[%s13930_s30 + $0x11e8] sm:$0xff] %v2585_v61 }
 0x134   : > { %2588 = vst [vmem:[%s13930_s30 + $0x11f0] sm:$0xff] %v2587_v62  ;;  %2590 = vst [vmem:[%s13930_s30 + $0x11f8] sm:$0xff] %v2589_v63  ;;  %v2591_v0 = vld [vmem:[%s13922_s29 + $0x2400] sm:$0xff]  ;;  %v2593_v1 = vld [vmem:[%s13922_s29 + $0x2410] sm:$0xff] }
 0x135   : > { %v2595_v2 = vld [vmem:[%s13922_s29 + $0x2420] sm:$0xff]  ;;  %2592 = vst [vmem:[%s13930_s30 + $0x1200] sm:$0xff] %v2591_v0  ;;  %2594 = vst [vmem:[%s13930_s30 + $0x1208] sm:$0xff] %v2593_v1  ;;  %v2597_v3 = vld [vmem:[%s13922_s29 + $0x2430] sm:$0xff] }
 0x136   : > { %2596 = vst [vmem:[%s13930_s30 + $0x1210] sm:$0xff] %v2595_v2  ;;  %v2599_v4 = vld [vmem:[%s13922_s29 + $0x2440] sm:$0xff]  ;;  %v2601_v5 = vld [vmem:[%s13922_s29 + $0x2450] sm:$0xff]  ;;  %2598 = vst [vmem:[%s13930_s30 + $0x1218] sm:$0xff] %v2597_v3 }
 0x137   : > { %2600 = vst [vmem:[%s13930_s30 + $0x1220] sm:$0xff] %v2599_v4  ;;  %2602 = vst [vmem:[%s13930_s30 + $0x1228] sm:$0xff] %v2601_v5  ;;  %v2603_v6 = vld [vmem:[%s13922_s29 + $0x2460] sm:$0xff]  ;;  %v2605_v7 = vld [vmem:[%s13922_s29 + $0x2470] sm:$0xff] }
 0x138   : > { %v2607_v8 = vld [vmem:[%s13922_s29 + $0x2480] sm:$0xff]  ;;  %2604 = vst [vmem:[%s13930_s30 + $0x1230] sm:$0xff] %v2603_v6  ;;  %2606 = vst [vmem:[%s13930_s30 + $0x1238] sm:$0xff] %v2605_v7  ;;  %v2609_v9 = vld [vmem:[%s13922_s29 + $0x2490] sm:$0xff] }
 0x139   : > { %2608 = vst [vmem:[%s13930_s30 + $0x1240] sm:$0xff] %v2607_v8  ;;  %v2611_v10 = vld [vmem:[%s13922_s29 + $0x24a0] sm:$0xff]  ;;  %v2613_v11 = vld [vmem:[%s13922_s29 + $0x24b0] sm:$0xff]  ;;  %2610 = vst [vmem:[%s13930_s30 + $0x1248] sm:$0xff] %v2609_v9 }
 0x13a   : > { %2612 = vst [vmem:[%s13930_s30 + $0x1250] sm:$0xff] %v2611_v10  ;;  %2614 = vst [vmem:[%s13930_s30 + $0x1258] sm:$0xff] %v2613_v11  ;;  %v2615_v12 = vld [vmem:[%s13922_s29 + $0x24c0] sm:$0xff]  ;;  %v2617_v13 = vld [vmem:[%s13922_s29 + $0x24d0] sm:$0xff] }
 0x13b   : > { %v2619_v14 = vld [vmem:[%s13922_s29 + $0x24e0] sm:$0xff]  ;;  %2616 = vst [vmem:[%s13930_s30 + $0x1260] sm:$0xff] %v2615_v12  ;;  %2618 = vst [vmem:[%s13930_s30 + $0x1268] sm:$0xff] %v2617_v13  ;;  %v2621_v15 = vld [vmem:[%s13922_s29 + $0x24f0] sm:$0xff] }
 0x13c   : > { %2620 = vst [vmem:[%s13930_s30 + $0x1270] sm:$0xff] %v2619_v14  ;;  %v2623_v16 = vld [vmem:[%s13922_s29 + $0x2500] sm:$0xff]  ;;  %v2625_v17 = vld [vmem:[%s13922_s29 + $0x2510] sm:$0xff]  ;;  %2622 = vst [vmem:[%s13930_s30 + $0x1278] sm:$0xff] %v2621_v15 }
 0x13d   : > { %2624 = vst [vmem:[%s13930_s30 + $0x1280] sm:$0xff] %v2623_v16  ;;  %2626 = vst [vmem:[%s13930_s30 + $0x1288] sm:$0xff] %v2625_v17  ;;  %v2627_v18 = vld [vmem:[%s13922_s29 + $0x2520] sm:$0xff]  ;;  %v2629_v19 = vld [vmem:[%s13922_s29 + $0x2530] sm:$0xff] }
 0x13e   : > { %v2631_v20 = vld [vmem:[%s13922_s29 + $0x2540] sm:$0xff]  ;;  %2628 = vst [vmem:[%s13930_s30 + $0x1290] sm:$0xff] %v2627_v18  ;;  %2630 = vst [vmem:[%s13930_s30 + $0x1298] sm:$0xff] %v2629_v19  ;;  %v2633_v21 = vld [vmem:[%s13922_s29 + $0x2550] sm:$0xff] }
 0x13f   : > { %2632 = vst [vmem:[%s13930_s30 + $0x12a0] sm:$0xff] %v2631_v20  ;;  %v2635_v22 = vld [vmem:[%s13922_s29 + $0x2560] sm:$0xff]  ;;  %v2637_v23 = vld [vmem:[%s13922_s29 + $0x2570] sm:$0xff]  ;;  %2634 = vst [vmem:[%s13930_s30 + $0x12a8] sm:$0xff] %v2633_v21 }
 0x140   : > { %2636 = vst [vmem:[%s13930_s30 + $0x12b0] sm:$0xff] %v2635_v22  ;;  %2638 = vst [vmem:[%s13930_s30 + $0x12b8] sm:$0xff] %v2637_v23  ;;  %v2639_v24 = vld [vmem:[%s13922_s29 + $0x2580] sm:$0xff]  ;;  %v2641_v25 = vld [vmem:[%s13922_s29 + $0x2590] sm:$0xff] }
 0x141   : > { %v2643_v26 = vld [vmem:[%s13922_s29 + $0x25a0] sm:$0xff]  ;;  %2640 = vst [vmem:[%s13930_s30 + $0x12c0] sm:$0xff] %v2639_v24  ;;  %2642 = vst [vmem:[%s13930_s30 + $0x12c8] sm:$0xff] %v2641_v25  ;;  %v2645_v27 = vld [vmem:[%s13922_s29 + $0x25b0] sm:$0xff] }
 0x142   : > { %2644 = vst [vmem:[%s13930_s30 + $0x12d0] sm:$0xff] %v2643_v26  ;;  %v2647_v28 = vld [vmem:[%s13922_s29 + $0x25c0] sm:$0xff]  ;;  %v2649_v29 = vld [vmem:[%s13922_s29 + $0x25d0] sm:$0xff]  ;;  %2646 = vst [vmem:[%s13930_s30 + $0x12d8] sm:$0xff] %v2645_v27 }
 0x143   : > { %2648 = vst [vmem:[%s13930_s30 + $0x12e0] sm:$0xff] %v2647_v28  ;;  %2650 = vst [vmem:[%s13930_s30 + $0x12e8] sm:$0xff] %v2649_v29  ;;  %v2651_v30 = vld [vmem:[%s13922_s29 + $0x25e0] sm:$0xff]  ;;  %v2653_v31 = vld [vmem:[%s13922_s29 + $0x25f0] sm:$0xff] }
 0x144   : > { %v2655_v32 = vld [vmem:[%s13922_s29 + $0x2600] sm:$0xff]  ;;  %2652 = vst [vmem:[%s13930_s30 + $0x12f0] sm:$0xff] %v2651_v30  ;;  %2654 = vst [vmem:[%s13930_s30 + $0x12f8] sm:$0xff] %v2653_v31  ;;  %v2657_v33 = vld [vmem:[%s13922_s29 + $0x2610] sm:$0xff] }
 0x145   : > { %2656 = vst [vmem:[%s13930_s30 + $0x1300] sm:$0xff] %v2655_v32  ;;  %v2659_v34 = vld [vmem:[%s13922_s29 + $0x2620] sm:$0xff]  ;;  %v2661_v35 = vld [vmem:[%s13922_s29 + $0x2630] sm:$0xff]  ;;  %2658 = vst [vmem:[%s13930_s30 + $0x1308] sm:$0xff] %v2657_v33 }
 0x146   : > { %2660 = vst [vmem:[%s13930_s30 + $0x1310] sm:$0xff] %v2659_v34  ;;  %2662 = vst [vmem:[%s13930_s30 + $0x1318] sm:$0xff] %v2661_v35  ;;  %v2663_v36 = vld [vmem:[%s13922_s29 + $0x2640] sm:$0xff]  ;;  %v2665_v37 = vld [vmem:[%s13922_s29 + $0x2650] sm:$0xff] }
 0x147   : > { %v2667_v38 = vld [vmem:[%s13922_s29 + $0x2660] sm:$0xff]  ;;  %2664 = vst [vmem:[%s13930_s30 + $0x1320] sm:$0xff] %v2663_v36  ;;  %2666 = vst [vmem:[%s13930_s30 + $0x1328] sm:$0xff] %v2665_v37  ;;  %v2669_v39 = vld [vmem:[%s13922_s29 + $0x2670] sm:$0xff] }
 0x148   : > { %2668 = vst [vmem:[%s13930_s30 + $0x1330] sm:$0xff] %v2667_v38  ;;  %v2671_v40 = vld [vmem:[%s13922_s29 + $0x2680] sm:$0xff]  ;;  %v2673_v41 = vld [vmem:[%s13922_s29 + $0x2690] sm:$0xff]  ;;  %2670 = vst [vmem:[%s13930_s30 + $0x1338] sm:$0xff] %v2669_v39 }
 0x149   : > { %2672 = vst [vmem:[%s13930_s30 + $0x1340] sm:$0xff] %v2671_v40  ;;  %2674 = vst [vmem:[%s13930_s30 + $0x1348] sm:$0xff] %v2673_v41  ;;  %v2675_v42 = vld [vmem:[%s13922_s29 + $0x26a0] sm:$0xff]  ;;  %v2677_v43 = vld [vmem:[%s13922_s29 + $0x26b0] sm:$0xff] }
 0x14a   : > { %v2679_v44 = vld [vmem:[%s13922_s29 + $0x26c0] sm:$0xff]  ;;  %2676 = vst [vmem:[%s13930_s30 + $0x1350] sm:$0xff] %v2675_v42  ;;  %2678 = vst [vmem:[%s13930_s30 + $0x1358] sm:$0xff] %v2677_v43  ;;  %v2681_v45 = vld [vmem:[%s13922_s29 + $0x26d0] sm:$0xff] }
 0x14b   : > { %2680 = vst [vmem:[%s13930_s30 + $0x1360] sm:$0xff] %v2679_v44  ;;  %v2683_v46 = vld [vmem:[%s13922_s29 + $0x26e0] sm:$0xff]  ;;  %v2685_v47 = vld [vmem:[%s13922_s29 + $0x26f0] sm:$0xff]  ;;  %2682 = vst [vmem:[%s13930_s30 + $0x1368] sm:$0xff] %v2681_v45 }
 0x14c   : > { %2684 = vst [vmem:[%s13930_s30 + $0x1370] sm:$0xff] %v2683_v46  ;;  %2686 = vst [vmem:[%s13930_s30 + $0x1378] sm:$0xff] %v2685_v47 }
 0x14d PF: > { %p11550_p7 = scmp.ge.s32.totalorder %s13854_s17, 1  ;;  %p5223_p8 = scmp.lt.s32.totalorder %s13854_s17, 3 }
 0x14f   : > { %p5224_p9 = pnand %p11550_p7, %p5223_p8 }
 0x150   : > { %s5230_s5 = sand.u32 (!%p5224_p9), 1, %s13846_s15   ;;  %v12781_v48 = vld [vmem:[%s16346_s0 + $0x4] ss:$156 sps:$4 sm:$0xff] (!%p5224_p9)   ;;  %v12787_v49 = vld [vmem:[%s16346_s0 + $0x54] ss:$156 sps:$4 sm:$0xff] (!%p5224_p9)  }
 0x151   : > { %5227 = sbr.rel (%p5224_p9) target bundleno = 1235 (0x4d3), region = 84  ;;  %9940 = vmatprep.mubr.bf16.mxu1 (!%p5224_p9), %v12781_v48  ;;  %10650 = vmatprep.mubr.bf16.mxu0 (!%p5224_p9), %v12787_v49 }
 0x152   : > { %s12654_s6 = smul.u32 (!%p5224_p9), 4992, %s5230_s5 }
 0x153   : > { %s12655_s27 = smul.u32 (!%p5224_p9), 112, %s5230_s5 }
 0x154   : > { %s15185_s11 = scalar_lea.vmem (!%p5224_p9), [#allocation2], %s12654_s6 }
 0x155   : > { %v12683_v50 = vld [vmem:[%s15185_s11 + $0x4] ss:$8 sps:$4 sm:$0xff] (!%p5224_p9)   ;;  %v12687_v52 = vld [vmem:[%s15185_s11] ss:$8 sps:$4 sm:$0xff] (!%p5224_p9)   ;;  %v12689_v54 = vld [vmem:[%s15185_s11 + $0x14] ss:$8 sps:$4 sm:$0xff] (!%p5224_p9)  }
 0x156   : > { %v12685_v51 = vld [vmem:[%s15185_s11 + $0xa04] ss:$8 sps:$4 sm:$0xff] (!%p5224_p9)   ;;  %9908 = vmatprep.subr.bf16.mxu1 (!%p5224_p9), %v12683_v50  ;;  %v12688_v53 = vld [vmem:[%s15185_s11 + $0xa00] ss:$8 sps:$4 sm:$0xff] (!%p5224_p9)   ;;  %v12691_v55 = vld [vmem:[%s15185_s11 + $0xa14] ss:$8 sps:$4 sm:$0xff] (!%p5224_p9)  }
 0x157   : > { %10618 = vmatprep.subr.bf16.mxu0 (!%p5224_p9), %v12685_v51  ;;  %9909 = vmatpush1.bf16.msra.mxu1 (!%p5224_p9), %v12687_v52  ;;  %v12693_v56 = vld [vmem:[%s15185_s11 + $0x10] ss:$8 sps:$4 sm:$0xff] (!%p5224_p9)   ;;  %v12695_v58 = vld [vmem:[%s15185_s11 + $0x24] ss:$8 sps:$4 sm:$0xff] (!%p5224_p9)   ;;  %v12699_v60 = vld [vmem:[%s15185_s11 + $0x20] ss:$8 sps:$4 sm:$0xff] (!%p5224_p9)  }
 0x158   : > { %10619 = vmatpush1.bf16.msra.mxu0 %v12688_v53  ;;  %9910 = vmatprep.subr.bf16.mxu1 %v12689_v54  ;;  %v12694_v57 = vld [vmem:[%s15185_s11 + $0xa10] ss:$8 sps:$4 sm:$0xff]   ;;  %v12697_v59 = vld [vmem:[%s15185_s11 + $0xa24] ss:$8 sps:$4 sm:$0xff]   ;;  %v12700_v61 = vld [vmem:[%s15185_s11 + $0xa20] ss:$8 sps:$4 sm:$0xff]  }
 0x159   : > { %10620 = vmatprep.subr.bf16.mxu0 %v12691_v55  ;;  %v12701_v62 = vld [vmem:[%s15185_s11 + $0x34] ss:$8 sps:$4 sm:$0xff]   ;;  %v12705_v0 = vld [vmem:[%s15185_s11 + $0x30] ss:$8 sps:$4 sm:$0xff]   ;;  %v12707_v2 = vld [vmem:[%s15185_s11 + $0x44] ss:$8 sps:$4 sm:$0xff]  }
 0x15a   : > { %v12703_v63 = vld [vmem:[%s15185_s11 + $0xa34] ss:$8 sps:$4 sm:$0xff]   ;;  %v12706_v1 = vld [vmem:[%s15185_s11 + $0xa30] ss:$8 sps:$4 sm:$0xff]   ;;  %v12709_v3 = vld [vmem:[%s15185_s11 + $0xa44] ss:$8 sps:$4 sm:$0xff]  }
 0x15b   : > { %9911 = vmatpush1.bf16.msra.mxu1 %v12693_v56  ;;  %v12711_v4 = vld [vmem:[%s15185_s11 + $0x40] ss:$8 sps:$4 sm:$0xff]   ;;  %v12713_v6 = vld [vmem:[%s15185_s11 + $0x54] ss:$8 sps:$4 sm:$0xff]   ;;  %v12717_v8 = vld [vmem:[%s15185_s11 + $0x50] ss:$8 sps:$4 sm:$0xff]  }
 0x15c   : > { %10621 = vmatpush1.bf16.msra.mxu0 %v12694_v57  ;;  %9912 = vmatprep.subr.bf16.mxu1 %v12695_v58  ;;  %v12712_v5 = vld [vmem:[%s15185_s11 + $0xa40] ss:$8 sps:$4 sm:$0xff]   ;;  %v12715_v7 = vld [vmem:[%s15185_s11 + $0xa54] ss:$8 sps:$4 sm:$0xff]   ;;  %v12718_v9 = vld [vmem:[%s15185_s11 + $0xa50] ss:$8 sps:$4 sm:$0xff]  }
 0x15d   : > { %10622 = vmatprep.subr.bf16.mxu0 %v12697_v59  ;;  %v12719_v10 = vld [vmem:[%s15185_s11 + $0x64] ss:$8 sps:$4 sm:$0xff]   ;;  %v12723_v12 = vld [vmem:[%s15185_s11 + $0x60] ss:$8 sps:$4 sm:$0xff]   ;;  %v12725_v14 = vld [vmem:[%s15185_s11 + $0x74] ss:$8 sps:$4 sm:$0xff]  }
 0x15e   : > { %v12721_v11 = vld [vmem:[%s15185_s11 + $0xa64] ss:$8 sps:$4 sm:$0xff]   ;;  %v12724_v13 = vld [vmem:[%s15185_s11 + $0xa60] ss:$8 sps:$4 sm:$0xff]   ;;  %v12727_v15 = vld [vmem:[%s15185_s11 + $0xa74] ss:$8 sps:$4 sm:$0xff]  }
 0x15f   : > { %9913 = vmatpush1.bf16.msra.mxu1 %v12699_v60  ;;  %v12729_v16 = vld [vmem:[%s15185_s11 + $0x70] ss:$8 sps:$4 sm:$0xff]   ;;  %v12731_v18 = vld [vmem:[%s15185_s11 + $0x84] ss:$8 sps:$4 sm:$0xff]   ;;  %v12735_v20 = vld [vmem:[%s15185_s11 + $0x80] ss:$8 sps:$4 sm:$0xff]  }
 0x160   : > { %10623 = vmatpush1.bf16.msra.mxu0 %v12700_v61  ;;  %9914 = vmatprep.subr.bf16.mxu1 %v12701_v62  ;;  %v12730_v17 = vld [vmem:[%s15185_s11 + $0xa70] ss:$8 sps:$4 sm:$0xff]   ;;  %v12733_v19 = vld [vmem:[%s15185_s11 + $0xa84] ss:$8 sps:$4 sm:$0xff]   ;;  %v12736_v21 = vld [vmem:[%s15185_s11 + $0xa80] ss:$8 sps:$4 sm:$0xff]  }
 0x161   : > { %10624 = vmatprep.subr.bf16.mxu0 %v12703_v63  ;;  %v12737_v22 = vld [vmem:[%s15185_s11 + $0x94] ss:$8 sps:$4 sm:$0xff]   ;;  %v12741_v24 = vld [vmem:[%s15185_s11 + $0x90] ss:$8 sps:$4 sm:$0xff]   ;;  %v12743_v26 = vld [vmem:[%s15185_s11 + $0xa4] ss:$8 sps:$4 sm:$0xff]  }
 0x162   : > { %v12739_v23 = vld [vmem:[%s15185_s11 + $0xa94] ss:$8 sps:$4 sm:$0xff]   ;;  %v12742_v25 = vld [vmem:[%s15185_s11 + $0xa90] ss:$8 sps:$4 sm:$0xff]   ;;  %v12745_v27 = vld [vmem:[%s15185_s11 + $0xaa4] ss:$8 sps:$4 sm:$0xff]  }
 0x163   : > { %9915 = vmatpush1.bf16.msra.mxu1 %v12705_v0  ;;  %v12747_v28 = vld [vmem:[%s15185_s11 + $0xa0] ss:$8 sps:$4 sm:$0xff]   ;;  %v12749_v30 = vld [vmem:[%s15185_s11 + $0xb4] ss:$8 sps:$4 sm:$0xff]   ;;  %v12753_v32 = vld [vmem:[%s15185_s11 + $0xb0] ss:$8 sps:$4 sm:$0xff]  }
 0x164   : > { %10625 = vmatpush1.bf16.msra.mxu0 %v12706_v1  ;;  %9916 = vmatprep.subr.bf16.mxu1 %v12707_v2  ;;  %v12748_v29 = vld [vmem:[%s15185_s11 + $0xaa0] ss:$8 sps:$4 sm:$0xff]   ;;  %v12751_v31 = vld [vmem:[%s15185_s11 + $0xab4] ss:$8 sps:$4 sm:$0xff]   ;;  %v12754_v33 = vld [vmem:[%s15185_s11 + $0xab0] ss:$8 sps:$4 sm:$0xff]  }
 0x165   : > { %10626 = vmatprep.subr.bf16.mxu0 %v12709_v3  ;;  %v12755_v34 = vld [vmem:[%s15185_s11 + $0xc4] ss:$8 sps:$4 sm:$0xff]   ;;  %v12759_v36 = vld [vmem:[%s15185_s11 + $0xc0] ss:$8 sps:$4 sm:$0xff]   ;;  %v12761_v38 = vld [vmem:[%s15185_s11 + $0xd4] ss:$8 sps:$4 sm:$0xff]  }
 0x166   : > { %v12757_v35 = vld [vmem:[%s15185_s11 + $0xac4] ss:$8 sps:$4 sm:$0xff]   ;;  %v12760_v37 = vld [vmem:[%s15185_s11 + $0xac0] ss:$8 sps:$4 sm:$0xff]   ;;  %v12763_v39 = vld [vmem:[%s15185_s11 + $0xad4] ss:$8 sps:$4 sm:$0xff]  }
 0x167   : > { %9917 = vmatpush1.bf16.msra.mxu1 %v12711_v4  ;;  %v12765_v40 = vld [vmem:[%s15185_s11 + $0xd0] ss:$8 sps:$4 sm:$0xff]   ;;  %v12767_v42 = vld [vmem:[%s15185_s11 + $0xe4] ss:$8 sps:$4 sm:$0xff]   ;;  %v12771_v44 = vld [vmem:[%s15185_s11 + $0xe0] ss:$8 sps:$4 sm:$0xff]  }
 0x168   : > { %10627 = vmatpush1.bf16.msra.mxu0 %v12712_v5  ;;  %9918 = vmatprep.subr.bf16.mxu1 %v12713_v6  ;;  %v12766_v41 = vld [vmem:[%s15185_s11 + $0xad0] ss:$8 sps:$4 sm:$0xff]   ;;  %v12769_v43 = vld [vmem:[%s15185_s11 + $0xae4] ss:$8 sps:$4 sm:$0xff]   ;;  %v12772_v45 = vld [vmem:[%s15185_s11 + $0xae0] ss:$8 sps:$4 sm:$0xff]  }
 0x169   : > { %10628 = vmatprep.subr.bf16.mxu0 %v12715_v7  ;;  %v12773_v46 = vld [vmem:[%s15185_s11 + $0xf4] ss:$8 sps:$4 sm:$0xff]   ;;  %v12777_v48 = vld [vmem:[%s15185_s11 + $0xf0] ss:$8 sps:$4 sm:$0xff]   ;;  %v12784_v50 = vld [vmem:[%s15185_s11 + $0x104] ss:$8 sps:$4 sm:$0xff]  }
 0x16a   : > { %v12775_v47 = vld [vmem:[%s15185_s11 + $0xaf4] ss:$8 sps:$4 sm:$0xff]   ;;  %v12778_v49 = vld [vmem:[%s15185_s11 + $0xaf0] ss:$8 sps:$4 sm:$0xff]   ;;  %v12790_v51 = vld [vmem:[%s15185_s11 + $0xb04] ss:$8 sps:$4 sm:$0xff]  }
 0x16b   : > { %9919 = vmatpush1.bf16.msra.mxu1 %v12717_v8  ;;  %v12779_v52 = vld [vmem:[%s16346_s0] ss:$156 sps:$4 sm:$0xff]   ;;  %v12785_v53 = vld [vmem:[%s16346_s0 + $0x50] ss:$156 sps:$4 sm:$0xff]   ;;  %v12855_v4 = vld [vmem:[%s16346_s0 + $0x138] ss:$156 sps:$4 sm:$0xff]  }
 0x16c   : > { %10629 = vmatpush1.bf16.msra.mxu0 %v12718_v9  ;;  %9920 = vmatprep.subr.bf16.mxu1 %v12719_v10  ;;  %v12782_v54 = vld [vmem:[%s15185_s11 + $0x100] ss:$8 sps:$4 sm:$0xff]   ;;  %v12793_v56 = vld [vmem:[%s15185_s11 + $0x114] ss:$8 sps:$4 sm:$0xff]   ;;  %v12791_v59 = vld [vmem:[%s15185_s11 + $0x110] ss:$8 sps:$4 sm:$0xff]  }
 0x16d   : > { %10630 = vmatprep.subr.bf16.mxu0 %v12721_v11  ;;  %v12788_v55 = vld [vmem:[%s15185_s11 + $0xb00] ss:$8 sps:$4 sm:$0xff]   ;;  %v12796_v57 = vld [vmem:[%s15185_s11 + $0xb14] ss:$8 sps:$4 sm:$0xff]   ;;  %v12794_v60 = vld [vmem:[%s15185_s11 + $0xb10] ss:$8 sps:$4 sm:$0xff]  }
 0x16e   : > { %v12845_v58 = vld [vmem:[%s16346_s0 + $0x13c] ss:$156 sps:$4 sm:$0xff]   ;;  %v12799_v61 = vld [vmem:[%s15185_s11 + $0x124] ss:$8 sps:$4 sm:$0xff]   ;;  %v12797_v63 = vld [vmem:[%s15185_s11 + $0x120] ss:$8 sps:$4 sm:$0xff]  }
 0x16f   : > { %9921 = vmatpush1.bf16.msra.mxu1 %v12723_v12  ;;  %v12802_v62 = vld [vmem:[%s15185_s11 + $0xb24] ss:$8 sps:$4 sm:$0xff]   ;;  %v12800_v0 = vld [vmem:[%s15185_s11 + $0xb20] ss:$8 sps:$4 sm:$0xff]   ;;  %v12805_v2 = vld [vmem:[%s15185_s11 + $0x134] ss:$8 sps:$4 sm:$0xff]  }
 0x170   : > { %10631 = vmatpush1.bf16.msra.mxu0 %v12724_v13  ;;  %9922 = vmatprep.subr.bf16.mxu1 %v12725_v14  ;;  %v12850_v1 = vld [vmem:[%s16346_s0 + $0x18c] ss:$156 sps:$4 sm:$0xff]   ;;  %v12808_v3 = vld [vmem:[%s15185_s11 + $0xb34] ss:$8 sps:$4 sm:$0xff]   ;;  %v12803_v6 = vld [vmem:[%s15185_s11 + $0x130] ss:$8 sps:$4 sm:$0xff]  }
 0x171   : > { %10632 = vmatprep.subr.bf16.mxu0 %v12727_v15  ;;  %v12856_v5 = vld [vmem:[%s16346_s0 + $0x188] ss:$156 sps:$4 sm:$0xff]   ;;  %v12806_v7 = vld [vmem:[%s15185_s11 + $0xb30] ss:$8 sps:$4 sm:$0xff]   ;;  %v12817_v14 = vld [vmem:[%s15185_s11 + $0x154] ss:$8 sps:$4 sm:$0xff]  }
 0x172   : > { %v12811_v8 = vld [vmem:[%s15185_s11 + $0x144] ss:$8 sps:$4 sm:$0xff]   ;;  %v12863_v9 = vld [vmem:[%s16346_s0 + $0x274] ss:$156 sps:$4 sm:$0xff]   ;;  %v12809_v11 = vld [vmem:[%s15185_s11 + $0x140] ss:$8 sps:$4 sm:$0xff]  }
 0x173   : > { %9923 = vmatpush1.bf16.msra.mxu1 %v12729_v16  ;;  %v12814_v10 = vld [vmem:[%s15185_s11 + $0xb44] ss:$8 sps:$4 sm:$0xff]   ;;  %v12812_v12 = vld [vmem:[%s15185_s11 + $0xb40] ss:$8 sps:$4 sm:$0xff]   ;;  %v12820_v15 = vld [vmem:[%s15185_s11 + $0xb54] ss:$8 sps:$4 sm:$0xff]  }
 0x174   : > { %10633 = vmatpush1.bf16.msra.mxu0 %v12730_v17  ;;  %9924 = vmatprep.subr.bf16.mxu1 %v12731_v18  ;;  %v12868_v13 = vld [vmem:[%s16346_s0 + $0x2c4] ss:$156 sps:$4 sm:$0xff]   ;;  %v12873_v16 = vld [vmem:[%s16346_s0 + $0x270] ss:$156 sps:$4 sm:$0xff]   ;;  %s16286_s15 = scalar_lea.vmem [#allocation3], %s12655_s27  ;;  %s12336_s5 = sshll.u32 (%p13912_p5), %s11544_s18, 4 }
 0x175   : > { %10634 = vmatprep.subr.bf16.mxu0 %v12733_v19  ;;  %v12874_v17 = vld [vmem:[%s16346_s0 + $0x2c0] ss:$156 sps:$4 sm:$0xff]   ;;  %v12815_v18 = vld [vmem:[%s15185_s11 + $0x150] ss:$8 sps:$4 sm:$0xff]   ;;  %s11435_s23 = scalar_lea.vmem (%p13912_p5), %s16350_s4, %s12336_s5 }
 0x176   : > { %v12818_v19 = vld [vmem:[%s15185_s11 + $0xb50] ss:$8 sps:$4 sm:$0xff]  }
 0x177   : > { %9925 = vmatpush1.bf16.msra.mxu1 %v12735_v20  ;;  %v5377_v20 = vld [vmem:[%s16346_s0 + $0x3a8] sm:$0xff] }
 0x178   : > { %10635 = vmatpush1.bf16.msra.mxu0 %v12736_v21  ;;  %9926 = vmatprep.subr.bf16.mxu1 %v12737_v22  ;;  %v12823_v21 = vld [vmem:[%s15185_s11 + $0x164] ss:$8 sps:$4 sm:$0xff]  }
 0x179   : > { %10636 = vmatprep.subr.bf16.mxu0 %v12739_v23  ;;  %v12826_v22 = vld [vmem:[%s15185_s11 + $0xb64] ss:$8 sps:$4 sm:$0xff]   ;;  %v11669_v23 = vcombine.high %v5377_v20, %v5377_v20 }
 0x17b   : > { %9927 = vmatpush1.bf16.msra.mxu1 %v12741_v24  ;;  %v5387_v24 = vld [vmem:[%s16346_s0 + $0x3f8] sm:$0xff] }
 0x17c   : > { %10637 = vmatpush1.bf16.msra.mxu0 %v12742_v25  ;;  %9928 = vmatprep.subr.bf16.mxu1 %v12743_v26  ;;  %v11689_v25 = vcombine.high %v5387_v24, %v5387_v24  ;;  %v11668_v26 = vcombine.low %v5377_v20, %v5377_v20  ;;  %v12974_v20 = vld [vmem:[%s16346_s0 + $0x190] ss:$156 sps:$4 sm:$0xff]  }
 0x17d   : > { %10638 = vmatprep.subr.bf16.mxu0 %v12745_v27  ;;  %v11688_v27 = vcombine.low %v5387_v24, %v5387_v24  ;;  %v12981_v24 = vld [vmem:[%s16346_s0 + $0x27c] ss:$156 sps:$4 sm:$0xff]  }
 0x17f   : > { %9929 = vmatpush1.bf16.msra.mxu1 %v12747_v28  ;;  %v12821_v28 = vld [vmem:[%s15185_s11 + $0x160] ss:$8 sps:$4 sm:$0xff]  }
 0x180   : > { %10639 = vmatpush1.bf16.msra.mxu0 %v12748_v29  ;;  %9930 = vmatprep.subr.bf16.mxu1 %v12749_v30  ;;  %v12824_v29 = vld [vmem:[%s15185_s11 + $0xb60] ss:$8 sps:$4 sm:$0xff]   ;;  %v12829_v30 = vld [vmem:[%s15185_s11 + $0x174] ss:$8 sps:$4 sm:$0xff]  }
 0x181   : > { %10640 = vmatprep.subr.bf16.mxu0 %v12751_v31  ;;  %v12832_v31 = vld [vmem:[%s15185_s11 + $0xb74] ss:$8 sps:$4 sm:$0xff]  }
 0x183   : > { %9931 = vmatpush1.bf16.msra.mxu1 %v12753_v32  ;;  %v12827_v32 = vld [vmem:[%s15185_s11 + $0x170] ss:$8 sps:$4 sm:$0xff]  }
 0x184   : > { %10641 = vmatpush1.bf16.msra.mxu0 %v12754_v33  ;;  %9932 = vmatprep.subr.bf16.mxu1 %v12755_v34  ;;  %v12899_v33 = vld [vmem:[%s16346_s0 + $0xc] ss:$156 sps:$4 sm:$0xff]   ;;  %v12830_v34 = vld [vmem:[%s15185_s11 + $0xb70] ss:$8 sps:$4 sm:$0xff]  }
 0x185   : > { %10642 = vmatprep.subr.bf16.mxu0 %v12757_v35  ;;  %v12835_v35 = vld [vmem:[%s15185_s11 + $0x184] ss:$8 sps:$4 sm:$0xff]  }
 0x187   : > { %9933 = vmatpush1.bf16.msra.mxu1 %v12759_v36  ;;  %v12838_v36 = vld [vmem:[%s15185_s11 + $0xb84] ss:$8 sps:$4 sm:$0xff]  }
 0x188   : > { %10643 = vmatpush1.bf16.msra.mxu0 %v12760_v37  ;;  %9934 = vmatprep.subr.bf16.mxu1 %v12761_v38  ;;  %v12905_v37 = vld [vmem:[%s16346_s0 + $0x5c] ss:$156 sps:$4 sm:$0xff]   ;;  %v12833_v38 = vld [vmem:[%s15185_s11 + $0x180] ss:$8 sps:$4 sm:$0xff]  }
 0x189   : > { %10644 = vmatprep.subr.bf16.mxu0 %v12763_v39  ;;  %v12836_v39 = vld [vmem:[%s15185_s11 + $0xb80] ss:$8 sps:$4 sm:$0xff]  }
 0x18b   : > { %9935 = vmatpush1.bf16.msra.mxu1 %v12765_v40  ;;  %v12841_v40 = vld [vmem:[%s15185_s11 + $0x194] ss:$8 sps:$4 sm:$0xff]  }
 0x18c   : > { %10645 = vmatpush1.bf16.msra.mxu0 %v12766_v41  ;;  %9936 = vmatprep.subr.bf16.mxu1 %v12767_v42  ;;  %v12844_v41 = vld [vmem:[%s15185_s11 + $0xb94] ss:$8 sps:$4 sm:$0xff]   ;;  %v12839_v42 = vld [vmem:[%s15185_s11 + $0x190] ss:$8 sps:$4 sm:$0xff]  }
 0x18d   : > { %10646 = vmatprep.subr.bf16.mxu0 %v12769_v43  ;;  %v12842_v43 = vld [vmem:[%s15185_s11 + $0xb90] ss:$8 sps:$4 sm:$0xff]  }
 0x18f   : > { %9937 = vmatpush1.bf16.msra.mxu1 %v12771_v44  ;;  %v12849_v44 = vld [vmem:[%s15185_s11 + $0x1a4] ss:$8 sps:$4 sm:$0xff]  }
 0x190   : > { %10647 = vmatpush1.bf16.msra.mxu0 %v12772_v45  ;;  %9938 = vmatprep.subr.bf16.mxu1 %v12773_v46  ;;  %v12854_v45 = vld [vmem:[%s15185_s11 + $0xba4] ss:$8 sps:$4 sm:$0xff]   ;;  %v12847_v46 = vld [vmem:[%s15185_s11 + $0x1a0] ss:$8 sps:$4 sm:$0xff]  }
 0x191   : > { %10648 = vmatprep.subr.bf16.mxu0 %v12775_v47  ;;  %v12852_v47 = vld [vmem:[%s15185_s11 + $0xba0] ss:$8 sps:$4 sm:$0xff]  }
 0x193   : > { %9939 = vmatpush1.bf16.msra.mxu1 %v12777_v48  ;;  %v12859_v48 = vld [vmem:[%s15185_s11 + $0x1b4] ss:$8 sps:$4 sm:$0xff]  }
 0x194   : > { %10649 = vmatpush1.bf16.msra.mxu0 %v12778_v49  ;;  %9979 = vmatprep.subr.bf16.mxu1 %v12784_v50  ;;  %v12862_v49 = vld [vmem:[%s15185_s11 + $0xbb4] ss:$8 sps:$4 sm:$0xff]   ;;  %v12857_v50 = vld [vmem:[%s15185_s11 + $0x1b0] ss:$8 sps:$4 sm:$0xff]  }
 0x195   : > { %10689 = vmatprep.subr.bf16.mxu0 %v12790_v51  ;;  %v12860_v51 = vld [vmem:[%s15185_s11 + $0xbb0] ss:$8 sps:$4 sm:$0xff]  }
 0x196   : > { %9941 = vmatmul.mubr.bf16.vlgmr.msra.gmra.mrb[0].mxu1 %v12779_v52  ;;  %v12867_v52 = vld [vmem:[%s15185_s11 + $0x1c4] ss:$8 sps:$4 sm:$0xff]  }
 0x197   : > { %10651 = vmatmul.mubr.bf16.vlgmr.msra.gmra.mrb[0].mxu0 %v12785_v53  ;;  %9980 = vmatpush1.bf16.msra.mxu1 %v12782_v54  ;;  %v12872_v53 = vld [vmem:[%s15185_s11 + $0xbc4] ss:$8 sps:$4 sm:$0xff]   ;;  %v12865_v54 = vld [vmem:[%s15185_s11 + $0x1c0] ss:$8 sps:$4 sm:$0xff]  }
 0x198   : > { %10690 = vmatpush1.bf16.msra.mxu0 %v12788_v55  ;;  %9981 = vmatprep.subr.bf16.mxu1 %v12793_v56  ;;  %v12870_v55 = vld [vmem:[%s15185_s11 + $0xbc0] ss:$8 sps:$4 sm:$0xff]   ;;  %v12877_v56 = vld [vmem:[%s15185_s11 + $0x1d4] ss:$8 sps:$4 sm:$0xff]  }
 0x199   : > { %10691 = vmatprep.subr.bf16.mxu0 %v12796_v57  ;;  %9950 = vmatprep.mubr.bf16.mxu1 %v12845_v58  ;;  %v12880_v57 = vld [vmem:[%s15185_s11 + $0xbd4] ss:$8 sps:$4 sm:$0xff]   ;;  %v12875_v58 = vld [vmem:[%s15185_s11 + $0x1d0] ss:$8 sps:$4 sm:$0xff]  }
 0x19a   : > { %10660 = vmatprep.mubr.bf16.mxu0 %v12850_v1  ;;  %v12896_v1 = vld [vmem:[%s15185_s11 + $0xbf4] ss:$8 sps:$4 sm:$0xff]  }
 0x19b   : > { %9982 = vmatpush1.bf16.msra.mxu1 %v12791_v59  ;;  %v12878_v59 = vld [vmem:[%s15185_s11 + $0xbd0] ss:$8 sps:$4 sm:$0xff]  }
 0x19c   : > { %10692 = vmatpush1.bf16.msra.mxu0 %v12794_v60  ;;  %9983 = vmatprep.subr.bf16.mxu1 %v12799_v61  ;;  %v12884_v60 = vld [vmem:[%s15185_s11 + $0x1e4] ss:$8 sps:$4 sm:$0xff]  }
 0x19d   : > { %10693 = vmatprep.subr.bf16.mxu0 %v12802_v62  ;;  %v12888_v61 = vld [vmem:[%s15185_s11 + $0xbe4] ss:$8 sps:$4 sm:$0xff]   ;;  %v12882_v62 = vld [vmem:[%s15185_s11 + $0x1e0] ss:$8 sps:$4 sm:$0xff]  }
 0x19e   : > { %9951 = vmatmul.mubr.bf16.gmra.mrb[4].mxu1 %v12855_v4  ;;  %v12897_v4 = vld [vmem:[%s16346_s0 + $0x8] ss:$156 sps:$4 sm:$0xff]  }
 0x19f   : > { %10661 = vmatmul.mubr.bf16.gmra.mrb[4].mxu0 %v12856_v5  ;;  %9984 = vmatpush1.bf16.msra.mxu1 %v12797_v63  ;;  %v12886_v63 = vld [vmem:[%s15185_s11 + $0xbe0] ss:$8 sps:$4 sm:$0xff]   ;;  %v12902_v5 = vld [vmem:[%s15185_s11 + $0x204] ss:$8 sps:$4 sm:$0xff]  }
 0x1a0   : > { %10694 = vmatpush1.bf16.msra.mxu0 %v12800_v0  ;;  %9985 = vmatprep.subr.bf16.mxu1 %v12805_v2  ;;  %v12893_v0 = vld [vmem:[%s15185_s11 + $0x1f4] ss:$8 sps:$4 sm:$0xff]   ;;  %v12891_v2 = vld [vmem:[%s15185_s11 + $0x1f0] ss:$8 sps:$4 sm:$0xff]  }
 0x1a1   : > { %10695 = vmatprep.subr.bf16.mxu0 %v12808_v3  ;;  %9960 = vmatprep.mubr.bf16.mxu1 %v12863_v9  ;;  %v12894_v3 = vld [vmem:[%s15185_s11 + $0xbf0] ss:$8 sps:$4 sm:$0xff]   ;;  %v12906_v9 = vld [vmem:[%s15185_s11 + $0xc00] ss:$8 sps:$4 sm:$0xff]  }
 0x1a2   : > { %10670 = vmatprep.mubr.bf16.mxu0 %v12868_v13  ;;  %v12968_v13 = vld [vmem:[%s16346_s0 + $0x194] ss:$156 sps:$4 sm:$0xff]  }
 0x1a3   : > { %9986 = vmatpush1.bf16.msra.mxu1 %v12803_v6  ;;  %v12908_v6 = vld [vmem:[%s15185_s11 + $0xc04] ss:$8 sps:$4 sm:$0xff]  }
 0x1a4   : > { %10696 = vmatpush1.bf16.msra.mxu0 %v12806_v7  ;;  %9987 = vmatprep.subr.bf16.mxu1 %v12811_v8  ;;  %v12900_v7 = vld [vmem:[%s15185_s11 + $0x200] ss:$8 sps:$4 sm:$0xff]   ;;  %v12903_v8 = vld [vmem:[%s16346_s0 + $0x58] ss:$156 sps:$4 sm:$0xff]  }
 0x1a5   : > { %10697 = vmatprep.subr.bf16.mxu0 %v12814_v10  ;;  %v12911_v10 = vld [vmem:[%s15185_s11 + $0x214] ss:$8 sps:$4 sm:$0xff]  }
 0x1a6   : > { %9961 = vmatmul.mubr.bf16.gmra.mrb[8].mxu1 %v12873_v16  ;;  %v12917_v16 = vld [vmem:[%s15185_s11 + $0x224] ss:$8 sps:$4 sm:$0xff]  }
 0x1a7   : > { %10671 = vmatmul.mubr.bf16.gmra.mrb[8].mxu0 %v12874_v17  ;;  %9988 = vmatpush1.bf16.msra.mxu1 %v12809_v11  ;;  %v12914_v11 = vld [vmem:[%s15185_s11 + $0xc14] ss:$8 sps:$4 sm:$0xff]   ;;  %v12920_v17 = vld [vmem:[%s15185_s11 + $0xc24] ss:$8 sps:$4 sm:$0xff]  }
 0x1a8   : > { %10698 = vmatpush1.bf16.msra.mxu0 %v12812_v12  ;;  %9989 = vmatprep.subr.bf16.mxu1 %v12817_v14  ;;  %v12963_v12 = vld [vmem:[%s16346_s0 + $0x144] ss:$156 sps:$4 sm:$0xff]   ;;  %v12909_v14 = vld [vmem:[%s15185_s11 + $0x210] ss:$8 sps:$4 sm:$0xff]  }
 0x1a9   : > { %10699 = vmatprep.subr.bf16.mxu0 %v12820_v15  ;;  %9970 = vmatprep.mubr.bf16.mxu1 %v11669_v23  ;;  %v12912_v15 = vld [vmem:[%s15185_s11 + $0xc10] ss:$8 sps:$4 sm:$0xff]   ;;  %v12926_v23 = vld [vmem:[%s15185_s11 + $0xc34] ss:$8 sps:$4 sm:$0xff]  }
 0x1aa   : > { %10680 = vmatprep.mubr.bf16.mxu0 %v11689_v25  ;;  %v12986_v25 = vld [vmem:[%s16346_s0 + $0x2cc] ss:$156 sps:$4 sm:$0xff]  }
 0x1ab   : > { %9990 = vmatpush1.bf16.msra.mxu1 %v12815_v18  ;;  %v12915_v18 = vld [vmem:[%s15185_s11 + $0x220] ss:$8 sps:$4 sm:$0xff]  }
 0x1ac   : > { %10700 = vmatpush1.bf16.msra.mxu0 %v12818_v19  ;;  %9991 = vmatprep.subr.bf16.mxu1 %v12823_v21  ;;  %v12973_v19 = vld [vmem:[%s16346_s0 + $0x140] ss:$156 sps:$4 sm:$0xff]  }
 0x1ad   : > { %10701 = vmatprep.subr.bf16.mxu0 %v12826_v22  ;;  %v12918_v21 = vld [vmem:[%s15185_s11 + $0xc20] ss:$8 sps:$4 sm:$0xff]   ;;  %v12923_v22 = vld [vmem:[%s15185_s11 + $0x234] ss:$8 sps:$4 sm:$0xff]  }
 0x1ae   : > { %9971 = vmatmul.mubr.bf16.gmra.mrb[12].mxu1 %v11668_v26  ;;  %v12921_v26 = vld [vmem:[%s15185_s11 + $0x230] ss:$8 sps:$4 sm:$0xff]  }
 0x1af   : > { %10681 = vmatmul.mubr.bf16.gmra.mrb[12].mxu0 %v11688_v27  ;;  %9992 = vmatpush1.bf16.msra.mxu1 %v12821_v28  ;;  %v12924_v27 = vld [vmem:[%s15185_s11 + $0xc30] ss:$8 sps:$4 sm:$0xff]   ;;  %v12929_v28 = vld [vmem:[%s15185_s11 + $0x244] ss:$8 sps:$4 sm:$0xff]  }
 0x1b0   : > { %10702 = vmatpush1.bf16.msra.mxu0 %v12824_v29  ;;  %9993 = vmatprep.subr.bf16.mxu1 %v12829_v30  ;;  %v12932_v29 = vld [vmem:[%s15185_s11 + $0xc44] ss:$8 sps:$4 sm:$0xff]   ;;  %v12927_v30 = vld [vmem:[%s15185_s11 + $0x240] ss:$8 sps:$4 sm:$0xff]  }
 0x1b1   : > { %10703 = vmatprep.subr.bf16.mxu0 %v12832_v31  ;;  %10011 = vmatprep.mubr.bf16.mxu1 %v12899_v33  ;;  %v12930_v31 = vld [vmem:[%s15185_s11 + $0xc40] ss:$8 sps:$4 sm:$0xff]  }
 0x1b2   : > { %10721 = vmatprep.mubr.bf16.mxu0 %v12905_v37  ;;  %v12992_v33 = vld [vmem:[%s16346_s0 + $0x2c8] ss:$156 sps:$4 sm:$0xff]   ;;  %v12938_v37 = vld [vmem:[%s15185_s11 + $0xc54] ss:$8 sps:$4 sm:$0xff]  }
 0x1b3   : > { %9994 = vmatpush1.bf16.msra.mxu1 %v12827_v32  ;;  %v12991_v32 = vld [vmem:[%s16346_s0 + $0x278] ss:$156 sps:$4 sm:$0xff]  }
 0x1b4   : > { %10704 = vmatpush1.bf16.msra.mxu0 %v12830_v34  ;;  %9995 = vmatprep.subr.bf16.mxu1 %v12835_v35  ;;  %v5378_v34 = vld [vmem:[%s16346_s0 + $0x3b0] sm:$0xff]  ;;  %v5388_v35 = vld [vmem:[%s16346_s0 + $0x400] sm:$0xff] }
 0x1b5   : > { %10705 = vmatprep.subr.bf16.mxu0 %v12838_v36  ;;  %v12935_v36 = vld [vmem:[%s15185_s11 + $0x254] ss:$8 sps:$4 sm:$0xff]  }
 0x1b7   : > { %9996 = vmatpush1.bf16.msra.mxu1 %v12833_v38  ;;  %v11671_v38 = vcombine.high %v5378_v34, %v5378_v34 }
 0x1b8   : > { %10706 = vmatpush1.bf16.msra.mxu0 %v12836_v39  ;;  %9997 = vmatprep.subr.bf16.mxu1 %v12841_v40  ;;  %v11691_v39 = vcombine.high %v5388_v35, %v5388_v35  ;;  %v12933_v40 = vld [vmem:[%s15185_s11 + $0x250] ss:$8 sps:$4 sm:$0xff]  }
 0x1b9   : > { %10707 = vmatprep.subr.bf16.mxu0 %v12844_v41  ;;  %v12936_v41 = vld [vmem:[%s15185_s11 + $0xc50] ss:$8 sps:$4 sm:$0xff]  }
 0x1bb   : > { %9998 = vmatpush1.bf16.msra.mxu1 %v12839_v42  ;;  %v12941_v42 = vld [vmem:[%s15185_s11 + $0x264] ss:$8 sps:$4 sm:$0xff]  }
 0x1bc   : > { %10708 = vmatpush1.bf16.msra.mxu0 %v12842_v43  ;;  %9999 = vmatprep.subr.bf16.mxu1 %v12849_v44  ;;  %v12944_v43 = vld [vmem:[%s15185_s11 + $0xc64] ss:$8 sps:$4 sm:$0xff]   ;;  %v12939_v44 = vld [vmem:[%s15185_s11 + $0x260] ss:$8 sps:$4 sm:$0xff]  }
 0x1bd   : > { %10709 = vmatprep.subr.bf16.mxu0 %v12854_v45  ;;  %v12942_v45 = vld [vmem:[%s15185_s11 + $0xc60] ss:$8 sps:$4 sm:$0xff]  }
 0x1bf   : > { %10000 = vmatpush1.bf16.msra.mxu1 %v12847_v46  ;;  %v11670_v46 = vcombine.low %v5378_v34, %v5378_v34  ;;  %v13035_v34 = vld [vmem:[%s15185_s11 + $0x324] ss:$8 sps:$4 sm:$0xff]  }
 0x1c0   : > { %10710 = vmatpush1.bf16.msra.mxu0 %v12852_v47  ;;  %10001 = vmatprep.subr.bf16.mxu1 %v12859_v48  ;;  %v11690_v47 = vcombine.low %v5388_v35, %v5388_v35  ;;  %v12947_v48 = vld [vmem:[%s15185_s11 + $0x274] ss:$8 sps:$4 sm:$0xff]   ;;  %v13038_v35 = vld [vmem:[%s15185_s11 + $0xd24] ss:$8 sps:$4 sm:$0xff]  }
 0x1c1   : > { %10711 = vmatprep.subr.bf16.mxu0 %v12862_v49  ;;  %v12950_v49 = vld [vmem:[%s15185_s11 + $0xc74] ss:$8 sps:$4 sm:$0xff]  }
 0x1c3   : > { %10002 = vmatpush1.bf16.msra.mxu1 %v12857_v50  ;;  %v13017_v50 = vld [vmem:[%s16346_s0 + $0x14] ss:$156 sps:$4 sm:$0xff]  }
 0x1c4   : > { %10712 = vmatpush1.bf16.msra.mxu0 %v12860_v51  ;;  %10003 = vmatprep.subr.bf16.mxu1 %v12867_v52  ;;  %v13023_v51 = vld [vmem:[%s16346_s0 + $0x64] ss:$156 sps:$4 sm:$0xff]   ;;  %v12945_v52 = vld [vmem:[%s15185_s11 + $0x270] ss:$8 sps:$4 sm:$0xff]  }
 0x1c5   : > { %10713 = vmatprep.subr.bf16.mxu0 %v12872_v53  ;;  %v12948_v53 = vld [vmem:[%s15185_s11 + $0xc70] ss:$8 sps:$4 sm:$0xff]  }
 0x1c7   : > { %10004 = vmatpush1.bf16.msra.mxu1 %v12865_v54  ;;  %v12953_v54 = vld [vmem:[%s15185_s11 + $0x284] ss:$8 sps:$4 sm:$0xff]  }
 0x1c8   : > { %10714 = vmatpush1.bf16.msra.mxu0 %v12870_v55  ;;  %10005 = vmatprep.subr.bf16.mxu1 %v12877_v56  ;;  %v12956_v55 = vld [vmem:[%s15185_s11 + $0xc84] ss:$8 sps:$4 sm:$0xff]   ;;  %v12951_v56 = vld [vmem:[%s15185_s11 + $0x280] ss:$8 sps:$4 sm:$0xff]  }
 0x1c9   : > { %10715 = vmatprep.subr.bf16.mxu0 %v12880_v57  ;;  %v12954_v57 = vld [vmem:[%s15185_s11 + $0xc80] ss:$8 sps:$4 sm:$0xff]  }
 0x1cb   : > { %10006 = vmatpush1.bf16.msra.mxu1 %v12875_v58  ;;  %v12959_v58 = vld [vmem:[%s15185_s11 + $0x294] ss:$8 sps:$4 sm:$0xff]  }
 0x1cc   : > { %10716 = vmatpush1.bf16.msra.mxu0 %v12878_v59  ;;  %10007 = vmatprep.subr.bf16.mxu1 %v12884_v60  ;;  %v12962_v59 = vld [vmem:[%s15185_s11 + $0xc94] ss:$8 sps:$4 sm:$0xff]   ;;  %v12957_v60 = vld [vmem:[%s15185_s11 + $0x290] ss:$8 sps:$4 sm:$0xff]  }
 0x1cd   : > { %10717 = vmatprep.subr.bf16.mxu0 %v12888_v61  ;;  %v12960_v61 = vld [vmem:[%s15185_s11 + $0xc90] ss:$8 sps:$4 sm:$0xff]  }
 0x1cf   : > { %10008 = vmatpush1.bf16.msra.mxu1 %v12882_v62  ;;  %v12967_v62 = vld [vmem:[%s15185_s11 + $0x2a4] ss:$8 sps:$4 sm:$0xff]  }
 0x1d0   : > { %10718 = vmatpush1.bf16.msra.mxu0 %v12886_v63  ;;  %10009 = vmatprep.subr.bf16.mxu1 %v12893_v0  ;;  %v12972_v63 = vld [vmem:[%s15185_s11 + $0xca4] ss:$8 sps:$4 sm:$0xff]   ;;  %v12965_v0 = vld [vmem:[%s15185_s11 + $0x2a0] ss:$8 sps:$4 sm:$0xff]  }
 0x1d1   : > { %10719 = vmatprep.subr.bf16.mxu0 %v12896_v1  ;;  %v12970_v1 = vld [vmem:[%s15185_s11 + $0xca0] ss:$8 sps:$4 sm:$0xff]  }
 0x1d3   : > { %10010 = vmatpush1.bf16.msra.mxu1 %v12891_v2  ;;  %v12977_v2 = vld [vmem:[%s15185_s11 + $0x2b4] ss:$8 sps:$4 sm:$0xff]  }
 0x1d4   : > { %10720 = vmatpush1.bf16.msra.mxu0 %v12894_v3  ;;  %10050 = vmatprep.subr.bf16.mxu1 %v12902_v5  ;;  %v12980_v3 = vld [vmem:[%s15185_s11 + $0xcb4] ss:$8 sps:$4 sm:$0xff]   ;;  %v12978_v5 = vld [vmem:[%s15185_s11 + $0xcb0] ss:$8 sps:$4 sm:$0xff]  }
 0x1d5   : > { %10760 = vmatprep.subr.bf16.mxu0 %v12908_v6  ;;  %v12985_v6 = vld [vmem:[%s15185_s11 + $0x2c4] ss:$8 sps:$4 sm:$0xff]  }
 0x1d6   : > { %10012 = vmatmul.mubr.bf16.vlgmr.msra.gmra.mrb[0].mxu1 %v12897_v4  ;;  %v12975_v4 = vld [vmem:[%s15185_s11 + $0x2b0] ss:$8 sps:$4 sm:$0xff]  }
 0x1d7   : > { %10722 = vmatmul.mubr.bf16.vlgmr.msra.gmra.mrb[0].mxu0 %v12903_v8  ;;  %10051 = vmatpush1.bf16.msra.mxu1 %v12900_v7  ;;  %v12990_v7 = vld [vmem:[%s15185_s11 + $0xcc4] ss:$8 sps:$4 sm:$0xff]   ;;  %v12983_v8 = vld [vmem:[%s15185_s11 + $0x2c0] ss:$8 sps:$4 sm:$0xff]  }
 0x1d8   : > { %10761 = vmatpush1.bf16.msra.mxu0 %v12906_v9  ;;  %10052 = vmatprep.subr.bf16.mxu1 %v12911_v10  ;;  %v12988_v9 = vld [vmem:[%s15185_s11 + $0xcc0] ss:$8 sps:$4 sm:$0xff]   ;;  %v12995_v10 = vld [vmem:[%s15185_s11 + $0x2d4] ss:$8 sps:$4 sm:$0xff]  }
 0x1d9   : > { %10762 = vmatprep.subr.bf16.mxu0 %v12914_v11  ;;  %10021 = vmatprep.mubr.bf16.mxu1 %v12963_v12  ;;  %v12998_v11 = vld [vmem:[%s15185_s11 + $0xcd4] ss:$8 sps:$4 sm:$0xff]   ;;  %v12993_v12 = vld [vmem:[%s15185_s11 + $0x2d0] ss:$8 sps:$4 sm:$0xff]  }
 0x1da   : > { %10731 = vmatprep.mubr.bf16.mxu0 %v12968_v13  ;;  %v12996_v13 = vld [vmem:[%s15185_s11 + $0xcd0] ss:$8 sps:$4 sm:$0xff]  }
 0x1db   : > { %10053 = vmatpush1.bf16.msra.mxu1 %v12909_v14  ;;  %v13002_v14 = vld [vmem:[%s15185_s11 + $0x2e4] ss:$8 sps:$4 sm:$0xff]  }
 0x1dc   : > { %10763 = vmatpush1.bf16.msra.mxu0 %v12912_v15  ;;  %10054 = vmatprep.subr.bf16.mxu1 %v12917_v16  ;;  %v13006_v15 = vld [vmem:[%s15185_s11 + $0xce4] ss:$8 sps:$4 sm:$0xff]   ;;  %v13000_v16 = vld [vmem:[%s15185_s11 + $0x2e0] ss:$8 sps:$4 sm:$0xff]  }
 0x1dd   : > { %10764 = vmatprep.subr.bf16.mxu0 %v12920_v17  ;;  %v13004_v17 = vld [vmem:[%s15185_s11 + $0xce0] ss:$8 sps:$4 sm:$0xff]  }
 0x1de   : > { %10022 = vmatmul.mubr.bf16.gmra.mrb[4].mxu1 %v12973_v19  ;;  %v13014_v19 = vld [vmem:[%s15185_s11 + $0xcf4] ss:$8 sps:$4 sm:$0xff]  }
 0x1df   : > { %10732 = vmatmul.mubr.bf16.gmra.mrb[4].mxu0 %v12974_v20  ;;  %10055 = vmatpush1.bf16.msra.mxu1 %v12915_v18  ;;  %v13011_v18 = vld [vmem:[%s15185_s11 + $0x2f4] ss:$8 sps:$4 sm:$0xff]   ;;  %v13009_v20 = vld [vmem:[%s15185_s11 + $0x2f0] ss:$8 sps:$4 sm:$0xff]  }
 0x1e0   : > { %10765 = vmatpush1.bf16.msra.mxu0 %v12918_v21  ;;  %10056 = vmatprep.subr.bf16.mxu1 %v12923_v22  ;;  %v13012_v21 = vld [vmem:[%s15185_s11 + $0xcf0] ss:$8 sps:$4 sm:$0xff]  }
 0x1e1   : > { %10766 = vmatprep.subr.bf16.mxu0 %v12926_v23  ;;  %10031 = vmatprep.mubr.bf16.mxu1 %v12981_v24  ;;  %v13015_v22 = vld [vmem:[%s16346_s0 + $0x10] ss:$156 sps:$4 sm:$0xff]  }
 0x1e2   : > { %10741 = vmatprep.mubr.bf16.mxu0 %v12986_v25  ;;  %v13020_v23 = vld [vmem:[%s15185_s11 + $0x304] ss:$8 sps:$4 sm:$0xff]   ;;  %v13018_v25 = vld [vmem:[%s15185_s11 + $0x300] ss:$8 sps:$4 sm:$0xff]  }
 0x1e3   : > { %10057 = vmatpush1.bf16.msra.mxu1 %v12921_v26  ;;  %v13026_v24 = vld [vmem:[%s15185_s11 + $0xd04] ss:$8 sps:$4 sm:$0xff]   ;;  %v13021_v26 = vld [vmem:[%s16346_s0 + $0x60] ss:$156 sps:$4 sm:$0xff]  }
 0x1e4   : > { %10767 = vmatpush1.bf16.msra.mxu0 %v12924_v27  ;;  %10058 = vmatprep.subr.bf16.mxu1 %v12929_v28  ;;  %v13024_v27 = vld [vmem:[%s15185_s11 + $0xd00] ss:$8 sps:$4 sm:$0xff]   ;;  %v13029_v28 = vld [vmem:[%s15185_s11 + $0x314] ss:$8 sps:$4 sm:$0xff]  }
 0x1e5   : > { %10768 = vmatprep.subr.bf16.mxu0 %v12932_v29  ;;  %v13032_v29 = vld [vmem:[%s15185_s11 + $0xd14] ss:$8 sps:$4 sm:$0xff]  }
 0x1e6   : > { %10032 = vmatmul.mubr.bf16.gmra.mrb[8].mxu1 %v12991_v32  ;;  %v13027_v32 = vld [vmem:[%s15185_s11 + $0x310] ss:$8 sps:$4 sm:$0xff]  }
 0x1e7   : > { %10742 = vmatmul.mubr.bf16.gmra.mrb[8].mxu0 %v12992_v33  ;;  %10059 = vmatpush1.bf16.msra.mxu1 %v12927_v30  ;;  %v13081_v30 = vld [vmem:[%s16346_s0 + $0x14c] ss:$156 sps:$4 sm:$0xff]   ;;  %v13030_v33 = vld [vmem:[%s15185_s11 + $0xd10] ss:$8 sps:$4 sm:$0xff]  }
 0x1e8   : > { %10769 = vmatpush1.bf16.msra.mxu0 %v12930_v31  ;;  %10060 = vmatprep.subr.bf16.mxu1 %v12935_v36  ;;  %v13086_v31 = vld [vmem:[%s16346_s0 + $0x19c] ss:$156 sps:$4 sm:$0xff]   ;;  %v13033_v36 = vld [vmem:[%s15185_s11 + $0x320] ss:$8 sps:$4 sm:$0xff]  }
 0x1e9   : > { %10770 = vmatprep.subr.bf16.mxu0 %v12938_v37  ;;  %10041 = vmatprep.mubr.bf16.mxu1 %v11671_v38  ;;  %v13091_v37 = vld [vmem:[%s16346_s0 + $0x148] ss:$156 sps:$4 sm:$0xff]   ;;  %v13092_v38 = vld [vmem:[%s16346_s0 + $0x198] ss:$156 sps:$4 sm:$0xff]  }
 0x1ea   : > { %10751 = vmatprep.mubr.bf16.mxu0 %v11691_v39  ;;  %v13036_v39 = vld [vmem:[%s15185_s11 + $0xd20] ss:$8 sps:$4 sm:$0xff]  }
 0x1eb   : > { %10061 = vmatpush1.bf16.msra.mxu1 %v12933_v40  ;;  %v13041_v40 = vld [vmem:[%s15185_s11 + $0x334] ss:$8 sps:$4 sm:$0xff]  }
 0x1ec   : > { %10771 = vmatpush1.bf16.msra.mxu0 %v12936_v41  ;;  %10062 = vmatprep.subr.bf16.mxu1 %v12941_v42  ;;  %v13044_v41 = vld [vmem:[%s15185_s11 + $0xd34] ss:$8 sps:$4 sm:$0xff]   ;;  %v13099_v42 = vld [vmem:[%s16346_s0 + $0x284] ss:$156 sps:$4 sm:$0xff]  }
 0x1ed   : > { %10772 = vmatprep.subr.bf16.mxu0 %v12944_v43  ;;  %v13039_v43 = vld [vmem:[%s15185_s11 + $0x330] ss:$8 sps:$4 sm:$0xff]  }
 0x1ee   : > { %10042 = vmatmul.mubr.bf16.gmra.mrb[12].mxu1 %v11670_v46  ;;  %v13047_v46 = vld [vmem:[%s15185_s11 + $0x344] ss:$8 sps:$4 sm:$0xff]  }
 0x1ef   : > { %10752 = vmatmul.mubr.bf16.gmra.mrb[12].mxu0 %v11690_v47  ;;  %10063 = vmatpush1.bf16.msra.mxu1 %v12939_v44  ;;  %v13104_v44 = vld [vmem:[%s16346_s0 + $0x2d4] ss:$156 sps:$4 sm:$0xff]   ;;  %v13050_v47 = vld [vmem:[%s15185_s11 + $0xd44] ss:$8 sps:$4 sm:$0xff]  }
 0x1f0   : > { %10773 = vmatpush1.bf16.msra.mxu0 %v12942_v45  ;;  %10064 = vmatprep.subr.bf16.mxu1 %v12947_v48  ;;  %v13042_v45 = vld [vmem:[%s15185_s11 + $0xd30] ss:$8 sps:$4 sm:$0xff]   ;;  %v13109_v48 = vld [vmem:[%s16346_s0 + $0x280] ss:$156 sps:$4 sm:$0xff]  }
 0x1f1   : > { %10774 = vmatprep.subr.bf16.mxu0 %v12950_v49  ;;  %10082 = vmatprep.mubr.bf16.mxu1 %v13017_v50  ;;  %v13110_v49 = vld [vmem:[%s16346_s0 + $0x2d0] ss:$156 sps:$4 sm:$0xff]   ;;  %v5379_v50 = vld [vmem:[%s16346_s0 + $0x3b8] sm:$0xff] }
 0x1f2   : > { %10792 = vmatprep.mubr.bf16.mxu0 %v13023_v51  ;;  %v5389_v51 = vld [vmem:[%s16346_s0 + $0x408] sm:$0xff] }
 0x1f3   : > { %10065 = vmatpush1.bf16.msra.mxu1 %v12945_v52  ;;  %v13045_v52 = vld [vmem:[%s15185_s11 + $0x340] ss:$8 sps:$4 sm:$0xff]  }
 0x1f4   : > { %10775 = vmatpush1.bf16.msra.mxu0 %v12948_v53  ;;  %10066 = vmatprep.subr.bf16.mxu1 %v12953_v54  ;;  %v13048_v53 = vld [vmem:[%s15185_s11 + $0xd40] ss:$8 sps:$4 sm:$0xff]   ;;  %v13053_v54 = vld [vmem:[%s15185_s11 + $0x354] ss:$8 sps:$4 sm:$0xff]  }
 0x1f5   : > { %10776 = vmatprep.subr.bf16.mxu0 %v12956_v55  ;;  %v13056_v55 = vld [vmem:[%s15185_s11 + $0xd54] ss:$8 sps:$4 sm:$0xff]  }
 0x1f7   : > { %10067 = vmatpush1.bf16.msra.mxu1 %v12951_v56  ;;  %v11673_v56 = vcombine.high %v5379_v50, %v5379_v50 }
 0x1f8   : > { %10777 = vmatpush1.bf16.msra.mxu0 %v12954_v57  ;;  %10068 = vmatprep.subr.bf16.mxu1 %v12959_v58  ;;  %v11693_v57 = vcombine.high %v5389_v51, %v5389_v51  ;;  %v13051_v58 = vld [vmem:[%s15185_s11 + $0x350] ss:$8 sps:$4 sm:$0xff]  }
 0x1f9   : > { %10778 = vmatprep.subr.bf16.mxu0 %v12962_v59  ;;  %v13054_v59 = vld [vmem:[%s15185_s11 + $0xd50] ss:$8 sps:$4 sm:$0xff]  }
 0x1fb   : > { %10069 = vmatpush1.bf16.msra.mxu1 %v12957_v60  ;;  %v13059_v60 = vld [vmem:[%s15185_s11 + $0x364] ss:$8 sps:$4 sm:$0xff]  }
 0x1fc   : > { %10779 = vmatpush1.bf16.msra.mxu0 %v12960_v61  ;;  %10070 = vmatprep.subr.bf16.mxu1 %v12967_v62  ;;  %v13062_v61 = vld [vmem:[%s15185_s11 + $0xd64] ss:$8 sps:$4 sm:$0xff]   ;;  %v13057_v62 = vld [vmem:[%s15185_s11 + $0x360] ss:$8 sps:$4 sm:$0xff]  }
 0x1fd   : > { %10780 = vmatprep.subr.bf16.mxu0 %v12972_v63  ;;  %v11672_v63 = vcombine.low %v5379_v50, %v5379_v50  ;;  %v13145_v50 = vld [vmem:[%s15185_s11 + $0x410] ss:$8 sps:$4 sm:$0xff]  }
 0x1ff   : > { %10071 = vmatpush1.bf16.msra.mxu1 %v12965_v0  ;;  %v11692_v0 = vcombine.low %v5389_v51, %v5389_v51  ;;  %v13148_v51 = vld [vmem:[%s15185_s11 + $0xe10] ss:$8 sps:$4 sm:$0xff]  }
 0x200   : > { %10781 = vmatpush1.bf16.msra.mxu0 %v12970_v1  ;;  %10072 = vmatprep.subr.bf16.mxu1 %v12977_v2  ;;  %v13060_v1 = vld [vmem:[%s15185_s11 + $0xd60] ss:$8 sps:$4 sm:$0xff]   ;;  %v13065_v2 = vld [vmem:[%s15185_s11 + $0x374] ss:$8 sps:$4 sm:$0xff]  }
 0x201   : > { %10782 = vmatprep.subr.bf16.mxu0 %v12980_v3  ;;  %v13068_v3 = vld [vmem:[%s15185_s11 + $0xd74] ss:$8 sps:$4 sm:$0xff]  }
 0x203   : > { %10073 = vmatpush1.bf16.msra.mxu1 %v12975_v4  ;;  %v13135_v4 = vld [vmem:[%s16346_s0 + $0x1c] ss:$156 sps:$4 sm:$0xff]  }
 0x204   : > { %10783 = vmatpush1.bf16.msra.mxu0 %v12978_v5  ;;  %10074 = vmatprep.subr.bf16.mxu1 %v12985_v6  ;;  %v13141_v5 = vld [vmem:[%s16346_s0 + $0x6c] ss:$156 sps:$4 sm:$0xff]   ;;  %v13063_v6 = vld [vmem:[%s15185_s11 + $0x370] ss:$8 sps:$4 sm:$0xff]  }
 0x205   : > { %10784 = vmatprep.subr.bf16.mxu0 %v12990_v7  ;;  %v13066_v7 = vld [vmem:[%s15185_s11 + $0xd70] ss:$8 sps:$4 sm:$0xff]  }
 0x207   : > { %10075 = vmatpush1.bf16.msra.mxu1 %v12983_v8  ;;  %v13071_v8 = vld [vmem:[%s15185_s11 + $0x384] ss:$8 sps:$4 sm:$0xff]  }
 0x208   : > { %10785 = vmatpush1.bf16.msra.mxu0 %v12988_v9  ;;  %10076 = vmatprep.subr.bf16.mxu1 %v12995_v10  ;;  %v13074_v9 = vld [vmem:[%s15185_s11 + $0xd84] ss:$8 sps:$4 sm:$0xff]   ;;  %v13069_v10 = vld [vmem:[%s15185_s11 + $0x380] ss:$8 sps:$4 sm:$0xff]  }
 0x209   : > { %10786 = vmatprep.subr.bf16.mxu0 %v12998_v11  ;;  %v13072_v11 = vld [vmem:[%s15185_s11 + $0xd80] ss:$8 sps:$4 sm:$0xff]  }
 0x20b   : > { %10077 = vmatpush1.bf16.msra.mxu1 %v12993_v12  ;;  %v13077_v12 = vld [vmem:[%s15185_s11 + $0x394] ss:$8 sps:$4 sm:$0xff]  }
 0x20c   : > { %10787 = vmatpush1.bf16.msra.mxu0 %v12996_v13  ;;  %10078 = vmatprep.subr.bf16.mxu1 %v13002_v14  ;;  %v13080_v13 = vld [vmem:[%s15185_s11 + $0xd94] ss:$8 sps:$4 sm:$0xff]   ;;  %v13075_v14 = vld [vmem:[%s15185_s11 + $0x390] ss:$8 sps:$4 sm:$0xff]  }
 0x20d   : > { %10788 = vmatprep.subr.bf16.mxu0 %v13006_v15  ;;  %v13078_v15 = vld [vmem:[%s15185_s11 + $0xd90] ss:$8 sps:$4 sm:$0xff]  }
 0x20f   : > { %10079 = vmatpush1.bf16.msra.mxu1 %v13000_v16  ;;  %v13085_v16 = vld [vmem:[%s15185_s11 + $0x3a4] ss:$8 sps:$4 sm:$0xff]  }
 0x210   : > { %10789 = vmatpush1.bf16.msra.mxu0 %v13004_v17  ;;  %10080 = vmatprep.subr.bf16.mxu1 %v13011_v18  ;;  %v13090_v17 = vld [vmem:[%s15185_s11 + $0xda4] ss:$8 sps:$4 sm:$0xff]   ;;  %v13083_v18 = vld [vmem:[%s15185_s11 + $0x3a0] ss:$8 sps:$4 sm:$0xff]  }
 0x211   : > { %10790 = vmatprep.subr.bf16.mxu0 %v13014_v19  ;;  %v13088_v19 = vld [vmem:[%s15185_s11 + $0xda0] ss:$8 sps:$4 sm:$0xff]  }
 0x213   : > { %10081 = vmatpush1.bf16.msra.mxu1 %v13009_v20  ;;  %v13095_v20 = vld [vmem:[%s15185_s11 + $0x3b4] ss:$8 sps:$4 sm:$0xff]  }
 0x214   : > { %10791 = vmatpush1.bf16.msra.mxu0 %v13012_v21  ;;  %10121 = vmatprep.subr.bf16.mxu1 %v13020_v23  ;;  %v13098_v21 = vld [vmem:[%s15185_s11 + $0xdb4] ss:$8 sps:$4 sm:$0xff]   ;;  %v13096_v23 = vld [vmem:[%s15185_s11 + $0xdb0] ss:$8 sps:$4 sm:$0xff]  }
 0x215   : > { %10831 = vmatprep.subr.bf16.mxu0 %v13026_v24  ;;  %v13103_v24 = vld [vmem:[%s15185_s11 + $0x3c4] ss:$8 sps:$4 sm:$0xff]  }
 0x216   : > { %10083 = vmatmul.mubr.bf16.vlgmr.msra.gmra.mrb[0].mxu1 %v13015_v22  ;;  %v13093_v22 = vld [vmem:[%s15185_s11 + $0x3b0] ss:$8 sps:$4 sm:$0xff]  }
 0x217   : > { %10793 = vmatmul.mubr.bf16.vlgmr.msra.gmra.mrb[0].mxu0 %v13021_v26  ;;  %10122 = vmatpush1.bf16.msra.mxu1 %v13018_v25  ;;  %v13108_v25 = vld [vmem:[%s15185_s11 + $0xdc4] ss:$8 sps:$4 sm:$0xff]   ;;  %v13101_v26 = vld [vmem:[%s15185_s11 + $0x3c0] ss:$8 sps:$4 sm:$0xff]  }
 0x218   : > { %10832 = vmatpush1.bf16.msra.mxu0 %v13024_v27  ;;  %10123 = vmatprep.subr.bf16.mxu1 %v13029_v28  ;;  %v13106_v27 = vld [vmem:[%s15185_s11 + $0xdc0] ss:$8 sps:$4 sm:$0xff]   ;;  %v13113_v28 = vld [vmem:[%s15185_s11 + $0x3d4] ss:$8 sps:$4 sm:$0xff]  }
 0x219   : > { %10833 = vmatprep.subr.bf16.mxu0 %v13032_v29  ;;  %10092 = vmatprep.mubr.bf16.mxu1 %v13081_v30  ;;  %v13116_v29 = vld [vmem:[%s15185_s11 + $0xdd4] ss:$8 sps:$4 sm:$0xff]   ;;  %v13111_v30 = vld [vmem:[%s15185_s11 + $0x3d0] ss:$8 sps:$4 sm:$0xff]  }
 0x21a   : > { %10802 = vmatprep.mubr.bf16.mxu0 %v13086_v31  ;;  %v13114_v31 = vld [vmem:[%s15185_s11 + $0xdd0] ss:$8 sps:$4 sm:$0xff]  }
 0x21b   : > { %10124 = vmatpush1.bf16.msra.mxu1 %v13027_v32  ;;  %v13120_v32 = vld [vmem:[%s15185_s11 + $0x3e4] ss:$8 sps:$4 sm:$0xff]  }
 0x21c   : > { %10834 = vmatpush1.bf16.msra.mxu0 %v13030_v33  ;;  %10125 = vmatprep.subr.bf16.mxu1 %v13035_v34  ;;  %v13124_v33 = vld [vmem:[%s15185_s11 + $0xde4] ss:$8 sps:$4 sm:$0xff]   ;;  %v13118_v34 = vld [vmem:[%s15185_s11 + $0x3e0] ss:$8 sps:$4 sm:$0xff]  }
 0x21d   : > { %10835 = vmatprep.subr.bf16.mxu0 %v13038_v35  ;;  %v13122_v35 = vld [vmem:[%s15185_s11 + $0xde0] ss:$8 sps:$4 sm:$0xff]  }
 0x21e   : > { %10093 = vmatmul.mubr.bf16.gmra.mrb[4].mxu1 %v13091_v37  ;;  %v13132_v37 = vld [vmem:[%s15185_s11 + $0xdf4] ss:$8 sps:$4 sm:$0xff]  }
 0x21f   : > { %10803 = vmatmul.mubr.bf16.gmra.mrb[4].mxu0 %v13092_v38  ;;  %10126 = vmatpush1.bf16.msra.mxu1 %v13033_v36  ;;  %v13129_v36 = vld [vmem:[%s15185_s11 + $0x3f4] ss:$8 sps:$4 sm:$0xff]   ;;  %v13127_v38 = vld [vmem:[%s15185_s11 + $0x3f0] ss:$8 sps:$4 sm:$0xff]  }
 0x220   : > { %10836 = vmatpush1.bf16.msra.mxu0 %v13036_v39  ;;  %10127 = vmatprep.subr.bf16.mxu1 %v13041_v40  ;;  %v13130_v39 = vld [vmem:[%s15185_s11 + $0xdf0] ss:$8 sps:$4 sm:$0xff]   ;;  %v13138_v40 = vld [vmem:[%s15185_s11 + $0x404] ss:$8 sps:$4 sm:$0xff]  }
 0x221   : > { %10837 = vmatprep.subr.bf16.mxu0 %v13044_v41  ;;  %10102 = vmatprep.mubr.bf16.mxu1 %v13099_v42  ;;  %v13144_v41 = vld [vmem:[%s15185_s11 + $0xe04] ss:$8 sps:$4 sm:$0xff]   ;;  %v13133_v42 = vld [vmem:[%s16346_s0 + $0x18] ss:$156 sps:$4 sm:$0xff]  }
 0x222   : > { %10812 = vmatprep.mubr.bf16.mxu0 %v13104_v44  ;;  %v13139_v44 = vld [vmem:[%s16346_s0 + $0x68] ss:$156 sps:$4 sm:$0xff]  }
 0x223   : > { %10128 = vmatpush1.bf16.msra.mxu1 %v13039_v43  ;;  %v13136_v43 = vld [vmem:[%s15185_s11 + $0x400] ss:$8 sps:$4 sm:$0xff]  }
 0x224   : > { %10838 = vmatpush1.bf16.msra.mxu0 %v13042_v45  ;;  %10129 = vmatprep.subr.bf16.mxu1 %v13047_v46  ;;  %v13142_v45 = vld [vmem:[%s15185_s11 + $0xe00] ss:$8 sps:$4 sm:$0xff]   ;;  %v13147_v46 = vld [vmem:[%s15185_s11 + $0x414] ss:$8 sps:$4 sm:$0xff]  }
 0x225   : > { %10839 = vmatprep.subr.bf16.mxu0 %v13050_v47  ;;  %v13150_v47 = vld [vmem:[%s15185_s11 + $0xe14] ss:$8 sps:$4 sm:$0xff]  }
 0x226   : > { %10103 = vmatmul.mubr.bf16.gmra.mrb[8].mxu1 %v13109_v48  ;;  %v13199_v48 = vld [vmem:[%s16346_s0 + $0x154] ss:$156 sps:$4 sm:$0xff]  }
 0x227   : > { %10813 = vmatmul.mubr.bf16.gmra.mrb[8].mxu0 %v13110_v49  ;;  %10130 = vmatpush1.bf16.msra.mxu1 %v13045_v52  ;;  %v13204_v49 = vld [vmem:[%s16346_s0 + $0x1a4] ss:$156 sps:$4 sm:$0xff]  }
 0x228   : > { %10840 = vmatpush1.bf16.msra.mxu0 %v13048_v53  ;;  %10131 = vmatprep.subr.bf16.mxu1 %v13053_v54  ;;  %v13153_v52 = vld [vmem:[%s15185_s11 + $0x424] ss:$8 sps:$4 sm:$0xff]   ;;  %v13151_v54 = vld [vmem:[%s15185_s11 + $0x420] ss:$8 sps:$4 sm:$0xff]  }
 0x229   : > { %10841 = vmatprep.subr.bf16.mxu0 %v13056_v55  ;;  %10112 = vmatprep.mubr.bf16.mxu1 %v11673_v56  ;;  %v13156_v53 = vld [vmem:[%s15185_s11 + $0xe24] ss:$8 sps:$4 sm:$0xff]   ;;  %v13154_v55 = vld [vmem:[%s15185_s11 + $0xe20] ss:$8 sps:$4 sm:$0xff]  }
 0x22a   : > { %10822 = vmatprep.mubr.bf16.mxu0 %v11693_v57  ;;  %v13209_v56 = vld [vmem:[%s16346_s0 + $0x150] ss:$156 sps:$4 sm:$0xff]   ;;  %v13210_v57 = vld [vmem:[%s16346_s0 + $0x1a0] ss:$156 sps:$4 sm:$0xff]  }
 0x22b   : > { %10132 = vmatpush1.bf16.msra.mxu1 %v13051_v58  ;;  %v13159_v58 = vld [vmem:[%s15185_s11 + $0x434] ss:$8 sps:$4 sm:$0xff]  }
 0x22c   : > { %10842 = vmatpush1.bf16.msra.mxu0 %v13054_v59  ;;  %10133 = vmatprep.subr.bf16.mxu1 %v13059_v60  ;;  %v13162_v59 = vld [vmem:[%s15185_s11 + $0xe34] ss:$8 sps:$4 sm:$0xff]   ;;  %v13217_v60 = vld [vmem:[%s16346_s0 + $0x28c] ss:$156 sps:$4 sm:$0xff]  }
 0x22d   : > { %10843 = vmatprep.subr.bf16.mxu0 %v13062_v61  ;;  %v13222_v61 = vld [vmem:[%s16346_s0 + $0x2dc] ss:$156 sps:$4 sm:$0xff]  }
 0x22e   : > { %10113 = vmatmul.mubr.bf16.gmra.mrb[12].mxu1 %v11672_v63  ;;  %v13160_v63 = vld [vmem:[%s15185_s11 + $0xe30] ss:$8 sps:$4 sm:$0xff]  }
 0x22f   : > { %10823 = vmatmul.mubr.bf16.gmra.mrb[12].mxu0 %v11692_v0  ;;  %10134 = vmatpush1.bf16.msra.mxu1 %v13057_v62  ;;  %v13157_v62 = vld [vmem:[%s15185_s11 + $0x430] ss:$8 sps:$4 sm:$0xff]   ;;  %v13165_v0 = vld [vmem:[%s15185_s11 + $0x444] ss:$8 sps:$4 sm:$0xff]  }
 0x230   : > { %10844 = vmatpush1.bf16.msra.mxu0 %v13060_v1  ;;  %10135 = vmatprep.subr.bf16.mxu1 %v13065_v2  ;;  %v13168_v1 = vld [vmem:[%s15185_s11 + $0xe44] ss:$8 sps:$4 sm:$0xff]   ;;  %v13163_v2 = vld [vmem:[%s15185_s11 + $0x440] ss:$8 sps:$4 sm:$0xff]  }
 0x231   : > { %10845 = vmatprep.subr.bf16.mxu0 %v13068_v3  ;;  %10153 = vmatprep.mubr.bf16.mxu1 %v13135_v4  ;;  %v13166_v3 = vld [vmem:[%s15185_s11 + $0xe40] ss:$8 sps:$4 sm:$0xff]  }
 0x232   : > { %10863 = vmatprep.mubr.bf16.mxu0 %v13141_v5  ;;  %v13227_v4 = vld [vmem:[%s16346_s0 + $0x288] ss:$156 sps:$4 sm:$0xff]   ;;  %v13228_v5 = vld [vmem:[%s16346_s0 + $0x2d8] ss:$156 sps:$4 sm:$0xff]  }
 0x233   : > { %10136 = vmatpush1.bf16.msra.mxu1 %v13063_v6  ;;  %v5380_v6 = vld [vmem:[%s16346_s0 + $0x3c0] sm:$0xff] }
 0x234   : > { %10846 = vmatpush1.bf16.msra.mxu0 %v13066_v7  ;;  %10137 = vmatprep.subr.bf16.mxu1 %v13071_v8  ;;  %v5390_v7 = vld [vmem:[%s16346_s0 + $0x410] sm:$0xff] }
 0x235   : > { %10847 = vmatprep.subr.bf16.mxu0 %v13074_v9  ;;  %v13171_v8 = vld [vmem:[%s15185_s11 + $0x454] ss:$8 sps:$4 sm:$0xff]  }
 0x236   : > { %v13174_v9 = vld [vmem:[%s15185_s11 + $0xe54] ss:$8 sps:$4 sm:$0xff]  }
 0x237   : > { %10138 = vmatpush1.bf16.msra.mxu1 %v13069_v10  ;;  %v11675_v10 = vcombine.high %v5380_v6, %v5380_v6 }
 0x238   : > { %10848 = vmatpush1.bf16.msra.mxu0 %v13072_v11  ;;  %10139 = vmatprep.subr.bf16.mxu1 %v13077_v12  ;;  %v11695_v11 = vcombine.high %v5390_v7, %v5390_v7  ;;  %v13169_v12 = vld [vmem:[%s15185_s11 + $0x450] ss:$8 sps:$4 sm:$0xff]  }
 0x239   : > { %10849 = vmatprep.subr.bf16.mxu0 %v13080_v13  ;;  %v13172_v13 = vld [vmem:[%s15185_s11 + $0xe50] ss:$8 sps:$4 sm:$0xff]  }
 0x23b   : > { %10140 = vmatpush1.bf16.msra.mxu1 %v13075_v14  ;;  %v13177_v14 = vld [vmem:[%s15185_s11 + $0x464] ss:$8 sps:$4 sm:$0xff]  }
 0x23c   : > { %10850 = vmatpush1.bf16.msra.mxu0 %v13078_v15  ;;  %10141 = vmatprep.subr.bf16.mxu1 %v13085_v16  ;;  %v13180_v15 = vld [vmem:[%s15185_s11 + $0xe64] ss:$8 sps:$4 sm:$0xff]   ;;  %v13175_v16 = vld [vmem:[%s15185_s11 + $0x460] ss:$8 sps:$4 sm:$0xff]  }
 0x23d   : > { %10851 = vmatprep.subr.bf16.mxu0 %v13090_v17  ;;  %v13178_v17 = vld [vmem:[%s15185_s11 + $0xe60] ss:$8 sps:$4 sm:$0xff]  }
 0x23f   : > { %10142 = vmatpush1.bf16.msra.mxu1 %v13083_v18  ;;  %v13183_v18 = vld [vmem:[%s15185_s11 + $0x474] ss:$8 sps:$4 sm:$0xff]  }
 0x240   : > { %10852 = vmatpush1.bf16.msra.mxu0 %v13088_v19  ;;  %10143 = vmatprep.subr.bf16.mxu1 %v13095_v20  ;;  %v11674_v19 = vcombine.low %v5380_v6, %v5380_v6  ;;  %v11694_v20 = vcombine.low %v5390_v7, %v5390_v7  ;;  %v13271_v6 = vld [vmem:[%s15185_s11 + $0x524] ss:$8 sps:$4 sm:$0xff]  }
 0x241   : > { %10853 = vmatprep.subr.bf16.mxu0 %v13098_v21  ;;  %v13186_v21 = vld [vmem:[%s15185_s11 + $0xe74] ss:$8 sps:$4 sm:$0xff]   ;;  %v13274_v7 = vld [vmem:[%s15185_s11 + $0xf24] ss:$8 sps:$4 sm:$0xff]  }
 0x243   : > { %10144 = vmatpush1.bf16.msra.mxu1 %v13093_v22  ;;  %v13253_v22 = vld [vmem:[%s16346_s0 + $0x24] ss:$156 sps:$4 sm:$0xff]  }
 0x244   : > { %10854 = vmatpush1.bf16.msra.mxu0 %v13096_v23  ;;  %10145 = vmatprep.subr.bf16.mxu1 %v13103_v24  ;;  %v13259_v23 = vld [vmem:[%s16346_s0 + $0x74] ss:$156 sps:$4 sm:$0xff]  }
 0x245   : > { %10855 = vmatprep.subr.bf16.mxu0 %v13108_v25  ;;  %v13181_v24 = vld [vmem:[%s15185_s11 + $0x470] ss:$8 sps:$4 sm:$0xff]  }
 0x246   : > { %v13184_v25 = vld [vmem:[%s15185_s11 + $0xe70] ss:$8 sps:$4 sm:$0xff]  }
 0x247   : > { %10146 = vmatpush1.bf16.msra.mxu1 %v13101_v26  ;;  %v13189_v26 = vld [vmem:[%s15185_s11 + $0x484] ss:$8 sps:$4 sm:$0xff]  }
 0x248   : > { %10856 = vmatpush1.bf16.msra.mxu0 %v13106_v27  ;;  %10147 = vmatprep.subr.bf16.mxu1 %v13113_v28  ;;  %v13192_v27 = vld [vmem:[%s15185_s11 + $0xe84] ss:$8 sps:$4 sm:$0xff]   ;;  %v13187_v28 = vld [vmem:[%s15185_s11 + $0x480] ss:$8 sps:$4 sm:$0xff]  }
 0x249   : > { %10857 = vmatprep.subr.bf16.mxu0 %v13116_v29  ;;  %v13190_v29 = vld [vmem:[%s15185_s11 + $0xe80] ss:$8 sps:$4 sm:$0xff]  }
 0x24b   : > { %10148 = vmatpush1.bf16.msra.mxu1 %v13111_v30  ;;  %v13195_v30 = vld [vmem:[%s15185_s11 + $0x494] ss:$8 sps:$4 sm:$0xff]  }
 0x24c   : > { %10858 = vmatpush1.bf16.msra.mxu0 %v13114_v31  ;;  %10149 = vmatprep.subr.bf16.mxu1 %v13120_v32  ;;  %v13198_v31 = vld [vmem:[%s15185_s11 + $0xe94] ss:$8 sps:$4 sm:$0xff]   ;;  %v13193_v32 = vld [vmem:[%s15185_s11 + $0x490] ss:$8 sps:$4 sm:$0xff]  }
 0x24d   : > { %10859 = vmatprep.subr.bf16.mxu0 %v13124_v33  ;;  %v13196_v33 = vld [vmem:[%s15185_s11 + $0xe90] ss:$8 sps:$4 sm:$0xff]  }
 0x24f   : > { %10150 = vmatpush1.bf16.msra.mxu1 %v13118_v34  ;;  %v13203_v34 = vld [vmem:[%s15185_s11 + $0x4a4] ss:$8 sps:$4 sm:$0xff]  }
 0x250   : > { %10860 = vmatpush1.bf16.msra.mxu0 %v13122_v35  ;;  %10151 = vmatprep.subr.bf16.mxu1 %v13129_v36  ;;  %v13208_v35 = vld [vmem:[%s15185_s11 + $0xea4] ss:$8 sps:$4 sm:$0xff]   ;;  %v13201_v36 = vld [vmem:[%s15185_s11 + $0x4a0] ss:$8 sps:$4 sm:$0xff]  }
 0x251   : > { %10861 = vmatprep.subr.bf16.mxu0 %v13132_v37  ;;  %v13206_v37 = vld [vmem:[%s15185_s11 + $0xea0] ss:$8 sps:$4 sm:$0xff]  }
 0x253   : > { %10152 = vmatpush1.bf16.msra.mxu1 %v13127_v38  ;;  %v13213_v38 = vld [vmem:[%s15185_s11 + $0x4b4] ss:$8 sps:$4 sm:$0xff]  }
 0x254   : > { %10862 = vmatpush1.bf16.msra.mxu0 %v13130_v39  ;;  %10192 = vmatprep.subr.bf16.mxu1 %v13138_v40  ;;  %v13216_v39 = vld [vmem:[%s15185_s11 + $0xeb4] ss:$8 sps:$4 sm:$0xff]   ;;  %v13211_v40 = vld [vmem:[%s15185_s11 + $0x4b0] ss:$8 sps:$4 sm:$0xff]  }
 0x255   : > { %10902 = vmatprep.subr.bf16.mxu0 %v13144_v41  ;;  %v13214_v41 = vld [vmem:[%s15185_s11 + $0xeb0] ss:$8 sps:$4 sm:$0xff]  }
 0x256   : > { %10154 = vmatmul.mubr.bf16.vlgmr.msra.gmra.mrb[0].mxu1 %v13133_v42  ;;  %v13221_v42 = vld [vmem:[%s15185_s11 + $0x4c4] ss:$8 sps:$4 sm:$0xff]  }
 0x257   : > { %10864 = vmatmul.mubr.bf16.vlgmr.msra.gmra.mrb[0].mxu0 %v13139_v44  ;;  %10193 = vmatpush1.bf16.msra.mxu1 %v13136_v43  ;;  %v13226_v43 = vld [vmem:[%s15185_s11 + $0xec4] ss:$8 sps:$4 sm:$0xff]   ;;  %v13219_v44 = vld [vmem:[%s15185_s11 + $0x4c0] ss:$8 sps:$4 sm:$0xff]  }
 0x258   : > { %10903 = vmatpush1.bf16.msra.mxu0 %v13142_v45  ;;  %10194 = vmatprep.subr.bf16.mxu1 %v13147_v46  ;;  %v13224_v45 = vld [vmem:[%s15185_s11 + $0xec0] ss:$8 sps:$4 sm:$0xff]   ;;  %v13231_v46 = vld [vmem:[%s15185_s11 + $0x4d4] ss:$8 sps:$4 sm:$0xff]  }
 0x259   : > { %10904 = vmatprep.subr.bf16.mxu0 %v13150_v47  ;;  %10163 = vmatprep.mubr.bf16.mxu1 %v13199_v48  ;;  %v13234_v47 = vld [vmem:[%s15185_s11 + $0xed4] ss:$8 sps:$4 sm:$0xff]   ;;  %v13229_v48 = vld [vmem:[%s15185_s11 + $0x4d0] ss:$8 sps:$4 sm:$0xff]  }
 0x25a   : > { %10873 = vmatprep.mubr.bf16.mxu0 %v13204_v49  ;;  %v13232_v49 = vld [vmem:[%s15185_s11 + $0xed0] ss:$8 sps:$4 sm:$0xff]  }
 0x25b   : > { %10195 = vmatpush1.bf16.msra.mxu1 %v13145_v50  ;;  %v13238_v50 = vld [vmem:[%s15185_s11 + $0x4e4] ss:$8 sps:$4 sm:$0xff]  }
 0x25c   : > { %10905 = vmatpush1.bf16.msra.mxu0 %v13148_v51  ;;  %10196 = vmatprep.subr.bf16.mxu1 %v13153_v52  ;;  %v13242_v51 = vld [vmem:[%s15185_s11 + $0xee4] ss:$8 sps:$4 sm:$0xff]   ;;  %v13236_v52 = vld [vmem:[%s15185_s11 + $0x4e0] ss:$8 sps:$4 sm:$0xff]  }
 0x25d   : > { %10906 = vmatprep.subr.bf16.mxu0 %v13156_v53  ;;  %v13240_v53 = vld [vmem:[%s15185_s11 + $0xee0] ss:$8 sps:$4 sm:$0xff]  }
 0x25e   : > { %10164 = vmatmul.mubr.bf16.gmra.mrb[4].mxu1 %v13209_v56  ;;  %v13245_v56 = vld [vmem:[%s15185_s11 + $0x4f0] ss:$8 sps:$4 sm:$0xff]  }
 0x25f   : > { %10874 = vmatmul.mubr.bf16.gmra.mrb[4].mxu0 %v13210_v57  ;;  %10197 = vmatpush1.bf16.msra.mxu1 %v13151_v54  ;;  %v13247_v54 = vld [vmem:[%s15185_s11 + $0x4f4] ss:$8 sps:$4 sm:$0xff]   ;;  %v13248_v57 = vld [vmem:[%s15185_s11 + $0xef0] ss:$8 sps:$4 sm:$0xff]  }
 0x260   : > { %10907 = vmatpush1.bf16.msra.mxu0 %v13154_v55  ;;  %10198 = vmatprep.subr.bf16.mxu1 %v13159_v58  ;;  %v13250_v55 = vld [vmem:[%s15185_s11 + $0xef4] ss:$8 sps:$4 sm:$0xff]  }
 0x261   : > { %10908 = vmatprep.subr.bf16.mxu0 %v13162_v59  ;;  %10173 = vmatprep.mubr.bf16.mxu1 %v13217_v60  ;;  %v13251_v58 = vld [vmem:[%s16346_s0 + $0x20] ss:$156 sps:$4 sm:$0xff]   ;;  %v13256_v59 = vld [vmem:[%s15185_s11 + $0x504] ss:$8 sps:$4 sm:$0xff]  }
 0x262   : > { %10883 = vmatprep.mubr.bf16.mxu0 %v13222_v61  ;;  %v13262_v60 = vld [vmem:[%s15185_s11 + $0xf04] ss:$8 sps:$4 sm:$0xff]   ;;  %v13254_v61 = vld [vmem:[%s15185_s11 + $0x500] ss:$8 sps:$4 sm:$0xff]  }
 0x263   : > { %10199 = vmatpush1.bf16.msra.mxu1 %v13157_v62  ;;  %v13257_v62 = vld [vmem:[%s16346_s0 + $0x70] ss:$156 sps:$4 sm:$0xff]  }
 0x264   : > { %10909 = vmatpush1.bf16.msra.mxu0 %v13160_v63  ;;  %10200 = vmatprep.subr.bf16.mxu1 %v13165_v0  ;;  %v13260_v63 = vld [vmem:[%s15185_s11 + $0xf00] ss:$8 sps:$4 sm:$0xff]   ;;  %v13265_v0 = vld [vmem:[%s15185_s11 + $0x514] ss:$8 sps:$4 sm:$0xff]  }
 0x265   : > { %10910 = vmatprep.subr.bf16.mxu0 %v13168_v1  ;;  %v13268_v1 = vld [vmem:[%s15185_s11 + $0xf14] ss:$8 sps:$4 sm:$0xff]  }
 0x266   : > { %10174 = vmatmul.mubr.bf16.gmra.mrb[8].mxu1 %v13227_v4  ;;  %v13263_v4 = vld [vmem:[%s15185_s11 + $0x510] ss:$8 sps:$4 sm:$0xff]  }
 0x267   : > { %10884 = vmatmul.mubr.bf16.gmra.mrb[8].mxu0 %v13228_v5  ;;  %10201 = vmatpush1.bf16.msra.mxu1 %v13163_v2  ;;  %v13317_v2 = vld [vmem:[%s16346_s0 + $0x15c] ss:$156 sps:$4 sm:$0xff]  }
 0x268   : > { %10911 = vmatpush1.bf16.msra.mxu0 %v13166_v3  ;;  %10202 = vmatprep.subr.bf16.mxu1 %v13171_v8  ;;  %v13322_v3 = vld [vmem:[%s16346_s0 + $0x1ac] ss:$156 sps:$4 sm:$0xff]   ;;  %v13266_v5 = vld [vmem:[%s15185_s11 + $0xf10] ss:$8 sps:$4 sm:$0xff]  }
 0x269   : > { %10912 = vmatprep.subr.bf16.mxu0 %v13174_v9  ;;  %10183 = vmatprep.mubr.bf16.mxu1 %v11675_v10  ;;  %v13269_v8 = vld [vmem:[%s15185_s11 + $0x520] ss:$8 sps:$4 sm:$0xff]   ;;  %v13327_v9 = vld [vmem:[%s16346_s0 + $0x158] ss:$156 sps:$4 sm:$0xff]  }
 0x26a   : > { %10893 = vmatprep.mubr.bf16.mxu0 %v11695_v11  ;;  %v13328_v10 = vld [vmem:[%s16346_s0 + $0x1a8] ss:$156 sps:$4 sm:$0xff]  }
 0x26b   : > { %10203 = vmatpush1.bf16.msra.mxu1 %v13169_v12  ;;  %v13272_v11 = vld [vmem:[%s15185_s11 + $0xf20] ss:$8 sps:$4 sm:$0xff]   ;;  %v13277_v12 = vld [vmem:[%s15185_s11 + $0x534] ss:$8 sps:$4 sm:$0xff]  }
 0x26c   : > { %10913 = vmatpush1.bf16.msra.mxu0 %v13172_v13  ;;  %10204 = vmatprep.subr.bf16.mxu1 %v13177_v14  ;;  %v13280_v13 = vld [vmem:[%s15185_s11 + $0xf34] ss:$8 sps:$4 sm:$0xff]  }
 0x26d   : > { %10914 = vmatprep.subr.bf16.mxu0 %v13180_v15  ;;  %v13335_v14 = vld [vmem:[%s16346_s0 + $0x294] ss:$156 sps:$4 sm:$0xff]  }
 0x26e   : > { %10184 = vmatmul.mubr.bf16.gmra.mrb[12].mxu1 %v11674_v19  ;;  %v13275_v15 = vld [vmem:[%s15185_s11 + $0x530] ss:$8 sps:$4 sm:$0xff]   ;;  %v13286_v19 = vld [vmem:[%s15185_s11 + $0xf44] ss:$8 sps:$4 sm:$0xff]  }
 0x26f   : > { %10894 = vmatmul.mubr.bf16.gmra.mrb[12].mxu0 %v11694_v20  ;;  %10205 = vmatpush1.bf16.msra.mxu1 %v13175_v16  ;;  %v13340_v16 = vld [vmem:[%s16346_s0 + $0x2e4] ss:$156 sps:$4 sm:$0xff]   ;;  %v13345_v20 = vld [vmem:[%s16346_s0 + $0x290] ss:$156 sps:$4 sm:$0xff]  }
 0x270   : > { %10915 = vmatpush1.bf16.msra.mxu0 %v13178_v17  ;;  %10206 = vmatprep.subr.bf16.mxu1 %v13183_v18  ;;  %v13278_v17 = vld [vmem:[%s15185_s11 + $0xf30] ss:$8 sps:$4 sm:$0xff]   ;;  %v13283_v18 = vld [vmem:[%s15185_s11 + $0x544] ss:$8 sps:$4 sm:$0xff]  }
 0x271   : > { %10916 = vmatprep.subr.bf16.mxu0 %v13186_v21  ;;  %10224 = vmatprep.mubr.bf16.mxu1 %v13253_v22  ;;  %v13281_v21 = vld [vmem:[%s15185_s11 + $0x540] ss:$8 sps:$4 sm:$0xff]  }
 0x272   : > { %10934 = vmatprep.mubr.bf16.mxu0 %v13259_v23  ;;  %v13346_v22 = vld [vmem:[%s16346_s0 + $0x2e0] ss:$156 sps:$4 sm:$0xff]   ;;  %v5381_v23 = vld [vmem:[%s16346_s0 + $0x3c8] sm:$0xff] }
 0x273   : > { %10207 = vmatpush1.bf16.msra.mxu1 %v13181_v24  ;;  %v5391_v24 = vld [vmem:[%s16346_s0 + $0x418] sm:$0xff] }
 0x274   : > { %10917 = vmatpush1.bf16.msra.mxu0 %v13184_v25  ;;  %10208 = vmatprep.subr.bf16.mxu1 %v13189_v26  ;;  %v13284_v25 = vld [vmem:[%s15185_s11 + $0xf40] ss:$8 sps:$4 sm:$0xff]   ;;  %v13289_v26 = vld [vmem:[%s15185_s11 + $0x554] ss:$8 sps:$4 sm:$0xff]  }
 0x275   : > { %10918 = vmatprep.subr.bf16.mxu0 %v13192_v27  ;;  %v13292_v27 = vld [vmem:[%s15185_s11 + $0xf54] ss:$8 sps:$4 sm:$0xff]  }
 0x277   : > { %10209 = vmatpush1.bf16.msra.mxu1 %v13187_v28  ;;  %v11677_v28 = vcombine.high %v5381_v23, %v5381_v23 }
 0x278   : > { %10919 = vmatpush1.bf16.msra.mxu0 %v13190_v29  ;;  %10210 = vmatprep.subr.bf16.mxu1 %v13195_v30  ;;  %v11697_v29 = vcombine.high %v5391_v24, %v5391_v24  ;;  %v13287_v30 = vld [vmem:[%s15185_s11 + $0x550] ss:$8 sps:$4 sm:$0xff]  }
 0x279   : > { %10920 = vmatprep.subr.bf16.mxu0 %v13198_v31  ;;  %v13290_v31 = vld [vmem:[%s15185_s11 + $0xf50] ss:$8 sps:$4 sm:$0xff]  }
 0x27b   : > { %10211 = vmatpush1.bf16.msra.mxu1 %v13193_v32  ;;  %v13295_v32 = vld [vmem:[%s15185_s11 + $0x564] ss:$8 sps:$4 sm:$0xff]  }
 0x27c   : > { %10921 = vmatpush1.bf16.msra.mxu0 %v13196_v33  ;;  %10212 = vmatprep.subr.bf16.mxu1 %v13203_v34  ;;  %v13298_v33 = vld [vmem:[%s15185_s11 + $0xf64] ss:$8 sps:$4 sm:$0xff]   ;;  %v13293_v34 = vld [vmem:[%s15185_s11 + $0x560] ss:$8 sps:$4 sm:$0xff]  }
 0x27d   : > { %10922 = vmatprep.subr.bf16.mxu0 %v13208_v35  ;;  %v13296_v35 = vld [vmem:[%s15185_s11 + $0xf60] ss:$8 sps:$4 sm:$0xff]  }
 0x27f   : > { %10213 = vmatpush1.bf16.msra.mxu1 %v13201_v36  ;;  %v11676_v36 = vcombine.low %v5381_v23, %v5381_v23  ;;  %v13384_v23 = vld [vmem:[%s15185_s11 + $0x1010] ss:$8 sps:$4 sm:$0xff]  }
 0x280   : > { %10923 = vmatpush1.bf16.msra.mxu0 %v13206_v37  ;;  %10214 = vmatprep.subr.bf16.mxu1 %v13213_v38  ;;  %v11696_v37 = vcombine.low %v5391_v24, %v5391_v24  ;;  %v13301_v38 = vld [vmem:[%s15185_s11 + $0x574] ss:$8 sps:$4 sm:$0xff]   ;;  %v13389_v24 = vld [vmem:[%s15185_s11 + $0x624] ss:$8 sps:$4 sm:$0xff]  }
 0x281   : > { %10924 = vmatprep.subr.bf16.mxu0 %v13216_v39  ;;  %v13304_v39 = vld [vmem:[%s15185_s11 + $0xf74] ss:$8 sps:$4 sm:$0xff]  }
 0x283   : > { %10215 = vmatpush1.bf16.msra.mxu1 %v13211_v40  ;;  %v13371_v40 = vld [vmem:[%s16346_s0 + $0x2c] ss:$156 sps:$4 sm:$0xff]  }
 0x284   : > { %10925 = vmatpush1.bf16.msra.mxu0 %v13214_v41  ;;  %10216 = vmatprep.subr.bf16.mxu1 %v13221_v42  ;;  %v13377_v41 = vld [vmem:[%s16346_s0 + $0x7c] ss:$156 sps:$4 sm:$0xff]  }
 0x285   : > { %10926 = vmatprep.subr.bf16.mxu0 %v13226_v43  ;;  %v13299_v42 = vld [vmem:[%s15185_s11 + $0x570] ss:$8 sps:$4 sm:$0xff]  }
 0x286   : > { %v13302_v43 = vld [vmem:[%s15185_s11 + $0xf70] ss:$8 sps:$4 sm:$0xff]  }
 0x287   : > { %10217 = vmatpush1.bf16.msra.mxu1 %v13219_v44  ;;  %v13307_v44 = vld [vmem:[%s15185_s11 + $0x584] ss:$8 sps:$4 sm:$0xff]  }
 0x288   : > { %10927 = vmatpush1.bf16.msra.mxu0 %v13224_v45  ;;  %10218 = vmatprep.subr.bf16.mxu1 %v13231_v46  ;;  %v13310_v45 = vld [vmem:[%s15185_s11 + $0xf84] ss:$8 sps:$4 sm:$0xff]   ;;  %v13305_v46 = vld [vmem:[%s15185_s11 + $0x580] ss:$8 sps:$4 sm:$0xff]  }
 0x289   : > { %10928 = vmatprep.subr.bf16.mxu0 %v13234_v47  ;;  %v13308_v47 = vld [vmem:[%s15185_s11 + $0xf80] ss:$8 sps:$4 sm:$0xff]  }
 0x28b   : > { %10219 = vmatpush1.bf16.msra.mxu1 %v13229_v48  ;;  %v13313_v48 = vld [vmem:[%s15185_s11 + $0x594] ss:$8 sps:$4 sm:$0xff]  }
 0x28c   : > { %10929 = vmatpush1.bf16.msra.mxu0 %v13232_v49  ;;  %10220 = vmatprep.subr.bf16.mxu1 %v13238_v50  ;;  %v13316_v49 = vld [vmem:[%s15185_s11 + $0xf94] ss:$8 sps:$4 sm:$0xff]   ;;  %v13311_v50 = vld [vmem:[%s15185_s11 + $0x590] ss:$8 sps:$4 sm:$0xff]  }
 0x28d   : > { %10930 = vmatprep.subr.bf16.mxu0 %v13242_v51  ;;  %v13314_v51 = vld [vmem:[%s15185_s11 + $0xf90] ss:$8 sps:$4 sm:$0xff]  }
 0x28f   : > { %10221 = vmatpush1.bf16.msra.mxu1 %v13236_v52  ;;  %v13321_v52 = vld [vmem:[%s15185_s11 + $0x5a4] ss:$8 sps:$4 sm:$0xff]  }
 0x290   : > { %10931 = vmatpush1.bf16.msra.mxu0 %v13240_v53  ;;  %10222 = vmatprep.subr.bf16.mxu1 %v13247_v54  ;;  %v13326_v53 = vld [vmem:[%s15185_s11 + $0xfa4] ss:$8 sps:$4 sm:$0xff]   ;;  %v13319_v54 = vld [vmem:[%s15185_s11 + $0x5a0] ss:$8 sps:$4 sm:$0xff]  }
 0x291   : > { %10932 = vmatprep.subr.bf16.mxu0 %v13250_v55  ;;  %v13324_v55 = vld [vmem:[%s15185_s11 + $0xfa0] ss:$8 sps:$4 sm:$0xff]  }
 0x293   : > { %10223 = vmatpush1.bf16.msra.mxu1 %v13245_v56  ;;  %v13331_v56 = vld [vmem:[%s15185_s11 + $0x5b4] ss:$8 sps:$4 sm:$0xff]  }
 0x294   : > { %10933 = vmatpush1.bf16.msra.mxu0 %v13248_v57  ;;  %10263 = vmatprep.subr.bf16.mxu1 %v13256_v59  ;;  %v13334_v57 = vld [vmem:[%s15185_s11 + $0xfb4] ss:$8 sps:$4 sm:$0xff]   ;;  %v13332_v59 = vld [vmem:[%s15185_s11 + $0xfb0] ss:$8 sps:$4 sm:$0xff]  }
 0x295   : > { %10973 = vmatprep.subr.bf16.mxu0 %v13262_v60  ;;  %v13339_v60 = vld [vmem:[%s15185_s11 + $0x5c4] ss:$8 sps:$4 sm:$0xff]  }
 0x296   : > { %10225 = vmatmul.mubr.bf16.vlgmr.msra.gmra.mrb[0].mxu1 %v13251_v58  ;;  %v13329_v58 = vld [vmem:[%s15185_s11 + $0x5b0] ss:$8 sps:$4 sm:$0xff]  }
 0x297   : > { %10935 = vmatmul.mubr.bf16.vlgmr.msra.gmra.mrb[0].mxu0 %v13257_v62  ;;  %10264 = vmatpush1.bf16.msra.mxu1 %v13254_v61  ;;  %v13344_v61 = vld [vmem:[%s15185_s11 + $0xfc4] ss:$8 sps:$4 sm:$0xff]   ;;  %v13337_v62 = vld [vmem:[%s15185_s11 + $0x5c0] ss:$8 sps:$4 sm:$0xff]  }
 0x298   : > { %10974 = vmatpush1.bf16.msra.mxu0 %v13260_v63  ;;  %10265 = vmatprep.subr.bf16.mxu1 %v13265_v0  ;;  %v13342_v63 = vld [vmem:[%s15185_s11 + $0xfc0] ss:$8 sps:$4 sm:$0xff]   ;;  %v13349_v0 = vld [vmem:[%s15185_s11 + $0x5d4] ss:$8 sps:$4 sm:$0xff]  }
 0x299   : > { %10975 = vmatprep.subr.bf16.mxu0 %v13268_v1  ;;  %10234 = vmatprep.mubr.bf16.mxu1 %v13317_v2  ;;  %v13352_v1 = vld [vmem:[%s15185_s11 + $0xfd4] ss:$8 sps:$4 sm:$0xff]   ;;  %v13347_v2 = vld [vmem:[%s15185_s11 + $0x5d0] ss:$8 sps:$4 sm:$0xff]  }
 0x29a   : > { %10944 = vmatprep.mubr.bf16.mxu0 %v13322_v3  ;;  %v13350_v3 = vld [vmem:[%s15185_s11 + $0xfd0] ss:$8 sps:$4 sm:$0xff]  }
 0x29b   : > { %10266 = vmatpush1.bf16.msra.mxu1 %v13263_v4  ;;  %v13356_v4 = vld [vmem:[%s15185_s11 + $0x5e4] ss:$8 sps:$4 sm:$0xff]  }
 0x29c   : > { %10976 = vmatpush1.bf16.msra.mxu0 %v13266_v5  ;;  %10267 = vmatprep.subr.bf16.mxu1 %v13271_v6  ;;  %v13360_v5 = vld [vmem:[%s15185_s11 + $0xfe4] ss:$8 sps:$4 sm:$0xff]   ;;  %v13354_v6 = vld [vmem:[%s15185_s11 + $0x5e0] ss:$8 sps:$4 sm:$0xff]  }
 0x29d   : > { %10977 = vmatprep.subr.bf16.mxu0 %v13274_v7  ;;  %v13358_v7 = vld [vmem:[%s15185_s11 + $0xfe0] ss:$8 sps:$4 sm:$0xff]  }
 0x29e   : > { %10235 = vmatmul.mubr.bf16.gmra.mrb[4].mxu1 %v13327_v9  ;;  %v13368_v9 = vld [vmem:[%s15185_s11 + $0xff4] ss:$8 sps:$4 sm:$0xff]  }
 0x29f   : > { %10945 = vmatmul.mubr.bf16.gmra.mrb[4].mxu0 %v13328_v10  ;;  %10268 = vmatpush1.bf16.msra.mxu1 %v13269_v8  ;;  %v13365_v8 = vld [vmem:[%s15185_s11 + $0x5f4] ss:$8 sps:$4 sm:$0xff]   ;;  %v13363_v10 = vld [vmem:[%s15185_s11 + $0x5f0] ss:$8 sps:$4 sm:$0xff]  }
 0x2a0   : > { %10978 = vmatpush1.bf16.msra.mxu0 %v13272_v11  ;;  %10269 = vmatprep.subr.bf16.mxu1 %v13277_v12  ;;  %v13366_v11 = vld [vmem:[%s15185_s11 + $0xff0] ss:$8 sps:$4 sm:$0xff]   ;;  %v13374_v12 = vld [vmem:[%s15185_s11 + $0x604] ss:$8 sps:$4 sm:$0xff]  }
 0x2a1   : > { %10979 = vmatprep.subr.bf16.mxu0 %v13280_v13  ;;  %10244 = vmatprep.mubr.bf16.mxu1 %v13335_v14  ;;  %v13369_v13 = vld [vmem:[%s16346_s0 + $0x28] ss:$156 sps:$4 sm:$0xff]  }
 0x2a2   : > { %10954 = vmatprep.mubr.bf16.mxu0 %v13340_v16  ;;  %v13380_v14 = vld [vmem:[%s15185_s11 + $0x1004] ss:$8 sps:$4 sm:$0xff]   ;;  %v13375_v16 = vld [vmem:[%s16346_s0 + $0x78] ss:$156 sps:$4 sm:$0xff]  }
 0x2a3   : > { %10270 = vmatpush1.bf16.msra.mxu1 %v13275_v15  ;;  %v13372_v15 = vld [vmem:[%s15185_s11 + $0x600] ss:$8 sps:$4 sm:$0xff]  }
 0x2a4   : > { %10980 = vmatpush1.bf16.msra.mxu0 %v13278_v17  ;;  %10271 = vmatprep.subr.bf16.mxu1 %v13283_v18  ;;  %v13378_v17 = vld [vmem:[%s15185_s11 + $0x1000] ss:$8 sps:$4 sm:$0xff]   ;;  %v13383_v18 = vld [vmem:[%s15185_s11 + $0x614] ss:$8 sps:$4 sm:$0xff]  }
 0x2a5   : > { %10981 = vmatprep.subr.bf16.mxu0 %v13286_v19  ;;  %v13386_v19 = vld [vmem:[%s15185_s11 + $0x1014] ss:$8 sps:$4 sm:$0xff]  }
 0x2a6   : > { %10245 = vmatmul.mubr.bf16.gmra.mrb[8].mxu1 %v13345_v20  ;;  %v13435_v20 = vld [vmem:[%s16346_s0 + $0x164] ss:$156 sps:$4 sm:$0xff]  }
 0x2a7   : > { %10955 = vmatmul.mubr.bf16.gmra.mrb[8].mxu0 %v13346_v22  ;;  %10272 = vmatpush1.bf16.msra.mxu1 %v13281_v21  ;;  %v13440_v21 = vld [vmem:[%s16346_s0 + $0x1b4] ss:$156 sps:$4 sm:$0xff]  }
 0x2a8   : > { %10982 = vmatpush1.bf16.msra.mxu0 %v13284_v25  ;;  %10273 = vmatprep.subr.bf16.mxu1 %v13289_v26  ;;  %v13381_v22 = vld [vmem:[%s15185_s11 + $0x610] ss:$8 sps:$4 sm:$0xff]   ;;  %v13392_v25 = vld [vmem:[%s15185_s11 + $0x1024] ss:$8 sps:$4 sm:$0xff]   ;;  %v13387_v26 = vld [vmem:[%s15185_s11 + $0x620] ss:$8 sps:$4 sm:$0xff]  }
 0x2a9   : > { %10983 = vmatprep.subr.bf16.mxu0 %v13292_v27  ;;  %10254 = vmatprep.mubr.bf16.mxu1 %v11677_v28  ;;  %v13445_v27 = vld [vmem:[%s16346_s0 + $0x160] ss:$156 sps:$4 sm:$0xff]   ;;  %v13446_v28 = vld [vmem:[%s16346_s0 + $0x1b0] ss:$156 sps:$4 sm:$0xff]  }
 0x2aa   : > { %10964 = vmatprep.mubr.bf16.mxu0 %v11697_v29  ;;  %v13390_v29 = vld [vmem:[%s15185_s11 + $0x1020] ss:$8 sps:$4 sm:$0xff]  }
 0x2ab   : > { %10274 = vmatpush1.bf16.msra.mxu1 %v13287_v30  ;;  %v13395_v30 = vld [vmem:[%s15185_s11 + $0x634] ss:$8 sps:$4 sm:$0xff]  }
 0x2ac   : > { %10984 = vmatpush1.bf16.msra.mxu0 %v13290_v31  ;;  %10275 = vmatprep.subr.bf16.mxu1 %v13295_v32  ;;  %v13398_v31 = vld [vmem:[%s15185_s11 + $0x1034] ss:$8 sps:$4 sm:$0xff]  }
 0x2ad   : > { %10985 = vmatprep.subr.bf16.mxu0 %v13298_v33  ;;  %v13453_v32 = vld [vmem:[%s16346_s0 + $0x29c] ss:$156 sps:$4 sm:$0xff]  }
 0x2ae   : > { %10255 = vmatmul.mubr.bf16.gmra.mrb[12].mxu1 %v11676_v36  ;;  %v13393_v33 = vld [vmem:[%s15185_s11 + $0x630] ss:$8 sps:$4 sm:$0xff]   ;;  %v13401_v36 = vld [vmem:[%s15185_s11 + $0x644] ss:$8 sps:$4 sm:$0xff]  }
 0x2af   : > { %10965 = vmatmul.mubr.bf16.gmra.mrb[12].mxu0 %v11696_v37  ;;  %10276 = vmatpush1.bf16.msra.mxu1 %v13293_v34  ;;  %v13458_v34 = vld [vmem:[%s16346_s0 + $0x2ec] ss:$156 sps:$4 sm:$0xff]  }
 0x2b0   : > { %10986 = vmatpush1.bf16.msra.mxu0 %v13296_v35  ;;  %10277 = vmatprep.subr.bf16.mxu1 %v13301_v38  ;;  %v13396_v35 = vld [vmem:[%s15185_s11 + $0x1030] ss:$8 sps:$4 sm:$0xff]   ;;  %v13404_v37 = vld [vmem:[%s15185_s11 + $0x1044] ss:$8 sps:$4 sm:$0xff]  }
 0x2b1   : > { %10987 = vmatprep.subr.bf16.mxu0 %v13304_v39  ;;  %10295 = vmatprep.mubr.bf16.mxu1 %v13371_v40  ;;  %v13463_v38 = vld [vmem:[%s16346_s0 + $0x298] ss:$156 sps:$4 sm:$0xff]   ;;  %v13464_v39 = vld [vmem:[%s16346_s0 + $0x2e8] ss:$156 sps:$4 sm:$0xff]  }
 0x2b2   : > { %11005 = vmatprep.mubr.bf16.mxu0 %v13377_v41  ;;  %v5382_v40 = vld [vmem:[%s16346_s0 + $0x3d0] sm:$0xff]  ;;  %v5392_v41 = vld [vmem:[%s16346_s0 + $0x420] sm:$0xff] }
 0x2b3   : > { %10278 = vmatpush1.bf16.msra.mxu1 %v13299_v42  ;;  %v13399_v42 = vld [vmem:[%s15185_s11 + $0x640] ss:$8 sps:$4 sm:$0xff]  }
 0x2b4   : > { %10988 = vmatpush1.bf16.msra.mxu0 %v13302_v43  ;;  %10279 = vmatprep.subr.bf16.mxu1 %v13307_v44  ;;  %v13402_v43 = vld [vmem:[%s15185_s11 + $0x1040] ss:$8 sps:$4 sm:$0xff]   ;;  %v13407_v44 = vld [vmem:[%s15185_s11 + $0x654] ss:$8 sps:$4 sm:$0xff]  }
 0x2b5   : > { %10989 = vmatprep.subr.bf16.mxu0 %v13310_v45  ;;  %v13410_v45 = vld [vmem:[%s15185_s11 + $0x1054] ss:$8 sps:$4 sm:$0xff]  }
 0x2b7   : > { %10280 = vmatpush1.bf16.msra.mxu1 %v13305_v46  ;;  %v11679_v46 = vcombine.high %v5382_v40, %v5382_v40 }
 0x2b8   : > { %10990 = vmatpush1.bf16.msra.mxu0 %v13308_v47  ;;  %10281 = vmatprep.subr.bf16.mxu1 %v13313_v48  ;;  %v11699_v47 = vcombine.high %v5392_v41, %v5392_v41  ;;  %v13405_v48 = vld [vmem:[%s15185_s11 + $0x650] ss:$8 sps:$4 sm:$0xff]  }
 0x2b9   : > { %10991 = vmatprep.subr.bf16.mxu0 %v13316_v49  ;;  %v13408_v49 = vld [vmem:[%s15185_s11 + $0x1050] ss:$8 sps:$4 sm:$0xff]  }
 0x2bb   : > { %10282 = vmatpush1.bf16.msra.mxu1 %v13311_v50  ;;  %v13413_v50 = vld [vmem:[%s15185_s11 + $0x664] ss:$8 sps:$4 sm:$0xff]  }
 0x2bc   : > { %10992 = vmatpush1.bf16.msra.mxu0 %v13314_v51  ;;  %10283 = vmatprep.subr.bf16.mxu1 %v13321_v52  ;;  %v13416_v51 = vld [vmem:[%s15185_s11 + $0x1064] ss:$8 sps:$4 sm:$0xff]   ;;  %v13411_v52 = vld [vmem:[%s15185_s11 + $0x660] ss:$8 sps:$4 sm:$0xff]  }
 0x2bd   : > { %10993 = vmatprep.subr.bf16.mxu0 %v13326_v53  ;;  %v11678_v53 = vcombine.low %v5382_v40, %v5382_v40  ;;  %v13499_v40 = vld [vmem:[%s15185_s11 + $0x710] ss:$8 sps:$4 sm:$0xff]  }
 0x2bf   : > { %10284 = vmatpush1.bf16.msra.mxu1 %v13319_v54  ;;  %v11698_v54 = vcombine.low %v5392_v41, %v5392_v41  ;;  %v13502_v41 = vld [vmem:[%s15185_s11 + $0x1110] ss:$8 sps:$4 sm:$0xff]  }
 0x2c0   : > { %10994 = vmatpush1.bf16.msra.mxu0 %v13324_v55  ;;  %10285 = vmatprep.subr.bf16.mxu1 %v13331_v56  ;;  %v13414_v55 = vld [vmem:[%s15185_s11 + $0x1060] ss:$8 sps:$4 sm:$0xff]   ;;  %v13419_v56 = vld [vmem:[%s15185_s11 + $0x674] ss:$8 sps:$4 sm:$0xff]  }
 0x2c1   : > { %10995 = vmatprep.subr.bf16.mxu0 %v13334_v57  ;;  %v13422_v57 = vld [vmem:[%s15185_s11 + $0x1074] ss:$8 sps:$4 sm:$0xff]  }
 0x2c3   : > { %10286 = vmatpush1.bf16.msra.mxu1 %v13329_v58  ;;  %v13489_v58 = vld [vmem:[%s16346_s0 + $0x34] ss:$156 sps:$4 sm:$0xff]  }
 0x2c4   : > { %10996 = vmatpush1.bf16.msra.mxu0 %v13332_v59  ;;  %10287 = vmatprep.subr.bf16.mxu1 %v13339_v60  ;;  %v13495_v59 = vld [vmem:[%s16346_s0 + $0x84] ss:$156 sps:$4 sm:$0xff]   ;;  %v13417_v60 = vld [vmem:[%s15185_s11 + $0x670] ss:$8 sps:$4 sm:$0xff]  }
 0x2c5   : > { %10997 = vmatprep.subr.bf16.mxu0 %v13344_v61  ;;  %v13420_v61 = vld [vmem:[%s15185_s11 + $0x1070] ss:$8 sps:$4 sm:$0xff]  }
 0x2c7   : > { %10288 = vmatpush1.bf16.msra.mxu1 %v13337_v62  ;;  %v13425_v62 = vld [vmem:[%s15185_s11 + $0x684] ss:$8 sps:$4 sm:$0xff]  }
 0x2c8   : > { %10998 = vmatpush1.bf16.msra.mxu0 %v13342_v63  ;;  %10289 = vmatprep.subr.bf16.mxu1 %v13349_v0  ;;  %v13428_v63 = vld [vmem:[%s15185_s11 + $0x1084] ss:$8 sps:$4 sm:$0xff]   ;;  %v13423_v0 = vld [vmem:[%s15185_s11 + $0x680] ss:$8 sps:$4 sm:$0xff]  }
 0x2c9   : > { %10999 = vmatprep.subr.bf16.mxu0 %v13352_v1  ;;  %v13426_v1 = vld [vmem:[%s15185_s11 + $0x1080] ss:$8 sps:$4 sm:$0xff]  }
 0x2cb   : > { %10290 = vmatpush1.bf16.msra.mxu1 %v13347_v2  ;;  %v13431_v2 = vld [vmem:[%s15185_s11 + $0x694] ss:$8 sps:$4 sm:$0xff]  }
 0x2cc   : > { %11000 = vmatpush1.bf16.msra.mxu0 %v13350_v3  ;;  %10291 = vmatprep.subr.bf16.mxu1 %v13356_v4  ;;  %v13434_v3 = vld [vmem:[%s15185_s11 + $0x1094] ss:$8 sps:$4 sm:$0xff]   ;;  %v13429_v4 = vld [vmem:[%s15185_s11 + $0x690] ss:$8 sps:$4 sm:$0xff]  }
 0x2cd   : > { %11001 = vmatprep.subr.bf16.mxu0 %v13360_v5  ;;  %v13432_v5 = vld [vmem:[%s15185_s11 + $0x1090] ss:$8 sps:$4 sm:$0xff]  }
 0x2cf   : > { %10292 = vmatpush1.bf16.msra.mxu1 %v13354_v6  ;;  %v13439_v6 = vld [vmem:[%s15185_s11 + $0x6a4] ss:$8 sps:$4 sm:$0xff]  }
 0x2d0   : > { %11002 = vmatpush1.bf16.msra.mxu0 %v13358_v7  ;;  %10293 = vmatprep.subr.bf16.mxu1 %v13365_v8  ;;  %v13444_v7 = vld [vmem:[%s15185_s11 + $0x10a4] ss:$8 sps:$4 sm:$0xff]   ;;  %v13437_v8 = vld [vmem:[%s15185_s11 + $0x6a0] ss:$8 sps:$4 sm:$0xff]  }
 0x2d1   : > { %11003 = vmatprep.subr.bf16.mxu0 %v13368_v9  ;;  %v13442_v9 = vld [vmem:[%s15185_s11 + $0x10a0] ss:$8 sps:$4 sm:$0xff]  }
 0x2d3   : > { %10294 = vmatpush1.bf16.msra.mxu1 %v13363_v10  ;;  %v13449_v10 = vld [vmem:[%s15185_s11 + $0x6b4] ss:$8 sps:$4 sm:$0xff]  }
 0x2d4   : > { %11004 = vmatpush1.bf16.msra.mxu0 %v13366_v11  ;;  %10334 = vmatprep.subr.bf16.mxu1 %v13374_v12  ;;  %v13452_v11 = vld [vmem:[%s15185_s11 + $0x10b4] ss:$8 sps:$4 sm:$0xff]   ;;  %v13447_v12 = vld [vmem:[%s15185_s11 + $0x6b0] ss:$8 sps:$4 sm:$0xff]  }
 0x2d5   : > { %11044 = vmatprep.subr.bf16.mxu0 %v13380_v14  ;;  %v13457_v14 = vld [vmem:[%s15185_s11 + $0x6c4] ss:$8 sps:$4 sm:$0xff]  }
 0x2d6   : > { %10296 = vmatmul.mubr.bf16.vlgmr.msra.gmra.mrb[0].mxu1 %v13369_v13  ;;  %v13450_v13 = vld [vmem:[%s15185_s11 + $0x10b0] ss:$8 sps:$4 sm:$0xff]  }
 0x2d7   : > { %11006 = vmatmul.mubr.bf16.vlgmr.msra.gmra.mrb[0].mxu0 %v13375_v16  ;;  %10335 = vmatpush1.bf16.msra.mxu1 %v13372_v15  ;;  %v13462_v15 = vld [vmem:[%s15185_s11 + $0x10c4] ss:$8 sps:$4 sm:$0xff]   ;;  %v13455_v16 = vld [vmem:[%s15185_s11 + $0x6c0] ss:$8 sps:$4 sm:$0xff]  }
 0x2d8   : > { %11045 = vmatpush1.bf16.msra.mxu0 %v13378_v17  ;;  %10336 = vmatprep.subr.bf16.mxu1 %v13383_v18  ;;  %v13460_v17 = vld [vmem:[%s15185_s11 + $0x10c0] ss:$8 sps:$4 sm:$0xff]   ;;  %v13467_v18 = vld [vmem:[%s15185_s11 + $0x6d4] ss:$8 sps:$4 sm:$0xff]  }
 0x2d9   : > { %11046 = vmatprep.subr.bf16.mxu0 %v13386_v19  ;;  %10305 = vmatprep.mubr.bf16.mxu1 %v13435_v20  ;;  %v13470_v19 = vld [vmem:[%s15185_s11 + $0x10d4] ss:$8 sps:$4 sm:$0xff]   ;;  %v13465_v20 = vld [vmem:[%s15185_s11 + $0x6d0] ss:$8 sps:$4 sm:$0xff]  }
 0x2da   : > { %11015 = vmatprep.mubr.bf16.mxu0 %v13440_v21  ;;  %v13468_v21 = vld [vmem:[%s15185_s11 + $0x10d0] ss:$8 sps:$4 sm:$0xff]  }
 0x2db   : > { %10337 = vmatpush1.bf16.msra.mxu1 %v13381_v22  ;;  %v13474_v22 = vld [vmem:[%s15185_s11 + $0x6e4] ss:$8 sps:$4 sm:$0xff]  }
 0x2dc   : > { %11047 = vmatpush1.bf16.msra.mxu0 %v13384_v23  ;;  %10338 = vmatprep.subr.bf16.mxu1 %v13389_v24  ;;  %v13478_v23 = vld [vmem:[%s15185_s11 + $0x10e4] ss:$8 sps:$4 sm:$0xff]   ;;  %v13472_v24 = vld [vmem:[%s15185_s11 + $0x6e0] ss:$8 sps:$4 sm:$0xff]  }
 0x2dd   : > { %11048 = vmatprep.subr.bf16.mxu0 %v13392_v25  ;;  %v13476_v25 = vld [vmem:[%s15185_s11 + $0x10e0] ss:$8 sps:$4 sm:$0xff]  }
 0x2de   : > { %10306 = vmatmul.mubr.bf16.gmra.mrb[4].mxu1 %v13445_v27  ;;  %v13486_v27 = vld [vmem:[%s15185_s11 + $0x10f4] ss:$8 sps:$4 sm:$0xff]  }
 0x2df   : > { %11016 = vmatmul.mubr.bf16.gmra.mrb[4].mxu0 %v13446_v28  ;;  %10339 = vmatpush1.bf16.msra.mxu1 %v13387_v26  ;;  %v13483_v26 = vld [vmem:[%s15185_s11 + $0x6f4] ss:$8 sps:$4 sm:$0xff]   ;;  %v13481_v28 = vld [vmem:[%s15185_s11 + $0x6f0] ss:$8 sps:$4 sm:$0xff]  }
 0x2e0   : > { %11049 = vmatpush1.bf16.msra.mxu0 %v13390_v29  ;;  %10340 = vmatprep.subr.bf16.mxu1 %v13395_v30  ;;  %v13484_v29 = vld [vmem:[%s15185_s11 + $0x10f0] ss:$8 sps:$4 sm:$0xff]   ;;  %v13492_v30 = vld [vmem:[%s15185_s11 + $0x704] ss:$8 sps:$4 sm:$0xff]  }
 0x2e1   : > { %11050 = vmatprep.subr.bf16.mxu0 %v13398_v31  ;;  %10315 = vmatprep.mubr.bf16.mxu1 %v13453_v32  ;;  %v13498_v31 = vld [vmem:[%s15185_s11 + $0x1104] ss:$8 sps:$4 sm:$0xff]  }
 0x2e2   : > { %11025 = vmatprep.mubr.bf16.mxu0 %v13458_v34  ;;  %v13487_v32 = vld [vmem:[%s16346_s0 + $0x30] ss:$156 sps:$4 sm:$0xff]   ;;  %v13493_v34 = vld [vmem:[%s16346_s0 + $0x80] ss:$156 sps:$4 sm:$0xff]  }
 0x2e3   : > { %10341 = vmatpush1.bf16.msra.mxu1 %v13393_v33  ;;  %v13490_v33 = vld [vmem:[%s15185_s11 + $0x700] ss:$8 sps:$4 sm:$0xff]  }
 0x2e4   : > { %11051 = vmatpush1.bf16.msra.mxu0 %v13396_v35  ;;  %10342 = vmatprep.subr.bf16.mxu1 %v13401_v36  ;;  %v13496_v35 = vld [vmem:[%s15185_s11 + $0x1100] ss:$8 sps:$4 sm:$0xff]   ;;  %v13501_v36 = vld [vmem:[%s15185_s11 + $0x714] ss:$8 sps:$4 sm:$0xff]  }
 0x2e5   : > { %11052 = vmatprep.subr.bf16.mxu0 %v13404_v37  ;;  %v13504_v37 = vld [vmem:[%s15185_s11 + $0x1114] ss:$8 sps:$4 sm:$0xff]  }
 0x2e6   : > { %10316 = vmatmul.mubr.bf16.gmra.mrb[8].mxu1 %v13463_v38  ;;  %v13553_v38 = vld [vmem:[%s16346_s0 + $0x16c] ss:$156 sps:$4 sm:$0xff]  }
 0x2e7   : > { %11026 = vmatmul.mubr.bf16.gmra.mrb[8].mxu0 %v13464_v39  ;;  %10343 = vmatpush1.bf16.msra.mxu1 %v13399_v42  ;;  %v13558_v39 = vld [vmem:[%s16346_s0 + $0x1bc] ss:$156 sps:$4 sm:$0xff]   ;;  %v13507_v42 = vld [vmem:[%s15185_s11 + $0x724] ss:$8 sps:$4 sm:$0xff]  }
 0x2e8   : > { %11053 = vmatpush1.bf16.msra.mxu0 %v13402_v43  ;;  %10344 = vmatprep.subr.bf16.mxu1 %v13407_v44  ;;  %v13510_v43 = vld [vmem:[%s15185_s11 + $0x1124] ss:$8 sps:$4 sm:$0xff]   ;;  %v13505_v44 = vld [vmem:[%s15185_s11 + $0x720] ss:$8 sps:$4 sm:$0xff]  }
 0x2e9   : > { %11054 = vmatprep.subr.bf16.mxu0 %v13410_v45  ;;  %10325 = vmatprep.mubr.bf16.mxu1 %v11679_v46  ;;  %v13508_v45 = vld [vmem:[%s15185_s11 + $0x1120] ss:$8 sps:$4 sm:$0xff]   ;;  %v13513_v46 = vld [vmem:[%s15185_s11 + $0x734] ss:$8 sps:$4 sm:$0xff]  }
 0x2ea   : > { %11035 = vmatprep.mubr.bf16.mxu0 %v11699_v47  ;;  %v13563_v47 = vld [vmem:[%s16346_s0 + $0x168] ss:$156 sps:$4 sm:$0xff]  }
 0x2eb   : > { %10345 = vmatpush1.bf16.msra.mxu1 %v13405_v48  ;;  %v13564_v48 = vld [vmem:[%s16346_s0 + $0x1b8] ss:$156 sps:$4 sm:$0xff]  }
 0x2ec   : > { %11055 = vmatpush1.bf16.msra.mxu0 %v13408_v49  ;;  %10346 = vmatprep.subr.bf16.mxu1 %v13413_v50  ;;  %v13516_v49 = vld [vmem:[%s15185_s11 + $0x1134] ss:$8 sps:$4 sm:$0xff]   ;;  %v13571_v50 = vld [vmem:[%s16346_s0 + $0x2a4] ss:$156 sps:$4 sm:$0xff]  }
 0x2ed   : > { %11056 = vmatprep.subr.bf16.mxu0 %v13416_v51  ;;  %v13576_v51 = vld [vmem:[%s16346_s0 + $0x2f4] ss:$156 sps:$4 sm:$0xff]  }
 0x2ee   : > { %10326 = vmatmul.mubr.bf16.gmra.mrb[12].mxu1 %v11678_v53  ;;  %v13514_v53 = vld [vmem:[%s15185_s11 + $0x1130] ss:$8 sps:$4 sm:$0xff]  }
 0x2ef   : > { %11036 = vmatmul.mubr.bf16.gmra.mrb[12].mxu0 %v11698_v54  ;;  %10347 = vmatpush1.bf16.msra.mxu1 %v13411_v52  ;;  %v13511_v52 = vld [vmem:[%s15185_s11 + $0x730] ss:$8 sps:$4 sm:$0xff]   ;;  %v13519_v54 = vld [vmem:[%s15185_s11 + $0x744] ss:$8 sps:$4 sm:$0xff]  }
 0x2f0   : > { %11057 = vmatpush1.bf16.msra.mxu0 %v13414_v55  ;;  %10348 = vmatprep.subr.bf16.mxu1 %v13419_v56  ;;  %v13522_v55 = vld [vmem:[%s15185_s11 + $0x1144] ss:$8 sps:$4 sm:$0xff]   ;;  %v13517_v56 = vld [vmem:[%s15185_s11 + $0x740] ss:$8 sps:$4 sm:$0xff]  }
 0x2f1   : > { %11058 = vmatprep.subr.bf16.mxu0 %v13422_v57  ;;  %10366 = vmatprep.mubr.bf16.mxu1 %v13489_v58  ;;  %v13520_v57 = vld [vmem:[%s15185_s11 + $0x1140] ss:$8 sps:$4 sm:$0xff]  }
 0x2f2   : > { %11076 = vmatprep.mubr.bf16.mxu0 %v13495_v59  ;;  %v13581_v58 = vld [vmem:[%s16346_s0 + $0x2a0] ss:$156 sps:$4 sm:$0xff]   ;;  %v13582_v59 = vld [vmem:[%s16346_s0 + $0x2f0] ss:$156 sps:$4 sm:$0xff]  }
 0x2f3   : > { %10349 = vmatpush1.bf16.msra.mxu1 %v13417_v60  ;;  %v5383_v60 = vld [vmem:[%s16346_s0 + $0x3d8] sm:$0xff] }
 0x2f4   : > { %11059 = vmatpush1.bf16.msra.mxu0 %v13420_v61  ;;  %10350 = vmatprep.subr.bf16.mxu1 %v13425_v62  ;;  %v5393_v61 = vld [vmem:[%s16346_s0 + $0x428] sm:$0xff]  ;;  %v13525_v62 = vld [vmem:[%s15185_s11 + $0x754] ss:$8 sps:$4 sm:$0xff]  }
 0x2f5   : > { %11060 = vmatprep.subr.bf16.mxu0 %v13428_v63  ;;  %v13528_v63 = vld [vmem:[%s15185_s11 + $0x1154] ss:$8 sps:$4 sm:$0xff]  }
 0x2f7   : > { %10351 = vmatpush1.bf16.msra.mxu1 %v13423_v0  ;;  %v11681_v0 = vcombine.high %v5383_v60, %v5383_v60 }
 0x2f8   : > { %11061 = vmatpush1.bf16.msra.mxu0 %v13426_v1  ;;  %10352 = vmatprep.subr.bf16.mxu1 %v13431_v2  ;;  %v11701_v1 = vcombine.high %v5393_v61, %v5393_v61  ;;  %v13523_v2 = vld [vmem:[%s15185_s11 + $0x750] ss:$8 sps:$4 sm:$0xff]  }
 0x2f9   : > { %11062 = vmatprep.subr.bf16.mxu0 %v13434_v3  ;;  %v13526_v3 = vld [vmem:[%s15185_s11 + $0x1150] ss:$8 sps:$4 sm:$0xff]  }
 0x2fb   : > { %10353 = vmatpush1.bf16.msra.mxu1 %v13429_v4  ;;  %v13531_v4 = vld [vmem:[%s15185_s11 + $0x764] ss:$8 sps:$4 sm:$0xff]  }
 0x2fc   : > { %11063 = vmatpush1.bf16.msra.mxu0 %v13432_v5  ;;  %10354 = vmatprep.subr.bf16.mxu1 %v13439_v6  ;;  %v13534_v5 = vld [vmem:[%s15185_s11 + $0x1164] ss:$8 sps:$4 sm:$0xff]   ;;  %v13529_v6 = vld [vmem:[%s15185_s11 + $0x760] ss:$8 sps:$4 sm:$0xff]  }
 0x2fd   : > { %11064 = vmatprep.subr.bf16.mxu0 %v13444_v7  ;;  %v13532_v7 = vld [vmem:[%s15185_s11 + $0x1160] ss:$8 sps:$4 sm:$0xff]  }
 0x2ff   : > { %10355 = vmatpush1.bf16.msra.mxu1 %v13437_v8  ;;  %v11680_v8 = vcombine.low %v5383_v60, %v5383_v60  ;;  %v13620_v60 = vld [vmem:[%s15185_s11 + $0x1210] ss:$8 sps:$4 sm:$0xff]  }
 0x300   : > { %11065 = vmatpush1.bf16.msra.mxu0 %v13442_v9  ;;  %10356 = vmatprep.subr.bf16.mxu1 %v13449_v10  ;;  %v11700_v9 = vcombine.low %v5393_v61, %v5393_v61  ;;  %v13537_v10 = vld [vmem:[%s15185_s11 + $0x774] ss:$8 sps:$4 sm:$0xff]   ;;  %v13625_v61 = vld [vmem:[%s15185_s11 + $0x824] ss:$8 sps:$4 sm:$0xff]  }
 0x301   : > { %11066 = vmatprep.subr.bf16.mxu0 %v13452_v11  ;;  %v13540_v11 = vld [vmem:[%s15185_s11 + $0x1174] ss:$8 sps:$4 sm:$0xff]  }
 0x303   : > { %10357 = vmatpush1.bf16.msra.mxu1 %v13447_v12  ;;  %v13607_v12 = vld [vmem:[%s16346_s0 + $0x3c] ss:$156 sps:$4 sm:$0xff]  }
 0x304   : > { %11067 = vmatpush1.bf16.msra.mxu0 %v13450_v13  ;;  %10358 = vmatprep.subr.bf16.mxu1 %v13457_v14  ;;  %v13613_v13 = vld [vmem:[%s16346_s0 + $0x8c] ss:$156 sps:$4 sm:$0xff]   ;;  %v13535_v14 = vld [vmem:[%s15185_s11 + $0x770] ss:$8 sps:$4 sm:$0xff]  }
 0x305   : > { %11068 = vmatprep.subr.bf16.mxu0 %v13462_v15  ;;  %v13538_v15 = vld [vmem:[%s15185_s11 + $0x1170] ss:$8 sps:$4 sm:$0xff]  }
 0x307   : > { %10359 = vmatpush1.bf16.msra.mxu1 %v13455_v16  ;;  %v13543_v16 = vld [vmem:[%s15185_s11 + $0x784] ss:$8 sps:$4 sm:$0xff]  }
 0x308   : > { %11069 = vmatpush1.bf16.msra.mxu0 %v13460_v17  ;;  %10360 = vmatprep.subr.bf16.mxu1 %v13467_v18  ;;  %v13546_v17 = vld [vmem:[%s15185_s11 + $0x1184] ss:$8 sps:$4 sm:$0xff]   ;;  %v13541_v18 = vld [vmem:[%s15185_s11 + $0x780] ss:$8 sps:$4 sm:$0xff]  }
 0x309   : > { %11070 = vmatprep.subr.bf16.mxu0 %v13470_v19  ;;  %v13544_v19 = vld [vmem:[%s15185_s11 + $0x1180] ss:$8 sps:$4 sm:$0xff]  }
 0x30b   : > { %10361 = vmatpush1.bf16.msra.mxu1 %v13465_v20  ;;  %v13549_v20 = vld [vmem:[%s15185_s11 + $0x794] ss:$8 sps:$4 sm:$0xff]  }
 0x30c   : > { %11071 = vmatpush1.bf16.msra.mxu0 %v13468_v21  ;;  %10362 = vmatprep.subr.bf16.mxu1 %v13474_v22  ;;  %v13552_v21 = vld [vmem:[%s15185_s11 + $0x1194] ss:$8 sps:$4 sm:$0xff]   ;;  %v13547_v22 = vld [vmem:[%s15185_s11 + $0x790] ss:$8 sps:$4 sm:$0xff]  }
 0x30d   : > { %11072 = vmatprep.subr.bf16.mxu0 %v13478_v23  ;;  %v13550_v23 = vld [vmem:[%s15185_s11 + $0x1190] ss:$8 sps:$4 sm:$0xff]  }
 0x30f   : > { %10363 = vmatpush1.bf16.msra.mxu1 %v13472_v24  ;;  %v13856_v24 = vmov 0  }
 0x310   : > { %11073 = vmatpush1.bf16.msra.mxu0 %v13476_v25  ;;  %10364 = vmatprep.subr.bf16.mxu1 %v13483_v26  ;;  %v13557_v25 = vld [vmem:[%s15185_s11 + $0x7a4] ss:$8 sps:$4 sm:$0xff]  }
 0x311   : > { %11074 = vmatprep.subr.bf16.mxu0 %v13486_v27  ;;  %12682 = vset.pattern.permute.xlu1 %v13856_v24  ;;  %v13562_v26 = vld [vmem:[%s15185_s11 + $0x11a4] ss:$8 sps:$4 sm:$0xff]   ;;  %v13555_v27 = vld [vmem:[%s15185_s11 + $0x7a0] ss:$8 sps:$4 sm:$0xff]  }
 0x312   : > { %12681 = vset.pattern.permute.xlu0 %v13856_v24 }
 0x313   : > { %10365 = vmatpush1.bf16.msra.mxu1 %v13481_v28  ;;  %v13560_v28 = vld [vmem:[%s15185_s11 + $0x11a0] ss:$8 sps:$4 sm:$0xff]  }
 0x314   : > { %11075 = vmatpush1.bf16.msra.mxu0 %v13484_v29  ;;  %10405 = vmatprep.subr.bf16.mxu1 %v13492_v30  ;;  %v13567_v29 = vld [vmem:[%s15185_s11 + $0x7b4] ss:$8 sps:$4 sm:$0xff]  }
 0x315   : > { %11115 = vmatprep.subr.bf16.mxu0 %v13498_v31  ;;  %v13570_v30 = vld [vmem:[%s15185_s11 + $0x11b4] ss:$8 sps:$4 sm:$0xff]   ;;  %v13565_v31 = vld [vmem:[%s15185_s11 + $0x7b0] ss:$8 sps:$4 sm:$0xff]  }
 0x316   : > { %10367 = vmatmul.mubr.bf16.vlgmr.msra.gmra.mrb[0].mxu1 %v13487_v32  ;;  %v13568_v32 = vld [vmem:[%s15185_s11 + $0x11b0] ss:$8 sps:$4 sm:$0xff]  }
 0x317   : > { %11077 = vmatmul.mubr.bf16.vlgmr.msra.gmra.mrb[0].mxu0 %v13493_v34  ;;  %10406 = vmatpush1.bf16.msra.mxu1 %v13490_v33  ;;  %v13575_v33 = vld [vmem:[%s15185_s11 + $0x7c4] ss:$8 sps:$4 sm:$0xff]  }
 0x318   : > { %11116 = vmatpush1.bf16.msra.mxu0 %v13496_v35  ;;  %10407 = vmatprep.subr.bf16.mxu1 %v13501_v36  ;;  %v13580_v34 = vld [vmem:[%s15185_s11 + $0x11c4] ss:$8 sps:$4 sm:$0xff]   ;;  %v13573_v35 = vld [vmem:[%s15185_s11 + $0x7c0] ss:$8 sps:$4 sm:$0xff]  }
 0x319   : > { %11117 = vmatprep.subr.bf16.mxu0 %v13504_v37  ;;  %10376 = vmatprep.mubr.bf16.mxu1 %v13553_v38  ;;  %v13578_v36 = vld [vmem:[%s15185_s11 + $0x11c0] ss:$8 sps:$4 sm:$0xff]   ;;  %v13585_v37 = vld [vmem:[%s15185_s11 + $0x7d4] ss:$8 sps:$4 sm:$0xff]  }
 0x31a   : > { %11086 = vmatprep.mubr.bf16.mxu0 %v13558_v39  ;;  %v13588_v38 = vld [vmem:[%s15185_s11 + $0x11d4] ss:$8 sps:$4 sm:$0xff]   ;;  %v13583_v39 = vld [vmem:[%s15185_s11 + $0x7d0] ss:$8 sps:$4 sm:$0xff]  }
 0x31b   : > { %10408 = vmatpush1.bf16.msra.mxu1 %v13499_v40  ;;  %v13586_v40 = vld [vmem:[%s15185_s11 + $0x11d0] ss:$8 sps:$4 sm:$0xff]  }
 0x31c   : > { %11118 = vmatpush1.bf16.msra.mxu0 %v13502_v41  ;;  %10409 = vmatprep.subr.bf16.mxu1 %v13507_v42  ;;  %v13592_v41 = vld [vmem:[%s15185_s11 + $0x7e4] ss:$8 sps:$4 sm:$0xff]  }
 0x31d   : > { %11119 = vmatprep.subr.bf16.mxu0 %v13510_v43  ;;  %v13596_v42 = vld [vmem:[%s15185_s11 + $0x11e4] ss:$8 sps:$4 sm:$0xff]   ;;  %v13590_v43 = vld [vmem:[%s15185_s11 + $0x7e0] ss:$8 sps:$4 sm:$0xff]  }
 0x31e   : > { %10377 = vmatmul.mubr.bf16.gmra.mrb[4].mxu1 %v13563_v47  ;;  %v13599_v47 = vld [vmem:[%s15185_s11 + $0x7f0] ss:$8 sps:$4 sm:$0xff]  }
 0x31f   : > { %11087 = vmatmul.mubr.bf16.gmra.mrb[4].mxu0 %v13564_v48  ;;  %10410 = vmatpush1.bf16.msra.mxu1 %v13505_v44  ;;  %v13594_v44 = vld [vmem:[%s15185_s11 + $0x11e0] ss:$8 sps:$4 sm:$0xff]   ;;  %v13602_v48 = vld [vmem:[%s15185_s11 + $0x11f0] ss:$8 sps:$4 sm:$0xff]  }
 0x320   : > { %11120 = vmatpush1.bf16.msra.mxu0 %v13508_v45  ;;  %10411 = vmatprep.subr.bf16.mxu1 %v13513_v46  ;;  %v13601_v45 = vld [vmem:[%s15185_s11 + $0x7f4] ss:$8 sps:$4 sm:$0xff]  }
 0x321   : > { %11121 = vmatprep.subr.bf16.mxu0 %v13516_v49  ;;  %10386 = vmatprep.mubr.bf16.mxu1 %v13571_v50  ;;  %v13604_v46 = vld [vmem:[%s15185_s11 + $0x11f4] ss:$8 sps:$4 sm:$0xff]   ;;  %v13610_v49 = vld [vmem:[%s15185_s11 + $0x804] ss:$8 sps:$4 sm:$0xff]  }
 0x322   : > { %11096 = vmatprep.mubr.bf16.mxu0 %v13576_v51  ;;  %v13616_v50 = vld [vmem:[%s15185_s11 + $0x1204] ss:$8 sps:$4 sm:$0xff]   ;;  %v13605_v51 = vld [vmem:[%s16346_s0 + $0x38] ss:$156 sps:$4 sm:$0xff]  }
 0x323   : > { %10412 = vmatpush1.bf16.msra.mxu1 %v13511_v52  ;;  %v13611_v52 = vld [vmem:[%s16346_s0 + $0x88] ss:$156 sps:$4 sm:$0xff]  }
 0x324   : > { %11122 = vmatpush1.bf16.msra.mxu0 %v13514_v53  ;;  %10413 = vmatprep.subr.bf16.mxu1 %v13519_v54  ;;  %v13608_v53 = vld [vmem:[%s15185_s11 + $0x800] ss:$8 sps:$4 sm:$0xff]  }
 0x325   : > { %11123 = vmatprep.subr.bf16.mxu0 %v13522_v55  ;;  %v13614_v54 = vld [vmem:[%s15185_s11 + $0x1200] ss:$8 sps:$4 sm:$0xff]   ;;  %v13619_v55 = vld [vmem:[%s15185_s11 + $0x814] ss:$8 sps:$4 sm:$0xff]  }
 0x326   : > { %10387 = vmatmul.mubr.bf16.gmra.mrb[8].mxu1 %v13581_v58  ;;  %v13673_v58 = vld [vmem:[%s16346_s0 + $0x174] ss:$156 sps:$4 sm:$0xff]  }
 0x327   : > { %11097 = vmatmul.mubr.bf16.gmra.mrb[8].mxu0 %v13582_v59  ;;  %10414 = vmatpush1.bf16.msra.mxu1 %v13517_v56  ;;  %v13622_v56 = vld [vmem:[%s15185_s11 + $0x1214] ss:$8 sps:$4 sm:$0xff]   ;;  %v13617_v59 = vld [vmem:[%s15185_s11 + $0x810] ss:$8 sps:$4 sm:$0xff]  }
 0x328   : > { %11124 = vmatpush1.bf16.msra.mxu0 %v13520_v57  ;;  %10415 = vmatprep.subr.bf16.mxu1 %v13525_v62  ;;  %v13671_v57 = vld [vmem:[%s16346_s0 + $0x1c4] ss:$156 sps:$4 sm:$0xff]  }
 0x329   : > { %11125 = vmatprep.subr.bf16.mxu0 %v13528_v63  ;;  %10396 = vmatprep.mubr.bf16.mxu1 %v11681_v0  ;;  %v13628_v62 = vld [vmem:[%s15185_s11 + $0x1224] ss:$8 sps:$4 sm:$0xff]   ;;  %v13678_v63 = vld [vmem:[%s16346_s0 + $0x1c0] ss:$156 sps:$4 sm:$0xff]  }
 0x32a   : > { %11106 = vmatprep.mubr.bf16.mxu0 %v11701_v1  ;;  %v13682_v0 = vld [vmem:[%s16346_s0 + $0x170] ss:$156 sps:$4 sm:$0xff]   ;;  %v13623_v1 = vld [vmem:[%s15185_s11 + $0x820] ss:$8 sps:$4 sm:$0xff]  }
 0x32b   : > { %10416 = vmatpush1.bf16.msra.mxu1 %v13523_v2  ;;  %v13626_v2 = vld [vmem:[%s15185_s11 + $0x1220] ss:$8 sps:$4 sm:$0xff]  }
 0x32c   : > { %11126 = vmatpush1.bf16.msra.mxu0 %v13526_v3  ;;  %10417 = vmatprep.subr.bf16.mxu1 %v13531_v4  ;;  %v13631_v3 = vld [vmem:[%s15185_s11 + $0x834] ss:$8 sps:$4 sm:$0xff]  }
 0x32d   : > { %11127 = vmatprep.subr.bf16.mxu0 %v13534_v5  ;;  %v13634_v4 = vld [vmem:[%s15185_s11 + $0x1234] ss:$8 sps:$4 sm:$0xff]  }
 0x32e   : > { %10397 = vmatmul.mubr.bf16.gmra.mrb[12].mxu1 %v11680_v8  ;;  %v13689_v5 = vld [vmem:[%s16346_s0 + $0x2fc] ss:$156 sps:$4 sm:$0xff]  }
 0x32f   : > { %11107 = vmatmul.mubr.bf16.gmra.mrb[12].mxu0 %v11700_v9  ;;  %10418 = vmatpush1.bf16.msra.mxu1 %v13529_v6  ;;  %v13691_v6 = vld [vmem:[%s16346_s0 + $0x2ac] ss:$156 sps:$4 sm:$0xff]   ;;  %v13632_v8 = vld [vmem:[%s15185_s11 + $0x1230] ss:$8 sps:$4 sm:$0xff]  }
 0x330   : > { %11128 = vmatpush1.bf16.msra.mxu0 %v13532_v7  ;;  %10419 = vmatprep.subr.bf16.mxu1 %v13537_v10  ;;  %v13629_v7 = vld [vmem:[%s15185_s11 + $0x830] ss:$8 sps:$4 sm:$0xff]   ;;  %v13637_v9 = vld [vmem:[%s15185_s11 + $0x844] ss:$8 sps:$4 sm:$0xff]  }
 0x331   : > { %11129 = vmatprep.subr.bf16.mxu0 %v13540_v11  ;;  %10437 = vmatprep.mubr.bf16.mxu1 %v13607_v12  ;;  %v13640_v10 = vld [vmem:[%s15185_s11 + $0x1244] ss:$8 sps:$4 sm:$0xff]   ;;  %v13696_v11 = vld [vmem:[%s16346_s0 + $0x2f8] ss:$156 sps:$4 sm:$0xff]  }
 0x332   : > { %11147 = vmatprep.mubr.bf16.mxu0 %v13613_v13  ;;  %v13700_v12 = vld [vmem:[%s16346_s0 + $0x2a8] ss:$156 sps:$4 sm:$0xff]   ;;  %v5394_v13 = vld [vmem:[%s16346_s0 + $0x430] sm:$0xff] }
 0x333   : > { %10420 = vmatpush1.bf16.msra.mxu1 %v13535_v14  ;;  %v5384_v14 = vld [vmem:[%s16346_s0 + $0x3e0] sm:$0xff] }
 0x334   : > { %11130 = vmatpush1.bf16.msra.mxu0 %v13538_v15  ;;  %10421 = vmatprep.subr.bf16.mxu1 %v13543_v16  ;;  %v13635_v15 = vld [vmem:[%s15185_s11 + $0x840] ss:$8 sps:$4 sm:$0xff]  }
 0x335   : > { %11131 = vmatprep.subr.bf16.mxu0 %v13546_v17  ;;  %v13638_v16 = vld [vmem:[%s15185_s11 + $0x1240] ss:$8 sps:$4 sm:$0xff]   ;;  %v13643_v17 = vld [vmem:[%s15185_s11 + $0x854] ss:$8 sps:$4 sm:$0xff]  }
 0x337   : > { %10422 = vmatpush1.bf16.msra.mxu1 %v13541_v18  ;;  %v13646_v18 = vld [vmem:[%s15185_s11 + $0x1254] ss:$8 sps:$4 sm:$0xff]  }
 0x338   : > { %11132 = vmatpush1.bf16.msra.mxu0 %v13544_v19  ;;  %10423 = vmatprep.subr.bf16.mxu1 %v13549_v20  ;;  %v11703_v19 = vcombine.high %v5394_v13, %v5394_v13  ;;  %v11683_v20 = vcombine.high %v5384_v14, %v5384_v14 }
 0x339   : > { %11133 = vmatprep.subr.bf16.mxu0 %v13552_v21  ;;  %v13641_v21 = vld [vmem:[%s15185_s11 + $0x850] ss:$8 sps:$4 sm:$0xff]  }
 0x33b   : > { %10424 = vmatpush1.bf16.msra.mxu1 %v13547_v22  ;;  %v13644_v22 = vld [vmem:[%s15185_s11 + $0x1250] ss:$8 sps:$4 sm:$0xff]  }
 0x33c   : > { %11134 = vmatpush1.bf16.msra.mxu0 %v13550_v23  ;;  %10425 = vmatprep.subr.bf16.mxu1 %v13557_v25  ;;  %v13649_v23 = vld [vmem:[%s15185_s11 + $0x864] ss:$8 sps:$4 sm:$0xff]  }
 0x33d   : > { %11135 = vmatprep.subr.bf16.mxu0 %v13562_v26  ;;  %v13652_v25 = vld [vmem:[%s15185_s11 + $0x1264] ss:$8 sps:$4 sm:$0xff]   ;;  %v11702_v26 = vcombine.low %v5394_v13, %v5394_v13  ;;  %v13713_v13 = vld [vmem:[%s15185_s11 + $0x12e0] ss:$8 sps:$4 sm:$0xff]  }
 0x33f   : > { %10426 = vmatpush1.bf16.msra.mxu1 %v13555_v27  ;;  %v11682_v27 = vcombine.low %v5384_v14, %v5384_v14  ;;  %v13719_v14 = vld [vmem:[%s15185_s11 + $0x8f4] ss:$8 sps:$4 sm:$0xff]  }
 0x340   : > { %11136 = vmatpush1.bf16.msra.mxu0 %v13560_v28  ;;  %10427 = vmatprep.subr.bf16.mxu1 %v13567_v29  ;;  %v13647_v28 = vld [vmem:[%s15185_s11 + $0x860] ss:$8 sps:$4 sm:$0xff]  }
 0x341   : > { %11137 = vmatprep.subr.bf16.mxu0 %v13570_v30  ;;  %v13650_v29 = vld [vmem:[%s15185_s11 + $0x1260] ss:$8 sps:$4 sm:$0xff]   ;;  %v13655_v30 = vld [vmem:[%s15185_s11 + $0x874] ss:$8 sps:$4 sm:$0xff]  }
 0x343   : > { %10428 = vmatpush1.bf16.msra.mxu1 %v13565_v31  ;;  %v13658_v31 = vld [vmem:[%s15185_s11 + $0x1274] ss:$8 sps:$4 sm:$0xff]  }
 0x344   : > { %11138 = vmatpush1.bf16.msra.mxu0 %v13568_v32  ;;  %10429 = vmatprep.subr.bf16.mxu1 %v13575_v33  ;;  %v13725_v32 = vld [vmem:[%s16346_s0 + $0x94] ss:$156 sps:$4 sm:$0xff]   ;;  %v13728_v33 = vld [vmem:[%s16346_s0 + $0x44] ss:$156 sps:$4 sm:$0xff]  }
 0x345   : > { %11139 = vmatprep.subr.bf16.mxu0 %v13580_v34  ;;  %v13653_v34 = vld [vmem:[%s15185_s11 + $0x870] ss:$8 sps:$4 sm:$0xff]  }
 0x347   : > { %10430 = vmatpush1.bf16.msra.mxu1 %v13573_v35  ;;  %v13656_v35 = vld [vmem:[%s15185_s11 + $0x1270] ss:$8 sps:$4 sm:$0xff]  }
 0x348   : > { %11140 = vmatpush1.bf16.msra.mxu0 %v13578_v36  ;;  %10431 = vmatprep.subr.bf16.mxu1 %v13585_v37  ;;  %v6023_v36 = vld [vmem:[%s16347_s1 + $0x10] sm:$0xff]  ;;  %v6021_v37 = vld [vmem:[%s16347_s1] sm:$0xff] }
 0x349   : > { %11141 = vmatprep.subr.bf16.mxu0 %v13588_v38  ;;  %v13661_v38 = vld [vmem:[%s15185_s11 + $0x884] ss:$8 sps:$4 sm:$0xff]   ;;  %6040 = vperm.xlu1 %12682, %v6023_v36   ;;  %v13747_v36 = vld [vmem:[%s15185_s11 + $0x1320] ss:$8 sps:$4 sm:$0xff]  }
 0x34a   : > { %6030 = vperm.xlu0 %12681, %v6021_v37   ;;  %v13752_v37 = vld [vmem:[%s15185_s11 + $0x934] ss:$8 sps:$4 sm:$0xff]  }
 0x34b   : > { %10432 = vmatpush1.bf16.msra.mxu1 %v13583_v39  ;;  %v13664_v39 = vld [vmem:[%s15185_s11 + $0x1284] ss:$8 sps:$4 sm:$0xff]  }
 0x34c   : > { %11142 = vmatpush1.bf16.msra.mxu0 %v13586_v40  ;;  %10433 = vmatprep.subr.bf16.mxu1 %v13592_v41  ;;  %v13659_v40 = vld [vmem:[%s15185_s11 + $0x880] ss:$8 sps:$4 sm:$0xff]  }
 0x34d   : > { %11143 = vmatprep.subr.bf16.mxu0 %v13596_v42  ;;  %v13662_v41 = vld [vmem:[%s15185_s11 + $0x1280] ss:$8 sps:$4 sm:$0xff]   ;;  %v6024_v42 = vld [vmem:[%s16347_s1 + $0x18] sm:$0xff] }
 0x34e   : > { %6045 = vperm.xlu1 %12682, %v6024_v42   ;;  %v13753_v42 = vld [vmem:[%s15185_s11 + $0x1330] ss:$8 sps:$4 sm:$0xff]  }
 0x34f   : > { %10434 = vmatpush1.bf16.msra.mxu1 %v13590_v43  ;;  %v6022_v43 = vld [vmem:[%s16347_s1 + $0x8] sm:$0xff] }
 0x350   : > { %11144 = vmatpush1.bf16.msra.mxu0 %v13594_v44  ;;  %10435 = vmatprep.subr.bf16.mxu1 %v13601_v45  ;;  %v13667_v44 = vld [vmem:[%s15185_s11 + $0x894] ss:$8 sps:$4 sm:$0xff]  }
 0x351   : > { %11145 = vmatprep.subr.bf16.mxu0 %v13604_v46  ;;  %v13670_v45 = vld [vmem:[%s15185_s11 + $0x1294] ss:$8 sps:$4 sm:$0xff]   ;;  %v13665_v46 = vld [vmem:[%s15185_s11 + $0x890] ss:$8 sps:$4 sm:$0xff]   ;;  %6035 = vperm.xlu0 %12681, %v6022_v43   ;;  %v13760_v43 = vld [vmem:[%s15185_s11 + $0x944] ss:$8 sps:$4 sm:$0xff]  }
 0x353   : > { %10436 = vmatpush1.bf16.msra.mxu1 %v13599_v47  ;;  %v13668_v47 = vld [vmem:[%s15185_s11 + $0x1290] ss:$8 sps:$4 sm:$0xff]  }
 0x354   : > { %11146 = vmatpush1.bf16.msra.mxu0 %v13602_v48  ;;  %10476 = vmatprep.subr.bf16.mxu1 %v13610_v49  ;;  %v6026_v48 = vld [vmem:[%s16347_s1 + $0x28] sm:$0xff]  ;;  %v6025_v49 = vld [vmem:[%s16347_s1 + $0x20] sm:$0xff] }
 0x355   : > { %11186 = vmatprep.subr.bf16.mxu0 %v13616_v50  ;;  %v13677_v50 = vld [vmem:[%s15185_s11 + $0x8a4] ss:$8 sps:$4 sm:$0xff]   ;;  %6055 = vperm.xlu1 %12682, %v6026_v48  }
 0x356   : > { %10438 = vmatmul.mubr.bf16.vlgmr.msra.gmra.mrb[0].mxu1 %v13605_v51  ;;  %v13681_v51 = vld [vmem:[%s15185_s11 + $0x12a4] ss:$8 sps:$4 sm:$0xff]   ;;  %6050 = vperm.xlu0 %12681, %v6025_v49   ;;  %v13758_v49 = vld [vmem:[%s15185_s11 + $0x940] ss:$8 sps:$4 sm:$0xff]  }
 0x357   : > { %11148 = vmatmul.mubr.bf16.vlgmr.msra.gmra.mrb[0].mxu0 %v13611_v52  ;;  %10477 = vmatpush1.bf16.msra.mxu1 %v13608_v53  ;;  %v13675_v52 = vld [vmem:[%s15185_s11 + $0x8a0] ss:$8 sps:$4 sm:$0xff]  }
 0x358   : > { %11187 = vmatpush1.bf16.msra.mxu0 %v13614_v54  ;;  %10478 = vmatprep.subr.bf16.mxu1 %v13619_v55  ;;  %v13679_v53 = vld [vmem:[%s15185_s11 + $0x12a0] ss:$8 sps:$4 sm:$0xff]   ;;  %v6027_v55 = vld [vmem:[%s16347_s1 + $0x30] sm:$0xff] }
 0x359   : > { %11188 = vmatprep.subr.bf16.mxu0 %v13622_v56  ;;  %11157 = vmatprep.mubr.bf16.mxu0 %v13671_v57  ;;  %v11342_v54 = vld [vmem:[%s16348_s2] sm:$0xff]  ;;  %v13685_v56 = vld [vmem:[%s15185_s11 + $0x8b4] ss:$8 sps:$4 sm:$0xff]   ;;  %v5385_v48 = vld [vmem:[%s16346_s0 + $0x3e8] sm:$0xff] }
 0x35a   : > { %10447 = vmatprep.mubr.bf16.mxu1 %v13673_v58  ;;  %v13688_v57 = vld [vmem:[%s15185_s11 + $0x12b4] ss:$8 sps:$4 sm:$0xff]   ;;  %v13683_v58 = vld [vmem:[%s15185_s11 + $0x8b0] ss:$8 sps:$4 sm:$0xff]   ;;  %11351 = vperm.xlu1 %12682, %v11342_v54   ;;  %v11685_v54 = vcombine.high %v5385_v48, %v5385_v48 }
 0x35b   : > { %10479 = vmatpush1.bf16.msra.mxu1 %v13617_v59  ;;  %6060 = vperm.xlu0 %12681, %v6027_v55   ;;  %v13686_v59 = vld [vmem:[%s15185_s11 + $0x12b0] ss:$8 sps:$4 sm:$0xff]  }
 0x35c   : > { %11189 = vmatpush1.bf16.msra.mxu0 %v13620_v60  ;;  %10480 = vmatprep.subr.bf16.mxu1 %v13625_v61  ;;  %v11344_v60 = vld [vmem:[%s16348_s2 + $0x10] sm:$0xff]  ;;  %v11343_v61 = vld [vmem:[%s16348_s2 + $0x8] sm:$0xff] }
 0x35d   : > { %11190 = vmatprep.subr.bf16.mxu0 %v13628_v62  ;;  %v13695_v62 = vld [vmem:[%s15185_s11 + $0x8c4] ss:$8 sps:$4 sm:$0xff]   ;;  %v13765_v55 = vld [vmem:[%s15185_s11 + $0x950] ss:$8 sps:$4 sm:$0xff]  }
 0x35e   : > { %10448 = vmatmul.mubr.bf16.gmra.mrb[4].mxu1 %v13682_v0  ;;  %v13693_v0 = vld [vmem:[%s15185_s11 + $0x8c0] ss:$8 sps:$4 sm:$0xff]   ;;  %11361 = vperm.xlu1 %12682, %v11344_v60   ;;  %v11684_v60 = vcombine.low %v5385_v48, %v5385_v48 }
 0x35f   : > { %11158 = vmatmul.mubr.bf16.gmra.mrb[4].mxu0 %v13678_v63  ;;  %10481 = vmatpush1.bf16.msra.mxu1 %v13623_v1  ;;  %v13699_v63 = vld [vmem:[%s15185_s11 + $0x12c4] ss:$8 sps:$4 sm:$0xff]   ;;  %v13697_v1 = vld [vmem:[%s15185_s11 + $0x12c0] ss:$8 sps:$4 sm:$0xff]  }
 0x360   : > { %11191 = vmatpush1.bf16.msra.mxu0 %v13626_v2  ;;  %10482 = vmatprep.subr.bf16.mxu1 %v13631_v3  ;;  %v11346_v2 = vld [vmem:[%s16348_s2 + $0x20] sm:$0xff]  ;;  %v11345_v3 = vld [vmem:[%s16348_s2 + $0x18] sm:$0xff] }
 0x361   : > { %11192 = vmatprep.subr.bf16.mxu0 %v13634_v4  ;;  %11167 = vmatprep.mubr.bf16.mxu0 %v13689_v5  ;;  %v13703_v4 = vld [vmem:[%s15185_s11 + $0x8d4] ss:$8 sps:$4 sm:$0xff]  }
 0x362   : > { %10457 = vmatprep.mubr.bf16.mxu1 %v13691_v6  ;;  %11356 = vperm.xlu0 %12681, %v11343_v61   ;;  %v13706_v5 = vld [vmem:[%s15185_s11 + $0x12d4] ss:$8 sps:$4 sm:$0xff]   ;;  %v13701_v6 = vld [vmem:[%s15185_s11 + $0x8d0] ss:$8 sps:$4 sm:$0xff]   ;;  %v13772_v61 = vld [vmem:[%s15185_s11 + $0x960] ss:$8 sps:$4 sm:$0xff]  }
 0x363   : > { %10483 = vmatpush1.bf16.msra.mxu1 %v13629_v7  ;;  %11371 = vperm.xlu1 %12682, %v11346_v2   ;;  %v13704_v7 = vld [vmem:[%s15185_s11 + $0x12d0] ss:$8 sps:$4 sm:$0xff]  }
 0x364   : > { %11193 = vmatpush1.bf16.msra.mxu0 %v13632_v8  ;;  %10484 = vmatprep.subr.bf16.mxu1 %v13637_v9  ;;  %v11348_v8 = vld [vmem:[%s16348_s2 + $0x30] sm:$0xff]  ;;  %v11347_v9 = vld [vmem:[%s16348_s2 + $0x28] sm:$0xff] }
 0x365   : > { %11194 = vmatprep.subr.bf16.mxu0 %v13640_v10  ;;  %v13711_v10 = vld [vmem:[%s15185_s11 + $0x8e4] ss:$8 sps:$4 sm:$0xff]   ;;  %v13779_v2 = vld [vmem:[%s15185_s11 + $0x970] ss:$8 sps:$4 sm:$0xff]  }
 0x366   : > { %10458 = vmatmul.mubr.bf16.gmra.mrb[8].mxu1 %v13700_v12  ;;  %11366 = vperm.xlu0 %12681, %v11345_v3   ;;  %v13709_v12 = vld [vmem:[%s15185_s11 + $0x8e0] ss:$8 sps:$4 sm:$0xff]   ;;  %v13782_v3 = vld [vmem:[%s15185_s11 + $0x1370] ss:$8 sps:$4 sm:$0xff]  }
 0x367   : > { %11168 = vmatmul.mubr.bf16.gmra.mrb[8].mxu0 %v13696_v11  ;;  %10485 = vmatpush1.bf16.msra.mxu1 %v13635_v15  ;;  %v13715_v11 = vld [vmem:[%s15185_s11 + $0x12e4] ss:$8 sps:$4 sm:$0xff]   ;;  %v13722_v15 = vld [vmem:[%s15185_s11 + $0x12f4] ss:$8 sps:$4 sm:$0xff]  }
 0x368   : > { %11195 = vmatpush1.bf16.msra.mxu0 %v13638_v16  ;;  %10486 = vmatprep.subr.bf16.mxu1 %v13643_v17  ;;  %v13717_v16 = vld [vmem:[%s15185_s11 + $0x8f0] ss:$8 sps:$4 sm:$0xff]  }
 0x369   : > { %11196 = vmatprep.subr.bf16.mxu0 %v13646_v18  ;;  %11177 = vmatprep.mubr.bf16.mxu0 %v11703_v19  ;;  %v13720_v17 = vld [vmem:[%s15185_s11 + $0x12f0] ss:$8 sps:$4 sm:$0xff]   ;;  %v13731_v18 = vld [vmem:[%s15185_s11 + $0x904] ss:$8 sps:$4 sm:$0xff]  }
 0x36a   : > { %10467 = vmatprep.mubr.bf16.mxu1 %v11683_v20  ;;  %11381 = vperm.xlu1 %12682, %v11348_v8   ;;  %v13734_v19 = vld [vmem:[%s15185_s11 + $0x1304] ss:$8 sps:$4 sm:$0xff]   ;;  %v13789_v8 = vld [vmem:[%s15185_s11 + $0x990] ss:$8 sps:$4 sm:$0xff]  }
 0x36b   : > { %10487 = vmatpush1.bf16.msra.mxu1 %v13641_v21  ;;  %11376 = vperm.xlu0 %12681, %v11347_v9   ;;  %v13723_v20 = vld [vmem:[%s16346_s0 + $0x90] ss:$156 sps:$4 sm:$0xff]   ;;  %v13726_v21 = vld [vmem:[%s16346_s0 + $0x40] ss:$156 sps:$4 sm:$0xff]  }
 0x36c   : > { %11197 = vmatpush1.bf16.msra.mxu0 %v13644_v22  ;;  %10488 = vmatprep.subr.bf16.mxu1 %v13649_v23  ;;  %v13729_v22 = vld [vmem:[%s15185_s11 + $0x900] ss:$8 sps:$4 sm:$0xff]   ;;  %v13797_v9 = vld [vmem:[%s15185_s11 + $0x9a4] ss:$8 sps:$4 sm:$0xff]  }
 0x36d   : > { %11198 = vmatprep.subr.bf16.mxu0 %v13652_v25  ;;  %v13732_v23 = vld [vmem:[%s15185_s11 + $0x1300] ss:$8 sps:$4 sm:$0xff]   ;;  %v13737_v25 = vld [vmem:[%s15185_s11 + $0x914] ss:$8 sps:$4 sm:$0xff]  }
 0x36e   : > { %10468 = vmatmul.mubr.bf16.gmra.mrb[12].mxu1 %v11682_v27  ;;  %v13741_v27 = vld [vmem:[%s16346_s0 + $0x1cc] ss:$156 sps:$4 sm:$0xff]  }
 0x36f   : > { %11178 = vmatmul.mubr.bf16.gmra.mrb[12].mxu0 %v11702_v26  ;;  %10489 = vmatpush1.bf16.msra.mxu1 %v13647_v28  ;;  %v13740_v26 = vld [vmem:[%s15185_s11 + $0x1314] ss:$8 sps:$4 sm:$0xff]  }
 0x370   : > { %11199 = vmatpush1.bf16.msra.mxu0 %v13650_v29  ;;  %10490 = vmatprep.subr.bf16.mxu1 %v13655_v30  ;;  %v13792_v28 = vld [vmem:[%s16346_s0 + $0x17c] ss:$156 sps:$4 sm:$0xff]  }
 0x371   : > { %11200 = vmatprep.subr.bf16.mxu0 %v13658_v31  ;;  %11218 = vmatprep.mubr.bf16.mxu0 %v13725_v32  ;;  %v13735_v29 = vld [vmem:[%s15185_s11 + $0x910] ss:$8 sps:$4 sm:$0xff]   ;;  %v13745_v31 = vld [vmem:[%s15185_s11 + $0x924] ss:$8 sps:$4 sm:$0xff]  }
 0x372   : > { %10508 = vmatprep.mubr.bf16.mxu1 %v13728_v33  ;;  %v13738_v30 = vld [vmem:[%s15185_s11 + $0x1310] ss:$8 sps:$4 sm:$0xff]   ;;  %v13749_v32 = vld [vmem:[%s15185_s11 + $0x1324] ss:$8 sps:$4 sm:$0xff]  }
 0x373   : > { %10491 = vmatpush1.bf16.msra.mxu1 %v13653_v34  ;;  %v13746_v33 = vld [vmem:[%s16346_s0 + $0x1c8] ss:$156 sps:$4 sm:$0xff]   ;;  %v13794_v34 = vld [vmem:[%s16346_s0 + $0x178] ss:$156 sps:$4 sm:$0xff]  }
 0x374   : > { %11201 = vmatpush1.bf16.msra.mxu0 %v13656_v35  ;;  %10492 = vmatprep.subr.bf16.mxu1 %v13661_v38  ;;  %v13743_v35 = vld [vmem:[%s15185_s11 + $0x920] ss:$8 sps:$4 sm:$0xff]   ;;  %v13755_v38 = vld [vmem:[%s15185_s11 + $0x1334] ss:$8 sps:$4 sm:$0xff]  }
 0x375   : > { %11202 = vmatprep.subr.bf16.mxu0 %v13664_v39  ;;  %v13756_v39 = vld [vmem:[%s16346_s0 + $0x304] ss:$156 sps:$4 sm:$0xff]  }
 0x377   : > { %10493 = vmatpush1.bf16.msra.mxu1 %v13659_v40  ;;  %v13802_v40 = vld [vmem:[%s16346_s0 + $0x2b4] ss:$156 sps:$4 sm:$0xff]  }
 0x378   : > { %11203 = vmatpush1.bf16.msra.mxu0 %v13662_v41  ;;  %10494 = vmatprep.subr.bf16.mxu1 %v13667_v44  ;;  %v13750_v41 = vld [vmem:[%s15185_s11 + $0x930] ss:$8 sps:$4 sm:$0xff]   ;;  %v13764_v44 = vld [vmem:[%s15185_s11 + $0x1344] ss:$8 sps:$4 sm:$0xff]  }
 0x379   : > { %11204 = vmatprep.subr.bf16.mxu0 %v13670_v45  ;;  %v13761_v45 = vld [vmem:[%s16346_s0 + $0x300] ss:$156 sps:$4 sm:$0xff]  }
 0x37b   : > { %10495 = vmatpush1.bf16.msra.mxu1 %v13665_v46  ;;  %v5395_v46 = vld [vmem:[%s16346_s0 + $0x438] sm:$0xff] }
 0x37c   : > { %11205 = vmatpush1.bf16.msra.mxu0 %v13668_v47  ;;  %10496 = vmatprep.subr.bf16.mxu1 %v13677_v50  ;;  %v13804_v47 = vld [vmem:[%s16346_s0 + $0x2b0] ss:$156 sps:$4 sm:$0xff]   ;;  %v13762_v50 = vld [vmem:[%s15185_s11 + $0x1340] ss:$8 sps:$4 sm:$0xff]  }
 0x37d   : > { %11206 = vmatprep.subr.bf16.mxu0 %v13681_v51  ;;  %v13767_v51 = vld [vmem:[%s15185_s11 + $0x954] ss:$8 sps:$4 sm:$0xff]  }
 0x37f   : > { %10497 = vmatpush1.bf16.msra.mxu1 %v13675_v52  ;;  %v13770_v52 = vld [vmem:[%s15185_s11 + $0x1354] ss:$8 sps:$4 sm:$0xff]  }
 0x380   : > { %11207 = vmatpush1.bf16.msra.mxu0 %v13679_v53  ;;  %10498 = vmatprep.subr.bf16.mxu1 %v13685_v56  ;;  %v11705_v53 = vcombine.high %v5395_v46, %v5395_v46  ;;  %v13768_v56 = vld [vmem:[%s15185_s11 + $0x1350] ss:$8 sps:$4 sm:$0xff]  }
 0x381   : > { %11208 = vmatprep.subr.bf16.mxu0 %v13688_v57  ;;  %v13774_v57 = vld [vmem:[%s15185_s11 + $0x964] ss:$8 sps:$4 sm:$0xff]  }
 0x383   : > { %10499 = vmatpush1.bf16.msra.mxu1 %v13683_v58  ;;  %v13778_v58 = vld [vmem:[%s15185_s11 + $0x1364] ss:$8 sps:$4 sm:$0xff]  }
 0x384   : > { %11209 = vmatpush1.bf16.msra.mxu0 %v13686_v59  ;;  %10500 = vmatprep.subr.bf16.mxu1 %v13695_v62  ;;  %v11704_v59 = vcombine.low %v5395_v46, %v5395_v46  ;;  %v13776_v62 = vld [vmem:[%s15185_s11 + $0x1360] ss:$8 sps:$4 sm:$0xff]  }
 0x385   : > { %11210 = vmatprep.subr.bf16.mxu0 %v13699_v63  ;;  %v13781_v63 = vld [vmem:[%s15185_s11 + $0x974] ss:$8 sps:$4 sm:$0xff]  }
 0x387   : > { %10501 = vmatpush1.bf16.msra.mxu1 %v13693_v0  ;;  %v13784_v0 = vld [vmem:[%s15185_s11 + $0x1374] ss:$8 sps:$4 sm:$0xff]  }
 0x388   : > { %11211 = vmatpush1.bf16.msra.mxu0 %v13697_v1  ;;  %10502 = vmatprep.subr.bf16.mxu1 %v13703_v4  ;;  %v13823_v1 = vld [vmem:[%s16346_s0 + $0x4c] ss:$156 sps:$4 sm:$0xff]  }
 0x389   : > { %11212 = vmatprep.subr.bf16.mxu0 %v13706_v5  ;;  %v13787_v4 = vld [vmem:[%s15185_s11 + $0x984] ss:$8 sps:$4 sm:$0xff]   ;;  %v13788_v5 = vld [vmem:[%s16346_s0 + $0x98] ss:$156 sps:$4 sm:$0xff]  }
 0x38b   : > { %10503 = vmatpush1.bf16.msra.mxu1 %v13701_v6  ;;  %v13785_v6 = vld [vmem:[%s15185_s11 + $0x980] ss:$8 sps:$4 sm:$0xff]  }
 0x38c   : > { %11213 = vmatpush1.bf16.msra.mxu0 %v13704_v7  ;;  %10504 = vmatprep.subr.bf16.mxu1 %v13711_v10  ;;  %v13791_v7 = vld [vmem:[%s15185_s11 + $0x994] ss:$8 sps:$4 sm:$0xff]   ;;  %v13798_v10 = vld [vmem:[%s16346_s0 + $0x1d0] ss:$156 sps:$4 sm:$0xff]  }
 0x38d   : > { %11214 = vmatprep.subr.bf16.mxu0 %v13715_v11  ;;  %v13795_v11 = vld [vmem:[%s15185_s11 + $0x9a0] ss:$8 sps:$4 sm:$0xff]  }
 0x38f   : > { %10505 = vmatpush1.bf16.msra.mxu1 %v13709_v12  ;;  %v13801_v12 = vld [vmem:[%s15185_s11 + $0x9b4] ss:$8 sps:$4 sm:$0xff]  }
 0x390   : > { %11215 = vmatpush1.bf16.msra.mxu0 %v13713_v13  ;;  %10506 = vmatprep.subr.bf16.mxu1 %v13719_v14  ;;  %v13799_v13 = vld [vmem:[%s15185_s11 + $0x9b0] ss:$8 sps:$4 sm:$0xff]   ;;  %v13807_v14 = vld [vmem:[%s15185_s11 + $0x9c4] ss:$8 sps:$4 sm:$0xff]  }
 0x391   : > { %11216 = vmatprep.subr.bf16.mxu0 %v13722_v15  ;;  %v13808_v15 = vld [vmem:[%s16346_s0 + $0x308] ss:$156 sps:$4 sm:$0xff]  }
 0x393   : > { %10507 = vmatpush1.bf16.msra.mxu1 %v13717_v16  ;;  %v13805_v16 = vld [vmem:[%s15185_s11 + $0x9c0] ss:$8 sps:$4 sm:$0xff]  }
 0x394   : > { %11217 = vmatpush1.bf16.msra.mxu0 %v13720_v17  ;;  %10547 = vmatprep.subr.bf16.mxu1 %v13731_v18  ;;  %v13811_v17 = vld [vmem:[%s15185_s11 + $0x9d4] ss:$8 sps:$4 sm:$0xff]   ;;  %v13809_v18 = vld [vmem:[%s15185_s11 + $0x9d0] ss:$8 sps:$4 sm:$0xff]  }
 0x395   : > { %11257 = vmatprep.subr.bf16.mxu0 %v13734_v19  ;;  %v13816_v19 = vld [vmem:[%s15185_s11 + $0x9e4] ss:$8 sps:$4 sm:$0xff]  }
 0x396   : > { %10509 = vmatmul.mubr.bf16.vlgmr.msra.gmra.mrb[0].mxu1 %v13726_v21  ;;  %v13814_v21 = vld [vmem:[%s15185_s11 + $0x9e0] ss:$8 sps:$4 sm:$0xff]  }
 0x397   : > { %11219 = vmatmul.mubr.bf16.vlgmr.msra.gmra.mrb[0].mxu0 %v13723_v20  ;;  %10548 = vmatpush1.bf16.msra.mxu1 %v13729_v22  ;;  %v13817_v20 = vld [vmem:[%s16346_s0 + $0x440] ss:$0 sps:$4 sm:$0xff]   ;;  %v13820_v22 = vld [vmem:[%s15185_s11 + $0x9f4] ss:$8 sps:$4 sm:$0xff]  }
 0x398   : > { %11258 = vmatpush1.bf16.msra.mxu0 %v13732_v23  ;;  %10549 = vmatprep.subr.bf16.mxu1 %v13737_v25  ;;  %v13818_v23 = vld [vmem:[%s15185_s11 + $0x9f0] ss:$8 sps:$4 sm:$0xff]   ;;  %v13821_v25 = vld [vmem:[%s16346_s0 + $0x48] ss:$156 sps:$4 sm:$0xff]  }
 0x399   : > { %11259 = vmatprep.subr.bf16.mxu0 %v13740_v26  ;;  %11228 = vmatprep.mubr.bf16.mxu0 %v13741_v27  ;;  %v13826_v26 = vld [vmem:[%s16346_s0 + $0x180] ss:$156 sps:$4 sm:$0xff]  }
 0x39a   : > { %10518 = vmatprep.mubr.bf16.mxu1 %v13792_v28  ;;  %v13827_v27 = vld [vmem:[%s16346_s0 + $0x2bc] ss:$156 sps:$4 sm:$0xff]   ;;  %v5386_v28 = vld [vmem:[%s16346_s0 + $0x3f0] sm:$0xff] }
 0x39b   : > { %10550 = vmatpush1.bf16.msra.mxu1 %v13735_v29  ;;  %v13829_v29 = vld [vmem:[%s16346_s0 + $0x2b8] ss:$156 sps:$4 sm:$0xff]  }
 0x39c   : > { %11260 = vmatpush1.bf16.msra.mxu0 %v13738_v30  ;;  %10551 = vmatprep.subr.bf16.mxu1 %v13745_v31  ;;  %v11687_v30 = vcombine.high %v5386_v28, %v5386_v28  ;;  %v11686_v31 = vcombine.low %v5386_v28, %v5386_v28 }
 0x39d   : > { %11261 = vmatprep.subr.bf16.mxu0 %v13749_v32 }
 0x39e   : > { %10519 = vmatmul.mubr.bf16.gmra.mrb[4].mxu1 %v13794_v34 }
 0x39f   : > { %11229 = vmatmul.mubr.bf16.gmra.mrb[4].mxu0 %v13746_v33  ;;  %10552 = vmatpush1.bf16.msra.mxu1 %v13743_v35 }
 0x3a0   : > { %11262 = vmatpush1.bf16.msra.mxu0 %v13747_v36  ;;  %10553 = vmatprep.subr.bf16.mxu1 %v13752_v37 }
 0x3a1   : > { %11263 = vmatprep.subr.bf16.mxu0 %v13755_v38  ;;  %11238 = vmatprep.mubr.bf16.mxu0 %v13756_v39 }
 0x3a2   : > { %10528 = vmatprep.mubr.bf16.mxu1 %v13802_v40 }
 0x3a3   : > { %10554 = vmatpush1.bf16.msra.mxu1 %v13750_v41 }
 0x3a4   : > { %11264 = vmatpush1.bf16.msra.mxu0 %v13753_v42  ;;  %10555 = vmatprep.subr.bf16.mxu1 %v13760_v43 }
 0x3a5   : > { %11265 = vmatprep.subr.bf16.mxu0 %v13764_v44 }
 0x3a6   : > { %10529 = vmatmul.mubr.bf16.gmra.mrb[8].mxu1 %v13804_v47 }
 0x3a7   : > { %11239 = vmatmul.mubr.bf16.gmra.mrb[8].mxu0 %v13761_v45  ;;  %10556 = vmatpush1.bf16.msra.mxu1 %v13758_v49 }
 0x3a8   : > { %11266 = vmatpush1.bf16.msra.mxu0 %v13762_v50  ;;  %10557 = vmatprep.subr.bf16.mxu1 %v13767_v51 }
 0x3a9   : > { %11267 = vmatprep.subr.bf16.mxu0 %v13770_v52  ;;  %11248 = vmatprep.mubr.bf16.mxu0 %v11705_v53 }
 0x3aa   : > { %10538 = vmatprep.mubr.bf16.mxu1 %v11685_v54 }
 0x3ab   : > { %10558 = vmatpush1.bf16.msra.mxu1 %v13765_v55 }
 0x3ac   : > { %11268 = vmatpush1.bf16.msra.mxu0 %v13768_v56  ;;  %10559 = vmatprep.subr.bf16.mxu1 %v13774_v57 }
 0x3ad   : > { %11269 = vmatprep.subr.bf16.mxu0 %v13778_v58 }
 0x3ae   : > { %10539 = vmatmul.mubr.bf16.gmra.mrb[12].mxu1 %v11684_v60 }
 0x3af   : > { %11249 = vmatmul.mubr.bf16.gmra.mrb[12].mxu0 %v11704_v59  ;;  %10560 = vmatpush1.bf16.msra.mxu1 %v13772_v61 }
 0x3b0   : > { %11270 = vmatpush1.bf16.msra.mxu0 %v13776_v62  ;;  %10561 = vmatprep.subr.bf16.mxu1 %v13781_v63 }
 0x3b1   : > { %11271 = vmatprep.subr.bf16.mxu0 %v13784_v0  ;;  %11289 = vmatprep.mubr.bf16.mxu0 %v13856_v24 }
 0x3b2   : > { %10579 = vmatprep.mubr.bf16.mxu1 %v13823_v1 }
 0x3b3   : > { %10562 = vmatpush1.bf16.msra.mxu1 %v13779_v2 }
 0x3b4   : > { %11272 = vmatpush1.bf16.msra.mxu0 %v13782_v3  ;;  %10563 = vmatprep.subr.bf16.mxu1 %v13787_v4 }
 0x3b7   : > { %11290 = vmatmul.mubr.bf16.vlgmr.msra.gmra.mrb[0].mxu0 %v13788_v5  ;;  %10564 = vmatpush1.bf16.msra.mxu1 %v13785_v6 }
 0x3b8   : > { %11299 = vmatprep.mubr.bf16.mxu0 %v13856_v24  ;;  %10565 = vmatprep.subr.bf16.mxu1 %v13791_v7 }
 0x3bb   : > { %10566 = vmatpush1.bf16.msra.mxu1 %v13789_v8 }
 0x3bc   : > { %10567 = vmatprep.subr.bf16.mxu1 %v13797_v9 }
 0x3bf   : > { %11300 = vmatmul.mubr.bf16.gmra.mrb[4].mxu0 %v13798_v10  ;;  %10568 = vmatpush1.bf16.msra.mxu1 %v13795_v11 }
 0x3c0   : > { %11309 = vmatprep.mubr.bf16.mxu0 %v13856_v24  ;;  %10569 = vmatprep.subr.bf16.mxu1 %v13801_v12 }
 0x3c3   : > { %10570 = vmatpush1.bf16.msra.mxu1 %v13799_v13 }
 0x3c4   : > { %10571 = vmatprep.subr.bf16.mxu1 %v13807_v14 }
 0x3c7   : > { %11310 = vmatmul.mubr.bf16.gmra.mrb[8].mxu0 %v13808_v15  ;;  %10572 = vmatpush1.bf16.msra.mxu1 %v13805_v16 }
 0x3c8   : > { %11319 = vmatprep.mubr.bf16.mxu0 %v13856_v24  ;;  %10573 = vmatprep.subr.bf16.mxu1 %v13811_v17  ;;  %v13824_v24 = vld [vmem:[%s16346_s0 + $0x184] ss:$156 sps:$4 sm:$0xff]   ;;  %v6041_v43 = vpop.permute.xlu1 %6040 }
 0x3c9   : > { %v6031_v40 = vpop.permute.xlu0 %6030 }
 0x3cb   : > { %10574 = vmatpush1.bf16.msra.mxu1 %v13809_v18 }
 0x3cc   : > { %10575 = vmatprep.subr.bf16.mxu1 %v13816_v19 }
 0x3cd   : > { %v6046_v47 = vpop.permute.xlu1 %6045 }
 0x3cf   : > { %11320 = vmatmul.mubr.bf16.gmra.mrb[12].mxu0 %v13817_v20  ;;  %10576 = vmatpush1.bf16.msra.mxu1 %v13814_v21 }
 0x3d0   : > { %10577 = vmatprep.subr.bf16.mxu1 %v13820_v22  ;;  %v6036_v46 = vpop.permute.xlu0 %6035 }
 0x3d3   : > { %10578 = vmatpush1.bf16.msra.mxu1 %v13818_v23 }
 0x3d4   : > { %v16280_v53 = vpop.permute.xlu1 %6055 }
 0x3d5   : > { %v16278_v50 = vpop.permute.xlu0 %6050 }
 0x3d6   : > { %10580 = vmatmul.mubr.bf16.vlgmr.msra.gmra.mrb[0].mxu1 %v13821_v25 }
 0x3d7   : > { %10589 = vmatprep.mubr.bf16.mxu1 %v13824_v24 }
 0x3d9   : > { %v11352_v63 = vpop.permute.xlu1 %11351 }
 0x3da   : > { %v16282_v54 = vpop.permute.xlu0 %6060 }
 0x3dd   : > { %v11362_v21 = vpop.permute.xlu1 %11361 }
 0x3de   : > { %10590 = vmatmul.mubr.bf16.gmra.mrb[4].mxu1 %v13826_v26 }
 0x3df   : > { %10599 = vmatprep.mubr.bf16.mxu1 %v13827_v27 }
 0x3e1   : > { %v11357_v4 = vpop.permute.xlu0 %11356 }
 0x3e5   : > { %v11367_v26 = vpop.permute.xlu0 %11366 }
 0x3e6   : > { %10600 = vmatmul.mubr.bf16.gmra.mrb[8].mxu1 %v13829_v29 }
 0x3e7   : > { %10609 = vmatprep.mubr.bf16.mxu1 %v11687_v30 }
 0x3ee   : > { %10610 = vmatmul.mubr.bf16.gmra.mrb[12].mxu1 %v11686_v31 }
 0x48a   : > { %v11291_v32 = vpop.f32.mrb[0].mxu0 }
 0x48b   : > { %v11293_v33 = vpop.f32.mrb[1].mxu0 }
 0x48c   : > { %v11295_v34 = vpop.f32.mrb[2].mxu0 }
 0x48d   : > { %v11297_v35 = vpop.f32.mrb[3].mxu0 }
 0x492   : > { %v11301_v36 = vpop.f32.mrb[4].mxu0 }
 0x493   : > { %v11303_v37 = vpop.f32.mrb[5].mxu0 }
 0x494   : > { %v11305_v38 = vpop.f32.mrb[6].mxu0 }
 0x495   : > { %v16264_v39 = vpop.f32.mrb[7].mxu0 }
 0x49a   : > { %v16266_v41 = vpop.f32.mrb[8].mxu0 }
 0x49b   : > { %v16268_v42 = vpop.f32.mrb[9].mxu0 }
 0x49c   : > { %v16270_v44 = vpop.f32.mrb[10].mxu0 }
 0x49d   : > { %v16272_v45 = vpop.f32.mrb[11].mxu0 }
 0x4a2   : > { %v16274_v48 = vpop.f32.mrb[12].mxu0 }
 0x4a3   : > { %v16276_v49 = vpop.f32.mrb[13].mxu0 }
 0x4a4   : > { %v11325_v51 = vpop.f32.mrb[14].mxu0 }
 0x4a5   : > { %v11326_v52 = vpop.f32.mrb[15].mxu0 }
 0x4a9   : > { %v10581_v55 = vpop.f32.mrb[0].mxu1 }
 0x4aa   : > { %v12337_v56 = vadd.f32 %v10581_v55, %v6031_v40  ;;  %v10583_v57 = vpop.f32.mrb[1].mxu1 }
 0x4ab   : > { %v12339_v58 = vadd.f32 %v10583_v57, %v6031_v40  ;;  %v10585_v59 = vpop.f32.mrb[2].mxu1  ;;  %v11377_v57 = vpop.permute.xlu0 %11376 }
 0x4ac   : > { %v12338_v60 = vadd.f32 %v12337_v56, %v11291_v32  ;;  %v12341_v61 = vadd.f32 %v10585_v59, %v6036_v46  ;;  %v10587_v62 = vpop.f32.mrb[3].mxu1 }
 0x4ad   : > { %v12340_v0 = vadd.f32 %v12339_v58, %v11293_v33  ;;  %v12343_v1 = vadd.f32 %v10587_v62, %v6036_v46 }
 0x4ae   : > { %vm11328_vm0 = vcmp.ge.f32.partialorder %v12338_v60, 0.0  ;;  %v11384_v2 = vmul.f32 %v12338_v60, %v11352_v63  ;;  %v12342_v3 = vadd.f32 %v12341_v61, %v11295_v34 }
 0x4af   : > { %vm11329_vm1 = vcmp.ge.f32.partialorder %v12340_v0, 0.0  ;;  %v11385_v5 = vmul.f32 %v12340_v0, %v11352_v63  ;;  %v12344_v6 = vadd.f32 %v12343_v1, %v11297_v35 }
 0x4b0   : > { %v11398_v7 = vsel %vm11328_vm0, %v12338_v60, %v11384_v2  ;;  %vm11330_vm2 = vcmp.ge.f32.partialorder %v12342_v3, 0.0  ;;  %v11386_v8 = vmul.f32 %v12342_v3, %v11357_v4 }
 0x4b1   : > { %11412 = vst [vmem:[%s16286_s15] sm:$0xff] %v11398_v7  ;;  %v11399_v9 = vsel %vm11329_vm1, %v12340_v0, %v11385_v5  ;;  %vm11331_vm3 = vcmp.ge.f32.partialorder %v12344_v6, 0.0  ;;  %v11387_v10 = vmul.f32 %v12344_v6, %v11357_v4  ;;  %v10591_v11 = vpop.f32.mrb[4].mxu1 }
 0x4b2   : > { %11413 = vst [vmem:[%s16286_s15 + $0x8] sm:$0xff] %v11399_v9  ;;  %v11400_v12 = vsel %vm11330_vm2, %v12342_v3, %v11386_v8  ;;  %v12345_v13 = vadd.f32 %v10591_v11, %v6041_v43  ;;  %v10593_v14 = vpop.f32.mrb[5].mxu1 }
 0x4b3   : > { %11414 = vst [vmem:[%s16286_s15 + $0x10] sm:$0xff] %v11400_v12  ;;  %v11401_v15 = vsel %vm11331_vm3, %v12344_v6, %v11387_v10  ;;  %v12347_v16 = vadd.f32 %v10593_v14, %v6041_v43  ;;  %v10595_v17 = vpop.f32.mrb[6].mxu1 }
 0x4b4   : > { %11415 = vst [vmem:[%s16286_s15 + $0x18] sm:$0xff] %v11401_v15  ;;  %v12346_v18 = vadd.f32 %v12345_v13, %v11301_v36  ;;  %v12349_v19 = vadd.f32 %v10595_v17, %v6046_v47  ;;  %v10597_v20 = vpop.f32.mrb[7].mxu1 }
 0x4b5   : > { %v12348_v22 = vadd.f32 %v12347_v16, %v11303_v37  ;;  %v12351_v23 = vadd.f32 %v10597_v20, %v6046_v47  ;;  %v11372_v47 = vpop.permute.xlu1 %11371 }
 0x4b6   : > { %vm11332_vm4 = vcmp.ge.f32.partialorder %v12346_v18, 0.0  ;;  %v11388_v25 = vmul.f32 %v12346_v18, %v11362_v21  ;;  %v12350_v24 = vadd.f32 %v12349_v19, %v11305_v38 }
 0x4b7   : > { %vm11333_vm5 = vcmp.ge.f32.partialorder %v12348_v22, 0.0  ;;  %v11389_v27 = vmul.f32 %v12348_v22, %v11362_v21  ;;  %v12352_v28 = vadd.f32 %v12351_v23, %v16264_v39 }
 0x4b8   : > { %v11402_v29 = vsel %vm11332_vm4, %v12346_v18, %v11388_v25  ;;  %vm11334_vm6 = vcmp.ge.f32.partialorder %v12350_v24, 0.0  ;;  %v11390_v30 = vmul.f32 %v12350_v24, %v11367_v26 }
 0x4b9   : > { %11416 = vst [vmem:[%s16286_s15 + $0x20] sm:$0xff] %v11402_v29  ;;  %v11403_v31 = vsel %vm11333_vm5, %v12348_v22, %v11389_v27  ;;  %vm11335_vm7 = vcmp.ge.f32.partialorder %v12352_v28, 0.0  ;;  %v11391_v32 = vmul.f32 %v12352_v28, %v11367_v26  ;;  %v10601_v33 = vpop.f32.mrb[8].mxu1  ;;  %v11382_v3 = vpop.permute.xlu1 %11381 }
 0x4ba   : > { %11417 = vst [vmem:[%s16286_s15 + $0x28] sm:$0xff] %v11403_v31  ;;  %v11404_v34 = vsel %vm11334_vm6, %v12350_v24, %v11390_v30  ;;  %v12353_v35 = vadd.f32 %v10601_v33, %v16278_v50  ;;  %v10603_v36 = vpop.f32.mrb[9].mxu1 }
 0x4bb   : > { %11418 = vst [vmem:[%s16286_s15 + $0x30] sm:$0xff] %v11404_v34  ;;  %v11405_v37 = vsel %vm11335_vm7, %v12352_v28, %v11391_v32  ;;  %v12355_v38 = vadd.f32 %v10603_v36, %v16278_v50  ;;  %v10605_v40 = vpop.f32.mrb[10].mxu1  ;;  %v11454_v9 = vld [vmem:[%s16286_s15 + $0x18] sm:$0xff] (%p13912_p5) }
 0x4bc   : > { %11419 = vst [vmem:[%s16286_s15 + $0x38] sm:$0xff] %v11405_v37  ;;  %v12354_v39 = vadd.f32 %v12353_v35, %v16266_v41  ;;  %v12357_v43 = vadd.f32 %v10605_v40, %v16280_v53  ;;  %v10607_v46 = vpop.f32.mrb[11].mxu1  ;;  %11455 = vst [vmem:[%s11435_s23 + $0x28] sm:$0xff] (%p13912_p5), %v11454_v9 }
 0x4bd   : > { %v12356_v51 = vadd.f32 %v12355_v38, %v16268_v42  ;;  %v12359_v52 = vadd.f32 %v10607_v46, %v16280_v53 }
 0x4be   : > { %vm11336_vm8 = vcmp.ge.f32.partialorder %v12354_v39, 0.0  ;;  %v11392_v55 = vmul.f32 %v12354_v39, %v11372_v47  ;;  %v12358_v56 = vadd.f32 %v12357_v43, %v16270_v44 }
 0x4bf   : > { %vm11337_vm9 = vcmp.ge.f32.partialorder %v12356_v51, 0.0  ;;  %v11393_v50 = vmul.f32 %v12356_v51, %v11372_v47  ;;  %v12360_v41 = vadd.f32 %v12359_v52, %v16272_v45 }
 0x4c0   : > { %v11406_v58 = vsel %vm11336_vm8, %v12354_v39, %v11392_v55  ;;  %vm11338_vm10 = vcmp.ge.f32.partialorder %v12358_v56, 0.0  ;;  %v11394_v59 = vmul.f32 %v12358_v56, %v11377_v57  ;;  %v11456_v10 = vld [vmem:[%s16286_s15 + $0x20] sm:$0xff] (%p13912_p5) }
 0x4c1   : > { %11420 = vst [vmem:[%s16286_s15 + $0x40] sm:$0xff] %v11406_v58  ;;  %v11407_v60 = vsel %vm11337_vm9, %v12356_v51, %v11393_v50  ;;  %vm11339_vm11 = vcmp.ge.f32.partialorder %v12360_v41, 0.0  ;;  %v11395_v42 = vmul.f32 %v12360_v41, %v11377_v57  ;;  %v10611_v53 = vpop.f32.mrb[12].mxu1  ;;  %v11458_v11 = vld [vmem:[%s16286_s15 + $0x28] sm:$0xff] (%p13912_p5)  ;;  %11457 = vst [vmem:[%s11435_s23 + $0x40] sm:$0xff] (%p13912_p5), %v11456_v10 }
 0x4c2   : > { %11421 = vst [vmem:[%s16286_s15 + $0x48] sm:$0xff] %v11407_v60  ;;  %v11408_v61 = vsel %vm11338_vm10, %v12358_v56, %v11394_v59  ;;  %v12361_v62 = vadd.f32 %v10611_v53, %v16282_v54  ;;  %v10613_v44 = vpop.f32.mrb[13].mxu1  ;;  %11459 = vst [vmem:[%s11435_s23 + $0x48] sm:$0xff] (%p13912_p5), %v11458_v11  ;;  %v11460_v12 = vld [vmem:[%s16286_s15 + $0x30] sm:$0xff] (%p13912_p5) }
 0x4c3   : > { %11422 = vst [vmem:[%s16286_s15 + $0x50] sm:$0xff] %v11408_v61  ;;  %v11409_v63 = vsel %vm11339_vm11, %v12360_v41, %v11395_v42  ;;  %v12363_v45 = vadd.f32 %v10613_v44, %v16282_v54  ;;  %v10615_v0 = vpop.f32.mrb[14].mxu1  ;;  %v11452_v54 = vld [vmem:[%s16286_s15 + $0x10] sm:$0xff] (%p13912_p5)  ;;  %v11462_v13 = vld [vmem:[%s16286_s15 + $0x38] sm:$0xff] (%p13912_p5)  ;;  %11461 = vst [vmem:[%s11435_s23 + $0x60] sm:$0xff] (%p13912_p5), %v11460_v12 }
 0x4c4   : > { %11423 = vst [vmem:[%s16286_s15 + $0x58] sm:$0xff] %v11409_v63  ;;  %v12362_v1 = vadd.f32 %v12361_v62, %v16274_v48  ;;  %v10616_v2 = vpop.f32.mrb[15].mxu1  ;;  %11432 = sbr.rel (!%p13912_p5) target bundleno = 1235 (0x4d3), region = 92  ;;  %v11448_v48 = vld [vmem:[%s16286_s15] sm:$0xff] (%p13912_p5)  ;;  %11453 = vst [vmem:[%s11435_s23 + $0x20] sm:$0xff] (%p13912_p5), %v11452_v54 }
 0x4c5   : > { %v12364_v4 = vadd.f32 %v12363_v45, %v16276_v49  ;;  %v11450_v49 = vld [vmem:[%s16286_s15 + $0x8] sm:$0xff] (%p13912_p5)  ;;  %11449 = vst [vmem:[%s11435_s23] sm:$0xff] (%p13912_p5), %v11448_v48  ;;  %11463 = vst [vmem:[%s11435_s23 + $0x68] sm:$0xff] (%p13912_p5), %v11462_v13 }
 0x4c6   : > { %vm11340_vm12 = vcmp.ge.f32.partialorder %v12362_v1, 0.0  ;;  %v11396_v5 = vmul.f32 %v12362_v1, %v11382_v3  ;;  %11451 = vst [vmem:[%s11435_s23 + $0x8] sm:$0xff] (%p13912_p5), %v11450_v49 }
 0x4c7   : > { %vm11341_vm13 = vcmp.ge.f32.partialorder %v12364_v4, 0.0  ;;  %v11397_v6 = vmul.f32 %v12364_v4, %v11382_v3 }
 0x4c8   : > { %v11410_v7 = vsel %vm11340_vm12, %v12362_v1, %v11396_v5  ;;  %v11464_v14 = vld [vmem:[%s16286_s15 + $0x40] sm:$0xff] (%p13912_p5) }
 0x4c9   : > { %11424 = vst [vmem:[%s16286_s15 + $0x60] sm:$0xff] %v11410_v7  ;;  %v11411_v8 = vsel %vm11341_vm13, %v12364_v4, %v11397_v6  ;;  %11465 = vst [vmem:[%s11435_s23 + $0x80] sm:$0xff] (%p13912_p5), %v11464_v14  ;;  %v11466_v15 = vld [vmem:[%s16286_s15 + $0x48] sm:$0xff] (%p13912_p5) }
 0x4ca   : > { %11425 = vst [vmem:[%s16286_s15 + $0x68] sm:$0xff] %v11411_v8  ;;  %v11468_v16 = vld [vmem:[%s16286_s15 + $0x50] sm:$0xff] (%p13912_p5)  ;;  %11467 = vst [vmem:[%s11435_s23 + $0x88] sm:$0xff] (%p13912_p5), %v11466_v15 }
 0x4cb   : > { %v11470_v17 = vld [vmem:[%s16286_s15 + $0x58] sm:$0xff]  ;;  %11469 = vst [vmem:[%s11435_s23 + $0xa0] sm:$0xff] %v11468_v16 }
 0x4cc   : > { %11471 = vst [vmem:[%s11435_s23 + $0xa8] sm:$0xff] %v11470_v17 }
 0x4d0   : > { %v11472_v18 = vld [vmem:[%s16286_s15 + $0x60] sm:$0xff] }
 0x4d1   : > { %v11474_v19 = vld [vmem:[%s16286_s15 + $0x68] sm:$0xff]  ;;  %11473 = vst [vmem:[%s11435_s23 + $0xc0] sm:$0xff] %v11472_v18 }
 0x4d2   : > { %11475 = vst [vmem:[%s11435_s23 + $0xc8] sm:$0xff] %v11474_v19 }
 0x4d3 PF: > { %p11_p10 = scmp.ge.s32.totalorder %s13899_s19, 4   ;;  %s16352_s15 = smov %s13850_s16 }
 0x4d4   : > { %s16353_s16 = smov %s13910_s22  ;;  %s16354_s17 = smov %s13899_s19 }
 0x4d5   :  { %13 = sbr.rel (!%p11_p10) target bundleno = 2 (0x2), region = 152 }

// kernel: crcnet_forward.47
= control target key start
LH: loop header
LB: loop body
LE: loop exit
PB: predicated region body
PF: predicated region fallthrough
CT: control target
= control target key end

     0   :  { %s5446_s15 = smov 0   ;;  %s5448_s16 = smov 0   ;;  %s6638_s0 = inlined_call_operand.vmem [shape: bf16[32,2560], index: 0, kind: input, shape index: {}]   ;;  %s6639_s1 = inlined_call_operand.vmem [shape: f32[32,1], index: 1, kind: input, shape index: {}]   ;;  %s6640_s2 = inlined_call_operand.vmem [shape: f32[32,1], index: 2, kind: input, shape index: {}]   ;;  %s6641_s3 = inlined_call_operand.vmem [shape: bf16[2560,512], index: 3, kind: input, shape index: {}]   ;;  %s6642_s4 = inlined_call_operand.vmem [shape: f32[32,512], index: 4, kind: output, shape index: {}]  }
   0x1   :  { %s5450_s17 = smov 0  }
   0x2 LB: > { %s4372_s18 = sadd.s32 4294967295, %s5418_s17   ;;  %s5463_s19 = sadd.s32 1, %s5418_s17   ;;  %s5418_s17 = sphi %s5450_s17, %s6646_s17   ;;  %s5414_s16 = sphi %s5448_s16, %s6645_s16   ;;  %s5410_s15 = sphi %s5446_s15, %s6644_s15  }
   0x3   : > { %s81_s20 = ssub.s32 %s5418_s17, %s5463_s19  ;;  %s84_s21 = sadd.s32 1, %s5414_s16 }
   0x4   : > { %p82_p0 = scmp.eq.s32.totalorder %s81_s20, 0  ;;  %p91_p1 = scmp.ne.s32.totalorder %s5414_s16, %s5410_s15 }
   0x5   : > { %p92_p2 = scmp.eq.s32.totalorder %s5418_s17, 0  ;;  %p121_p3 = scmp.eq.s32.totalorder %s4372_s18, 1 }
   0x6   : > { %s5474_s22 = scalar_select %p82_p0, %s5414_s16, %s84_s21  }
   0x7   : > { %p93_p4 = por %p92_p2, %p91_p1  ;;  %p5476_p5 = por %p121_p3, %p91_p1 }
   0x8   : > { %p4375_p6 = scmp.ge.s32.totalorder %s5418_s17, 2 }
   0xa   : > { %152 = sbr.rel (%p4375_p6) target bundleno = 181 (0xb5), region = 28 }
  0x11   : > { %155 = sbr.rel (!%p93_p4) target bundleno = 181 (0xb5), region = 32  ;;  %s157_s24 = sand.u32 (%p93_p4), 1, %s5414_s16  }
  0x12   : > { %s4745_s25 = sshll.u32 (%p93_p4), %s5418_s17, 3  ;;  %s4827_s26 = smul.u32 (%p93_p4), 2560, %s157_s24 }
  0x13   : > { %s5486_s29 = scalar_lea.vmem (%p93_p4), %s6641_s3, %s4745_s25 }
  0x14   : > { %v828_v0 = vld [vmem:[%s5486_s29] sm:$0xff] (%p93_p4)  ;;  %v830_v1 = vld [vmem:[%s5486_s29 + $0x10] sm:$0xff] (%p93_p4)  ;;  %s5494_s30 = scalar_lea.vmem (%p93_p4), [#allocation2], %s4827_s26 }
  0x15   : > { %v832_v2 = vld [vmem:[%s5486_s29 + $0x20] sm:$0xff] (%p93_p4)  ;;  %v834_v3 = vld [vmem:[%s5486_s29 + $0x30] sm:$0xff] (%p93_p4)  ;;  %829 = vst [vmem:[%s5494_s30] sm:$0xff] (%p93_p4), %v828_v0  ;;  %831 = vst [vmem:[%s5494_s30 + $0x8] sm:$0xff] (%p93_p4), %v830_v1 }
  0x16   : > { %v836_v4 = vld [vmem:[%s5486_s29 + $0x40] sm:$0xff] (%p93_p4)  ;;  %v838_v5 = vld [vmem:[%s5486_s29 + $0x50] sm:$0xff] (%p93_p4)  ;;  %833 = vst [vmem:[%s5494_s30 + $0x10] sm:$0xff] (%p93_p4), %v832_v2  ;;  %835 = vst [vmem:[%s5494_s30 + $0x18] sm:$0xff] (%p93_p4), %v834_v3 }
  0x17   : > { %837 = vst [vmem:[%s5494_s30 + $0x20] sm:$0xff] (%p93_p4), %v836_v4  ;;  %839 = vst [vmem:[%s5494_s30 + $0x28] sm:$0xff] (%p93_p4), %v838_v5  ;;  %v840_v6 = vld [vmem:[%s5486_s29 + $0x60] sm:$0xff] (%p93_p4)  ;;  %v842_v7 = vld [vmem:[%s5486_s29 + $0x70] sm:$0xff] (%p93_p4) }
  0x18   : > { %v844_v8 = vld [vmem:[%s5486_s29 + $0x80] sm:$0xff]  ;;  %841 = vst [vmem:[%s5494_s30 + $0x30] sm:$0xff] %v840_v6  ;;  %843 = vst [vmem:[%s5494_s30 + $0x38] sm:$0xff] %v842_v7  ;;  %v846_v9 = vld [vmem:[%s5486_s29 + $0x90] sm:$0xff] }
  0x19   : > { %845 = vst [vmem:[%s5494_s30 + $0x40] sm:$0xff] %v844_v8  ;;  %v848_v10 = vld [vmem:[%s5486_s29 + $0xa0] sm:$0xff]  ;;  %v850_v11 = vld [vmem:[%s5486_s29 + $0xb0] sm:$0xff]  ;;  %847 = vst [vmem:[%s5494_s30 + $0x48] sm:$0xff] %v846_v9 }
  0x1a   : > { %849 = vst [vmem:[%s5494_s30 + $0x50] sm:$0xff] %v848_v10  ;;  %851 = vst [vmem:[%s5494_s30 + $0x58] sm:$0xff] %v850_v11  ;;  %v852_v12 = vld [vmem:[%s5486_s29 + $0xc0] sm:$0xff]  ;;  %v854_v13 = vld [vmem:[%s5486_s29 + $0xd0] sm:$0xff] }
  0x1b   : > { %v856_v14 = vld [vmem:[%s5486_s29 + $0xe0] sm:$0xff]  ;;  %853 = vst [vmem:[%s5494_s30 + $0x60] sm:$0xff] %v852_v12  ;;  %855 = vst [vmem:[%s5494_s30 + $0x68] sm:$0xff] %v854_v13  ;;  %v858_v15 = vld [vmem:[%s5486_s29 + $0xf0] sm:$0xff] }
  0x1c   : > { %857 = vst [vmem:[%s5494_s30 + $0x70] sm:$0xff] %v856_v14  ;;  %v860_v16 = vld [vmem:[%s5486_s29 + $0x100] sm:$0xff]  ;;  %v862_v17 = vld [vmem:[%s5486_s29 + $0x110] sm:$0xff]  ;;  %859 = vst [vmem:[%s5494_s30 + $0x78] sm:$0xff] %v858_v15 }
  0x1d   : > { %861 = vst [vmem:[%s5494_s30 + $0x80] sm:$0xff] %v860_v16  ;;  %863 = vst [vmem:[%s5494_s30 + $0x88] sm:$0xff] %v862_v17  ;;  %v864_v18 = vld [vmem:[%s5486_s29 + $0x120] sm:$0xff]  ;;  %v866_v19 = vld [vmem:[%s5486_s29 + $0x130] sm:$0xff] }
  0x1e   : > { %v868_v20 = vld [vmem:[%s5486_s29 + $0x140] sm:$0xff]  ;;  %865 = vst [vmem:[%s5494_s30 + $0x90] sm:$0xff] %v864_v18  ;;  %867 = vst [vmem:[%s5494_s30 + $0x98] sm:$0xff] %v866_v19  ;;  %v870_v21 = vld [vmem:[%s5486_s29 + $0x150] sm:$0xff] }
  0x1f   : > { %869 = vst [vmem:[%s5494_s30 + $0xa0] sm:$0xff] %v868_v20  ;;  %v872_v22 = vld [vmem:[%s5486_s29 + $0x160] sm:$0xff]  ;;  %v874_v23 = vld [vmem:[%s5486_s29 + $0x170] sm:$0xff]  ;;  %871 = vst [vmem:[%s5494_s30 + $0xa8] sm:$0xff] %v870_v21 }
  0x20   : > { %873 = vst [vmem:[%s5494_s30 + $0xb0] sm:$0xff] %v872_v22  ;;  %875 = vst [vmem:[%s5494_s30 + $0xb8] sm:$0xff] %v874_v23  ;;  %v876_v24 = vld [vmem:[%s5486_s29 + $0x180] sm:$0xff]  ;;  %v878_v25 = vld [vmem:[%s5486_s29 + $0x190] sm:$0xff] }
  0x21   : > { %v880_v26 = vld [vmem:[%s5486_s29 + $0x1a0] sm:$0xff]  ;;  %877 = vst [vmem:[%s5494_s30 + $0xc0] sm:$0xff] %v876_v24  ;;  %879 = vst [vmem:[%s5494_s30 + $0xc8] sm:$0xff] %v878_v25  ;;  %v882_v27 = vld [vmem:[%s5486_s29 + $0x1b0] sm:$0xff] }
  0x22   : > { %881 = vst [vmem:[%s5494_s30 + $0xd0] sm:$0xff] %v880_v26  ;;  %v884_v28 = vld [vmem:[%s5486_s29 + $0x1c0] sm:$0xff]  ;;  %v886_v29 = vld [vmem:[%s5486_s29 + $0x1d0] sm:$0xff]  ;;  %883 = vst [vmem:[%s5494_s30 + $0xd8] sm:$0xff] %v882_v27 }
  0x23   : > { %885 = vst [vmem:[%s5494_s30 + $0xe0] sm:$0xff] %v884_v28  ;;  %887 = vst [vmem:[%s5494_s30 + $0xe8] sm:$0xff] %v886_v29  ;;  %v888_v30 = vld [vmem:[%s5486_s29 + $0x1e0] sm:$0xff]  ;;  %v890_v31 = vld [vmem:[%s5486_s29 + $0x1f0] sm:$0xff] }
  0x24   : > { %v892_v32 = vld [vmem:[%s5486_s29 + $0x200] sm:$0xff]  ;;  %889 = vst [vmem:[%s5494_s30 + $0xf0] sm:$0xff] %v888_v30  ;;  %891 = vst [vmem:[%s5494_s30 + $0xf8] sm:$0xff] %v890_v31  ;;  %v894_v33 = vld [vmem:[%s5486_s29 + $0x210] sm:$0xff] }
  0x25   : > { %893 = vst [vmem:[%s5494_s30 + $0x100] sm:$0xff] %v892_v32  ;;  %v896_v34 = vld [vmem:[%s5486_s29 + $0x220] sm:$0xff]  ;;  %v898_v35 = vld [vmem:[%s5486_s29 + $0x230] sm:$0xff]  ;;  %895 = vst [vmem:[%s5494_s30 + $0x108] sm:$0xff] %v894_v33 }
  0x26   : > { %897 = vst [vmem:[%s5494_s30 + $0x110] sm:$0xff] %v896_v34  ;;  %899 = vst [vmem:[%s5494_s30 + $0x118] sm:$0xff] %v898_v35  ;;  %v900_v36 = vld [vmem:[%s5486_s29 + $0x240] sm:$0xff]  ;;  %v902_v37 = vld [vmem:[%s5486_s29 + $0x250] sm:$0xff] }
  0x27   : > { %v904_v38 = vld [vmem:[%s5486_s29 + $0x260] sm:$0xff]  ;;  %901 = vst [vmem:[%s5494_s30 + $0x120] sm:$0xff] %v900_v36  ;;  %903 = vst [vmem:[%s5494_s30 + $0x128] sm:$0xff] %v902_v37  ;;  %v906_v39 = vld [vmem:[%s5486_s29 + $0x270] sm:$0xff] }
  0x28   : > { %905 = vst [vmem:[%s5494_s30 + $0x130] sm:$0xff] %v904_v38  ;;  %v908_v40 = vld [vmem:[%s5486_s29 + $0x280] sm:$0xff]  ;;  %v910_v41 = vld [vmem:[%s5486_s29 + $0x290] sm:$0xff]  ;;  %907 = vst [vmem:[%s5494_s30 + $0x138] sm:$0xff] %v906_v39 }
  0x29   : > { %909 = vst [vmem:[%s5494_s30 + $0x140] sm:$0xff] %v908_v40  ;;  %911 = vst [vmem:[%s5494_s30 + $0x148] sm:$0xff] %v910_v41  ;;  %v912_v42 = vld [vmem:[%s5486_s29 + $0x2a0] sm:$0xff]  ;;  %v914_v43 = vld [vmem:[%s5486_s29 + $0x2b0] sm:$0xff] }
  0x2a   : > { %v916_v44 = vld [vmem:[%s5486_s29 + $0x2c0] sm:$0xff]  ;;  %913 = vst [vmem:[%s5494_s30 + $0x150] sm:$0xff] %v912_v42  ;;  %915 = vst [vmem:[%s5494_s30 + $0x158] sm:$0xff] %v914_v43  ;;  %v918_v45 = vld [vmem:[%s5486_s29 + $0x2d0] sm:$0xff] }
  0x2b   : > { %917 = vst [vmem:[%s5494_s30 + $0x160] sm:$0xff] %v916_v44  ;;  %v920_v46 = vld [vmem:[%s5486_s29 + $0x2e0] sm:$0xff]  ;;  %v922_v47 = vld [vmem:[%s5486_s29 + $0x2f0] sm:$0xff]  ;;  %919 = vst [vmem:[%s5494_s30 + $0x168] sm:$0xff] %v918_v45 }
  0x2c   : > { %921 = vst [vmem:[%s5494_s30 + $0x170] sm:$0xff] %v920_v46  ;;  %923 = vst [vmem:[%s5494_s30 + $0x178] sm:$0xff] %v922_v47  ;;  %v924_v48 = vld [vmem:[%s5486_s29 + $0x300] sm:$0xff]  ;;  %v926_v49 = vld [vmem:[%s5486_s29 + $0x310] sm:$0xff] }
  0x2d   : > { %v928_v50 = vld [vmem:[%s5486_s29 + $0x320] sm:$0xff]  ;;  %925 = vst [vmem:[%s5494_s30 + $0x180] sm:$0xff] %v924_v48  ;;  %927 = vst [vmem:[%s5494_s30 + $0x188] sm:$0xff] %v926_v49  ;;  %v930_v51 = vld [vmem:[%s5486_s29 + $0x330] sm:$0xff] }
  0x2e   : > { %929 = vst [vmem:[%s5494_s30 + $0x190] sm:$0xff] %v928_v50  ;;  %v932_v52 = vld [vmem:[%s5486_s29 + $0x340] sm:$0xff]  ;;  %v934_v53 = vld [vmem:[%s5486_s29 + $0x350] sm:$0xff]  ;;  %931 = vst [vmem:[%s5494_s30 + $0x198] sm:$0xff] %v930_v51 }
  0x2f   : > { %933 = vst [vmem:[%s5494_s30 + $0x1a0] sm:$0xff] %v932_v52  ;;  %935 = vst [vmem:[%s5494_s30 + $0x1a8] sm:$0xff] %v934_v53  ;;  %v936_v54 = vld [vmem:[%s5486_s29 + $0x360] sm:$0xff]  ;;  %v938_v55 = vld [vmem:[%s5486_s29 + $0x370] sm:$0xff] }
  0x30   : > { %v940_v56 = vld [vmem:[%s5486_s29 + $0x380] sm:$0xff]  ;;  %937 = vst [vmem:[%s5494_s30 + $0x1b0] sm:$0xff] %v936_v54  ;;  %939 = vst [vmem:[%s5494_s30 + $0x1b8] sm:$0xff] %v938_v55  ;;  %v942_v57 = vld [vmem:[%s5486_s29 + $0x390] sm:$0xff] }
  0x31   : > { %941 = vst [vmem:[%s5494_s30 + $0x1c0] sm:$0xff] %v940_v56  ;;  %v944_v58 = vld [vmem:[%s5486_s29 + $0x3a0] sm:$0xff]  ;;  %v946_v59 = vld [vmem:[%s5486_s29 + $0x3b0] sm:$0xff]  ;;  %943 = vst [vmem:[%s5494_s30 + $0x1c8] sm:$0xff] %v942_v57 }
  0x32   : > { %945 = vst [vmem:[%s5494_s30 + $0x1d0] sm:$0xff] %v944_v58  ;;  %947 = vst [vmem:[%s5494_s30 + $0x1d8] sm:$0xff] %v946_v59  ;;  %v948_v60 = vld [vmem:[%s5486_s29 + $0x3c0] sm:$0xff]  ;;  %v950_v61 = vld [vmem:[%s5486_s29 + $0x3d0] sm:$0xff] }
  0x33   : > { %v952_v62 = vld [vmem:[%s5486_s29 + $0x3e0] sm:$0xff]  ;;  %949 = vst [vmem:[%s5494_s30 + $0x1e0] sm:$0xff] %v948_v60  ;;  %951 = vst [vmem:[%s5494_s30 + $0x1e8] sm:$0xff] %v950_v61  ;;  %v954_v63 = vld [vmem:[%s5486_s29 + $0x3f0] sm:$0xff] }
  0x34   : > { %953 = vst [vmem:[%s5494_s30 + $0x1f0] sm:$0xff] %v952_v62  ;;  %v956_v0 = vld [vmem:[%s5486_s29 + $0x400] sm:$0xff]  ;;  %v958_v1 = vld [vmem:[%s5486_s29 + $0x410] sm:$0xff]  ;;  %955 = vst [vmem:[%s5494_s30 + $0x1f8] sm:$0xff] %v954_v63 }
  0x35   : > { %957 = vst [vmem:[%s5494_s30 + $0x200] sm:$0xff] %v956_v0  ;;  %959 = vst [vmem:[%s5494_s30 + $0x208] sm:$0xff] %v958_v1  ;;  %v960_v2 = vld [vmem:[%s5486_s29 + $0x420] sm:$0xff]  ;;  %v962_v3 = vld [vmem:[%s5486_s29 + $0x430] sm:$0xff] }
  0x36   : > { %v964_v4 = vld [vmem:[%s5486_s29 + $0x440] sm:$0xff]  ;;  %961 = vst [vmem:[%s5494_s30 + $0x210] sm:$0xff] %v960_v2  ;;  %963 = vst [vmem:[%s5494_s30 + $0x218] sm:$0xff] %v962_v3  ;;  %v966_v5 = vld [vmem:[%s5486_s29 + $0x450] sm:$0xff] }
  0x37   : > { %965 = vst [vmem:[%s5494_s30 + $0x220] sm:$0xff] %v964_v4  ;;  %v968_v6 = vld [vmem:[%s5486_s29 + $0x460] sm:$0xff]  ;;  %v970_v7 = vld [vmem:[%s5486_s29 + $0x470] sm:$0xff]  ;;  %967 = vst [vmem:[%s5494_s30 + $0x228] sm:$0xff] %v966_v5 }
  0x38   : > { %969 = vst [vmem:[%s5494_s30 + $0x230] sm:$0xff] %v968_v6  ;;  %971 = vst [vmem:[%s5494_s30 + $0x238] sm:$0xff] %v970_v7  ;;  %v972_v8 = vld [vmem:[%s5486_s29 + $0x480] sm:$0xff]  ;;  %v974_v9 = vld [vmem:[%s5486_s29 + $0x490] sm:$0xff] }
  0x39   : > { %v976_v10 = vld [vmem:[%s5486_s29 + $0x4a0] sm:$0xff]  ;;  %973 = vst [vmem:[%s5494_s30 + $0x240] sm:$0xff] %v972_v8  ;;  %975 = vst [vmem:[%s5494_s30 + $0x248] sm:$0xff] %v974_v9  ;;  %v978_v11 = vld [vmem:[%s5486_s29 + $0x4b0] sm:$0xff] }
  0x3a   : > { %977 = vst [vmem:[%s5494_s30 + $0x250] sm:$0xff] %v976_v10  ;;  %v980_v12 = vld [vmem:[%s5486_s29 + $0x4c0] sm:$0xff]  ;;  %v982_v13 = vld [vmem:[%s5486_s29 + $0x4d0] sm:$0xff]  ;;  %979 = vst [vmem:[%s5494_s30 + $0x258] sm:$0xff] %v978_v11 }
  0x3b   : > { %981 = vst [vmem:[%s5494_s30 + $0x260] sm:$0xff] %v980_v12  ;;  %983 = vst [vmem:[%s5494_s30 + $0x268] sm:$0xff] %v982_v13  ;;  %v984_v14 = vld [vmem:[%s5486_s29 + $0x4e0] sm:$0xff]  ;;  %v986_v15 = vld [vmem:[%s5486_s29 + $0x4f0] sm:$0xff] }
  0x3c   : > { %v988_v16 = vld [vmem:[%s5486_s29 + $0x500] sm:$0xff]  ;;  %985 = vst [vmem:[%s5494_s30 + $0x270] sm:$0xff] %v984_v14  ;;  %987 = vst [vmem:[%s5494_s30 + $0x278] sm:$0xff] %v986_v15  ;;  %v990_v17 = vld [vmem:[%s5486_s29 + $0x510] sm:$0xff] }
  0x3d   : > { %989 = vst [vmem:[%s5494_s30 + $0x280] sm:$0xff] %v988_v16  ;;  %v992_v18 = vld [vmem:[%s5486_s29 + $0x520] sm:$0xff]  ;;  %v994_v19 = vld [vmem:[%s5486_s29 + $0x530] sm:$0xff]  ;;  %991 = vst [vmem:[%s5494_s30 + $0x288] sm:$0xff] %v990_v17 }
  0x3e   : > { %993 = vst [vmem:[%s5494_s30 + $0x290] sm:$0xff] %v992_v18  ;;  %995 = vst [vmem:[%s5494_s30 + $0x298] sm:$0xff] %v994_v19  ;;  %v996_v20 = vld [vmem:[%s5486_s29 + $0x540] sm:$0xff]  ;;  %v998_v21 = vld [vmem:[%s5486_s29 + $0x550] sm:$0xff] }
  0x3f   : > { %v1000_v22 = vld [vmem:[%s5486_s29 + $0x560] sm:$0xff]  ;;  %997 = vst [vmem:[%s5494_s30 + $0x2a0] sm:$0xff] %v996_v20  ;;  %999 = vst [vmem:[%s5494_s30 + $0x2a8] sm:$0xff] %v998_v21  ;;  %v1002_v23 = vld [vmem:[%s5486_s29 + $0x570] sm:$0xff] }
  0x40   : > { %1001 = vst [vmem:[%s5494_s30 + $0x2b0] sm:$0xff] %v1000_v22  ;;  %v1004_v24 = vld [vmem:[%s5486_s29 + $0x580] sm:$0xff]  ;;  %v1006_v25 = vld [vmem:[%s5486_s29 + $0x590] sm:$0xff]  ;;  %1003 = vst [vmem:[%s5494_s30 + $0x2b8] sm:$0xff] %v1002_v23 }
  0x41   : > { %1005 = vst [vmem:[%s5494_s30 + $0x2c0] sm:$0xff] %v1004_v24  ;;  %1007 = vst [vmem:[%s5494_s30 + $0x2c8] sm:$0xff] %v1006_v25  ;;  %v1008_v26 = vld [vmem:[%s5486_s29 + $0x5a0] sm:$0xff]  ;;  %v1010_v27 = vld [vmem:[%s5486_s29 + $0x5b0] sm:$0xff] }
  0x42   : > { %v1012_v28 = vld [vmem:[%s5486_s29 + $0x5c0] sm:$0xff]  ;;  %1009 = vst [vmem:[%s5494_s30 + $0x2d0] sm:$0xff] %v1008_v26  ;;  %1011 = vst [vmem:[%s5494_s30 + $0x2d8] sm:$0xff] %v1010_v27  ;;  %v1014_v29 = vld [vmem:[%s5486_s29 + $0x5d0] sm:$0xff] }
  0x43   : > { %1013 = vst [vmem:[%s5494_s30 + $0x2e0] sm:$0xff] %v1012_v28  ;;  %v1016_v30 = vld [vmem:[%s5486_s29 + $0x5e0] sm:$0xff]  ;;  %v1018_v31 = vld [vmem:[%s5486_s29 + $0x5f0] sm:$0xff]  ;;  %1015 = vst [vmem:[%s5494_s30 + $0x2e8] sm:$0xff] %v1014_v29 }
  0x44   : > { %1017 = vst [vmem:[%s5494_s30 + $0x2f0] sm:$0xff] %v1016_v30  ;;  %1019 = vst [vmem:[%s5494_s30 + $0x2f8] sm:$0xff] %v1018_v31  ;;  %v1020_v32 = vld [vmem:[%s5486_s29 + $0x600] sm:$0xff]  ;;  %v1022_v33 = vld [vmem:[%s5486_s29 + $0x610] sm:$0xff] }
  0x45   : > { %v1024_v34 = vld [vmem:[%s5486_s29 + $0x620] sm:$0xff]  ;;  %1021 = vst [vmem:[%s5494_s30 + $0x300] sm:$0xff] %v1020_v32  ;;  %1023 = vst [vmem:[%s5494_s30 + $0x308] sm:$0xff] %v1022_v33  ;;  %v1026_v35 = vld [vmem:[%s5486_s29 + $0x630] sm:$0xff] }
  0x46   : > { %1025 = vst [vmem:[%s5494_s30 + $0x310] sm:$0xff] %v1024_v34  ;;  %v1028_v36 = vld [vmem:[%s5486_s29 + $0x640] sm:$0xff]  ;;  %v1030_v37 = vld [vmem:[%s5486_s29 + $0x650] sm:$0xff]  ;;  %1027 = vst [vmem:[%s5494_s30 + $0x318] sm:$0xff] %v1026_v35 }
  0x47   : > { %1029 = vst [vmem:[%s5494_s30 + $0x320] sm:$0xff] %v1028_v36  ;;  %1031 = vst [vmem:[%s5494_s30 + $0x328] sm:$0xff] %v1030_v37  ;;  %v1032_v38 = vld [vmem:[%s5486_s29 + $0x660] sm:$0xff]  ;;  %v1034_v39 = vld [vmem:[%s5486_s29 + $0x670] sm:$0xff] }
  0x48   : > { %v1036_v40 = vld [vmem:[%s5486_s29 + $0x680] sm:$0xff]  ;;  %1033 = vst [vmem:[%s5494_s30 + $0x330] sm:$0xff] %v1032_v38  ;;  %1035 = vst [vmem:[%s5494_s30 + $0x338] sm:$0xff] %v1034_v39  ;;  %v1038_v41 = vld [vmem:[%s5486_s29 + $0x690] sm:$0xff] }
  0x49   : > { %1037 = vst [vmem:[%s5494_s30 + $0x340] sm:$0xff] %v1036_v40  ;;  %v1040_v42 = vld [vmem:[%s5486_s29 + $0x6a0] sm:$0xff]  ;;  %v1042_v43 = vld [vmem:[%s5486_s29 + $0x6b0] sm:$0xff]  ;;  %1039 = vst [vmem:[%s5494_s30 + $0x348] sm:$0xff] %v1038_v41 }
  0x4a   : > { %1041 = vst [vmem:[%s5494_s30 + $0x350] sm:$0xff] %v1040_v42  ;;  %1043 = vst [vmem:[%s5494_s30 + $0x358] sm:$0xff] %v1042_v43  ;;  %v1044_v44 = vld [vmem:[%s5486_s29 + $0x6c0] sm:$0xff]  ;;  %v1046_v45 = vld [vmem:[%s5486_s29 + $0x6d0] sm:$0xff] }
  0x4b   : > { %v1048_v46 = vld [vmem:[%s5486_s29 + $0x6e0] sm:$0xff]  ;;  %1045 = vst [vmem:[%s5494_s30 + $0x360] sm:$0xff] %v1044_v44  ;;  %1047 = vst [vmem:[%s5494_s30 + $0x368] sm:$0xff] %v1046_v45  ;;  %v1050_v47 = vld [vmem:[%s5486_s29 + $0x6f0] sm:$0xff] }
  0x4c   : > { %1049 = vst [vmem:[%s5494_s30 + $0x370] sm:$0xff] %v1048_v46  ;;  %v1052_v48 = vld [vmem:[%s5486_s29 + $0x700] sm:$0xff]  ;;  %v1054_v49 = vld [vmem:[%s5486_s29 + $0x710] sm:$0xff]  ;;  %1051 = vst [vmem:[%s5494_s30 + $0x378] sm:$0xff] %v1050_v47 }
  0x4d   : > { %1053 = vst [vmem:[%s5494_s30 + $0x380] sm:$0xff] %v1052_v48  ;;  %1055 = vst [vmem:[%s5494_s30 + $0x388] sm:$0xff] %v1054_v49  ;;  %v1056_v50 = vld [vmem:[%s5486_s29 + $0x720] sm:$0xff]  ;;  %v1058_v51 = vld [vmem:[%s5486_s29 + $0x730] sm:$0xff] }
  0x4e   : > { %v1060_v52 = vld [vmem:[%s5486_s29 + $0x740] sm:$0xff]  ;;  %1057 = vst [vmem:[%s5494_s30 + $0x390] sm:$0xff] %v1056_v50  ;;  %1059 = vst [vmem:[%s5494_s30 + $0x398] sm:$0xff] %v1058_v51  ;;  %v1062_v53 = vld [vmem:[%s5486_s29 + $0x750] sm:$0xff] }
  0x4f   : > { %1061 = vst [vmem:[%s5494_s30 + $0x3a0] sm:$0xff] %v1060_v52  ;;  %v1064_v54 = vld [vmem:[%s5486_s29 + $0x760] sm:$0xff]  ;;  %v1066_v55 = vld [vmem:[%s5486_s29 + $0x770] sm:$0xff]  ;;  %1063 = vst [vmem:[%s5494_s30 + $0x3a8] sm:$0xff] %v1062_v53 }
  0x50   : > { %1065 = vst [vmem:[%s5494_s30 + $0x3b0] sm:$0xff] %v1064_v54  ;;  %1067 = vst [vmem:[%s5494_s30 + $0x3b8] sm:$0xff] %v1066_v55  ;;  %v1068_v56 = vld [vmem:[%s5486_s29 + $0x780] sm:$0xff]  ;;  %v1070_v57 = vld [vmem:[%s5486_s29 + $0x790] sm:$0xff] }
  0x51   : > { %v1072_v58 = vld [vmem:[%s5486_s29 + $0x7a0] sm:$0xff]  ;;  %1069 = vst [vmem:[%s5494_s30 + $0x3c0] sm:$0xff] %v1068_v56  ;;  %1071 = vst [vmem:[%s5494_s30 + $0x3c8] sm:$0xff] %v1070_v57  ;;  %v1074_v59 = vld [vmem:[%s5486_s29 + $0x7b0] sm:$0xff] }
  0x52   : > { %1073 = vst [vmem:[%s5494_s30 + $0x3d0] sm:$0xff] %v1072_v58  ;;  %v1076_v60 = vld [vmem:[%s5486_s29 + $0x7c0] sm:$0xff]  ;;  %v1078_v61 = vld [vmem:[%s5486_s29 + $0x7d0] sm:$0xff]  ;;  %1075 = vst [vmem:[%s5494_s30 + $0x3d8] sm:$0xff] %v1074_v59 }
  0x53   : > { %1077 = vst [vmem:[%s5494_s30 + $0x3e0] sm:$0xff] %v1076_v60  ;;  %1079 = vst [vmem:[%s5494_s30 + $0x3e8] sm:$0xff] %v1078_v61  ;;  %v1080_v62 = vld [vmem:[%s5486_s29 + $0x7e0] sm:$0xff]  ;;  %v1082_v63 = vld [vmem:[%s5486_s29 + $0x7f0] sm:$0xff] }
  0x54   : > { %v1084_v0 = vld [vmem:[%s5486_s29 + $0x800] sm:$0xff]  ;;  %1081 = vst [vmem:[%s5494_s30 + $0x3f0] sm:$0xff] %v1080_v62  ;;  %1083 = vst [vmem:[%s5494_s30 + $0x3f8] sm:$0xff] %v1082_v63  ;;  %v1086_v1 = vld [vmem:[%s5486_s29 + $0x810] sm:$0xff] }
  0x55   : > { %1085 = vst [vmem:[%s5494_s30 + $0x400] sm:$0xff] %v1084_v0  ;;  %v1088_v2 = vld [vmem:[%s5486_s29 + $0x820] sm:$0xff]  ;;  %v1090_v3 = vld [vmem:[%s5486_s29 + $0x830] sm:$0xff]  ;;  %1087 = vst [vmem:[%s5494_s30 + $0x408] sm:$0xff] %v1086_v1 }
  0x56   : > { %1089 = vst [vmem:[%s5494_s30 + $0x410] sm:$0xff] %v1088_v2  ;;  %1091 = vst [vmem:[%s5494_s30 + $0x418] sm:$0xff] %v1090_v3  ;;  %v1092_v4 = vld [vmem:[%s5486_s29 + $0x840] sm:$0xff]  ;;  %v1094_v5 = vld [vmem:[%s5486_s29 + $0x850] sm:$0xff] }
  0x57   : > { %v1096_v6 = vld [vmem:[%s5486_s29 + $0x860] sm:$0xff]  ;;  %1093 = vst [vmem:[%s5494_s30 + $0x420] sm:$0xff] %v1092_v4  ;;  %1095 = vst [vmem:[%s5494_s30 + $0x428] sm:$0xff] %v1094_v5  ;;  %v1098_v7 = vld [vmem:[%s5486_s29 + $0x870] sm:$0xff] }
  0x58   : > { %1097 = vst [vmem:[%s5494_s30 + $0x430] sm:$0xff] %v1096_v6  ;;  %v1100_v8 = vld [vmem:[%s5486_s29 + $0x880] sm:$0xff]  ;;  %v1102_v9 = vld [vmem:[%s5486_s29 + $0x890] sm:$0xff]  ;;  %1099 = vst [vmem:[%s5494_s30 + $0x438] sm:$0xff] %v1098_v7 }
  0x59   : > { %1101 = vst [vmem:[%s5494_s30 + $0x440] sm:$0xff] %v1100_v8  ;;  %1103 = vst [vmem:[%s5494_s30 + $0x448] sm:$0xff] %v1102_v9  ;;  %v1104_v10 = vld [vmem:[%s5486_s29 + $0x8a0] sm:$0xff]  ;;  %v1106_v11 = vld [vmem:[%s5486_s29 + $0x8b0] sm:$0xff] }
  0x5a   : > { %v1108_v12 = vld [vmem:[%s5486_s29 + $0x8c0] sm:$0xff]  ;;  %1105 = vst [vmem:[%s5494_s30 + $0x450] sm:$0xff] %v1104_v10  ;;  %1107 = vst [vmem:[%s5494_s30 + $0x458] sm:$0xff] %v1106_v11  ;;  %v1110_v13 = vld [vmem:[%s5486_s29 + $0x8d0] sm:$0xff] }
  0x5b   : > { %1109 = vst [vmem:[%s5494_s30 + $0x460] sm:$0xff] %v1108_v12  ;;  %v1112_v14 = vld [vmem:[%s5486_s29 + $0x8e0] sm:$0xff]  ;;  %v1114_v15 = vld [vmem:[%s5486_s29 + $0x8f0] sm:$0xff]  ;;  %1111 = vst [vmem:[%s5494_s30 + $0x468] sm:$0xff] %v1110_v13 }
  0x5c   : > { %1113 = vst [vmem:[%s5494_s30 + $0x470] sm:$0xff] %v1112_v14  ;;  %1115 = vst [vmem:[%s5494_s30 + $0x478] sm:$0xff] %v1114_v15  ;;  %v1116_v16 = vld [vmem:[%s5486_s29 + $0x900] sm:$0xff]  ;;  %v1118_v17 = vld [vmem:[%s5486_s29 + $0x910] sm:$0xff] }
  0x5d   : > { %v1120_v18 = vld [vmem:[%s5486_s29 + $0x920] sm:$0xff]  ;;  %1117 = vst [vmem:[%s5494_s30 + $0x480] sm:$0xff] %v1116_v16  ;;  %1119 = vst [vmem:[%s5494_s30 + $0x488] sm:$0xff] %v1118_v17  ;;  %v1122_v19 = vld [vmem:[%s5486_s29 + $0x930] sm:$0xff] }
  0x5e   : > { %1121 = vst [vmem:[%s5494_s30 + $0x490] sm:$0xff] %v1120_v18  ;;  %v1124_v20 = vld [vmem:[%s5486_s29 + $0x940] sm:$0xff]  ;;  %v1126_v21 = vld [vmem:[%s5486_s29 + $0x950] sm:$0xff]  ;;  %1123 = vst [vmem:[%s5494_s30 + $0x498] sm:$0xff] %v1122_v19 }
  0x5f   : > { %1125 = vst [vmem:[%s5494_s30 + $0x4a0] sm:$0xff] %v1124_v20  ;;  %1127 = vst [vmem:[%s5494_s30 + $0x4a8] sm:$0xff] %v1126_v21  ;;  %v1128_v22 = vld [vmem:[%s5486_s29 + $0x960] sm:$0xff]  ;;  %v1130_v23 = vld [vmem:[%s5486_s29 + $0x970] sm:$0xff] }
  0x60   : > { %v1132_v24 = vld [vmem:[%s5486_s29 + $0x980] sm:$0xff]  ;;  %1129 = vst [vmem:[%s5494_s30 + $0x4b0] sm:$0xff] %v1128_v22  ;;  %1131 = vst [vmem:[%s5494_s30 + $0x4b8] sm:$0xff] %v1130_v23  ;;  %v1134_v25 = vld [vmem:[%s5486_s29 + $0x990] sm:$0xff] }
  0x61   : > { %1133 = vst [vmem:[%s5494_s30 + $0x4c0] sm:$0xff] %v1132_v24  ;;  %v1136_v26 = vld [vmem:[%s5486_s29 + $0x9a0] sm:$0xff]  ;;  %v1138_v27 = vld [vmem:[%s5486_s29 + $0x9b0] sm:$0xff]  ;;  %1135 = vst [vmem:[%s5494_s30 + $0x4c8] sm:$0xff] %v1134_v25 }
  0x62   : > { %1137 = vst [vmem:[%s5494_s30 + $0x4d0] sm:$0xff] %v1136_v26  ;;  %1139 = vst [vmem:[%s5494_s30 + $0x4d8] sm:$0xff] %v1138_v27  ;;  %v1140_v28 = vld [vmem:[%s5486_s29 + $0x9c0] sm:$0xff]  ;;  %v1142_v29 = vld [vmem:[%s5486_s29 + $0x9d0] sm:$0xff] }
  0x63   : > { %v1144_v30 = vld [vmem:[%s5486_s29 + $0x9e0] sm:$0xff]  ;;  %1141 = vst [vmem:[%s5494_s30 + $0x4e0] sm:$0xff] %v1140_v28  ;;  %1143 = vst [vmem:[%s5494_s30 + $0x4e8] sm:$0xff] %v1142_v29  ;;  %v1146_v31 = vld [vmem:[%s5486_s29 + $0x9f0] sm:$0xff] }
  0x64   : > { %1145 = vst [vmem:[%s5494_s30 + $0x4f0] sm:$0xff] %v1144_v30  ;;  %v1148_v32 = vld [vmem:[%s5486_s29 + $0xa00] sm:$0xff]  ;;  %v1150_v33 = vld [vmem:[%s5486_s29 + $0xa10] sm:$0xff]  ;;  %1147 = vst [vmem:[%s5494_s30 + $0x4f8] sm:$0xff] %v1146_v31 }
  0x65   : > { %1149 = vst [vmem:[%s5494_s30 + $0x500] sm:$0xff] %v1148_v32  ;;  %1151 = vst [vmem:[%s5494_s30 + $0x508] sm:$0xff] %v1150_v33  ;;  %v1152_v34 = vld [vmem:[%s5486_s29 + $0xa20] sm:$0xff]  ;;  %v1154_v35 = vld [vmem:[%s5486_s29 + $0xa30] sm:$0xff] }
  0x66   : > { %v1156_v36 = vld [vmem:[%s5486_s29 + $0xa40] sm:$0xff]  ;;  %1153 = vst [vmem:[%s5494_s30 + $0x510] sm:$0xff] %v1152_v34  ;;  %1155 = vst [vmem:[%s5494_s30 + $0x518] sm:$0xff] %v1154_v35  ;;  %v1158_v37 = vld [vmem:[%s5486_s29 + $0xa50] sm:$0xff] }
  0x67   : > { %1157 = vst [vmem:[%s5494_s30 + $0x520] sm:$0xff] %v1156_v36  ;;  %v1160_v38 = vld [vmem:[%s5486_s29 + $0xa60] sm:$0xff]  ;;  %v1162_v39 = vld [vmem:[%s5486_s29 + $0xa70] sm:$0xff]  ;;  %1159 = vst [vmem:[%s5494_s30 + $0x528] sm:$0xff] %v1158_v37 }
  0x68   : > { %1161 = vst [vmem:[%s5494_s30 + $0x530] sm:$0xff] %v1160_v38  ;;  %1163 = vst [vmem:[%s5494_s30 + $0x538] sm:$0xff] %v1162_v39  ;;  %v1164_v40 = vld [vmem:[%s5486_s29 + $0xa80] sm:$0xff]  ;;  %v1166_v41 = vld [vmem:[%s5486_s29 + $0xa90] sm:$0xff] }
  0x69   : > { %v1168_v42 = vld [vmem:[%s5486_s29 + $0xaa0] sm:$0xff]  ;;  %1165 = vst [vmem:[%s5494_s30 + $0x540] sm:$0xff] %v1164_v40  ;;  %1167 = vst [vmem:[%s5494_s30 + $0x548] sm:$0xff] %v1166_v41  ;;  %v1170_v43 = vld [vmem:[%s5486_s29 + $0xab0] sm:$0xff] }
  0x6a   : > { %1169 = vst [vmem:[%s5494_s30 + $0x550] sm:$0xff] %v1168_v42  ;;  %v1172_v44 = vld [vmem:[%s5486_s29 + $0xac0] sm:$0xff]  ;;  %v1174_v45 = vld [vmem:[%s5486_s29 + $0xad0] sm:$0xff]  ;;  %1171 = vst [vmem:[%s5494_s30 + $0x558] sm:$0xff] %v1170_v43 }
  0x6b   : > { %1173 = vst [vmem:[%s5494_s30 + $0x560] sm:$0xff] %v1172_v44  ;;  %1175 = vst [vmem:[%s5494_s30 + $0x568] sm:$0xff] %v1174_v45  ;;  %v1176_v46 = vld [vmem:[%s5486_s29 + $0xae0] sm:$0xff]  ;;  %v1178_v47 = vld [vmem:[%s5486_s29 + $0xaf0] sm:$0xff] }
  0x6c   : > { %v1180_v48 = vld [vmem:[%s5486_s29 + $0xb00] sm:$0xff]  ;;  %1177 = vst [vmem:[%s5494_s30 + $0x570] sm:$0xff] %v1176_v46  ;;  %1179 = vst [vmem:[%s5494_s30 + $0x578] sm:$0xff] %v1178_v47  ;;  %v1182_v49 = vld [vmem:[%s5486_s29 + $0xb10] sm:$0xff] }
  0x6d   : > { %1181 = vst [vmem:[%s5494_s30 + $0x580] sm:$0xff] %v1180_v48  ;;  %v1184_v50 = vld [vmem:[%s5486_s29 + $0xb20] sm:$0xff]  ;;  %v1186_v51 = vld [vmem:[%s5486_s29 + $0xb30] sm:$0xff]  ;;  %1183 = vst [vmem:[%s5494_s30 + $0x588] sm:$0xff] %v1182_v49 }
  0x6e   : > { %1185 = vst [vmem:[%s5494_s30 + $0x590] sm:$0xff] %v1184_v50  ;;  %1187 = vst [vmem:[%s5494_s30 + $0x598] sm:$0xff] %v1186_v51  ;;  %v1188_v52 = vld [vmem:[%s5486_s29 + $0xb40] sm:$0xff]  ;;  %v1190_v53 = vld [vmem:[%s5486_s29 + $0xb50] sm:$0xff] }
  0x6f   : > { %v1192_v54 = vld [vmem:[%s5486_s29 + $0xb60] sm:$0xff]  ;;  %1189 = vst [vmem:[%s5494_s30 + $0x5a0] sm:$0xff] %v1188_v52  ;;  %1191 = vst [vmem:[%s5494_s30 + $0x5a8] sm:$0xff] %v1190_v53  ;;  %v1194_v55 = vld [vmem:[%s5486_s29 + $0xb70] sm:$0xff] }
  0x70   : > { %1193 = vst [vmem:[%s5494_s30 + $0x5b0] sm:$0xff] %v1192_v54  ;;  %v1196_v56 = vld [vmem:[%s5486_s29 + $0xb80] sm:$0xff]  ;;  %v1198_v57 = vld [vmem:[%s5486_s29 + $0xb90] sm:$0xff]  ;;  %1195 = vst [vmem:[%s5494_s30 + $0x5b8] sm:$0xff] %v1194_v55 }
  0x71   : > { %1197 = vst [vmem:[%s5494_s30 + $0x5c0] sm:$0xff] %v1196_v56  ;;  %1199 = vst [vmem:[%s5494_s30 + $0x5c8] sm:$0xff] %v1198_v57  ;;  %v1200_v58 = vld [vmem:[%s5486_s29 + $0xba0] sm:$0xff]  ;;  %v1202_v59 = vld [vmem:[%s5486_s29 + $0xbb0] sm:$0xff] }
  0x72   : > { %v1204_v60 = vld [vmem:[%s5486_s29 + $0xbc0] sm:$0xff]  ;;  %1201 = vst [vmem:[%s5494_s30 + $0x5d0] sm:$0xff] %v1200_v58  ;;  %1203 = vst [vmem:[%s5494_s30 + $0x5d8] sm:$0xff] %v1202_v59  ;;  %v1206_v61 = vld [vmem:[%s5486_s29 + $0xbd0] sm:$0xff] }
  0x73   : > { %1205 = vst [vmem:[%s5494_s30 + $0x5e0] sm:$0xff] %v1204_v60  ;;  %v1208_v62 = vld [vmem:[%s5486_s29 + $0xbe0] sm:$0xff]  ;;  %v1210_v63 = vld [vmem:[%s5486_s29 + $0xbf0] sm:$0xff]  ;;  %1207 = vst [vmem:[%s5494_s30 + $0x5e8] sm:$0xff] %v1206_v61 }
  0x74   : > { %1209 = vst [vmem:[%s5494_s30 + $0x5f0] sm:$0xff] %v1208_v62  ;;  %1211 = vst [vmem:[%s5494_s30 + $0x5f8] sm:$0xff] %v1210_v63  ;;  %v1212_v0 = vld [vmem:[%s5486_s29 + $0xc00] sm:$0xff]  ;;  %v1214_v1 = vld [vmem:[%s5486_s29 + $0xc10] sm:$0xff] }
  0x75   : > { %v1216_v2 = vld [vmem:[%s5486_s29 + $0xc20] sm:$0xff]  ;;  %1213 = vst [vmem:[%s5494_s30 + $0x600] sm:$0xff] %v1212_v0  ;;  %1215 = vst [vmem:[%s5494_s30 + $0x608] sm:$0xff] %v1214_v1  ;;  %v1218_v3 = vld [vmem:[%s5486_s29 + $0xc30] sm:$0xff] }
  0x76   : > { %1217 = vst [vmem:[%s5494_s30 + $0x610] sm:$0xff] %v1216_v2  ;;  %v1220_v4 = vld [vmem:[%s5486_s29 + $0xc40] sm:$0xff]  ;;  %v1222_v5 = vld [vmem:[%s5486_s29 + $0xc50] sm:$0xff]  ;;  %1219 = vst [vmem:[%s5494_s30 + $0x618] sm:$0xff] %v1218_v3 }
  0x77   : > { %1221 = vst [vmem:[%s5494_s30 + $0x620] sm:$0xff] %v1220_v4  ;;  %1223 = vst [vmem:[%s5494_s30 + $0x628] sm:$0xff] %v1222_v5  ;;  %v1224_v6 = vld [vmem:[%s5486_s29 + $0xc60] sm:$0xff]  ;;  %v1226_v7 = vld [vmem:[%s5486_s29 + $0xc70] sm:$0xff] }
  0x78   : > { %v1228_v8 = vld [vmem:[%s5486_s29 + $0xc80] sm:$0xff]  ;;  %1225 = vst [vmem:[%s5494_s30 + $0x630] sm:$0xff] %v1224_v6  ;;  %1227 = vst [vmem:[%s5494_s30 + $0x638] sm:$0xff] %v1226_v7  ;;  %v1230_v9 = vld [vmem:[%s5486_s29 + $0xc90] sm:$0xff] }
  0x79   : > { %1229 = vst [vmem:[%s5494_s30 + $0x640] sm:$0xff] %v1228_v8  ;;  %v1232_v10 = vld [vmem:[%s5486_s29 + $0xca0] sm:$0xff]  ;;  %v1234_v11 = vld [vmem:[%s5486_s29 + $0xcb0] sm:$0xff]  ;;  %1231 = vst [vmem:[%s5494_s30 + $0x648] sm:$0xff] %v1230_v9 }
  0x7a   : > { %1233 = vst [vmem:[%s5494_s30 + $0x650] sm:$0xff] %v1232_v10  ;;  %1235 = vst [vmem:[%s5494_s30 + $0x658] sm:$0xff] %v1234_v11  ;;  %v1236_v12 = vld [vmem:[%s5486_s29 + $0xcc0] sm:$0xff]  ;;  %v1238_v13 = vld [vmem:[%s5486_s29 + $0xcd0] sm:$0xff] }
  0x7b   : > { %v1240_v14 = vld [vmem:[%s5486_s29 + $0xce0] sm:$0xff]  ;;  %1237 = vst [vmem:[%s5494_s30 + $0x660] sm:$0xff] %v1236_v12  ;;  %1239 = vst [vmem:[%s5494_s30 + $0x668] sm:$0xff] %v1238_v13  ;;  %v1242_v15 = vld [vmem:[%s5486_s29 + $0xcf0] sm:$0xff] }
  0x7c   : > { %1241 = vst [vmem:[%s5494_s30 + $0x670] sm:$0xff] %v1240_v14  ;;  %v1244_v16 = vld [vmem:[%s5486_s29 + $0xd00] sm:$0xff]  ;;  %v1246_v17 = vld [vmem:[%s5486_s29 + $0xd10] sm:$0xff]  ;;  %1243 = vst [vmem:[%s5494_s30 + $0x678] sm:$0xff] %v1242_v15 }
  0x7d   : > { %1245 = vst [vmem:[%s5494_s30 + $0x680] sm:$0xff] %v1244_v16  ;;  %1247 = vst [vmem:[%s5494_s30 + $0x688] sm:$0xff] %v1246_v17  ;;  %v1248_v18 = vld [vmem:[%s5486_s29 + $0xd20] sm:$0xff]  ;;  %v1250_v19 = vld [vmem:[%s5486_s29 + $0xd30] sm:$0xff] }
  0x7e   : > { %v1252_v20 = vld [vmem:[%s5486_s29 + $0xd40] sm:$0xff]  ;;  %1249 = vst [vmem:[%s5494_s30 + $0x690] sm:$0xff] %v1248_v18  ;;  %1251 = vst [vmem:[%s5494_s30 + $0x698] sm:$0xff] %v1250_v19  ;;  %v1254_v21 = vld [vmem:[%s5486_s29 + $0xd50] sm:$0xff] }
  0x7f   : > { %1253 = vst [vmem:[%s5494_s30 + $0x6a0] sm:$0xff] %v1252_v20  ;;  %v1256_v22 = vld [vmem:[%s5486_s29 + $0xd60] sm:$0xff]  ;;  %v1258_v23 = vld [vmem:[%s5486_s29 + $0xd70] sm:$0xff]  ;;  %1255 = vst [vmem:[%s5494_s30 + $0x6a8] sm:$0xff] %v1254_v21 }
  0x80   : > { %1257 = vst [vmem:[%s5494_s30 + $0x6b0] sm:$0xff] %v1256_v22  ;;  %1259 = vst [vmem:[%s5494_s30 + $0x6b8] sm:$0xff] %v1258_v23  ;;  %v1260_v24 = vld [vmem:[%s5486_s29 + $0xd80] sm:$0xff]  ;;  %v1262_v25 = vld [vmem:[%s5486_s29 + $0xd90] sm:$0xff] }
  0x81   : > { %v1264_v26 = vld [vmem:[%s5486_s29 + $0xda0] sm:$0xff]  ;;  %1261 = vst [vmem:[%s5494_s30 + $0x6c0] sm:$0xff] %v1260_v24  ;;  %1263 = vst [vmem:[%s5494_s30 + $0x6c8] sm:$0xff] %v1262_v25  ;;  %v1266_v27 = vld [vmem:[%s5486_s29 + $0xdb0] sm:$0xff] }
  0x82   : > { %1265 = vst [vmem:[%s5494_s30 + $0x6d0] sm:$0xff] %v1264_v26  ;;  %v1268_v28 = vld [vmem:[%s5486_s29 + $0xdc0] sm:$0xff]  ;;  %v1270_v29 = vld [vmem:[%s5486_s29 + $0xdd0] sm:$0xff]  ;;  %1267 = vst [vmem:[%s5494_s30 + $0x6d8] sm:$0xff] %v1266_v27 }
  0x83   : > { %1269 = vst [vmem:[%s5494_s30 + $0x6e0] sm:$0xff] %v1268_v28  ;;  %1271 = vst [vmem:[%s5494_s30 + $0x6e8] sm:$0xff] %v1270_v29  ;;  %v1272_v30 = vld [vmem:[%s5486_s29 + $0xde0] sm:$0xff]  ;;  %v1274_v31 = vld [vmem:[%s5486_s29 + $0xdf0] sm:$0xff] }
  0x84   : > { %v1276_v32 = vld [vmem:[%s5486_s29 + $0xe00] sm:$0xff]  ;;  %1273 = vst [vmem:[%s5494_s30 + $0x6f0] sm:$0xff] %v1272_v30  ;;  %1275 = vst [vmem:[%s5494_s30 + $0x6f8] sm:$0xff] %v1274_v31  ;;  %v1278_v33 = vld [vmem:[%s5486_s29 + $0xe10] sm:$0xff] }
  0x85   : > { %1277 = vst [vmem:[%s5494_s30 + $0x700] sm:$0xff] %v1276_v32  ;;  %v1280_v34 = vld [vmem:[%s5486_s29 + $0xe20] sm:$0xff]  ;;  %v1282_v35 = vld [vmem:[%s5486_s29 + $0xe30] sm:$0xff]  ;;  %1279 = vst [vmem:[%s5494_s30 + $0x708] sm:$0xff] %v1278_v33 }
  0x86   : > { %1281 = vst [vmem:[%s5494_s30 + $0x710] sm:$0xff] %v1280_v34  ;;  %1283 = vst [vmem:[%s5494_s30 + $0x718] sm:$0xff] %v1282_v35  ;;  %v1284_v36 = vld [vmem:[%s5486_s29 + $0xe40] sm:$0xff]  ;;  %v1286_v37 = vld [vmem:[%s5486_s29 + $0xe50] sm:$0xff] }
  0x87   : > { %v1288_v38 = vld [vmem:[%s5486_s29 + $0xe60] sm:$0xff]  ;;  %1285 = vst [vmem:[%s5494_s30 + $0x720] sm:$0xff] %v1284_v36  ;;  %1287 = vst [vmem:[%s5494_s30 + $0x728] sm:$0xff] %v1286_v37  ;;  %v1290_v39 = vld [vmem:[%s5486_s29 + $0xe70] sm:$0xff] }
  0x88   : > { %1289 = vst [vmem:[%s5494_s30 + $0x730] sm:$0xff] %v1288_v38  ;;  %v1292_v40 = vld [vmem:[%s5486_s29 + $0xe80] sm:$0xff]  ;;  %v1294_v41 = vld [vmem:[%s5486_s29 + $0xe90] sm:$0xff]  ;;  %1291 = vst [vmem:[%s5494_s30 + $0x738] sm:$0xff] %v1290_v39 }
  0x89   : > { %1293 = vst [vmem:[%s5494_s30 + $0x740] sm:$0xff] %v1292_v40  ;;  %1295 = vst [vmem:[%s5494_s30 + $0x748] sm:$0xff] %v1294_v41  ;;  %v1296_v42 = vld [vmem:[%s5486_s29 + $0xea0] sm:$0xff]  ;;  %v1298_v43 = vld [vmem:[%s5486_s29 + $0xeb0] sm:$0xff] }
  0x8a   : > { %v1300_v44 = vld [vmem:[%s5486_s29 + $0xec0] sm:$0xff]  ;;  %1297 = vst [vmem:[%s5494_s30 + $0x750] sm:$0xff] %v1296_v42  ;;  %1299 = vst [vmem:[%s5494_s30 + $0x758] sm:$0xff] %v1298_v43  ;;  %v1302_v45 = vld [vmem:[%s5486_s29 + $0xed0] sm:$0xff] }
  0x8b   : > { %1301 = vst [vmem:[%s5494_s30 + $0x760] sm:$0xff] %v1300_v44  ;;  %v1304_v46 = vld [vmem:[%s5486_s29 + $0xee0] sm:$0xff]  ;;  %v1306_v47 = vld [vmem:[%s5486_s29 + $0xef0] sm:$0xff]  ;;  %1303 = vst [vmem:[%s5494_s30 + $0x768] sm:$0xff] %v1302_v45 }
  0x8c   : > { %1305 = vst [vmem:[%s5494_s30 + $0x770] sm:$0xff] %v1304_v46  ;;  %1307 = vst [vmem:[%s5494_s30 + $0x778] sm:$0xff] %v1306_v47  ;;  %v1308_v48 = vld [vmem:[%s5486_s29 + $0xf00] sm:$0xff]  ;;  %v1310_v49 = vld [vmem:[%s5486_s29 + $0xf10] sm:$0xff] }
  0x8d   : > { %v1312_v50 = vld [vmem:[%s5486_s29 + $0xf20] sm:$0xff]  ;;  %1309 = vst [vmem:[%s5494_s30 + $0x780] sm:$0xff] %v1308_v48  ;;  %1311 = vst [vmem:[%s5494_s30 + $0x788] sm:$0xff] %v1310_v49  ;;  %v1314_v51 = vld [vmem:[%s5486_s29 + $0xf30] sm:$0xff] }
  0x8e   : > { %1313 = vst [vmem:[%s5494_s30 + $0x790] sm:$0xff] %v1312_v50  ;;  %v1316_v52 = vld [vmem:[%s5486_s29 + $0xf40] sm:$0xff]  ;;  %v1318_v53 = vld [vmem:[%s5486_s29 + $0xf50] sm:$0xff]  ;;  %1315 = vst [vmem:[%s5494_s30 + $0x798] sm:$0xff] %v1314_v51 }
  0x8f   : > { %1317 = vst [vmem:[%s5494_s30 + $0x7a0] sm:$0xff] %v1316_v52  ;;  %1319 = vst [vmem:[%s5494_s30 + $0x7a8] sm:$0xff] %v1318_v53  ;;  %v1320_v54 = vld [vmem:[%s5486_s29 + $0xf60] sm:$0xff]  ;;  %v1322_v55 = vld [vmem:[%s5486_s29 + $0xf70] sm:$0xff] }
  0x90   : > { %v1324_v56 = vld [vmem:[%s5486_s29 + $0xf80] sm:$0xff]  ;;  %1321 = vst [vmem:[%s5494_s30 + $0x7b0] sm:$0xff] %v1320_v54  ;;  %1323 = vst [vmem:[%s5494_s30 + $0x7b8] sm:$0xff] %v1322_v55  ;;  %v1326_v57 = vld [vmem:[%s5486_s29 + $0xf90] sm:$0xff] }
  0x91   : > { %1325 = vst [vmem:[%s5494_s30 + $0x7c0] sm:$0xff] %v1324_v56  ;;  %v1328_v58 = vld [vmem:[%s5486_s29 + $0xfa0] sm:$0xff]  ;;  %v1330_v59 = vld [vmem:[%s5486_s29 + $0xfb0] sm:$0xff]  ;;  %1327 = vst [vmem:[%s5494_s30 + $0x7c8] sm:$0xff] %v1326_v57 }
  0x92   : > { %1329 = vst [vmem:[%s5494_s30 + $0x7d0] sm:$0xff] %v1328_v58  ;;  %1331 = vst [vmem:[%s5494_s30 + $0x7d8] sm:$0xff] %v1330_v59  ;;  %v1332_v60 = vld [vmem:[%s5486_s29 + $0xfc0] sm:$0xff]  ;;  %v1334_v61 = vld [vmem:[%s5486_s29 + $0xfd0] sm:$0xff] }
  0x93   : > { %v1336_v62 = vld [vmem:[%s5486_s29 + $0xfe0] sm:$0xff]  ;;  %1333 = vst [vmem:[%s5494_s30 + $0x7e0] sm:$0xff] %v1332_v60  ;;  %1335 = vst [vmem:[%s5494_s30 + $0x7e8] sm:$0xff] %v1334_v61  ;;  %v1338_v63 = vld [vmem:[%s5486_s29 + $0xff0] sm:$0xff] }
  0x94   : > { %1337 = vst [vmem:[%s5494_s30 + $0x7f0] sm:$0xff] %v1336_v62  ;;  %v1340_v0 = vld [vmem:[%s5486_s29 + $0x1000] sm:$0xff]  ;;  %v1342_v1 = vld [vmem:[%s5486_s29 + $0x1010] sm:$0xff]  ;;  %1339 = vst [vmem:[%s5494_s30 + $0x7f8] sm:$0xff] %v1338_v63 }
  0x95   : > { %1341 = vst [vmem:[%s5494_s30 + $0x800] sm:$0xff] %v1340_v0  ;;  %1343 = vst [vmem:[%s5494_s30 + $0x808] sm:$0xff] %v1342_v1  ;;  %v1344_v2 = vld [vmem:[%s5486_s29 + $0x1020] sm:$0xff]  ;;  %v1346_v3 = vld [vmem:[%s5486_s29 + $0x1030] sm:$0xff] }
  0x96   : > { %v1348_v4 = vld [vmem:[%s5486_s29 + $0x1040] sm:$0xff]  ;;  %1345 = vst [vmem:[%s5494_s30 + $0x810] sm:$0xff] %v1344_v2  ;;  %1347 = vst [vmem:[%s5494_s30 + $0x818] sm:$0xff] %v1346_v3  ;;  %v1350_v5 = vld [vmem:[%s5486_s29 + $0x1050] sm:$0xff] }
  0x97   : > { %1349 = vst [vmem:[%s5494_s30 + $0x820] sm:$0xff] %v1348_v4  ;;  %v1352_v6 = vld [vmem:[%s5486_s29 + $0x1060] sm:$0xff]  ;;  %v1354_v7 = vld [vmem:[%s5486_s29 + $0x1070] sm:$0xff]  ;;  %1351 = vst [vmem:[%s5494_s30 + $0x828] sm:$0xff] %v1350_v5 }
  0x98   : > { %1353 = vst [vmem:[%s5494_s30 + $0x830] sm:$0xff] %v1352_v6  ;;  %1355 = vst [vmem:[%s5494_s30 + $0x838] sm:$0xff] %v1354_v7  ;;  %v1356_v8 = vld [vmem:[%s5486_s29 + $0x1080] sm:$0xff]  ;;  %v1358_v9 = vld [vmem:[%s5486_s29 + $0x1090] sm:$0xff] }
  0x99   : > { %v1360_v10 = vld [vmem:[%s5486_s29 + $0x10a0] sm:$0xff]  ;;  %1357 = vst [vmem:[%s5494_s30 + $0x840] sm:$0xff] %v1356_v8  ;;  %1359 = vst [vmem:[%s5494_s30 + $0x848] sm:$0xff] %v1358_v9  ;;  %v1362_v11 = vld [vmem:[%s5486_s29 + $0x10b0] sm:$0xff] }
  0x9a   : > { %1361 = vst [vmem:[%s5494_s30 + $0x850] sm:$0xff] %v1360_v10  ;;  %v1364_v12 = vld [vmem:[%s5486_s29 + $0x10c0] sm:$0xff]  ;;  %v1366_v13 = vld [vmem:[%s5486_s29 + $0x10d0] sm:$0xff]  ;;  %1363 = vst [vmem:[%s5494_s30 + $0x858] sm:$0xff] %v1362_v11 }
  0x9b   : > { %1365 = vst [vmem:[%s5494_s30 + $0x860] sm:$0xff] %v1364_v12  ;;  %1367 = vst [vmem:[%s5494_s30 + $0x868] sm:$0xff] %v1366_v13  ;;  %v1368_v14 = vld [vmem:[%s5486_s29 + $0x10e0] sm:$0xff]  ;;  %v1370_v15 = vld [vmem:[%s5486_s29 + $0x10f0] sm:$0xff] }
  0x9c   : > { %v1372_v16 = vld [vmem:[%s5486_s29 + $0x1100] sm:$0xff]  ;;  %1369 = vst [vmem:[%s5494_s30 + $0x870] sm:$0xff] %v1368_v14  ;;  %1371 = vst [vmem:[%s5494_s30 + $0x878] sm:$0xff] %v1370_v15  ;;  %v1374_v17 = vld [vmem:[%s5486_s29 + $0x1110] sm:$0xff] }
  0x9d   : > { %1373 = vst [vmem:[%s5494_s30 + $0x880] sm:$0xff] %v1372_v16  ;;  %v1376_v18 = vld [vmem:[%s5486_s29 + $0x1120] sm:$0xff]  ;;  %v1378_v19 = vld [vmem:[%s5486_s29 + $0x1130] sm:$0xff]  ;;  %1375 = vst [vmem:[%s5494_s30 + $0x888] sm:$0xff] %v1374_v17 }
  0x9e   : > { %1377 = vst [vmem:[%s5494_s30 + $0x890] sm:$0xff] %v1376_v18  ;;  %1379 = vst [vmem:[%s5494_s30 + $0x898] sm:$0xff] %v1378_v19  ;;  %v1380_v20 = vld [vmem:[%s5486_s29 + $0x1140] sm:$0xff]  ;;  %v1382_v21 = vld [vmem:[%s5486_s29 + $0x1150] sm:$0xff] }
  0x9f   : > { %v1384_v22 = vld [vmem:[%s5486_s29 + $0x1160] sm:$0xff]  ;;  %1381 = vst [vmem:[%s5494_s30 + $0x8a0] sm:$0xff] %v1380_v20  ;;  %1383 = vst [vmem:[%s5494_s30 + $0x8a8] sm:$0xff] %v1382_v21  ;;  %v1386_v23 = vld [vmem:[%s5486_s29 + $0x1170] sm:$0xff] }
  0xa0   : > { %1385 = vst [vmem:[%s5494_s30 + $0x8b0] sm:$0xff] %v1384_v22  ;;  %v1388_v24 = vld [vmem:[%s5486_s29 + $0x1180] sm:$0xff]  ;;  %v1390_v25 = vld [vmem:[%s5486_s29 + $0x1190] sm:$0xff]  ;;  %1387 = vst [vmem:[%s5494_s30 + $0x8b8] sm:$0xff] %v1386_v23 }
  0xa1   : > { %1389 = vst [vmem:[%s5494_s30 + $0x8c0] sm:$0xff] %v1388_v24  ;;  %1391 = vst [vmem:[%s5494_s30 + $0x8c8] sm:$0xff] %v1390_v25  ;;  %v1392_v26 = vld [vmem:[%s5486_s29 + $0x11a0] sm:$0xff]  ;;  %v1394_v27 = vld [vmem:[%s5486_s29 + $0x11b0] sm:$0xff] }
  0xa2   : > { %v1396_v28 = vld [vmem:[%s5486_s29 + $0x11c0] sm:$0xff]  ;;  %1393 = vst [vmem:[%s5494_s30 + $0x8d0] sm:$0xff] %v1392_v26  ;;  %1395 = vst [vmem:[%s5494_s30 + $0x8d8] sm:$0xff] %v1394_v27  ;;  %v1398_v29 = vld [vmem:[%s5486_s29 + $0x11d0] sm:$0xff] }
  0xa3   : > { %1397 = vst [vmem:[%s5494_s30 + $0x8e0] sm:$0xff] %v1396_v28  ;;  %v1400_v30 = vld [vmem:[%s5486_s29 + $0x11e0] sm:$0xff]  ;;  %v1402_v31 = vld [vmem:[%s5486_s29 + $0x11f0] sm:$0xff]  ;;  %1399 = vst [vmem:[%s5494_s30 + $0x8e8] sm:$0xff] %v1398_v29 }
  0xa4   : > { %1401 = vst [vmem:[%s5494_s30 + $0x8f0] sm:$0xff] %v1400_v30  ;;  %1403 = vst [vmem:[%s5494_s30 + $0x8f8] sm:$0xff] %v1402_v31  ;;  %v1404_v32 = vld [vmem:[%s5486_s29 + $0x1200] sm:$0xff]  ;;  %v1406_v33 = vld [vmem:[%s5486_s29 + $0x1210] sm:$0xff] }
  0xa5   : > { %v1408_v34 = vld [vmem:[%s5486_s29 + $0x1220] sm:$0xff]  ;;  %1405 = vst [vmem:[%s5494_s30 + $0x900] sm:$0xff] %v1404_v32  ;;  %1407 = vst [vmem:[%s5494_s30 + $0x908] sm:$0xff] %v1406_v33  ;;  %v1410_v35 = vld [vmem:[%s5486_s29 + $0x1230] sm:$0xff] }
  0xa6   : > { %1409 = vst [vmem:[%s5494_s30 + $0x910] sm:$0xff] %v1408_v34  ;;  %v1412_v36 = vld [vmem:[%s5486_s29 + $0x1240] sm:$0xff]  ;;  %v1414_v37 = vld [vmem:[%s5486_s29 + $0x1250] sm:$0xff]  ;;  %1411 = vst [vmem:[%s5494_s30 + $0x918] sm:$0xff] %v1410_v35 }
  0xa7   : > { %1413 = vst [vmem:[%s5494_s30 + $0x920] sm:$0xff] %v1412_v36  ;;  %1415 = vst [vmem:[%s5494_s30 + $0x928] sm:$0xff] %v1414_v37  ;;  %v1416_v38 = vld [vmem:[%s5486_s29 + $0x1260] sm:$0xff]  ;;  %v1418_v39 = vld [vmem:[%s5486_s29 + $0x1270] sm:$0xff] }
  0xa8   : > { %v1420_v40 = vld [vmem:[%s5486_s29 + $0x1280] sm:$0xff]  ;;  %1417 = vst [vmem:[%s5494_s30 + $0x930] sm:$0xff] %v1416_v38  ;;  %1419 = vst [vmem:[%s5494_s30 + $0x938] sm:$0xff] %v1418_v39  ;;  %v1422_v41 = vld [vmem:[%s5486_s29 + $0x1290] sm:$0xff] }
  0xa9   : > { %1421 = vst [vmem:[%s5494_s30 + $0x940] sm:$0xff] %v1420_v40  ;;  %v1424_v42 = vld [vmem:[%s5486_s29 + $0x12a0] sm:$0xff]  ;;  %v1426_v43 = vld [vmem:[%s5486_s29 + $0x12b0] sm:$0xff]  ;;  %1423 = vst [vmem:[%s5494_s30 + $0x948] sm:$0xff] %v1422_v41 }
  0xaa   : > { %1425 = vst [vmem:[%s5494_s30 + $0x950] sm:$0xff] %v1424_v42  ;;  %1427 = vst [vmem:[%s5494_s30 + $0x958] sm:$0xff] %v1426_v43  ;;  %v1428_v44 = vld [vmem:[%s5486_s29 + $0x12c0] sm:$0xff]  ;;  %v1430_v45 = vld [vmem:[%s5486_s29 + $0x12d0] sm:$0xff] }
  0xab   : > { %v1432_v46 = vld [vmem:[%s5486_s29 + $0x12e0] sm:$0xff]  ;;  %1429 = vst [vmem:[%s5494_s30 + $0x960] sm:$0xff] %v1428_v44  ;;  %1431 = vst [vmem:[%s5494_s30 + $0x968] sm:$0xff] %v1430_v45  ;;  %v1434_v47 = vld [vmem:[%s5486_s29 + $0x12f0] sm:$0xff] }
  0xac   : > { %1433 = vst [vmem:[%s5494_s30 + $0x970] sm:$0xff] %v1432_v46  ;;  %v1436_v48 = vld [vmem:[%s5486_s29 + $0x1300] sm:$0xff]  ;;  %v1438_v49 = vld [vmem:[%s5486_s29 + $0x1310] sm:$0xff]  ;;  %1435 = vst [vmem:[%s5494_s30 + $0x978] sm:$0xff] %v1434_v47 }
  0xad   : > { %1437 = vst [vmem:[%s5494_s30 + $0x980] sm:$0xff] %v1436_v48  ;;  %1439 = vst [vmem:[%s5494_s30 + $0x988] sm:$0xff] %v1438_v49  ;;  %v1440_v50 = vld [vmem:[%s5486_s29 + $0x1320] sm:$0xff]  ;;  %v1442_v51 = vld [vmem:[%s5486_s29 + $0x1330] sm:$0xff] }
  0xae   : > { %v1444_v52 = vld [vmem:[%s5486_s29 + $0x1340] sm:$0xff]  ;;  %1441 = vst [vmem:[%s5494_s30 + $0x990] sm:$0xff] %v1440_v50  ;;  %1443 = vst [vmem:[%s5494_s30 + $0x998] sm:$0xff] %v1442_v51  ;;  %v1446_v53 = vld [vmem:[%s5486_s29 + $0x1350] sm:$0xff] }
  0xaf   : > { %1445 = vst [vmem:[%s5494_s30 + $0x9a0] sm:$0xff] %v1444_v52  ;;  %v1448_v54 = vld [vmem:[%s5486_s29 + $0x1360] sm:$0xff]  ;;  %v1450_v55 = vld [vmem:[%s5486_s29 + $0x1370] sm:$0xff]  ;;  %1447 = vst [vmem:[%s5494_s30 + $0x9a8] sm:$0xff] %v1446_v53 }
  0xb0   : > { %1449 = vst [vmem:[%s5494_s30 + $0x9b0] sm:$0xff] %v1448_v54  ;;  %1451 = vst [vmem:[%s5494_s30 + $0x9b8] sm:$0xff] %v1450_v55  ;;  %v1452_v56 = vld [vmem:[%s5486_s29 + $0x1380] sm:$0xff]  ;;  %v1454_v57 = vld [vmem:[%s5486_s29 + $0x1390] sm:$0xff] }
  0xb1   : > { %v1456_v58 = vld [vmem:[%s5486_s29 + $0x13a0] sm:$0xff]  ;;  %1453 = vst [vmem:[%s5494_s30 + $0x9c0] sm:$0xff] %v1452_v56  ;;  %1455 = vst [vmem:[%s5494_s30 + $0x9c8] sm:$0xff] %v1454_v57  ;;  %v1458_v59 = vld [vmem:[%s5486_s29 + $0x13b0] sm:$0xff] }
  0xb2   : > { %1457 = vst [vmem:[%s5494_s30 + $0x9d0] sm:$0xff] %v1456_v58  ;;  %v1460_v60 = vld [vmem:[%s5486_s29 + $0x13c0] sm:$0xff]  ;;  %v1462_v61 = vld [vmem:[%s5486_s29 + $0x13d0] sm:$0xff]  ;;  %1459 = vst [vmem:[%s5494_s30 + $0x9d8] sm:$0xff] %v1458_v59 }
  0xb3   : > { %1461 = vst [vmem:[%s5494_s30 + $0x9e0] sm:$0xff] %v1460_v60  ;;  %1463 = vst [vmem:[%s5494_s30 + $0x9e8] sm:$0xff] %v1462_v61  ;;  %v1464_v62 = vld [vmem:[%s5486_s29 + $0x13e0] sm:$0xff]  ;;  %v1466_v63 = vld [vmem:[%s5486_s29 + $0x13f0] sm:$0xff] }
  0xb4   : > { %1465 = vst [vmem:[%s5494_s30 + $0x9f0] sm:$0xff] %v1464_v62  ;;  %1467 = vst [vmem:[%s5494_s30 + $0x9f8] sm:$0xff] %v1466_v63 }
  0xb5 PF: > { %p4378_p7 = scmp.ge.s32.totalorder %s5418_s17, 1  ;;  %p1472_p8 = scmp.lt.s32.totalorder %s5418_s17, 3 }
  0xb7   : > { %p1473_p9 = pnand %p4378_p7, %p1472_p8 }
  0xb8   : > { %s1479_s5 = sand.u32 (!%p1473_p9), 1, %s5410_s15   ;;  %v4954_v0 = vld [vmem:[%s6638_s0 + $0x4] ss:$80 sps:$4 sm:$0xff] (!%p1473_p9)   ;;  %v4960_v1 = vld [vmem:[%s6638_s0 + $0x2c] ss:$80 sps:$4 sm:$0xff] (!%p1473_p9)  }
  0xb9   : > { %1476 = sbr.rel (%p1473_p9) target bundleno = 749 (0x2ed), region = 70  ;;  %3721 = vmatprep.mubr.bf16.mxu1 (!%p1473_p9), %v4954_v0  ;;  %3986 = vmatprep.mubr.bf16.mxu0 (!%p1473_p9), %v4960_v1  ;;  %s4379_s25 = sshll.u32 (!%p1473_p9), %s1479_s5, 6 }
  0xba   : > { %s4828_s6 = smul.u32 (!%p1473_p9), 2560, %s1479_s5  ;;  %s6603_s15 = scalar_lea.vmem (!%p1473_p9), [#allocation3], %s4379_s25 }
  0xbc   : > { %s6141_s11 = scalar_lea.vmem (!%p1473_p9), [#allocation2], %s4828_s6 }
  0xbd   : > { %v4856_v2 = vld [vmem:[%s6141_s11 + $0x4] ss:$8 sps:$4 sm:$0xff] (!%p1473_p9)   ;;  %v4860_v4 = vld [vmem:[%s6141_s11] ss:$8 sps:$4 sm:$0xff] (!%p1473_p9)   ;;  %v4862_v6 = vld [vmem:[%s6141_s11 + $0x14] ss:$8 sps:$4 sm:$0xff] (!%p1473_p9)  }
  0xbe   : > { %v4858_v3 = vld [vmem:[%s6141_s11 + $0x504] ss:$8 sps:$4 sm:$0xff] (!%p1473_p9)   ;;  %3689 = vmatprep.subr.bf16.mxu1 (!%p1473_p9), %v4856_v2  ;;  %v4861_v5 = vld [vmem:[%s6141_s11 + $0x500] ss:$8 sps:$4 sm:$0xff] (!%p1473_p9)   ;;  %v4864_v7 = vld [vmem:[%s6141_s11 + $0x514] ss:$8 sps:$4 sm:$0xff] (!%p1473_p9)  }
  0xbf   : > { %3954 = vmatprep.subr.bf16.mxu0 (!%p1473_p9), %v4858_v3  ;;  %3690 = vmatpush1.bf16.msra.mxu1 (!%p1473_p9), %v4860_v4  ;;  %v4866_v8 = vld [vmem:[%s6141_s11 + $0x10] ss:$8 sps:$4 sm:$0xff] (!%p1473_p9)   ;;  %v4868_v10 = vld [vmem:[%s6141_s11 + $0x24] ss:$8 sps:$4 sm:$0xff] (!%p1473_p9)   ;;  %v4872_v12 = vld [vmem:[%s6141_s11 + $0x20] ss:$8 sps:$4 sm:$0xff] (!%p1473_p9)  }
  0xc0   : > { %3955 = vmatpush1.bf16.msra.mxu0 %v4861_v5  ;;  %3691 = vmatprep.subr.bf16.mxu1 %v4862_v6  ;;  %v4867_v9 = vld [vmem:[%s6141_s11 + $0x510] ss:$8 sps:$4 sm:$0xff]   ;;  %v4870_v11 = vld [vmem:[%s6141_s11 + $0x524] ss:$8 sps:$4 sm:$0xff]   ;;  %v4873_v13 = vld [vmem:[%s6141_s11 + $0x520] ss:$8 sps:$4 sm:$0xff]  }
  0xc1   : > { %3956 = vmatprep.subr.bf16.mxu0 %v4864_v7  ;;  %v4874_v14 = vld [vmem:[%s6141_s11 + $0x34] ss:$8 sps:$4 sm:$0xff]   ;;  %v4878_v16 = vld [vmem:[%s6141_s11 + $0x30] ss:$8 sps:$4 sm:$0xff]   ;;  %v4880_v18 = vld [vmem:[%s6141_s11 + $0x44] ss:$8 sps:$4 sm:$0xff]  }
  0xc2   : > { %v4876_v15 = vld [vmem:[%s6141_s11 + $0x534] ss:$8 sps:$4 sm:$0xff]   ;;  %v4879_v17 = vld [vmem:[%s6141_s11 + $0x530] ss:$8 sps:$4 sm:$0xff]   ;;  %v4882_v19 = vld [vmem:[%s6141_s11 + $0x544] ss:$8 sps:$4 sm:$0xff]  }
  0xc3   : > { %3692 = vmatpush1.bf16.msra.mxu1 %v4866_v8  ;;  %v4884_v20 = vld [vmem:[%s6141_s11 + $0x40] ss:$8 sps:$4 sm:$0xff]   ;;  %v4886_v22 = vld [vmem:[%s6141_s11 + $0x54] ss:$8 sps:$4 sm:$0xff]   ;;  %v4890_v24 = vld [vmem:[%s6141_s11 + $0x50] ss:$8 sps:$4 sm:$0xff]  }
  0xc4   : > { %3957 = vmatpush1.bf16.msra.mxu0 %v4867_v9  ;;  %3693 = vmatprep.subr.bf16.mxu1 %v4868_v10  ;;  %v4885_v21 = vld [vmem:[%s6141_s11 + $0x540] ss:$8 sps:$4 sm:$0xff]   ;;  %v4888_v23 = vld [vmem:[%s6141_s11 + $0x554] ss:$8 sps:$4 sm:$0xff]   ;;  %v4891_v25 = vld [vmem:[%s6141_s11 + $0x550] ss:$8 sps:$4 sm:$0xff]  }
  0xc5   : > { %3958 = vmatprep.subr.bf16.mxu0 %v4870_v11  ;;  %v4892_v26 = vld [vmem:[%s6141_s11 + $0x64] ss:$8 sps:$4 sm:$0xff]   ;;  %v4896_v28 = vld [vmem:[%s6141_s11 + $0x60] ss:$8 sps:$4 sm:$0xff]   ;;  %v4898_v30 = vld [vmem:[%s6141_s11 + $0x74] ss:$8 sps:$4 sm:$0xff]  }
  0xc6   : > { %v4894_v27 = vld [vmem:[%s6141_s11 + $0x564] ss:$8 sps:$4 sm:$0xff]   ;;  %v4897_v29 = vld [vmem:[%s6141_s11 + $0x560] ss:$8 sps:$4 sm:$0xff]   ;;  %v4900_v31 = vld [vmem:[%s6141_s11 + $0x574] ss:$8 sps:$4 sm:$0xff]  }
  0xc7   : > { %3694 = vmatpush1.bf16.msra.mxu1 %v4872_v12  ;;  %v4902_v32 = vld [vmem:[%s6141_s11 + $0x70] ss:$8 sps:$4 sm:$0xff]   ;;  %v4904_v34 = vld [vmem:[%s6141_s11 + $0x84] ss:$8 sps:$4 sm:$0xff]   ;;  %v4908_v36 = vld [vmem:[%s6141_s11 + $0x80] ss:$8 sps:$4 sm:$0xff]  }
  0xc8   : > { %3959 = vmatpush1.bf16.msra.mxu0 %v4873_v13  ;;  %3695 = vmatprep.subr.bf16.mxu1 %v4874_v14  ;;  %v4903_v33 = vld [vmem:[%s6141_s11 + $0x570] ss:$8 sps:$4 sm:$0xff]   ;;  %v4906_v35 = vld [vmem:[%s6141_s11 + $0x584] ss:$8 sps:$4 sm:$0xff]   ;;  %v4909_v37 = vld [vmem:[%s6141_s11 + $0x580] ss:$8 sps:$4 sm:$0xff]  }
  0xc9   : > { %3960 = vmatprep.subr.bf16.mxu0 %v4876_v15  ;;  %v4910_v38 = vld [vmem:[%s6141_s11 + $0x94] ss:$8 sps:$4 sm:$0xff]   ;;  %v4914_v40 = vld [vmem:[%s6141_s11 + $0x90] ss:$8 sps:$4 sm:$0xff]   ;;  %v4916_v42 = vld [vmem:[%s6141_s11 + $0xa4] ss:$8 sps:$4 sm:$0xff]  }
  0xca   : > { %v4912_v39 = vld [vmem:[%s6141_s11 + $0x594] ss:$8 sps:$4 sm:$0xff]   ;;  %v4915_v41 = vld [vmem:[%s6141_s11 + $0x590] ss:$8 sps:$4 sm:$0xff]   ;;  %v4918_v43 = vld [vmem:[%s6141_s11 + $0x5a4] ss:$8 sps:$4 sm:$0xff]  }
  0xcb   : > { %3696 = vmatpush1.bf16.msra.mxu1 %v4878_v16  ;;  %v4920_v44 = vld [vmem:[%s6141_s11 + $0xa0] ss:$8 sps:$4 sm:$0xff]   ;;  %v4922_v46 = vld [vmem:[%s6141_s11 + $0xb4] ss:$8 sps:$4 sm:$0xff]   ;;  %v4926_v48 = vld [vmem:[%s6141_s11 + $0xb0] ss:$8 sps:$4 sm:$0xff]  }
  0xcc   : > { %3961 = vmatpush1.bf16.msra.mxu0 %v4879_v17  ;;  %3697 = vmatprep.subr.bf16.mxu1 %v4880_v18  ;;  %v4921_v45 = vld [vmem:[%s6141_s11 + $0x5a0] ss:$8 sps:$4 sm:$0xff]   ;;  %v4924_v47 = vld [vmem:[%s6141_s11 + $0x5b4] ss:$8 sps:$4 sm:$0xff]   ;;  %v4927_v49 = vld [vmem:[%s6141_s11 + $0x5b0] ss:$8 sps:$4 sm:$0xff]  }
  0xcd   : > { %3962 = vmatprep.subr.bf16.mxu0 %v4882_v19  ;;  %v4928_v50 = vld [vmem:[%s6141_s11 + $0xc4] ss:$8 sps:$4 sm:$0xff]   ;;  %v4932_v52 = vld [vmem:[%s6141_s11 + $0xc0] ss:$8 sps:$4 sm:$0xff]   ;;  %v4934_v54 = vld [vmem:[%s6141_s11 + $0xd4] ss:$8 sps:$4 sm:$0xff]  }
  0xce   : > { %v4930_v51 = vld [vmem:[%s6141_s11 + $0x5c4] ss:$8 sps:$4 sm:$0xff]   ;;  %v4933_v53 = vld [vmem:[%s6141_s11 + $0x5c0] ss:$8 sps:$4 sm:$0xff]   ;;  %v4936_v55 = vld [vmem:[%s6141_s11 + $0x5d4] ss:$8 sps:$4 sm:$0xff]  }
  0xcf   : > { %3698 = vmatpush1.bf16.msra.mxu1 %v4884_v20  ;;  %v4938_v56 = vld [vmem:[%s6141_s11 + $0xd0] ss:$8 sps:$4 sm:$0xff]   ;;  %v4940_v58 = vld [vmem:[%s6141_s11 + $0xe4] ss:$8 sps:$4 sm:$0xff]   ;;  %v4944_v60 = vld [vmem:[%s6141_s11 + $0xe0] ss:$8 sps:$4 sm:$0xff]  }
  0xd0   : > { %3963 = vmatpush1.bf16.msra.mxu0 %v4885_v21  ;;  %3699 = vmatprep.subr.bf16.mxu1 %v4886_v22  ;;  %v4939_v57 = vld [vmem:[%s6141_s11 + $0x5d0] ss:$8 sps:$4 sm:$0xff]   ;;  %v4942_v59 = vld [vmem:[%s6141_s11 + $0x5e4] ss:$8 sps:$4 sm:$0xff]   ;;  %v4945_v61 = vld [vmem:[%s6141_s11 + $0x5e0] ss:$8 sps:$4 sm:$0xff]  }
  0xd1   : > { %3964 = vmatprep.subr.bf16.mxu0 %v4888_v23  ;;  %v4946_v62 = vld [vmem:[%s6141_s11 + $0xf4] ss:$8 sps:$4 sm:$0xff]   ;;  %v4950_v0 = vld [vmem:[%s6141_s11 + $0xf0] ss:$8 sps:$4 sm:$0xff]   ;;  %v4957_v2 = vld [vmem:[%s6141_s11 + $0x104] ss:$8 sps:$4 sm:$0xff]  }
  0xd2   : > { %v4948_v63 = vld [vmem:[%s6141_s11 + $0x5f4] ss:$8 sps:$4 sm:$0xff]   ;;  %v4951_v1 = vld [vmem:[%s6141_s11 + $0x5f0] ss:$8 sps:$4 sm:$0xff]   ;;  %v4963_v3 = vld [vmem:[%s6141_s11 + $0x604] ss:$8 sps:$4 sm:$0xff]  }
  0xd3   : > { %3700 = vmatpush1.bf16.msra.mxu1 %v4890_v24  ;;  %v4952_v4 = vld [vmem:[%s6638_s0] ss:$80 sps:$4 sm:$0xff]   ;;  %v4958_v5 = vld [vmem:[%s6638_s0 + $0x28] ss:$80 sps:$4 sm:$0xff]   ;;  %v4966_v8 = vld [vmem:[%s6141_s11 + $0x114] ss:$8 sps:$4 sm:$0xff]  }
  0xd4   : > { %3965 = vmatpush1.bf16.msra.mxu0 %v4891_v25  ;;  %3701 = vmatprep.subr.bf16.mxu1 %v4892_v26  ;;  %v4955_v6 = vld [vmem:[%s6141_s11 + $0x100] ss:$8 sps:$4 sm:$0xff]   ;;  %v4969_v9 = vld [vmem:[%s6141_s11 + $0x614] ss:$8 sps:$4 sm:$0xff]   ;;  %v4964_v11 = vld [vmem:[%s6141_s11 + $0x110] ss:$8 sps:$4 sm:$0xff]  }
  0xd5   : > { %3966 = vmatprep.subr.bf16.mxu0 %v4894_v27  ;;  %v4961_v7 = vld [vmem:[%s6141_s11 + $0x600] ss:$8 sps:$4 sm:$0xff]   ;;  %v5042_v10 = vld [vmem:[%s6638_s0 + $0xa4] ss:$80 sps:$4 sm:$0xff]   ;;  %v4967_v12 = vld [vmem:[%s6141_s11 + $0x610] ss:$8 sps:$4 sm:$0xff]  }
  0xd6   : > { %v4972_v13 = vld [vmem:[%s6141_s11 + $0x124] ss:$8 sps:$4 sm:$0xff]   ;;  %v4970_v15 = vld [vmem:[%s6141_s11 + $0x120] ss:$8 sps:$4 sm:$0xff]   ;;  %v4978_v17 = vld [vmem:[%s6141_s11 + $0x134] ss:$8 sps:$4 sm:$0xff]  }
  0xd7   : > { %3702 = vmatpush1.bf16.msra.mxu1 %v4896_v28  ;;  %v4975_v14 = vld [vmem:[%s6141_s11 + $0x624] ss:$8 sps:$4 sm:$0xff]   ;;  %v4973_v16 = vld [vmem:[%s6141_s11 + $0x620] ss:$8 sps:$4 sm:$0xff]   ;;  %v4981_v18 = vld [vmem:[%s6141_s11 + $0x634] ss:$8 sps:$4 sm:$0xff]  }
  0xd8   : > { %3967 = vmatpush1.bf16.msra.mxu0 %v4897_v29  ;;  %3703 = vmatprep.subr.bf16.mxu1 %v4898_v30  ;;  %v4976_v19 = vld [vmem:[%s6141_s11 + $0x130] ss:$8 sps:$4 sm:$0xff]   ;;  %v4984_v21 = vld [vmem:[%s6141_s11 + $0x144] ss:$8 sps:$4 sm:$0xff]   ;;  %v4982_v23 = vld [vmem:[%s6141_s11 + $0x140] ss:$8 sps:$4 sm:$0xff]  }
  0xd9   : > { %3968 = vmatprep.subr.bf16.mxu0 %v4900_v31  ;;  %v4979_v20 = vld [vmem:[%s6141_s11 + $0x630] ss:$8 sps:$4 sm:$0xff]   ;;  %v4987_v22 = vld [vmem:[%s6141_s11 + $0x644] ss:$8 sps:$4 sm:$0xff]   ;;  %v4985_v24 = vld [vmem:[%s6141_s11 + $0x640] ss:$8 sps:$4 sm:$0xff]  }
  0xda   : > { %v4990_v25 = vld [vmem:[%s6141_s11 + $0x154] ss:$8 sps:$4 sm:$0xff]   ;;  %v4988_v28 = vld [vmem:[%s6141_s11 + $0x150] ss:$8 sps:$4 sm:$0xff]   ;;  %s4746_s5 = sshll.u32 (%p5476_p5), %s4372_s18, 4 }
  0xdb   : > { %3704 = vmatpush1.bf16.msra.mxu1 %v4902_v32  ;;  %v4993_v26 = vld [vmem:[%s6141_s11 + $0x654] ss:$8 sps:$4 sm:$0xff]   ;;  %v4991_v29 = vld [vmem:[%s6141_s11 + $0x650] ss:$8 sps:$4 sm:$0xff]   ;;  %v4996_v32 = vld [vmem:[%s6141_s11 + $0x164] ss:$8 sps:$4 sm:$0xff]   ;;  %s4284_s28 = scalar_lea.vmem (%p5476_p5), %s6642_s4, %s4746_s5 }
  0xdc   : > { %3969 = vmatpush1.bf16.msra.mxu0 %v4903_v33  ;;  %3705 = vmatprep.subr.bf16.mxu1 %v4904_v34  ;;  %v5047_v27 = vld [vmem:[%s6638_s0 + $0xcc] ss:$80 sps:$4 sm:$0xff]   ;;  %v5052_v30 = vld [vmem:[%s6638_s0 + $0xa0] ss:$80 sps:$4 sm:$0xff]   ;;  %v5053_v31 = vld [vmem:[%s6638_s0 + $0xc8] ss:$80 sps:$4 sm:$0xff]  }
  0xdd   : > { %3970 = vmatprep.subr.bf16.mxu0 %v4906_v35  ;;  %v4999_v33 = vld [vmem:[%s6141_s11 + $0x664] ss:$8 sps:$4 sm:$0xff]   ;;  %v4994_v34 = vld [vmem:[%s6141_s11 + $0x160] ss:$8 sps:$4 sm:$0xff]  }
  0xde   : > { %v4997_v35 = vld [vmem:[%s6141_s11 + $0x660] ss:$8 sps:$4 sm:$0xff]  }
  0xdf   : > { %3706 = vmatpush1.bf16.msra.mxu1 %v4908_v36  ;;  %v5062_v36 = vld [vmem:[%s6638_s0 + $0xc] ss:$80 sps:$4 sm:$0xff]  }
  0xe0   : > { %3971 = vmatpush1.bf16.msra.mxu0 %v4909_v37  ;;  %3707 = vmatprep.subr.bf16.mxu1 %v4910_v38  ;;  %v5002_v37 = vld [vmem:[%s6141_s11 + $0x174] ss:$8 sps:$4 sm:$0xff]  }
  0xe1   : > { %3972 = vmatprep.subr.bf16.mxu0 %v4912_v39  ;;  %v5005_v38 = vld [vmem:[%s6141_s11 + $0x674] ss:$8 sps:$4 sm:$0xff]  }
  0xe2   : > { %v5068_v39 = vld [vmem:[%s6638_s0 + $0x34] ss:$80 sps:$4 sm:$0xff]  }
  0xe3   : > { %3708 = vmatpush1.bf16.msra.mxu1 %v4914_v40  ;;  %v5000_v40 = vld [vmem:[%s6141_s11 + $0x170] ss:$8 sps:$4 sm:$0xff]  }
  0xe4   : > { %3973 = vmatpush1.bf16.msra.mxu0 %v4915_v41  ;;  %3709 = vmatprep.subr.bf16.mxu1 %v4916_v42  ;;  %v5003_v41 = vld [vmem:[%s6141_s11 + $0x670] ss:$8 sps:$4 sm:$0xff]   ;;  %v5008_v42 = vld [vmem:[%s6141_s11 + $0x184] ss:$8 sps:$4 sm:$0xff]  }
  0xe5   : > { %3974 = vmatprep.subr.bf16.mxu0 %v4918_v43  ;;  %v5011_v43 = vld [vmem:[%s6141_s11 + $0x684] ss:$8 sps:$4 sm:$0xff]  }
  0xe7   : > { %3710 = vmatpush1.bf16.msra.mxu1 %v4920_v44  ;;  %v5006_v44 = vld [vmem:[%s6141_s11 + $0x180] ss:$8 sps:$4 sm:$0xff]  }
  0xe8   : > { %3975 = vmatpush1.bf16.msra.mxu0 %v4921_v45  ;;  %3711 = vmatprep.subr.bf16.mxu1 %v4922_v46  ;;  %v5009_v45 = vld [vmem:[%s6141_s11 + $0x680] ss:$8 sps:$4 sm:$0xff]   ;;  %v5014_v46 = vld [vmem:[%s6141_s11 + $0x194] ss:$8 sps:$4 sm:$0xff]  }
  0xe9   : > { %3976 = vmatprep.subr.bf16.mxu0 %v4924_v47  ;;  %v5017_v47 = vld [vmem:[%s6141_s11 + $0x694] ss:$8 sps:$4 sm:$0xff]  }
  0xeb   : > { %3712 = vmatpush1.bf16.msra.mxu1 %v4926_v48  ;;  %v5012_v48 = vld [vmem:[%s6141_s11 + $0x190] ss:$8 sps:$4 sm:$0xff]  }
  0xec   : > { %3977 = vmatpush1.bf16.msra.mxu0 %v4927_v49  ;;  %3713 = vmatprep.subr.bf16.mxu1 %v4928_v50  ;;  %v5015_v49 = vld [vmem:[%s6141_s11 + $0x690] ss:$8 sps:$4 sm:$0xff]   ;;  %v5020_v50 = vld [vmem:[%s6141_s11 + $0x1a4] ss:$8 sps:$4 sm:$0xff]  }
  0xed   : > { %3978 = vmatprep.subr.bf16.mxu0 %v4930_v51  ;;  %v5023_v51 = vld [vmem:[%s6141_s11 + $0x6a4] ss:$8 sps:$4 sm:$0xff]  }
  0xef   : > { %3714 = vmatpush1.bf16.msra.mxu1 %v4932_v52  ;;  %v5018_v52 = vld [vmem:[%s6141_s11 + $0x1a0] ss:$8 sps:$4 sm:$0xff]  }
  0xf0   : > { %3979 = vmatpush1.bf16.msra.mxu0 %v4933_v53  ;;  %3715 = vmatprep.subr.bf16.mxu1 %v4934_v54  ;;  %v5021_v53 = vld [vmem:[%s6141_s11 + $0x6a0] ss:$8 sps:$4 sm:$0xff]   ;;  %v5026_v54 = vld [vmem:[%s6141_s11 + $0x1b4] ss:$8 sps:$4 sm:$0xff]  }
  0xf1   : > { %3980 = vmatprep.subr.bf16.mxu0 %v4936_v55  ;;  %v5029_v55 = vld [vmem:[%s6141_s11 + $0x6b4] ss:$8 sps:$4 sm:$0xff]  }
  0xf3   : > { %3716 = vmatpush1.bf16.msra.mxu1 %v4938_v56  ;;  %v5024_v56 = vld [vmem:[%s6141_s11 + $0x1b0] ss:$8 sps:$4 sm:$0xff]  }
  0xf4   : > { %3981 = vmatpush1.bf16.msra.mxu0 %v4939_v57  ;;  %3717 = vmatprep.subr.bf16.mxu1 %v4940_v58  ;;  %v5027_v57 = vld [vmem:[%s6141_s11 + $0x6b0] ss:$8 sps:$4 sm:$0xff]   ;;  %v5032_v58 = vld [vmem:[%s6141_s11 + $0x1c4] ss:$8 sps:$4 sm:$0xff]  }
  0xf5   : > { %3982 = vmatprep.subr.bf16.mxu0 %v4942_v59  ;;  %v5035_v59 = vld [vmem:[%s6141_s11 + $0x6c4] ss:$8 sps:$4 sm:$0xff]  }
  0xf7   : > { %3718 = vmatpush1.bf16.msra.mxu1 %v4944_v60  ;;  %v5030_v60 = vld [vmem:[%s6141_s11 + $0x1c0] ss:$8 sps:$4 sm:$0xff]  }
  0xf8   : > { %3983 = vmatpush1.bf16.msra.mxu0 %v4945_v61  ;;  %3719 = vmatprep.subr.bf16.mxu1 %v4946_v62  ;;  %v5033_v61 = vld [vmem:[%s6141_s11 + $0x6c0] ss:$8 sps:$4 sm:$0xff]   ;;  %v5038_v62 = vld [vmem:[%s6141_s11 + $0x1d4] ss:$8 sps:$4 sm:$0xff]  }
  0xf9   : > { %3984 = vmatprep.subr.bf16.mxu0 %v4948_v63  ;;  %v5041_v63 = vld [vmem:[%s6141_s11 + $0x6d4] ss:$8 sps:$4 sm:$0xff]  }
  0xfb   : > { %3720 = vmatpush1.bf16.msra.mxu1 %v4950_v0  ;;  %v5036_v0 = vld [vmem:[%s6141_s11 + $0x1d0] ss:$8 sps:$4 sm:$0xff]  }
  0xfc   : > { %3985 = vmatpush1.bf16.msra.mxu0 %v4951_v1  ;;  %3742 = vmatprep.subr.bf16.mxu1 %v4957_v2  ;;  %v5039_v1 = vld [vmem:[%s6141_s11 + $0x6d0] ss:$8 sps:$4 sm:$0xff]   ;;  %v5046_v2 = vld [vmem:[%s6141_s11 + $0x1e4] ss:$8 sps:$4 sm:$0xff]  }
  0xfd   : > { %4007 = vmatprep.subr.bf16.mxu0 %v4963_v3  ;;  %v5051_v3 = vld [vmem:[%s6141_s11 + $0x6e4] ss:$8 sps:$4 sm:$0xff]  }
  0xfe   : > { %3722 = vmatmul.mubr.bf16.vlgmr.msra.gmra.mrb[0].mxu1 %v4952_v4  ;;  %v5044_v4 = vld [vmem:[%s6141_s11 + $0x1e0] ss:$8 sps:$4 sm:$0xff]  }
  0xff   : > { %3987 = vmatmul.mubr.bf16.vlgmr.msra.gmra.mrb[0].mxu0 %v4958_v5  ;;  %3743 = vmatpush1.bf16.msra.mxu1 %v4955_v6  ;;  %v5049_v5 = vld [vmem:[%s6141_s11 + $0x6e0] ss:$8 sps:$4 sm:$0xff]   ;;  %v5056_v6 = vld [vmem:[%s6141_s11 + $0x1f4] ss:$8 sps:$4 sm:$0xff]  }
 0x100   : > { %4008 = vmatpush1.bf16.msra.mxu0 %v4961_v7  ;;  %3744 = vmatprep.subr.bf16.mxu1 %v4966_v8  ;;  %v5059_v7 = vld [vmem:[%s6141_s11 + $0x6f4] ss:$8 sps:$4 sm:$0xff]   ;;  %v5054_v8 = vld [vmem:[%s6141_s11 + $0x1f0] ss:$8 sps:$4 sm:$0xff]  }
 0x101   : > { %4009 = vmatprep.subr.bf16.mxu0 %v4969_v9  ;;  %3731 = vmatprep.mubr.bf16.mxu1 %v5042_v10  ;;  %v5057_v9 = vld [vmem:[%s6141_s11 + $0x6f0] ss:$8 sps:$4 sm:$0xff]   ;;  %v5065_v10 = vld [vmem:[%s6141_s11 + $0x204] ss:$8 sps:$4 sm:$0xff]  }
 0x102   : > { %3996 = vmatprep.mubr.bf16.mxu0 %v5047_v27  ;;  %v5161_v27 = vld [vmem:[%s6638_s0 + $0xd0] ss:$80 sps:$4 sm:$0xff]  }
 0x103   : > { %3745 = vmatpush1.bf16.msra.mxu1 %v4964_v11  ;;  %v5060_v11 = vld [vmem:[%s6638_s0 + $0x8] ss:$80 sps:$4 sm:$0xff]  }
 0x104   : > { %4010 = vmatpush1.bf16.msra.mxu0 %v4967_v12  ;;  %3746 = vmatprep.subr.bf16.mxu1 %v4972_v13  ;;  %v5071_v12 = vld [vmem:[%s6141_s11 + $0x704] ss:$8 sps:$4 sm:$0xff]   ;;  %v5063_v13 = vld [vmem:[%s6141_s11 + $0x200] ss:$8 sps:$4 sm:$0xff]  }
 0x105   : > { %4011 = vmatprep.subr.bf16.mxu0 %v4975_v14  ;;  %v5066_v14 = vld [vmem:[%s6638_s0 + $0x30] ss:$80 sps:$4 sm:$0xff]  }
 0x106   : > { %3732 = vmatmul.mubr.bf16.gmra.mrb[4].mxu1 %v5052_v30  ;;  %v5170_v30 = vld [vmem:[%s6638_s0 + $0x14] ss:$80 sps:$4 sm:$0xff]  }
 0x107   : > { %3747 = vmatpush1.bf16.msra.mxu1 %v4970_v15  ;;  %3997 = vmatmul.mubr.bf16.gmra.mrb[4].mxu0 %v5053_v31  ;;  %v5069_v15 = vld [vmem:[%s6141_s11 + $0x700] ss:$8 sps:$4 sm:$0xff]   ;;  %v5176_v31 = vld [vmem:[%s6638_s0 + $0x3c] ss:$80 sps:$4 sm:$0xff]  }
 0x108   : > { %4012 = vmatpush1.bf16.msra.mxu0 %v4973_v16  ;;  %3748 = vmatprep.subr.bf16.mxu1 %v4978_v17  ;;  %v5074_v16 = vld [vmem:[%s6141_s11 + $0x214] ss:$8 sps:$4 sm:$0xff]  }
 0x109   : > { %4013 = vmatprep.subr.bf16.mxu0 %v4981_v18  ;;  %3774 = vmatprep.mubr.bf16.mxu1 %v5062_v36  ;;  %v5077_v17 = vld [vmem:[%s6141_s11 + $0x714] ss:$8 sps:$4 sm:$0xff]   ;;  %v5090_v36 = vld [vmem:[%s6141_s11 + $0x240] ss:$8 sps:$4 sm:$0xff]  }
 0x10a   : > { %4039 = vmatprep.mubr.bf16.mxu0 %v5068_v39  ;;  %v5150_v18 = vld [vmem:[%s6638_s0 + $0xac] ss:$80 sps:$4 sm:$0xff]  }
 0x10b   : > { %3749 = vmatpush1.bf16.msra.mxu1 %v4976_v19  ;;  %v5155_v19 = vld [vmem:[%s6638_s0 + $0xd4] ss:$80 sps:$4 sm:$0xff]  }
 0x10c   : > { %4014 = vmatpush1.bf16.msra.mxu0 %v4979_v20  ;;  %3750 = vmatprep.subr.bf16.mxu1 %v4984_v21  ;;  %v5072_v20 = vld [vmem:[%s6141_s11 + $0x210] ss:$8 sps:$4 sm:$0xff]   ;;  %v5101_v39 = vld [vmem:[%s6141_s11 + $0x754] ss:$8 sps:$4 sm:$0xff]  }
 0x10d   : > { %4015 = vmatprep.subr.bf16.mxu0 %v4987_v22  ;;  %v5075_v21 = vld [vmem:[%s6141_s11 + $0x710] ss:$8 sps:$4 sm:$0xff]   ;;  %v5080_v22 = vld [vmem:[%s6141_s11 + $0x224] ss:$8 sps:$4 sm:$0xff]  }
 0x10f   : > { %3751 = vmatpush1.bf16.msra.mxu1 %v4982_v23  ;;  %v5083_v23 = vld [vmem:[%s6141_s11 + $0x724] ss:$8 sps:$4 sm:$0xff]  }
 0x110   : > { %4016 = vmatpush1.bf16.msra.mxu0 %v4985_v24  ;;  %3752 = vmatprep.subr.bf16.mxu1 %v4990_v25  ;;  %v5078_v24 = vld [vmem:[%s6141_s11 + $0x220] ss:$8 sps:$4 sm:$0xff]  }
 0x111   : > { %4017 = vmatprep.subr.bf16.mxu0 %v4993_v26  ;;  %v5081_v25 = vld [vmem:[%s6141_s11 + $0x720] ss:$8 sps:$4 sm:$0xff]  }
 0x112   : > { %v5160_v26 = vld [vmem:[%s6638_s0 + $0xa8] ss:$80 sps:$4 sm:$0xff]  }
 0x113   : > { %3753 = vmatpush1.bf16.msra.mxu1 %v4988_v28  ;;  %v5086_v28 = vld [vmem:[%s6141_s11 + $0x234] ss:$8 sps:$4 sm:$0xff]  }
 0x114   : > { %4018 = vmatpush1.bf16.msra.mxu0 %v4991_v29  ;;  %3754 = vmatprep.subr.bf16.mxu1 %v4996_v32  ;;  %v5089_v29 = vld [vmem:[%s6141_s11 + $0x734] ss:$8 sps:$4 sm:$0xff]   ;;  %v5084_v32 = vld [vmem:[%s6141_s11 + $0x230] ss:$8 sps:$4 sm:$0xff]  }
 0x115   : > { %4019 = vmatprep.subr.bf16.mxu0 %v4999_v33  ;;  %v5087_v33 = vld [vmem:[%s6141_s11 + $0x730] ss:$8 sps:$4 sm:$0xff]  }
 0x117   : > { %3755 = vmatpush1.bf16.msra.mxu1 %v4994_v34  ;;  %v5092_v34 = vld [vmem:[%s6141_s11 + $0x244] ss:$8 sps:$4 sm:$0xff]  }
 0x118   : > { %4020 = vmatpush1.bf16.msra.mxu0 %v4997_v35  ;;  %3756 = vmatprep.subr.bf16.mxu1 %v5002_v37  ;;  %v5095_v35 = vld [vmem:[%s6141_s11 + $0x744] ss:$8 sps:$4 sm:$0xff]   ;;  %v5093_v37 = vld [vmem:[%s6141_s11 + $0x740] ss:$8 sps:$4 sm:$0xff]  }
 0x119   : > { %4021 = vmatprep.subr.bf16.mxu0 %v5005_v38  ;;  %v5098_v38 = vld [vmem:[%s6141_s11 + $0x254] ss:$8 sps:$4 sm:$0xff]  }
 0x11b   : > { %3757 = vmatpush1.bf16.msra.mxu1 %v5000_v40  ;;  %v5096_v40 = vld [vmem:[%s6141_s11 + $0x250] ss:$8 sps:$4 sm:$0xff]  }
 0x11c   : > { %4022 = vmatpush1.bf16.msra.mxu0 %v5003_v41  ;;  %3758 = vmatprep.subr.bf16.mxu1 %v5008_v42  ;;  %v5099_v41 = vld [vmem:[%s6141_s11 + $0x750] ss:$8 sps:$4 sm:$0xff]   ;;  %v5104_v42 = vld [vmem:[%s6141_s11 + $0x264] ss:$8 sps:$4 sm:$0xff]  }
 0x11d   : > { %4023 = vmatprep.subr.bf16.mxu0 %v5011_v43  ;;  %v5107_v43 = vld [vmem:[%s6141_s11 + $0x764] ss:$8 sps:$4 sm:$0xff]  }
 0x11f   : > { %3759 = vmatpush1.bf16.msra.mxu1 %v5006_v44  ;;  %v5102_v44 = vld [vmem:[%s6141_s11 + $0x260] ss:$8 sps:$4 sm:$0xff]  }
 0x120   : > { %4024 = vmatpush1.bf16.msra.mxu0 %v5009_v45  ;;  %3760 = vmatprep.subr.bf16.mxu1 %v5014_v46  ;;  %v5105_v45 = vld [vmem:[%s6141_s11 + $0x760] ss:$8 sps:$4 sm:$0xff]   ;;  %v5110_v46 = vld [vmem:[%s6141_s11 + $0x274] ss:$8 sps:$4 sm:$0xff]  }
 0x121   : > { %4025 = vmatprep.subr.bf16.mxu0 %v5017_v47  ;;  %v5113_v47 = vld [vmem:[%s6141_s11 + $0x774] ss:$8 sps:$4 sm:$0xff]  }
 0x123   : > { %3761 = vmatpush1.bf16.msra.mxu1 %v5012_v48  ;;  %v5108_v48 = vld [vmem:[%s6141_s11 + $0x270] ss:$8 sps:$4 sm:$0xff]  }
 0x124   : > { %4026 = vmatpush1.bf16.msra.mxu0 %v5015_v49  ;;  %3762 = vmatprep.subr.bf16.mxu1 %v5020_v50  ;;  %v5111_v49 = vld [vmem:[%s6141_s11 + $0x770] ss:$8 sps:$4 sm:$0xff]   ;;  %v5116_v50 = vld [vmem:[%s6141_s11 + $0x284] ss:$8 sps:$4 sm:$0xff]  }
 0x125   : > { %4027 = vmatprep.subr.bf16.mxu0 %v5023_v51  ;;  %v5119_v51 = vld [vmem:[%s6141_s11 + $0x784] ss:$8 sps:$4 sm:$0xff]  }
 0x127   : > { %3763 = vmatpush1.bf16.msra.mxu1 %v5018_v52  ;;  %v5114_v52 = vld [vmem:[%s6141_s11 + $0x280] ss:$8 sps:$4 sm:$0xff]  }
 0x128   : > { %4028 = vmatpush1.bf16.msra.mxu0 %v5021_v53  ;;  %3764 = vmatprep.subr.bf16.mxu1 %v5026_v54  ;;  %v5117_v53 = vld [vmem:[%s6141_s11 + $0x780] ss:$8 sps:$4 sm:$0xff]   ;;  %v5122_v54 = vld [vmem:[%s6141_s11 + $0x294] ss:$8 sps:$4 sm:$0xff]  }
 0x129   : > { %4029 = vmatprep.subr.bf16.mxu0 %v5029_v55  ;;  %v5125_v55 = vld [vmem:[%s6141_s11 + $0x794] ss:$8 sps:$4 sm:$0xff]  }
 0x12b   : > { %3765 = vmatpush1.bf16.msra.mxu1 %v5024_v56  ;;  %v5120_v56 = vld [vmem:[%s6141_s11 + $0x290] ss:$8 sps:$4 sm:$0xff]  }
 0x12c   : > { %4030 = vmatpush1.bf16.msra.mxu0 %v5027_v57  ;;  %3766 = vmatprep.subr.bf16.mxu1 %v5032_v58  ;;  %v5123_v57 = vld [vmem:[%s6141_s11 + $0x790] ss:$8 sps:$4 sm:$0xff]   ;;  %v5128_v58 = vld [vmem:[%s6141_s11 + $0x2a4] ss:$8 sps:$4 sm:$0xff]  }
 0x12d   : > { %4031 = vmatprep.subr.bf16.mxu0 %v5035_v59  ;;  %v5131_v59 = vld [vmem:[%s6141_s11 + $0x7a4] ss:$8 sps:$4 sm:$0xff]  }
 0x12f   : > { %3767 = vmatpush1.bf16.msra.mxu1 %v5030_v60  ;;  %v5126_v60 = vld [vmem:[%s6141_s11 + $0x2a0] ss:$8 sps:$4 sm:$0xff]  }
 0x130   : > { %4032 = vmatpush1.bf16.msra.mxu0 %v5033_v61  ;;  %3768 = vmatprep.subr.bf16.mxu1 %v5038_v62  ;;  %v5129_v61 = vld [vmem:[%s6141_s11 + $0x7a0] ss:$8 sps:$4 sm:$0xff]   ;;  %v5134_v62 = vld [vmem:[%s6141_s11 + $0x2b4] ss:$8 sps:$4 sm:$0xff]  }
 0x131   : > { %4033 = vmatprep.subr.bf16.mxu0 %v5041_v63  ;;  %v5137_v63 = vld [vmem:[%s6141_s11 + $0x7b4] ss:$8 sps:$4 sm:$0xff]  }
 0x133   : > { %3769 = vmatpush1.bf16.msra.mxu1 %v5036_v0  ;;  %v5132_v0 = vld [vmem:[%s6141_s11 + $0x2b0] ss:$8 sps:$4 sm:$0xff]  }
 0x134   : > { %4034 = vmatpush1.bf16.msra.mxu0 %v5039_v1  ;;  %3770 = vmatprep.subr.bf16.mxu1 %v5046_v2  ;;  %v5135_v1 = vld [vmem:[%s6141_s11 + $0x7b0] ss:$8 sps:$4 sm:$0xff]   ;;  %v5140_v2 = vld [vmem:[%s6141_s11 + $0x2c4] ss:$8 sps:$4 sm:$0xff]  }
 0x135   : > { %4035 = vmatprep.subr.bf16.mxu0 %v5051_v3  ;;  %v5143_v3 = vld [vmem:[%s6141_s11 + $0x7c4] ss:$8 sps:$4 sm:$0xff]  }
 0x137   : > { %3771 = vmatpush1.bf16.msra.mxu1 %v5044_v4  ;;  %v5138_v4 = vld [vmem:[%s6141_s11 + $0x2c0] ss:$8 sps:$4 sm:$0xff]  }
 0x138   : > { %4036 = vmatpush1.bf16.msra.mxu0 %v5049_v5  ;;  %3772 = vmatprep.subr.bf16.mxu1 %v5056_v6  ;;  %v5141_v5 = vld [vmem:[%s6141_s11 + $0x7c0] ss:$8 sps:$4 sm:$0xff]   ;;  %v5146_v6 = vld [vmem:[%s6141_s11 + $0x2d4] ss:$8 sps:$4 sm:$0xff]  }
 0x139   : > { %4037 = vmatprep.subr.bf16.mxu0 %v5059_v7  ;;  %v5149_v7 = vld [vmem:[%s6141_s11 + $0x7d4] ss:$8 sps:$4 sm:$0xff]  }
 0x13b   : > { %3773 = vmatpush1.bf16.msra.mxu1 %v5054_v8  ;;  %v5144_v8 = vld [vmem:[%s6141_s11 + $0x2d0] ss:$8 sps:$4 sm:$0xff]  }
 0x13c   : > { %4038 = vmatpush1.bf16.msra.mxu0 %v5057_v9  ;;  %3795 = vmatprep.subr.bf16.mxu1 %v5065_v10  ;;  %v5147_v9 = vld [vmem:[%s6141_s11 + $0x7d0] ss:$8 sps:$4 sm:$0xff]   ;;  %v5154_v10 = vld [vmem:[%s6141_s11 + $0x2e4] ss:$8 sps:$4 sm:$0xff]  }
 0x13d   : > { %4060 = vmatprep.subr.bf16.mxu0 %v5071_v12  ;;  %v5152_v12 = vld [vmem:[%s6141_s11 + $0x2e0] ss:$8 sps:$4 sm:$0xff]  }
 0x13e   : > { %3775 = vmatmul.mubr.bf16.vlgmr.msra.gmra.mrb[0].mxu1 %v5060_v11  ;;  %v5159_v11 = vld [vmem:[%s6141_s11 + $0x7e4] ss:$8 sps:$4 sm:$0xff]  }
 0x13f   : > { %4040 = vmatmul.mubr.bf16.vlgmr.msra.gmra.mrb[0].mxu0 %v5066_v14  ;;  %3796 = vmatpush1.bf16.msra.mxu1 %v5063_v13  ;;  %v5157_v13 = vld [vmem:[%s6141_s11 + $0x7e0] ss:$8 sps:$4 sm:$0xff]   ;;  %v5164_v14 = vld [vmem:[%s6141_s11 + $0x2f4] ss:$8 sps:$4 sm:$0xff]  }
 0x140   : > { %4061 = vmatpush1.bf16.msra.mxu0 %v5069_v15  ;;  %3797 = vmatprep.subr.bf16.mxu1 %v5074_v16  ;;  %v5167_v15 = vld [vmem:[%s6141_s11 + $0x7f4] ss:$8 sps:$4 sm:$0xff]   ;;  %v5162_v16 = vld [vmem:[%s6141_s11 + $0x2f0] ss:$8 sps:$4 sm:$0xff]  }
 0x141   : > { %4062 = vmatprep.subr.bf16.mxu0 %v5077_v17  ;;  %3784 = vmatprep.mubr.bf16.mxu1 %v5150_v18  ;;  %v5165_v17 = vld [vmem:[%s6141_s11 + $0x7f0] ss:$8 sps:$4 sm:$0xff]   ;;  %v5173_v18 = vld [vmem:[%s6141_s11 + $0x304] ss:$8 sps:$4 sm:$0xff]  }
 0x142   : > { %4049 = vmatprep.mubr.bf16.mxu0 %v5155_v19  ;;  %v5179_v19 = vld [vmem:[%s6141_s11 + $0x804] ss:$8 sps:$4 sm:$0xff]  }
 0x143   : > { %3798 = vmatpush1.bf16.msra.mxu1 %v5072_v20  ;;  %v5168_v20 = vld [vmem:[%s6638_s0 + $0x10] ss:$80 sps:$4 sm:$0xff]  }
 0x144   : > { %4063 = vmatpush1.bf16.msra.mxu0 %v5075_v21  ;;  %3799 = vmatprep.subr.bf16.mxu1 %v5080_v22  ;;  %v5171_v21 = vld [vmem:[%s6141_s11 + $0x300] ss:$8 sps:$4 sm:$0xff]  }
 0x145   : > { %4064 = vmatprep.subr.bf16.mxu0 %v5083_v23  ;;  %v5174_v22 = vld [vmem:[%s6638_s0 + $0x38] ss:$80 sps:$4 sm:$0xff]  }
 0x146   : > { %3785 = vmatmul.mubr.bf16.gmra.mrb[4].mxu1 %v5160_v26  ;;  %v5177_v23 = vld [vmem:[%s6141_s11 + $0x800] ss:$8 sps:$4 sm:$0xff]   ;;  %v5258_v26 = vld [vmem:[%s6638_s0 + $0xb4] ss:$80 sps:$4 sm:$0xff]  }
 0x147   : > { %4050 = vmatmul.mubr.bf16.gmra.mrb[4].mxu0 %v5161_v27  ;;  %3800 = vmatpush1.bf16.msra.mxu1 %v5078_v24  ;;  %v5182_v24 = vld [vmem:[%s6141_s11 + $0x314] ss:$8 sps:$4 sm:$0xff]  }
 0x148   : > { %4065 = vmatpush1.bf16.msra.mxu0 %v5081_v25  ;;  %3801 = vmatprep.subr.bf16.mxu1 %v5086_v28  ;;  %v5185_v25 = vld [vmem:[%s6141_s11 + $0x814] ss:$8 sps:$4 sm:$0xff]   ;;  %v5180_v28 = vld [vmem:[%s6141_s11 + $0x310] ss:$8 sps:$4 sm:$0xff]  }
 0x149   : > { %4066 = vmatprep.subr.bf16.mxu0 %v5089_v29  ;;  %3827 = vmatprep.mubr.bf16.mxu1 %v5170_v30  ;;  %v5263_v27 = vld [vmem:[%s6638_s0 + $0xdc] ss:$80 sps:$4 sm:$0xff]   ;;  %v5183_v29 = vld [vmem:[%s6141_s11 + $0x810] ss:$8 sps:$4 sm:$0xff]  }
 0x14a   : > { %4092 = vmatprep.mubr.bf16.mxu0 %v5176_v31  ;;  %v5188_v30 = vld [vmem:[%s6141_s11 + $0x324] ss:$8 sps:$4 sm:$0xff]  }
 0x14b   : > { %3802 = vmatpush1.bf16.msra.mxu1 %v5084_v32  ;;  %v5191_v31 = vld [vmem:[%s6141_s11 + $0x824] ss:$8 sps:$4 sm:$0xff]   ;;  %v5186_v32 = vld [vmem:[%s6141_s11 + $0x320] ss:$8 sps:$4 sm:$0xff]  }
 0x14c   : > { %4067 = vmatpush1.bf16.msra.mxu0 %v5087_v33  ;;  %3803 = vmatprep.subr.bf16.mxu1 %v5092_v34  ;;  %v5189_v33 = vld [vmem:[%s6141_s11 + $0x820] ss:$8 sps:$4 sm:$0xff]  }
 0x14d   : > { %4068 = vmatprep.subr.bf16.mxu0 %v5095_v35  ;;  %v5268_v34 = vld [vmem:[%s6638_s0 + $0xb0] ss:$80 sps:$4 sm:$0xff]   ;;  %v5269_v35 = vld [vmem:[%s6638_s0 + $0xd8] ss:$80 sps:$4 sm:$0xff]  }
 0x14f   : > { %3804 = vmatpush1.bf16.msra.mxu1 %v5090_v36  ;;  %v5194_v36 = vld [vmem:[%s6141_s11 + $0x334] ss:$8 sps:$4 sm:$0xff]  }
 0x150   : > { %4069 = vmatpush1.bf16.msra.mxu0 %v5093_v37  ;;  %3805 = vmatprep.subr.bf16.mxu1 %v5098_v38  ;;  %v5197_v37 = vld [vmem:[%s6141_s11 + $0x834] ss:$8 sps:$4 sm:$0xff]  }
 0x151   : > { %4070 = vmatprep.subr.bf16.mxu0 %v5101_v39  ;;  %v5278_v38 = vld [vmem:[%s6638_s0 + $0x1c] ss:$80 sps:$4 sm:$0xff]   ;;  %v5284_v39 = vld [vmem:[%s6638_s0 + $0x44] ss:$80 sps:$4 sm:$0xff]  }
 0x153   : > { %3806 = vmatpush1.bf16.msra.mxu1 %v5096_v40  ;;  %v5192_v40 = vld [vmem:[%s6141_s11 + $0x330] ss:$8 sps:$4 sm:$0xff]  }
 0x154   : > { %4071 = vmatpush1.bf16.msra.mxu0 %v5099_v41  ;;  %3807 = vmatprep.subr.bf16.mxu1 %v5104_v42  ;;  %v5195_v41 = vld [vmem:[%s6141_s11 + $0x830] ss:$8 sps:$4 sm:$0xff]   ;;  %v5200_v42 = vld [vmem:[%s6141_s11 + $0x344] ss:$8 sps:$4 sm:$0xff]  }
 0x155   : > { %4072 = vmatprep.subr.bf16.mxu0 %v5107_v43  ;;  %v5203_v43 = vld [vmem:[%s6141_s11 + $0x844] ss:$8 sps:$4 sm:$0xff]  }
 0x157   : > { %3808 = vmatpush1.bf16.msra.mxu1 %v5102_v44  ;;  %v5198_v44 = vld [vmem:[%s6141_s11 + $0x340] ss:$8 sps:$4 sm:$0xff]  }
 0x158   : > { %4073 = vmatpush1.bf16.msra.mxu0 %v5105_v45  ;;  %3809 = vmatprep.subr.bf16.mxu1 %v5110_v46  ;;  %v5201_v45 = vld [vmem:[%s6141_s11 + $0x840] ss:$8 sps:$4 sm:$0xff]   ;;  %v5420_v46 = vmov 0  }
 0x159   : > { %4074 = vmatprep.subr.bf16.mxu0 %v5113_v47  ;;  %4855 = vset.pattern.permute.xlu1 %v5420_v46  ;;  %v5206_v47 = vld [vmem:[%s6141_s11 + $0x354] ss:$8 sps:$4 sm:$0xff]  }
 0x15a   : > { %4854 = vset.pattern.permute.xlu0 %v5420_v46  ;;  %v5291_v46 = vld [vmem:[%s6141_s11 + $0x910] ss:$8 sps:$4 sm:$0xff]  }
 0x15b   : > { %3810 = vmatpush1.bf16.msra.mxu1 %v5108_v48  ;;  %v5209_v48 = vld [vmem:[%s6141_s11 + $0x854] ss:$8 sps:$4 sm:$0xff]  }
 0x15c   : > { %4075 = vmatpush1.bf16.msra.mxu0 %v5111_v49  ;;  %3811 = vmatprep.subr.bf16.mxu1 %v5116_v50  ;;  %v5204_v49 = vld [vmem:[%s6141_s11 + $0x350] ss:$8 sps:$4 sm:$0xff]  }
 0x15d   : > { %4076 = vmatprep.subr.bf16.mxu0 %v5119_v51  ;;  %v5207_v50 = vld [vmem:[%s6141_s11 + $0x850] ss:$8 sps:$4 sm:$0xff]   ;;  %v5212_v51 = vld [vmem:[%s6141_s11 + $0x364] ss:$8 sps:$4 sm:$0xff]  }
 0x15f   : > { %3812 = vmatpush1.bf16.msra.mxu1 %v5114_v52  ;;  %v5215_v52 = vld [vmem:[%s6141_s11 + $0x864] ss:$8 sps:$4 sm:$0xff]  }
 0x160   : > { %4077 = vmatpush1.bf16.msra.mxu0 %v5117_v53  ;;  %3813 = vmatprep.subr.bf16.mxu1 %v5122_v54  ;;  %v5210_v53 = vld [vmem:[%s6141_s11 + $0x360] ss:$8 sps:$4 sm:$0xff]  }
 0x161   : > { %4078 = vmatprep.subr.bf16.mxu0 %v5125_v55  ;;  %v5213_v54 = vld [vmem:[%s6141_s11 + $0x860] ss:$8 sps:$4 sm:$0xff]   ;;  %v5218_v55 = vld [vmem:[%s6141_s11 + $0x374] ss:$8 sps:$4 sm:$0xff]  }
 0x163   : > { %3814 = vmatpush1.bf16.msra.mxu1 %v5120_v56  ;;  %v5221_v56 = vld [vmem:[%s6141_s11 + $0x874] ss:$8 sps:$4 sm:$0xff]  }
 0x164   : > { %4079 = vmatpush1.bf16.msra.mxu0 %v5123_v57  ;;  %3815 = vmatprep.subr.bf16.mxu1 %v5128_v58  ;;  %v5216_v57 = vld [vmem:[%s6141_s11 + $0x370] ss:$8 sps:$4 sm:$0xff]  }
 0x165   : > { %4080 = vmatprep.subr.bf16.mxu0 %v5131_v59  ;;  %v5219_v58 = vld [vmem:[%s6141_s11 + $0x870] ss:$8 sps:$4 sm:$0xff]   ;;  %v5224_v59 = vld [vmem:[%s6141_s11 + $0x384] ss:$8 sps:$4 sm:$0xff]  }
 0x167   : > { %3816 = vmatpush1.bf16.msra.mxu1 %v5126_v60  ;;  %v5227_v60 = vld [vmem:[%s6141_s11 + $0x884] ss:$8 sps:$4 sm:$0xff]  }
 0x168   : > { %4081 = vmatpush1.bf16.msra.mxu0 %v5129_v61  ;;  %3817 = vmatprep.subr.bf16.mxu1 %v5134_v62  ;;  %v5222_v61 = vld [vmem:[%s6141_s11 + $0x380] ss:$8 sps:$4 sm:$0xff]  }
 0x169   : > { %4082 = vmatprep.subr.bf16.mxu0 %v5137_v63  ;;  %v5225_v62 = vld [vmem:[%s6141_s11 + $0x880] ss:$8 sps:$4 sm:$0xff]   ;;  %v5230_v63 = vld [vmem:[%s6141_s11 + $0x394] ss:$8 sps:$4 sm:$0xff]  }
 0x16b   : > { %3818 = vmatpush1.bf16.msra.mxu1 %v5132_v0  ;;  %v5233_v0 = vld [vmem:[%s6141_s11 + $0x894] ss:$8 sps:$4 sm:$0xff]  }
 0x16c   : > { %4083 = vmatpush1.bf16.msra.mxu0 %v5135_v1  ;;  %3819 = vmatprep.subr.bf16.mxu1 %v5140_v2  ;;  %v5228_v1 = vld [vmem:[%s6141_s11 + $0x390] ss:$8 sps:$4 sm:$0xff]  }
 0x16d   : > { %4084 = vmatprep.subr.bf16.mxu0 %v5143_v3  ;;  %v5231_v2 = vld [vmem:[%s6141_s11 + $0x890] ss:$8 sps:$4 sm:$0xff]   ;;  %v5236_v3 = vld [vmem:[%s6141_s11 + $0x3a4] ss:$8 sps:$4 sm:$0xff]  }
 0x16f   : > { %3820 = vmatpush1.bf16.msra.mxu1 %v5138_v4  ;;  %v5239_v4 = vld [vmem:[%s6141_s11 + $0x8a4] ss:$8 sps:$4 sm:$0xff]  }
 0x170   : > { %4085 = vmatpush1.bf16.msra.mxu0 %v5141_v5  ;;  %3821 = vmatprep.subr.bf16.mxu1 %v5146_v6  ;;  %v5234_v5 = vld [vmem:[%s6141_s11 + $0x3a0] ss:$8 sps:$4 sm:$0xff]  }
 0x171   : > { %4086 = vmatprep.subr.bf16.mxu0 %v5149_v7  ;;  %v5237_v6 = vld [vmem:[%s6141_s11 + $0x8a0] ss:$8 sps:$4 sm:$0xff]   ;;  %v5242_v7 = vld [vmem:[%s6141_s11 + $0x3b4] ss:$8 sps:$4 sm:$0xff]  }
 0x173   : > { %3822 = vmatpush1.bf16.msra.mxu1 %v5144_v8  ;;  %v5245_v8 = vld [vmem:[%s6141_s11 + $0x8b4] ss:$8 sps:$4 sm:$0xff]  }
 0x174   : > { %4087 = vmatpush1.bf16.msra.mxu0 %v5147_v9  ;;  %3823 = vmatprep.subr.bf16.mxu1 %v5154_v10  ;;  %v5240_v9 = vld [vmem:[%s6141_s11 + $0x3b0] ss:$8 sps:$4 sm:$0xff]  }
 0x175   : > { %4088 = vmatprep.subr.bf16.mxu0 %v5159_v11  ;;  %v5243_v10 = vld [vmem:[%s6141_s11 + $0x8b0] ss:$8 sps:$4 sm:$0xff]  }
 0x176   : > { %v1867_v11 = vld [vmem:[%s6639_s1 + $0x10] sm:$0xff] }
 0x177   : > { %3824 = vmatpush1.bf16.msra.mxu1 %v5152_v12  ;;  %v1865_v12 = vld [vmem:[%s6639_s1] sm:$0xff]  ;;  %1881 = vperm.xlu1 %4855, %v1867_v11  }
 0x178   : > { %4089 = vmatpush1.bf16.msra.mxu0 %v5157_v13  ;;  %3825 = vmatprep.subr.bf16.mxu1 %v5164_v14  ;;  %v5248_v13 = vld [vmem:[%s6141_s11 + $0x3c4] ss:$8 sps:$4 sm:$0xff]  }
 0x179   : > { %4090 = vmatprep.subr.bf16.mxu0 %v5167_v15  ;;  %v5251_v14 = vld [vmem:[%s6141_s11 + $0x8c4] ss:$8 sps:$4 sm:$0xff]   ;;  %1871 = vperm.xlu0 %4854, %v1865_v12   ;;  %v1868_v15 = vld [vmem:[%s6639_s1 + $0x18] sm:$0xff] }
 0x17a   : > { %v5332_v11 = vld [vmem:[%s6141_s11 + $0x484] ss:$8 sps:$4 sm:$0xff]  }
 0x17b   : > { %3826 = vmatpush1.bf16.msra.mxu1 %v5162_v16  ;;  %v1866_v16 = vld [vmem:[%s6639_s1 + $0x8] sm:$0xff]  ;;  %1886 = vperm.xlu1 %4855, %v1868_v15   ;;  %v5338_v15 = vld [vmem:[%s6141_s11 + $0x494] ss:$8 sps:$4 sm:$0xff]  }
 0x17c   : > { %4091 = vmatpush1.bf16.msra.mxu0 %v5165_v17  ;;  %3848 = vmatprep.subr.bf16.mxu1 %v5173_v18  ;;  %v5246_v17 = vld [vmem:[%s6141_s11 + $0x3c0] ss:$8 sps:$4 sm:$0xff]   ;;  %v5335_v12 = vld [vmem:[%s6141_s11 + $0x984] ss:$8 sps:$4 sm:$0xff]  }
 0x17d   : > { %4113 = vmatprep.subr.bf16.mxu0 %v5179_v19  ;;  %v5249_v18 = vld [vmem:[%s6141_s11 + $0x8c0] ss:$8 sps:$4 sm:$0xff]   ;;  %v5254_v19 = vld [vmem:[%s6141_s11 + $0x3d4] ss:$8 sps:$4 sm:$0xff]   ;;  %1876 = vperm.xlu0 %4854, %v1866_v16  }
 0x17e   : > { %3828 = vmatmul.mubr.bf16.vlgmr.msra.gmra.mrb[0].mxu1 %v5168_v20  ;;  %v5257_v20 = vld [vmem:[%s6141_s11 + $0x8d4] ss:$8 sps:$4 sm:$0xff]  }
 0x17f   : > { %4093 = vmatmul.mubr.bf16.vlgmr.msra.gmra.mrb[0].mxu0 %v5174_v22  ;;  %3849 = vmatpush1.bf16.msra.mxu1 %v5171_v21  ;;  %v4228_v21 = vld [vmem:[%s6640_s2 + $0x8] sm:$0xff]  ;;  %v4227_v22 = vld [vmem:[%s6640_s2] sm:$0xff]  ;;  %v5341_v16 = vld [vmem:[%s6141_s11 + $0x994] ss:$8 sps:$4 sm:$0xff]  }
 0x180   : > { %4114 = vmatpush1.bf16.msra.mxu0 %v5177_v23  ;;  %3850 = vmatprep.subr.bf16.mxu1 %v5182_v24  ;;  %v5252_v23 = vld [vmem:[%s6141_s11 + $0x3d0] ss:$8 sps:$4 sm:$0xff]  }
 0x181   : > { %4115 = vmatprep.subr.bf16.mxu0 %v5185_v25  ;;  %3837 = vmatprep.mubr.bf16.mxu1 %v5258_v26  ;;  %v5255_v24 = vld [vmem:[%s6141_s11 + $0x8d0] ss:$8 sps:$4 sm:$0xff]   ;;  %v5262_v25 = vld [vmem:[%s6141_s11 + $0x3e4] ss:$8 sps:$4 sm:$0xff]  }
 0x182   : > { %4102 = vmatprep.mubr.bf16.mxu0 %v5263_v27  ;;  %v5267_v26 = vld [vmem:[%s6141_s11 + $0x8e4] ss:$8 sps:$4 sm:$0xff]   ;;  %4238 = vperm.xlu1 %4855, %v4228_v21   ;;  %v4230_v27 = vld [vmem:[%s6640_s2 + $0x18] sm:$0xff]  ;;  %v5342_v21 = vld [vmem:[%s6141_s11 + $0x4a0] ss:$8 sps:$4 sm:$0xff]  }
 0x183   : > { %3851 = vmatpush1.bf16.msra.mxu1 %v5180_v28  ;;  %4233 = vperm.xlu0 %4854, %v4227_v22   ;;  %v4229_v28 = vld [vmem:[%s6640_s2 + $0x10] sm:$0xff]  ;;  %v5345_v22 = vld [vmem:[%s6141_s11 + $0x9a0] ss:$8 sps:$4 sm:$0xff]  }
 0x184   : > { %4116 = vmatpush1.bf16.msra.mxu0 %v5183_v29  ;;  %3852 = vmatprep.subr.bf16.mxu1 %v5188_v30  ;;  %v5260_v29 = vld [vmem:[%s6141_s11 + $0x3e0] ss:$8 sps:$4 sm:$0xff]  }
 0x185   : > { %4117 = vmatprep.subr.bf16.mxu0 %v5191_v31  ;;  %v5265_v30 = vld [vmem:[%s6141_s11 + $0x8e0] ss:$8 sps:$4 sm:$0xff]   ;;  %v5272_v31 = vld [vmem:[%s6141_s11 + $0x3f4] ss:$8 sps:$4 sm:$0xff]  }
 0x186   : > { %3838 = vmatmul.mubr.bf16.gmra.mrb[4].mxu1 %v5268_v34  ;;  %4248 = vperm.xlu1 %4855, %v4230_v27   ;;  %v5273_v34 = vld [vmem:[%s6141_s11 + $0x8f0] ss:$8 sps:$4 sm:$0xff]   ;;  %v5356_v27 = vld [vmem:[%s6141_s11 + $0x4c4] ss:$8 sps:$4 sm:$0xff]  }
 0x187   : > { %4103 = vmatmul.mubr.bf16.gmra.mrb[4].mxu0 %v5269_v35  ;;  %3853 = vmatpush1.bf16.msra.mxu1 %v5186_v32  ;;  %v5275_v32 = vld [vmem:[%s6141_s11 + $0x8f4] ss:$8 sps:$4 sm:$0xff]   ;;  %v5281_v35 = vld [vmem:[%s6141_s11 + $0x404] ss:$8 sps:$4 sm:$0xff]  }
 0x188   : > { %4118 = vmatpush1.bf16.msra.mxu0 %v5189_v33  ;;  %3854 = vmatprep.subr.bf16.mxu1 %v5194_v36  ;;  %v5270_v33 = vld [vmem:[%s6141_s11 + $0x3f0] ss:$8 sps:$4 sm:$0xff]   ;;  %v5287_v36 = vld [vmem:[%s6141_s11 + $0x904] ss:$8 sps:$4 sm:$0xff]  }
 0x189   : > { %4119 = vmatprep.subr.bf16.mxu0 %v5197_v37  ;;  %3880 = vmatprep.mubr.bf16.mxu1 %v5278_v38  ;;  %v5276_v37 = vld [vmem:[%s6638_s0 + $0x18] ss:$80 sps:$4 sm:$0xff]   ;;  %v5282_v38 = vld [vmem:[%s6638_s0 + $0x40] ss:$80 sps:$4 sm:$0xff]  }
 0x18a   : > { %4145 = vmatprep.mubr.bf16.mxu0 %v5284_v39  ;;  %4243 = vperm.xlu0 %4854, %v4229_v28   ;;  %v5279_v39 = vld [vmem:[%s6141_s11 + $0x400] ss:$8 sps:$4 sm:$0xff]   ;;  %v5359_v28 = vld [vmem:[%s6141_s11 + $0x9c4] ss:$8 sps:$4 sm:$0xff]  }
 0x18b   : > { %3855 = vmatpush1.bf16.msra.mxu1 %v5192_v40  ;;  %v5285_v40 = vld [vmem:[%s6141_s11 + $0x900] ss:$8 sps:$4 sm:$0xff]  }
 0x18c   : > { %4120 = vmatpush1.bf16.msra.mxu0 %v5195_v41  ;;  %3856 = vmatprep.subr.bf16.mxu1 %v5200_v42  ;;  %v5290_v41 = vld [vmem:[%s6141_s11 + $0x414] ss:$8 sps:$4 sm:$0xff]  }
 0x18d   : > { %4121 = vmatprep.subr.bf16.mxu0 %v5203_v43  ;;  %v5293_v42 = vld [vmem:[%s6141_s11 + $0x914] ss:$8 sps:$4 sm:$0xff]  }
 0x18e   : > { %v5366_v43 = vld [vmem:[%s6638_s0 + $0xbc] ss:$80 sps:$4 sm:$0xff]  }
 0x18f   : > { %3857 = vmatpush1.bf16.msra.mxu1 %v5198_v44  ;;  %v5368_v44 = vld [vmem:[%s6638_s0 + $0xe4] ss:$80 sps:$4 sm:$0xff]  }
 0x190   : > { %4122 = vmatpush1.bf16.msra.mxu0 %v5201_v45  ;;  %3858 = vmatprep.subr.bf16.mxu1 %v5206_v47  ;;  %v5288_v45 = vld [vmem:[%s6141_s11 + $0x410] ss:$8 sps:$4 sm:$0xff]   ;;  %v5296_v47 = vld [vmem:[%s6141_s11 + $0x424] ss:$8 sps:$4 sm:$0xff]  }
 0x191   : > { %4123 = vmatprep.subr.bf16.mxu0 %v5209_v48  ;;  %v5299_v48 = vld [vmem:[%s6141_s11 + $0x924] ss:$8 sps:$4 sm:$0xff]  }
 0x193   : > { %3859 = vmatpush1.bf16.msra.mxu1 %v5204_v49  ;;  %v5370_v49 = vld [vmem:[%s6638_s0 + $0xb8] ss:$80 sps:$4 sm:$0xff]  }
 0x194   : > { %4124 = vmatpush1.bf16.msra.mxu0 %v5207_v50  ;;  %3860 = vmatprep.subr.bf16.mxu1 %v5212_v51  ;;  %v5374_v50 = vld [vmem:[%s6638_s0 + $0xe0] ss:$80 sps:$4 sm:$0xff]  }
 0x195   : > { %4125 = vmatprep.subr.bf16.mxu0 %v5215_v52  ;;  %v5294_v51 = vld [vmem:[%s6141_s11 + $0x420] ss:$8 sps:$4 sm:$0xff]  }
 0x196   : > { %v5297_v52 = vld [vmem:[%s6141_s11 + $0x920] ss:$8 sps:$4 sm:$0xff]  }
 0x197   : > { %3861 = vmatpush1.bf16.msra.mxu1 %v5210_v53  ;;  %v5302_v53 = vld [vmem:[%s6141_s11 + $0x434] ss:$8 sps:$4 sm:$0xff]  }
 0x198   : > { %4126 = vmatpush1.bf16.msra.mxu0 %v5213_v54  ;;  %3862 = vmatprep.subr.bf16.mxu1 %v5218_v55  ;;  %v5305_v54 = vld [vmem:[%s6141_s11 + $0x934] ss:$8 sps:$4 sm:$0xff]  }
 0x199   : > { %4127 = vmatprep.subr.bf16.mxu0 %v5221_v56  ;;  %v5386_v55 = vld [vmem:[%s6638_s0 + $0x24] ss:$80 sps:$4 sm:$0xff]   ;;  %v5389_v56 = vld [vmem:[%s6638_s0 + $0x4c] ss:$80 sps:$4 sm:$0xff]  }
 0x19b   : > { %3863 = vmatpush1.bf16.msra.mxu1 %v5216_v57  ;;  %v5300_v57 = vld [vmem:[%s6141_s11 + $0x430] ss:$8 sps:$4 sm:$0xff]  }
 0x19c   : > { %4128 = vmatpush1.bf16.msra.mxu0 %v5219_v58  ;;  %3864 = vmatprep.subr.bf16.mxu1 %v5224_v59  ;;  %v5303_v58 = vld [vmem:[%s6141_s11 + $0x930] ss:$8 sps:$4 sm:$0xff]   ;;  %v5308_v59 = vld [vmem:[%s6141_s11 + $0x444] ss:$8 sps:$4 sm:$0xff]  }
 0x19d   : > { %4129 = vmatprep.subr.bf16.mxu0 %v5227_v60  ;;  %v5311_v60 = vld [vmem:[%s6141_s11 + $0x944] ss:$8 sps:$4 sm:$0xff]  }
 0x19f   : > { %3865 = vmatpush1.bf16.msra.mxu1 %v5222_v61  ;;  %v5306_v61 = vld [vmem:[%s6141_s11 + $0x440] ss:$8 sps:$4 sm:$0xff]  }
 0x1a0   : > { %4130 = vmatpush1.bf16.msra.mxu0 %v5225_v62  ;;  %3866 = vmatprep.subr.bf16.mxu1 %v5230_v63  ;;  %v5309_v62 = vld [vmem:[%s6141_s11 + $0x940] ss:$8 sps:$4 sm:$0xff]   ;;  %v5314_v63 = vld [vmem:[%s6141_s11 + $0x454] ss:$8 sps:$4 sm:$0xff]  }
 0x1a1   : > { %4131 = vmatprep.subr.bf16.mxu0 %v5233_v0  ;;  %v5317_v0 = vld [vmem:[%s6141_s11 + $0x954] ss:$8 sps:$4 sm:$0xff]  }
 0x1a3   : > { %3867 = vmatpush1.bf16.msra.mxu1 %v5228_v1  ;;  %v5312_v1 = vld [vmem:[%s6141_s11 + $0x450] ss:$8 sps:$4 sm:$0xff]  }
 0x1a4   : > { %4132 = vmatpush1.bf16.msra.mxu0 %v5231_v2  ;;  %3868 = vmatprep.subr.bf16.mxu1 %v5236_v3  ;;  %v5315_v2 = vld [vmem:[%s6141_s11 + $0x950] ss:$8 sps:$4 sm:$0xff]   ;;  %v5320_v3 = vld [vmem:[%s6141_s11 + $0x464] ss:$8 sps:$4 sm:$0xff]  }
 0x1a5   : > { %4133 = vmatprep.subr.bf16.mxu0 %v5239_v4  ;;  %v5323_v4 = vld [vmem:[%s6141_s11 + $0x964] ss:$8 sps:$4 sm:$0xff]  }
 0x1a7   : > { %3869 = vmatpush1.bf16.msra.mxu1 %v5234_v5  ;;  %v5318_v5 = vld [vmem:[%s6141_s11 + $0x460] ss:$8 sps:$4 sm:$0xff]  }
 0x1a8   : > { %4134 = vmatpush1.bf16.msra.mxu0 %v5237_v6  ;;  %3870 = vmatprep.subr.bf16.mxu1 %v5242_v7  ;;  %v5321_v6 = vld [vmem:[%s6141_s11 + $0x960] ss:$8 sps:$4 sm:$0xff]   ;;  %v5326_v7 = vld [vmem:[%s6141_s11 + $0x474] ss:$8 sps:$4 sm:$0xff]  }
 0x1a9   : > { %4135 = vmatprep.subr.bf16.mxu0 %v5245_v8  ;;  %v5329_v8 = vld [vmem:[%s6141_s11 + $0x974] ss:$8 sps:$4 sm:$0xff]  }
 0x1ab   : > { %3871 = vmatpush1.bf16.msra.mxu1 %v5240_v9  ;;  %v5324_v9 = vld [vmem:[%s6141_s11 + $0x470] ss:$8 sps:$4 sm:$0xff]  }
 0x1ac   : > { %4136 = vmatpush1.bf16.msra.mxu0 %v5243_v10  ;;  %3872 = vmatprep.subr.bf16.mxu1 %v5248_v13  ;;  %v5327_v10 = vld [vmem:[%s6141_s11 + $0x970] ss:$8 sps:$4 sm:$0xff]   ;;  %v5330_v13 = vld [vmem:[%s6141_s11 + $0x480] ss:$8 sps:$4 sm:$0xff]  }
 0x1ad   : > { %4137 = vmatprep.subr.bf16.mxu0 %v5251_v14  ;;  %v5333_v14 = vld [vmem:[%s6141_s11 + $0x980] ss:$8 sps:$4 sm:$0xff]  }
 0x1af   : > { %3873 = vmatpush1.bf16.msra.mxu1 %v5246_v17  ;;  %v5336_v17 = vld [vmem:[%s6141_s11 + $0x490] ss:$8 sps:$4 sm:$0xff]  }
 0x1b0   : > { %4138 = vmatpush1.bf16.msra.mxu0 %v5249_v18  ;;  %3874 = vmatprep.subr.bf16.mxu1 %v5254_v19  ;;  %v5339_v18 = vld [vmem:[%s6141_s11 + $0x990] ss:$8 sps:$4 sm:$0xff]   ;;  %v5344_v19 = vld [vmem:[%s6141_s11 + $0x4a4] ss:$8 sps:$4 sm:$0xff]  }
 0x1b1   : > { %4139 = vmatprep.subr.bf16.mxu0 %v5257_v20  ;;  %v5347_v20 = vld [vmem:[%s6141_s11 + $0x9a4] ss:$8 sps:$4 sm:$0xff]  }
 0x1b3   : > { %3875 = vmatpush1.bf16.msra.mxu1 %v5252_v23  ;;  %v5350_v23 = vld [vmem:[%s6141_s11 + $0x4b4] ss:$8 sps:$4 sm:$0xff]  }
 0x1b4   : > { %4140 = vmatpush1.bf16.msra.mxu0 %v5255_v24  ;;  %3876 = vmatprep.subr.bf16.mxu1 %v5262_v25  ;;  %v5353_v24 = vld [vmem:[%s6141_s11 + $0x9b4] ss:$8 sps:$4 sm:$0xff]   ;;  %v5348_v25 = vld [vmem:[%s6141_s11 + $0x4b0] ss:$8 sps:$4 sm:$0xff]  }
 0x1b5   : > { %4141 = vmatprep.subr.bf16.mxu0 %v5267_v26  ;;  %v5351_v26 = vld [vmem:[%s6141_s11 + $0x9b0] ss:$8 sps:$4 sm:$0xff]  }
 0x1b7   : > { %3877 = vmatpush1.bf16.msra.mxu1 %v5260_v29  ;;  %v5354_v29 = vld [vmem:[%s6141_s11 + $0x4c0] ss:$8 sps:$4 sm:$0xff]  }
 0x1b8   : > { %4142 = vmatpush1.bf16.msra.mxu0 %v5265_v30  ;;  %3878 = vmatprep.subr.bf16.mxu1 %v5272_v31  ;;  %v5357_v30 = vld [vmem:[%s6141_s11 + $0x9c0] ss:$8 sps:$4 sm:$0xff]   ;;  %v5362_v31 = vld [vmem:[%s6141_s11 + $0x4d4] ss:$8 sps:$4 sm:$0xff]  }
 0x1b9   : > { %4143 = vmatprep.subr.bf16.mxu0 %v5275_v32  ;;  %v5365_v32 = vld [vmem:[%s6141_s11 + $0x9d4] ss:$8 sps:$4 sm:$0xff]  }
 0x1bb   : > { %3879 = vmatpush1.bf16.msra.mxu1 %v5270_v33  ;;  %v5360_v33 = vld [vmem:[%s6141_s11 + $0x4d0] ss:$8 sps:$4 sm:$0xff]  }
 0x1bc   : > { %4144 = vmatpush1.bf16.msra.mxu0 %v5273_v34  ;;  %3901 = vmatprep.subr.bf16.mxu1 %v5281_v35  ;;  %v5363_v34 = vld [vmem:[%s6141_s11 + $0x9d0] ss:$8 sps:$4 sm:$0xff]   ;;  %v5373_v35 = vld [vmem:[%s6141_s11 + $0x4e4] ss:$8 sps:$4 sm:$0xff]  }
 0x1bd   : > { %4166 = vmatprep.subr.bf16.mxu0 %v5287_v36  ;;  %v5377_v36 = vld [vmem:[%s6141_s11 + $0x9e4] ss:$8 sps:$4 sm:$0xff]  }
 0x1be   : > { %3881 = vmatmul.mubr.bf16.vlgmr.msra.gmra.mrb[0].mxu1 %v5276_v37  ;;  %v5371_v37 = vld [vmem:[%s6141_s11 + $0x4e0] ss:$8 sps:$4 sm:$0xff]  }
 0x1bf   : > { %4146 = vmatmul.mubr.bf16.vlgmr.msra.gmra.mrb[0].mxu0 %v5282_v38  ;;  %3902 = vmatpush1.bf16.msra.mxu1 %v5279_v39  ;;  %v5375_v38 = vld [vmem:[%s6141_s11 + $0x9e0] ss:$8 sps:$4 sm:$0xff]   ;;  %v5380_v39 = vld [vmem:[%s6141_s11 + $0x4f4] ss:$8 sps:$4 sm:$0xff]  }
 0x1c0   : > { %4167 = vmatpush1.bf16.msra.mxu0 %v5285_v40  ;;  %3903 = vmatprep.subr.bf16.mxu1 %v5290_v41  ;;  %v5383_v40 = vld [vmem:[%s6141_s11 + $0x9f4] ss:$8 sps:$4 sm:$0xff]   ;;  %v5378_v41 = vld [vmem:[%s6141_s11 + $0x4f0] ss:$8 sps:$4 sm:$0xff]  }
 0x1c1   : > { %4168 = vmatprep.subr.bf16.mxu0 %v5293_v42  ;;  %3890 = vmatprep.mubr.bf16.mxu1 %v5366_v43  ;;  %v5381_v42 = vld [vmem:[%s6141_s11 + $0x9f0] ss:$8 sps:$4 sm:$0xff]  }
 0x1c2   : > { %4155 = vmatprep.mubr.bf16.mxu0 %v5368_v44  ;;  %v5384_v43 = vld [vmem:[%s6638_s0 + $0x20] ss:$80 sps:$4 sm:$0xff]   ;;  %v5387_v44 = vld [vmem:[%s6638_s0 + $0x48] ss:$80 sps:$4 sm:$0xff]  }
 0x1c3   : > { %3904 = vmatpush1.bf16.msra.mxu1 %v5288_v45  ;;  %v5390_v45 = vld [vmem:[%s6638_s0 + $0xc4] ss:$80 sps:$4 sm:$0xff]  }
 0x1c4   : > { %4169 = vmatpush1.bf16.msra.mxu0 %v5291_v46  ;;  %3905 = vmatprep.subr.bf16.mxu1 %v5296_v47  ;;  %v5392_v46 = vld [vmem:[%s6638_s0 + $0xec] ss:$80 sps:$4 sm:$0xff]   ;;  %v5394_v47 = vld [vmem:[%s6638_s0 + $0xc0] ss:$80 sps:$4 sm:$0xff]  }
 0x1c5   : > { %4170 = vmatprep.subr.bf16.mxu0 %v5299_v48  ;;  %v5395_v48 = vld [vmem:[%s6638_s0 + $0xe8] ss:$80 sps:$4 sm:$0xff]  }
 0x1c6   : > { %3891 = vmatmul.mubr.bf16.gmra.mrb[4].mxu1 %v5370_v49 }
 0x1c7   : > { %4156 = vmatmul.mubr.bf16.gmra.mrb[4].mxu0 %v5374_v50  ;;  %3906 = vmatpush1.bf16.msra.mxu1 %v5294_v51 }
 0x1c8   : > { %4171 = vmatpush1.bf16.msra.mxu0 %v5297_v52  ;;  %3907 = vmatprep.subr.bf16.mxu1 %v5302_v53 }
 0x1c9   : > { %4172 = vmatprep.subr.bf16.mxu0 %v5305_v54  ;;  %3933 = vmatprep.mubr.bf16.mxu1 %v5386_v55 }
 0x1ca   : > { %4198 = vmatprep.mubr.bf16.mxu0 %v5389_v56 }
 0x1cb   : > { %3908 = vmatpush1.bf16.msra.mxu1 %v5300_v57 }
 0x1cc   : > { %4173 = vmatpush1.bf16.msra.mxu0 %v5303_v58  ;;  %3909 = vmatprep.subr.bf16.mxu1 %v5308_v59 }
 0x1cd   : > { %4174 = vmatprep.subr.bf16.mxu0 %v5311_v60 }
 0x1cf   : > { %3910 = vmatpush1.bf16.msra.mxu1 %v5306_v61 }
 0x1d0   : > { %4175 = vmatpush1.bf16.msra.mxu0 %v5309_v62  ;;  %3911 = vmatprep.subr.bf16.mxu1 %v5314_v63 }
 0x1d1   : > { %4176 = vmatprep.subr.bf16.mxu0 %v5317_v0 }
 0x1d3   : > { %3912 = vmatpush1.bf16.msra.mxu1 %v5312_v1 }
 0x1d4   : > { %4177 = vmatpush1.bf16.msra.mxu0 %v5315_v2  ;;  %3913 = vmatprep.subr.bf16.mxu1 %v5320_v3 }
 0x1d5   : > { %4178 = vmatprep.subr.bf16.mxu0 %v5323_v4 }
 0x1d7   : > { %3914 = vmatpush1.bf16.msra.mxu1 %v5318_v5 }
 0x1d8   : > { %4179 = vmatpush1.bf16.msra.mxu0 %v5321_v6  ;;  %3915 = vmatprep.subr.bf16.mxu1 %v5326_v7 }
 0x1d9   : > { %4180 = vmatprep.subr.bf16.mxu0 %v5329_v8 }
 0x1db   : > { %3916 = vmatpush1.bf16.msra.mxu1 %v5324_v9 }
 0x1dc   : > { %4181 = vmatpush1.bf16.msra.mxu0 %v5327_v10  ;;  %3917 = vmatprep.subr.bf16.mxu1 %v5332_v11 }
 0x1dd   : > { %4182 = vmatprep.subr.bf16.mxu0 %v5335_v12 }
 0x1df   : > { %3918 = vmatpush1.bf16.msra.mxu1 %v5330_v13 }
 0x1e0   : > { %4183 = vmatpush1.bf16.msra.mxu0 %v5333_v14  ;;  %3919 = vmatprep.subr.bf16.mxu1 %v5338_v15 }
 0x1e1   : > { %4184 = vmatprep.subr.bf16.mxu0 %v5341_v16 }
 0x1e3   : > { %3920 = vmatpush1.bf16.msra.mxu1 %v5336_v17 }
 0x1e4   : > { %4185 = vmatpush1.bf16.msra.mxu0 %v5339_v18  ;;  %3921 = vmatprep.subr.bf16.mxu1 %v5344_v19 }
 0x1e5   : > { %4186 = vmatprep.subr.bf16.mxu0 %v5347_v20 }
 0x1e7   : > { %3922 = vmatpush1.bf16.msra.mxu1 %v5342_v21 }
 0x1e8   : > { %4187 = vmatpush1.bf16.msra.mxu0 %v5345_v22  ;;  %3923 = vmatprep.subr.bf16.mxu1 %v5350_v23 }
 0x1e9   : > { %4188 = vmatprep.subr.bf16.mxu0 %v5353_v24 }
 0x1eb   : > { %3924 = vmatpush1.bf16.msra.mxu1 %v5348_v25 }
 0x1ec   : > { %4189 = vmatpush1.bf16.msra.mxu0 %v5351_v26  ;;  %3925 = vmatprep.subr.bf16.mxu1 %v5356_v27 }
 0x1ed   : > { %4190 = vmatprep.subr.bf16.mxu0 %v5359_v28 }
 0x1ef   : > { %3926 = vmatpush1.bf16.msra.mxu1 %v5354_v29 }
 0x1f0   : > { %4191 = vmatpush1.bf16.msra.mxu0 %v5357_v30  ;;  %3927 = vmatprep.subr.bf16.mxu1 %v5362_v31 }
 0x1f1   : > { %4192 = vmatprep.subr.bf16.mxu0 %v5365_v32 }
 0x1f3   : > { %3928 = vmatpush1.bf16.msra.mxu1 %v5360_v33 }
 0x1f4   : > { %4193 = vmatpush1.bf16.msra.mxu0 %v5363_v34  ;;  %3929 = vmatprep.subr.bf16.mxu1 %v5373_v35 }
 0x1f5   : > { %4194 = vmatprep.subr.bf16.mxu0 %v5377_v36 }
 0x1f6   : > { %v1882_v50 = vpop.permute.xlu1 %1881 }
 0x1f7   : > { %3930 = vmatpush1.bf16.msra.mxu1 %v5371_v37 }
 0x1f8   : > { %4195 = vmatpush1.bf16.msra.mxu0 %v5375_v38  ;;  %3931 = vmatprep.subr.bf16.mxu1 %v5380_v39  ;;  %v1872_v49 = vpop.permute.xlu0 %1871 }
 0x1f9   : > { %4196 = vmatprep.subr.bf16.mxu0 %v5383_v40 }
 0x1fa   : > { %v1887_v52 = vpop.permute.xlu1 %1886 }
 0x1fb   : > { %3932 = vmatpush1.bf16.msra.mxu1 %v5378_v41 }
 0x1fc   : > { %4197 = vmatpush1.bf16.msra.mxu0 %v5381_v42  ;;  %v1877_v51 = vpop.permute.xlu0 %1876 }
 0x1fe   : > { %3934 = vmatmul.mubr.bf16.vlgmr.msra.gmra.mrb[0].mxu1 %v5384_v43 }
 0x1ff   : > { %4199 = vmatmul.mubr.bf16.vlgmr.msra.gmra.mrb[0].mxu0 %v5387_v44  ;;  %3943 = vmatprep.mubr.bf16.mxu1 %v5390_v45 }
 0x200   : > { %4208 = vmatprep.mubr.bf16.mxu0 %v5392_v46 }
 0x201   : > { %v4239_v6 = vpop.permute.xlu1 %4238 }
 0x202   : > { %v4234_v1 = vpop.permute.xlu0 %4233 }
 0x205   : > { %v4249_v32 = vpop.permute.xlu1 %4248 }
 0x206   : > { %3944 = vmatmul.mubr.bf16.gmra.mrb[4].mxu1 %v5394_v47 }
 0x207   : > { %4209 = vmatmul.mubr.bf16.gmra.mrb[4].mxu0 %v5395_v48 }
 0x209   : > { %v4244_v27 = vpop.permute.xlu0 %4243 }
 0x2d1   : > { %v3935_v53 = vpop.f32.mrb[0].mxu1 }
 0x2d2   : > { %v4200_v54 = vpop.f32.mrb[0].mxu0  ;;  %v4747_v55 = vadd.f32 %v3935_v53, %v1872_v49  ;;  %v3937_v56 = vpop.f32.mrb[1].mxu1 }
 0x2d3   : > { %v4202_v57 = vpop.f32.mrb[1].mxu0  ;;  %v4749_v58 = vadd.f32 %v3937_v56, %v1872_v49  ;;  %v3939_v59 = vpop.f32.mrb[2].mxu1 }
 0x2d4   : > { %v4204_v60 = vpop.f32.mrb[2].mxu0  ;;  %v4748_v61 = vadd.f32 %v4747_v55, %v4200_v54  ;;  %v4751_v62 = vadd.f32 %v3939_v59, %v1877_v51  ;;  %v3941_v63 = vpop.f32.mrb[3].mxu1 }
 0x2d5   : > { %v4206_v0 = vpop.f32.mrb[3].mxu0  ;;  %v4750_v2 = vadd.f32 %v4749_v58, %v4202_v57  ;;  %v4753_v3 = vadd.f32 %v3941_v63, %v1877_v51 }
 0x2d6   : > { %vm4219_vm0 = vcmp.ge.f32.partialorder %v4748_v61, 0.0  ;;  %v4251_v4 = vmul.f32 %v4748_v61, %v4234_v1  ;;  %v4752_v5 = vadd.f32 %v4751_v62, %v4204_v60 }
 0x2d7   : > { %vm4220_vm1 = vcmp.ge.f32.partialorder %v4750_v2, 0.0  ;;  %v4252_v7 = vmul.f32 %v4750_v2, %v4234_v1  ;;  %v4754_v8 = vadd.f32 %v4753_v3, %v4206_v0 }
 0x2d8   : > { %v4259_v9 = vsel %vm4219_vm0, %v4748_v61, %v4251_v4  ;;  %vm4221_vm2 = vcmp.ge.f32.partialorder %v4752_v5, 0.0  ;;  %v4253_v10 = vmul.f32 %v4752_v5, %v4239_v6 }
 0x2d9   : > { %4267 = vst [vmem:[%s6603_s15] sm:$0xff] %v4259_v9  ;;  %v4260_v11 = vsel %vm4220_vm1, %v4750_v2, %v4252_v7  ;;  %vm4222_vm3 = vcmp.ge.f32.partialorder %v4754_v8, 0.0  ;;  %v4254_v12 = vmul.f32 %v4754_v8, %v4239_v6  ;;  %v3945_v13 = vpop.f32.mrb[4].mxu1 }
 0x2da   : > { %v4210_v14 = vpop.f32.mrb[4].mxu0  ;;  %4268 = vst [vmem:[%s6603_s15 + $0x8] sm:$0xff] %v4260_v11  ;;  %v4261_v15 = vsel %vm4221_vm2, %v4752_v5, %v4253_v10  ;;  %v4755_v16 = vadd.f32 %v3945_v13, %v1882_v50  ;;  %v3947_v17 = vpop.f32.mrb[5].mxu1 }
 0x2db   : > { %v4212_v18 = vpop.f32.mrb[5].mxu0  ;;  %4269 = vst [vmem:[%s6603_s15 + $0x10] sm:$0xff] %v4261_v15  ;;  %v4262_v19 = vsel %vm4222_vm3, %v4754_v8, %v4254_v12  ;;  %v4757_v20 = vadd.f32 %v3947_v17, %v1882_v50  ;;  %v3949_v21 = vpop.f32.mrb[6].mxu1 }
 0x2dc   : > { %v4214_v22 = vpop.f32.mrb[6].mxu0  ;;  %4270 = vst [vmem:[%s6603_s15 + $0x18] sm:$0xff] %v4262_v19  ;;  %v4756_v23 = vadd.f32 %v4755_v16, %v4210_v14  ;;  %v4759_v24 = vadd.f32 %v3949_v21, %v1887_v52  ;;  %v3951_v25 = vpop.f32.mrb[7].mxu1 }
 0x2dd   : > { %v4216_v26 = vpop.f32.mrb[7].mxu0  ;;  %v4758_v28 = vadd.f32 %v4757_v20, %v4212_v18  ;;  %v4761_v29 = vadd.f32 %v3951_v25, %v1887_v52 }
 0x2de   : > { %vm4223_vm4 = vcmp.ge.f32.partialorder %v4756_v23, 0.0  ;;  %v4255_v30 = vmul.f32 %v4756_v23, %v4244_v27  ;;  %v4760_v31 = vadd.f32 %v4759_v24, %v4214_v22  ;;  %4281 = sbr.rel (!%p5476_p5) target bundleno = 749 (0x2ed), region = 78 }
 0x2df   : > { %vm4224_vm5 = vcmp.ge.f32.partialorder %v4758_v28, 0.0  ;;  %v4256_v33 = vmul.f32 %v4758_v28, %v4244_v27  ;;  %v4762_v34 = vadd.f32 %v4761_v29, %v4216_v26 }
 0x2e0   : > { %v4263_v35 = vsel %vm4223_vm4, %v4756_v23, %v4255_v30  ;;  %vm4225_vm6 = vcmp.ge.f32.partialorder %v4760_v31, 0.0  ;;  %v4257_v36 = vmul.f32 %v4760_v31, %v4249_v32  ;;  %v4297_v41 = vld [vmem:[%s6603_s15] sm:$0xff] (%p5476_p5) }
 0x2e1   : > { %4271 = vst [vmem:[%s6603_s15 + $0x20] sm:$0xff] %v4263_v35  ;;  %v4264_v37 = vsel %vm4224_vm5, %v4758_v28, %v4256_v33  ;;  %vm4226_vm7 = vcmp.ge.f32.partialorder %v4762_v34, 0.0  ;;  %v4258_v38 = vmul.f32 %v4762_v34, %v4249_v32  ;;  %v4299_v42 = vld [vmem:[%s6603_s15 + $0x8] sm:$0xff] (%p5476_p5)  ;;  %4298 = vst [vmem:[%s4284_s28] sm:$0xff] (%p5476_p5), %v4297_v41 }
 0x2e2   : > { %4272 = vst [vmem:[%s6603_s15 + $0x28] sm:$0xff] %v4264_v37  ;;  %v4265_v39 = vsel %vm4225_vm6, %v4760_v31, %v4257_v36  ;;  %v4301_v43 = vld [vmem:[%s6603_s15 + $0x10] sm:$0xff] (%p5476_p5)  ;;  %4300 = vst [vmem:[%s4284_s28 + $0x8] sm:$0xff] (%p5476_p5), %v4299_v42 }
 0x2e3   : > { %4273 = vst [vmem:[%s6603_s15 + $0x30] sm:$0xff] %v4265_v39  ;;  %v4266_v40 = vsel %vm4226_vm7, %v4762_v34, %v4258_v38  ;;  %v4303_v44 = vld [vmem:[%s6603_s15 + $0x18] sm:$0xff] (%p5476_p5)  ;;  %4302 = vst [vmem:[%s4284_s28 + $0x20] sm:$0xff] (%p5476_p5), %v4301_v43 }
 0x2e4   : > { %4274 = vst [vmem:[%s6603_s15 + $0x38] sm:$0xff] %v4266_v40  ;;  %4304 = vst [vmem:[%s4284_s28 + $0x28] sm:$0xff] (%p5476_p5), %v4303_v44 }
 0x2e8   : > { %v4305_v45 = vld [vmem:[%s6603_s15 + $0x20] sm:$0xff] }
 0x2e9   : > { %v4307_v46 = vld [vmem:[%s6603_s15 + $0x28] sm:$0xff]  ;;  %4306 = vst [vmem:[%s4284_s28 + $0x40] sm:$0xff] %v4305_v45 }
 0x2ea   : > { %4308 = vst [vmem:[%s4284_s28 + $0x48] sm:$0xff] %v4307_v46  ;;  %v4309_v47 = vld [vmem:[%s6603_s15 + $0x30] sm:$0xff] }
 0x2eb   : > { %v4311_v48 = vld [vmem:[%s6603_s15 + $0x38] sm:$0xff]  ;;  %4310 = vst [vmem:[%s4284_s28 + $0x60] sm:$0xff] %v4309_v47 }
 0x2ec   : > { %4312 = vst [vmem:[%s4284_s28 + $0x68] sm:$0xff] %v4311_v48 }
 0x2ed PF: > { %p11_p10 = scmp.ge.s32.totalorder %s5463_s19, 4   ;;  %s6644_s15 = smov %s5414_s16 }
 0x2ee   : > { %s6645_s16 = smov %s5474_s22  ;;  %s6646_s17 = smov %s5463_s19 }
 0x2ef   :  { %13 = sbr.rel (!%p11_p10) target bundleno = 2 (0x2), region = 132 }

// kernel: crcnet_forward.49
= control target key start
LH: loop header
LB: loop body
LE: loop exit
PB: predicated region body
PF: predicated region fallthrough
CT: control target
= control target key end

     0   :  { %s602_s12 = smov 0   ;;  %s604_s13 = smov 0   ;;  %s678_s0 = inlined_call_operand.vmem [shape: bf16[8,128], index: 0, kind: input, shape index: {}]   ;;  %s679_s1 = inlined_call_operand.vmem [shape: f32[8,1], index: 1, kind: input, shape index: {}]   ;;  %s680_s2 = inlined_call_operand.vmem [shape: bf16[128,512], index: 2, kind: input, shape index: {}]   ;;  %s681_s3 = inlined_call_operand.vmem [shape: f32[8,512], index: 3, kind: output, shape index: {}]  }
   0x1   :  { %s606_s14 = smov 0  }
   0x2 LB: > { %s477_s15 = sadd.s32 4294967295, %s579_s14   ;;  %s619_s16 = sadd.s32 1, %s579_s14   ;;  %s579_s14 = sphi %s606_s14, %s684_s14   ;;  %s575_s13 = sphi %s604_s13, %s683_s13   ;;  %s571_s12 = sphi %s602_s12, %s682_s12  }
   0x3   : > { %s59_s17 = ssub.s32 %s579_s14, %s619_s16  ;;  %s62_s18 = sadd.s32 1, %s575_s13 }
   0x4   : > { %p60_p0 = scmp.eq.s32.totalorder %s59_s17, 0  ;;  %p69_p1 = scmp.ne.s32.totalorder %s575_s13, %s571_s12 }
   0x5   : > { %p70_p2 = scmp.eq.s32.totalorder %s579_s14, 0  ;;  %p480_p4 = scmp.ge.s32.totalorder %s579_s14, 2 }
   0x6   : > { %s628_s19 = scalar_select %p60_p0, %s575_s13, %s62_s18  }
   0x7   : > { %p71_p3 = por %p70_p2, %p69_p1  ;;  %127 = sbr.rel (%p480_p4) target bundleno = 26 (0x1a), region = 24 }
   0xe   : > { %130 = sbr.rel (!%p71_p3) target bundleno = 26 (0x1a), region = 28  ;;  %s132_s20 = sand.u32 (%p71_p3), 1, %s575_s13  }
   0xf   : > { %s506_s21 = sshll.u32 (%p71_p3), %s579_s14, 3  ;;  %s481_s22 = sshll.u32 (%p71_p3), %s132_s20, 7 }
  0x10   : > { %s636_s25 = scalar_lea.vmem (%p71_p3), %s680_s2, %s506_s21  ;;  %s134_s26 = scalar_lea.vmem (%p71_p3), [#allocation2], %s481_s22 }
  0x11   : > { %v195_v0 = vld [vmem:[%s636_s25] sm:$0xff] (%p71_p3)  ;;  %v197_v1 = vld [vmem:[%s636_s25 + $0x10] sm:$0xff] (%p71_p3) }
  0x12   : > { %v199_v2 = vld [vmem:[%s636_s25 + $0x20] sm:$0xff] (%p71_p3)  ;;  %196 = vst [vmem:[%s134_s26] sm:$0xff] (%p71_p3), %v195_v0  ;;  %198 = vst [vmem:[%s134_s26 + $0x8] sm:$0xff] (%p71_p3), %v197_v1  ;;  %v201_v3 = vld [vmem:[%s636_s25 + $0x30] sm:$0xff] (%p71_p3) }
  0x13   : > { %200 = vst [vmem:[%s134_s26 + $0x10] sm:$0xff] (%p71_p3), %v199_v2  ;;  %v203_v4 = vld [vmem:[%s636_s25 + $0x40] sm:$0xff] (%p71_p3)  ;;  %v205_v5 = vld [vmem:[%s636_s25 + $0x50] sm:$0xff] (%p71_p3)  ;;  %202 = vst [vmem:[%s134_s26 + $0x18] sm:$0xff] (%p71_p3), %v201_v3 }
  0x14   : > { %204 = vst [vmem:[%s134_s26 + $0x20] sm:$0xff] (%p71_p3), %v203_v4  ;;  %206 = vst [vmem:[%s134_s26 + $0x28] sm:$0xff] (%p71_p3), %v205_v5  ;;  %v207_v6 = vld [vmem:[%s636_s25 + $0x60] sm:$0xff] (%p71_p3)  ;;  %v209_v7 = vld [vmem:[%s636_s25 + $0x70] sm:$0xff] (%p71_p3) }
  0x15   : > { %v211_v8 = vld [vmem:[%s636_s25 + $0x80] sm:$0xff]  ;;  %208 = vst [vmem:[%s134_s26 + $0x30] sm:$0xff] %v207_v6  ;;  %210 = vst [vmem:[%s134_s26 + $0x38] sm:$0xff] %v209_v7  ;;  %v213_v9 = vld [vmem:[%s636_s25 + $0x90] sm:$0xff] }
  0x16   : > { %212 = vst [vmem:[%s134_s26 + $0x40] sm:$0xff] %v211_v8  ;;  %v215_v10 = vld [vmem:[%s636_s25 + $0xa0] sm:$0xff]  ;;  %v217_v11 = vld [vmem:[%s636_s25 + $0xb0] sm:$0xff]  ;;  %214 = vst [vmem:[%s134_s26 + $0x48] sm:$0xff] %v213_v9 }
  0x17   : > { %216 = vst [vmem:[%s134_s26 + $0x50] sm:$0xff] %v215_v10  ;;  %218 = vst [vmem:[%s134_s26 + $0x58] sm:$0xff] %v217_v11  ;;  %v219_v12 = vld [vmem:[%s636_s25 + $0xc0] sm:$0xff]  ;;  %v221_v13 = vld [vmem:[%s636_s25 + $0xd0] sm:$0xff] }
  0x18   : > { %v223_v14 = vld [vmem:[%s636_s25 + $0xe0] sm:$0xff]  ;;  %220 = vst [vmem:[%s134_s26 + $0x60] sm:$0xff] %v219_v12  ;;  %222 = vst [vmem:[%s134_s26 + $0x68] sm:$0xff] %v221_v13  ;;  %v225_v15 = vld [vmem:[%s636_s25 + $0xf0] sm:$0xff] }
  0x19   : > { %224 = vst [vmem:[%s134_s26 + $0x70] sm:$0xff] %v223_v14  ;;  %226 = vst [vmem:[%s134_s26 + $0x78] sm:$0xff] %v225_v15 }
  0x1a PF: > { %p484_p5 = scmp.ge.s32.totalorder %s579_s14, 1  ;;  %p231_p6 = scmp.lt.s32.totalorder %s579_s14, 3 }
  0x1c   : > { %p232_p7 = pnand %p484_p5, %p231_p6 }
  0x1d   : > { %s238_s27 = sand.u32 (!%p232_p7), 1, %s571_s12   ;;  %v286_v16 = vld [vmem:[%s679_s1] sm:$0xff] (!%p232_p7)  ;;  %v581_v17 = vmov (!%p232_p7), 0   ;;  %s486_s7 = sshll.u32 (!%p232_p7), %s477_s15, 1 }
  0x1e   : > { %235 = sbr.rel (%p232_p7) target bundleno = 281 (0x119), region = 66  ;;  %s485_s30 = sshll.u32 (!%p232_p7), %s238_s27, 7  ;;  %404 = vmatprep.mubr.bf16.mxu0 (!%p232_p7), %v581_v17  ;;  %532 = vset.pattern.permute.xlu0 (!%p232_p7), %v581_v17  ;;  %v269_v34 = vld [vmem:[%s678_s0] sm:$0xf] (!%p232_p7) }
  0x1f   : > { %289 = vperm.xlu0 (!%p232_p7), %532, %v286_v16   ;;  %s240_s4 = scalar_lea.vmem (!%p232_p7), [#allocation2], %s485_s30  ;;  %p263_p8 = scmp.lt.s32.totalorder (!%p232_p7), %s486_s7, 3 }
  0x20   : > { %v533_v18 = vld [vmem:[%s240_s4 + $0x4] ss:$8 sps:$4 sm:$0xff] (!%p232_p7)   ;;  %v535_v19 = vld [vmem:[%s240_s4] ss:$8 sps:$4 sm:$0xff] (!%p232_p7)   ;;  %v536_v20 = vld [vmem:[%s240_s4 + $0x14] ss:$8 sps:$4 sm:$0xff] (!%p232_p7)  }
  0x21   : > { %372 = vmatprep.subr.bf16.mxu0 (!%p232_p7), %v533_v18  ;;  %v538_v21 = vld [vmem:[%s240_s4 + $0x10] ss:$8 sps:$4 sm:$0xff] (!%p232_p7)   ;;  %v539_v22 = vld [vmem:[%s240_s4 + $0x24] ss:$8 sps:$4 sm:$0xff] (!%p232_p7)   ;;  %v541_v23 = vld [vmem:[%s240_s4 + $0x20] ss:$8 sps:$4 sm:$0xff] (!%p232_p7)  }
  0x22   : > { %373 = vmatpush1.bf16.msra.mxu0 (!%p232_p7), %v535_v19  ;;  %v542_v24 = vld [vmem:[%s240_s4 + $0x34] ss:$8 sps:$4 sm:$0xff] (!%p232_p7)   ;;  %v544_v25 = vld [vmem:[%s240_s4 + $0x30] ss:$8 sps:$4 sm:$0xff] (!%p232_p7)   ;;  %v545_v26 = vld [vmem:[%s240_s4 + $0x44] ss:$8 sps:$4 sm:$0xff] (!%p232_p7)  }
  0x23   : > { %374 = vmatprep.subr.bf16.mxu0 (!%p232_p7), %v536_v20  ;;  %v547_v27 = vld [vmem:[%s240_s4 + $0x40] ss:$8 sps:$4 sm:$0xff] (!%p232_p7)   ;;  %v548_v28 = vld [vmem:[%s240_s4 + $0x54] ss:$8 sps:$4 sm:$0xff] (!%p232_p7)   ;;  %v550_v29 = vld [vmem:[%s240_s4 + $0x50] ss:$8 sps:$4 sm:$0xff] (!%p232_p7)  }
  0x24   : > { %v551_v30 = vld [vmem:[%s240_s4 + $0x64] ss:$8 sps:$4 sm:$0xff] (!%p232_p7)   ;;  %v553_v31 = vld [vmem:[%s240_s4 + $0x60] ss:$8 sps:$4 sm:$0xff] (!%p232_p7)   ;;  %v554_v32 = vld [vmem:[%s240_s4 + $0x74] ss:$8 sps:$4 sm:$0xff] (!%p232_p7)  }
  0x25   : > { %v556_v33 = vld [vmem:[%s240_s4 + $0x70] ss:$8 sps:$4 sm:$0xff]   ;;  %s686_s7 = smov (!%p263_p8, %s486_s7), 3 }
  0x26   : > { %375 = vmatpush1.bf16.msra.mxu0 %v538_v21  ;;  %s487_s8 = sshll.u32 %s686_s7, 3 }
  0x27   : > { %376 = vmatprep.subr.bf16.mxu0 %v539_v22  ;;  %s266_s11 = scalar_lea.vmem %s681_s3, %s487_s8 }
  0x2a   : > { %377 = vmatpush1.bf16.msra.mxu0 %v541_v23 }
  0x2b   : > { %378 = vmatprep.subr.bf16.mxu0 %v542_v24 }
  0x2e   : > { %379 = vmatpush1.bf16.msra.mxu0 %v544_v25 }
  0x2f   : > { %380 = vmatprep.subr.bf16.mxu0 %v545_v26 }
  0x32   : > { %381 = vmatpush1.bf16.msra.mxu0 %v547_v27 }
  0x33   : > { %382 = vmatprep.subr.bf16.mxu0 %v548_v28 }
  0x36   : > { %383 = vmatpush1.bf16.msra.mxu0 %v550_v29 }
  0x37   : > { %384 = vmatprep.subr.bf16.mxu0 %v551_v30 }
  0x3a   : > { %385 = vmatpush1.bf16.msra.mxu0 %v553_v31 }
  0x3b   : > { %386 = vmatprep.subr.bf16.mxu0 %v554_v32 }
  0x3e   : > { %387 = vmatpush1.bf16.msra.mxu0 %v556_v33 }
  0x41   : > { %405 = vmatmul.mubr.bf16.vlgmr.msra.gmra.mrb[0].mxu0 %v269_v34 }
  0x9e   : > { %v290_v35 = vpop.permute.xlu0 %289 }
 0x114   : > { %v406_v36 = vpop.f32.mrb[0].mxu0 }
 0x115   : > { %v407_v37 = vadd.f32 %v406_v36, %v290_v35  ;;  %v408_v38 = vpop.f32.mrb[1].mxu0 }
 0x116   : > { %v409_v39 = vadd.f32 %v408_v38, %v290_v35  ;;  %v410_v40 = vpop.f32.mrb[2].mxu0 }
 0x117   : > { %413 = vst [vmem:[%s266_s11] sm:$0xff] %v407_v37  ;;  %v411_v41 = vpop.f32.mrb[3].mxu0 }
 0x118   : > { %414 = vst [vmem:[%s266_s11 + $0x8] sm:$0xff] %v409_v39 }
 0x119 PF: > { %p10_p9 = scmp.ge.s32.totalorder %s619_s16, 4   ;;  %s682_s12 = smov %s575_s13 }
 0x11a   : > { %s683_s13 = smov %s628_s19  ;;  %s684_s14 = smov %s619_s16 }
 0x11b   :  { %12 = sbr.rel (!%p10_p9) target bundleno = 2 (0x2), region = 105 }

// kernel: crcnet_forward.48
= control target key start
LH: loop header
LB: loop body
LE: loop exit
PB: predicated region body
PF: predicated region fallthrough
CT: control target
= control target key end

     0   :  { %s2768_s15 = smov 0   ;;  %s2770_s16 = smov 0   ;;  %s3360_s0 = inlined_call_operand.vmem [shape: bf16[16,1280], index: 0, kind: input, shape index: {}]   ;;  %s3361_s1 = inlined_call_operand.vmem [shape: f32[16,1], index: 1, kind: input, shape index: {}]   ;;  %s3362_s2 = inlined_call_operand.vmem [shape: f32[16,1], index: 2, kind: input, shape index: {}]   ;;  %s3363_s3 = inlined_call_operand.vmem [shape: bf16[1280,512], index: 3, kind: input, shape index: {}]   ;;  %s3364_s4 = inlined_call_operand.vmem [shape: f32[16,512], index: 4, kind: output, shape index: {}]  }
   0x1   :  { %s2772_s17 = smov 0  }
   0x2 LB: > { %s2229_s18 = sadd.s32 4294967295, %s2740_s17   ;;  %s2785_s19 = sadd.s32 1, %s2740_s17   ;;  %s2740_s17 = sphi %s2772_s17, %s3368_s17   ;;  %s2736_s16 = sphi %s2770_s16, %s3367_s16   ;;  %s2732_s15 = sphi %s2768_s15, %s3366_s15  }
   0x3   : > { %s81_s20 = ssub.s32 %s2740_s17, %s2785_s19  ;;  %s84_s21 = sadd.s32 1, %s2736_s16 }
   0x4   : > { %p82_p0 = scmp.eq.s32.totalorder %s81_s20, 0  ;;  %p91_p1 = scmp.ne.s32.totalorder %s2736_s16, %s2732_s15 }
   0x5   : > { %p92_p2 = scmp.eq.s32.totalorder %s2740_s17, 0  ;;  %p121_p3 = scmp.eq.s32.totalorder %s2229_s18, 1 }
   0x6   : > { %s2796_s22 = scalar_select %p82_p0, %s2736_s16, %s84_s21  }
   0x7   : > { %p93_p4 = por %p92_p2, %p91_p1  ;;  %p2798_p5 = por %p121_p3, %p91_p1 }
   0x8   : > { %p2232_p6 = scmp.ge.s32.totalorder %s2740_s17, 2 }
   0xa   : > { %152 = sbr.rel (%p2232_p6) target bundleno = 101 (0x65), region = 28 }
  0x11   : > { %155 = sbr.rel (!%p93_p4) target bundleno = 101 (0x65), region = 32  ;;  %s157_s24 = sand.u32 (%p93_p4), 1, %s2736_s16  }
  0x12   : > { %s2412_s25 = sshll.u32 (%p93_p4), %s2740_s17, 3  ;;  %s2434_s26 = smul.u32 (%p93_p4), 1280, %s157_s24 }
  0x13   : > { %s2808_s29 = scalar_lea.vmem (%p93_p4), %s3363_s3, %s2412_s25 }
  0x14   : > { %v508_v0 = vld [vmem:[%s2808_s29] sm:$0xff] (%p93_p4)  ;;  %v510_v1 = vld [vmem:[%s2808_s29 + $0x10] sm:$0xff] (%p93_p4)  ;;  %s2816_s30 = scalar_lea.vmem (%p93_p4), [#allocation2], %s2434_s26 }
  0x15   : > { %v512_v2 = vld [vmem:[%s2808_s29 + $0x20] sm:$0xff] (%p93_p4)  ;;  %v514_v3 = vld [vmem:[%s2808_s29 + $0x30] sm:$0xff] (%p93_p4)  ;;  %509 = vst [vmem:[%s2816_s30] sm:$0xff] (%p93_p4), %v508_v0  ;;  %511 = vst [vmem:[%s2816_s30 + $0x8] sm:$0xff] (%p93_p4), %v510_v1 }
  0x16   : > { %v516_v4 = vld [vmem:[%s2808_s29 + $0x40] sm:$0xff] (%p93_p4)  ;;  %v518_v5 = vld [vmem:[%s2808_s29 + $0x50] sm:$0xff] (%p93_p4)  ;;  %513 = vst [vmem:[%s2816_s30 + $0x10] sm:$0xff] (%p93_p4), %v512_v2  ;;  %515 = vst [vmem:[%s2816_s30 + $0x18] sm:$0xff] (%p93_p4), %v514_v3 }
  0x17   : > { %517 = vst [vmem:[%s2816_s30 + $0x20] sm:$0xff] (%p93_p4), %v516_v4  ;;  %519 = vst [vmem:[%s2816_s30 + $0x28] sm:$0xff] (%p93_p4), %v518_v5  ;;  %v520_v6 = vld [vmem:[%s2808_s29 + $0x60] sm:$0xff] (%p93_p4)  ;;  %v522_v7 = vld [vmem:[%s2808_s29 + $0x70] sm:$0xff] (%p93_p4) }
  0x18   : > { %v524_v8 = vld [vmem:[%s2808_s29 + $0x80] sm:$0xff]  ;;  %521 = vst [vmem:[%s2816_s30 + $0x30] sm:$0xff] %v520_v6  ;;  %523 = vst [vmem:[%s2816_s30 + $0x38] sm:$0xff] %v522_v7  ;;  %v526_v9 = vld [vmem:[%s2808_s29 + $0x90] sm:$0xff] }
  0x19   : > { %525 = vst [vmem:[%s2816_s30 + $0x40] sm:$0xff] %v524_v8  ;;  %v528_v10 = vld [vmem:[%s2808_s29 + $0xa0] sm:$0xff]  ;;  %v530_v11 = vld [vmem:[%s2808_s29 + $0xb0] sm:$0xff]  ;;  %527 = vst [vmem:[%s2816_s30 + $0x48] sm:$0xff] %v526_v9 }
  0x1a   : > { %529 = vst [vmem:[%s2816_s30 + $0x50] sm:$0xff] %v528_v10  ;;  %531 = vst [vmem:[%s2816_s30 + $0x58] sm:$0xff] %v530_v11  ;;  %v532_v12 = vld [vmem:[%s2808_s29 + $0xc0] sm:$0xff]  ;;  %v534_v13 = vld [vmem:[%s2808_s29 + $0xd0] sm:$0xff] }
  0x1b   : > { %v536_v14 = vld [vmem:[%s2808_s29 + $0xe0] sm:$0xff]  ;;  %533 = vst [vmem:[%s2816_s30 + $0x60] sm:$0xff] %v532_v12  ;;  %535 = vst [vmem:[%s2816_s30 + $0x68] sm:$0xff] %v534_v13  ;;  %v538_v15 = vld [vmem:[%s2808_s29 + $0xf0] sm:$0xff] }
  0x1c   : > { %537 = vst [vmem:[%s2816_s30 + $0x70] sm:$0xff] %v536_v14  ;;  %v540_v16 = vld [vmem:[%s2808_s29 + $0x100] sm:$0xff]  ;;  %v542_v17 = vld [vmem:[%s2808_s29 + $0x110] sm:$0xff]  ;;  %539 = vst [vmem:[%s2816_s30 + $0x78] sm:$0xff] %v538_v15 }
  0x1d   : > { %541 = vst [vmem:[%s2816_s30 + $0x80] sm:$0xff] %v540_v16  ;;  %543 = vst [vmem:[%s2816_s30 + $0x88] sm:$0xff] %v542_v17  ;;  %v544_v18 = vld [vmem:[%s2808_s29 + $0x120] sm:$0xff]  ;;  %v546_v19 = vld [vmem:[%s2808_s29 + $0x130] sm:$0xff] }
  0x1e   : > { %v548_v20 = vld [vmem:[%s2808_s29 + $0x140] sm:$0xff]  ;;  %545 = vst [vmem:[%s2816_s30 + $0x90] sm:$0xff] %v544_v18  ;;  %547 = vst [vmem:[%s2816_s30 + $0x98] sm:$0xff] %v546_v19  ;;  %v550_v21 = vld [vmem:[%s2808_s29 + $0x150] sm:$0xff] }
  0x1f   : > { %549 = vst [vmem:[%s2816_s30 + $0xa0] sm:$0xff] %v548_v20  ;;  %v552_v22 = vld [vmem:[%s2808_s29 + $0x160] sm:$0xff]  ;;  %v554_v23 = vld [vmem:[%s2808_s29 + $0x170] sm:$0xff]  ;;  %551 = vst [vmem:[%s2816_s30 + $0xa8] sm:$0xff] %v550_v21 }
  0x20   : > { %553 = vst [vmem:[%s2816_s30 + $0xb0] sm:$0xff] %v552_v22  ;;  %555 = vst [vmem:[%s2816_s30 + $0xb8] sm:$0xff] %v554_v23  ;;  %v556_v24 = vld [vmem:[%s2808_s29 + $0x180] sm:$0xff]  ;;  %v558_v25 = vld [vmem:[%s2808_s29 + $0x190] sm:$0xff] }
  0x21   : > { %v560_v26 = vld [vmem:[%s2808_s29 + $0x1a0] sm:$0xff]  ;;  %557 = vst [vmem:[%s2816_s30 + $0xc0] sm:$0xff] %v556_v24  ;;  %559 = vst [vmem:[%s2816_s30 + $0xc8] sm:$0xff] %v558_v25  ;;  %v562_v27 = vld [vmem:[%s2808_s29 + $0x1b0] sm:$0xff] }
  0x22   : > { %561 = vst [vmem:[%s2816_s30 + $0xd0] sm:$0xff] %v560_v26  ;;  %v564_v28 = vld [vmem:[%s2808_s29 + $0x1c0] sm:$0xff]  ;;  %v566_v29 = vld [vmem:[%s2808_s29 + $0x1d0] sm:$0xff]  ;;  %563 = vst [vmem:[%s2816_s30 + $0xd8] sm:$0xff] %v562_v27 }
  0x23   : > { %565 = vst [vmem:[%s2816_s30 + $0xe0] sm:$0xff] %v564_v28  ;;  %567 = vst [vmem:[%s2816_s30 + $0xe8] sm:$0xff] %v566_v29  ;;  %v568_v30 = vld [vmem:[%s2808_s29 + $0x1e0] sm:$0xff]  ;;  %v570_v31 = vld [vmem:[%s2808_s29 + $0x1f0] sm:$0xff] }
  0x24   : > { %v572_v32 = vld [vmem:[%s2808_s29 + $0x200] sm:$0xff]  ;;  %569 = vst [vmem:[%s2816_s30 + $0xf0] sm:$0xff] %v568_v30  ;;  %571 = vst [vmem:[%s2816_s30 + $0xf8] sm:$0xff] %v570_v31  ;;  %v574_v33 = vld [vmem:[%s2808_s29 + $0x210] sm:$0xff] }
  0x25   : > { %573 = vst [vmem:[%s2816_s30 + $0x100] sm:$0xff] %v572_v32  ;;  %v576_v34 = vld [vmem:[%s2808_s29 + $0x220] sm:$0xff]  ;;  %v578_v35 = vld [vmem:[%s2808_s29 + $0x230] sm:$0xff]  ;;  %575 = vst [vmem:[%s2816_s30 + $0x108] sm:$0xff] %v574_v33 }
  0x26   : > { %577 = vst [vmem:[%s2816_s30 + $0x110] sm:$0xff] %v576_v34  ;;  %579 = vst [vmem:[%s2816_s30 + $0x118] sm:$0xff] %v578_v35  ;;  %v580_v36 = vld [vmem:[%s2808_s29 + $0x240] sm:$0xff]  ;;  %v582_v37 = vld [vmem:[%s2808_s29 + $0x250] sm:$0xff] }
  0x27   : > { %v584_v38 = vld [vmem:[%s2808_s29 + $0x260] sm:$0xff]  ;;  %581 = vst [vmem:[%s2816_s30 + $0x120] sm:$0xff] %v580_v36  ;;  %583 = vst [vmem:[%s2816_s30 + $0x128] sm:$0xff] %v582_v37  ;;  %v586_v39 = vld [vmem:[%s2808_s29 + $0x270] sm:$0xff] }
  0x28   : > { %585 = vst [vmem:[%s2816_s30 + $0x130] sm:$0xff] %v584_v38  ;;  %v588_v40 = vld [vmem:[%s2808_s29 + $0x280] sm:$0xff]  ;;  %v590_v41 = vld [vmem:[%s2808_s29 + $0x290] sm:$0xff]  ;;  %587 = vst [vmem:[%s2816_s30 + $0x138] sm:$0xff] %v586_v39 }
  0x29   : > { %589 = vst [vmem:[%s2816_s30 + $0x140] sm:$0xff] %v588_v40  ;;  %591 = vst [vmem:[%s2816_s30 + $0x148] sm:$0xff] %v590_v41  ;;  %v592_v42 = vld [vmem:[%s2808_s29 + $0x2a0] sm:$0xff]  ;;  %v594_v43 = vld [vmem:[%s2808_s29 + $0x2b0] sm:$0xff] }
  0x2a   : > { %v596_v44 = vld [vmem:[%s2808_s29 + $0x2c0] sm:$0xff]  ;;  %593 = vst [vmem:[%s2816_s30 + $0x150] sm:$0xff] %v592_v42  ;;  %595 = vst [vmem:[%s2816_s30 + $0x158] sm:$0xff] %v594_v43  ;;  %v598_v45 = vld [vmem:[%s2808_s29 + $0x2d0] sm:$0xff] }
  0x2b   : > { %597 = vst [vmem:[%s2816_s30 + $0x160] sm:$0xff] %v596_v44  ;;  %v600_v46 = vld [vmem:[%s2808_s29 + $0x2e0] sm:$0xff]  ;;  %v602_v47 = vld [vmem:[%s2808_s29 + $0x2f0] sm:$0xff]  ;;  %599 = vst [vmem:[%s2816_s30 + $0x168] sm:$0xff] %v598_v45 }
  0x2c   : > { %601 = vst [vmem:[%s2816_s30 + $0x170] sm:$0xff] %v600_v46  ;;  %603 = vst [vmem:[%s2816_s30 + $0x178] sm:$0xff] %v602_v47  ;;  %v604_v48 = vld [vmem:[%s2808_s29 + $0x300] sm:$0xff]  ;;  %v606_v49 = vld [vmem:[%s2808_s29 + $0x310] sm:$0xff] }
  0x2d   : > { %v608_v50 = vld [vmem:[%s2808_s29 + $0x320] sm:$0xff]  ;;  %605 = vst [vmem:[%s2816_s30 + $0x180] sm:$0xff] %v604_v48  ;;  %607 = vst [vmem:[%s2816_s30 + $0x188] sm:$0xff] %v606_v49  ;;  %v610_v51 = vld [vmem:[%s2808_s29 + $0x330] sm:$0xff] }
  0x2e   : > { %609 = vst [vmem:[%s2816_s30 + $0x190] sm:$0xff] %v608_v50  ;;  %v612_v52 = vld [vmem:[%s2808_s29 + $0x340] sm:$0xff]  ;;  %v614_v53 = vld [vmem:[%s2808_s29 + $0x350] sm:$0xff]  ;;  %611 = vst [vmem:[%s2816_s30 + $0x198] sm:$0xff] %v610_v51 }
  0x2f   : > { %613 = vst [vmem:[%s2816_s30 + $0x1a0] sm:$0xff] %v612_v52  ;;  %615 = vst [vmem:[%s2816_s30 + $0x1a8] sm:$0xff] %v614_v53  ;;  %v616_v54 = vld [vmem:[%s2808_s29 + $0x360] sm:$0xff]  ;;  %v618_v55 = vld [vmem:[%s2808_s29 + $0x370] sm:$0xff] }
  0x30   : > { %v620_v56 = vld [vmem:[%s2808_s29 + $0x380] sm:$0xff]  ;;  %617 = vst [vmem:[%s2816_s30 + $0x1b0] sm:$0xff] %v616_v54  ;;  %619 = vst [vmem:[%s2816_s30 + $0x1b8] sm:$0xff] %v618_v55  ;;  %v622_v57 = vld [vmem:[%s2808_s29 + $0x390] sm:$0xff] }
  0x31   : > { %621 = vst [vmem:[%s2816_s30 + $0x1c0] sm:$0xff] %v620_v56  ;;  %v624_v58 = vld [vmem:[%s2808_s29 + $0x3a0] sm:$0xff]  ;;  %v626_v59 = vld [vmem:[%s2808_s29 + $0x3b0] sm:$0xff]  ;;  %623 = vst [vmem:[%s2816_s30 + $0x1c8] sm:$0xff] %v622_v57 }
  0x32   : > { %625 = vst [vmem:[%s2816_s30 + $0x1d0] sm:$0xff] %v624_v58  ;;  %627 = vst [vmem:[%s2816_s30 + $0x1d8] sm:$0xff] %v626_v59  ;;  %v628_v60 = vld [vmem:[%s2808_s29 + $0x3c0] sm:$0xff]  ;;  %v630_v61 = vld [vmem:[%s2808_s29 + $0x3d0] sm:$0xff] }
  0x33   : > { %v632_v62 = vld [vmem:[%s2808_s29 + $0x3e0] sm:$0xff]  ;;  %629 = vst [vmem:[%s2816_s30 + $0x1e0] sm:$0xff] %v628_v60  ;;  %631 = vst [vmem:[%s2816_s30 + $0x1e8] sm:$0xff] %v630_v61  ;;  %v634_v63 = vld [vmem:[%s2808_s29 + $0x3f0] sm:$0xff] }
  0x34   : > { %633 = vst [vmem:[%s2816_s30 + $0x1f0] sm:$0xff] %v632_v62  ;;  %v636_v0 = vld [vmem:[%s2808_s29 + $0x400] sm:$0xff]  ;;  %v638_v1 = vld [vmem:[%s2808_s29 + $0x410] sm:$0xff]  ;;  %635 = vst [vmem:[%s2816_s30 + $0x1f8] sm:$0xff] %v634_v63 }
  0x35   : > { %637 = vst [vmem:[%s2816_s30 + $0x200] sm:$0xff] %v636_v0  ;;  %639 = vst [vmem:[%s2816_s30 + $0x208] sm:$0xff] %v638_v1  ;;  %v640_v2 = vld [vmem:[%s2808_s29 + $0x420] sm:$0xff]  ;;  %v642_v3 = vld [vmem:[%s2808_s29 + $0x430] sm:$0xff] }
  0x36   : > { %v644_v4 = vld [vmem:[%s2808_s29 + $0x440] sm:$0xff]  ;;  %641 = vst [vmem:[%s2816_s30 + $0x210] sm:$0xff] %v640_v2  ;;  %643 = vst [vmem:[%s2816_s30 + $0x218] sm:$0xff] %v642_v3  ;;  %v646_v5 = vld [vmem:[%s2808_s29 + $0x450] sm:$0xff] }
  0x37   : > { %645 = vst [vmem:[%s2816_s30 + $0x220] sm:$0xff] %v644_v4  ;;  %v648_v6 = vld [vmem:[%s2808_s29 + $0x460] sm:$0xff]  ;;  %v650_v7 = vld [vmem:[%s2808_s29 + $0x470] sm:$0xff]  ;;  %647 = vst [vmem:[%s2816_s30 + $0x228] sm:$0xff] %v646_v5 }
  0x38   : > { %649 = vst [vmem:[%s2816_s30 + $0x230] sm:$0xff] %v648_v6  ;;  %651 = vst [vmem:[%s2816_s30 + $0x238] sm:$0xff] %v650_v7  ;;  %v652_v8 = vld [vmem:[%s2808_s29 + $0x480] sm:$0xff]  ;;  %v654_v9 = vld [vmem:[%s2808_s29 + $0x490] sm:$0xff] }
  0x39   : > { %v656_v10 = vld [vmem:[%s2808_s29 + $0x4a0] sm:$0xff]  ;;  %653 = vst [vmem:[%s2816_s30 + $0x240] sm:$0xff] %v652_v8  ;;  %655 = vst [vmem:[%s2816_s30 + $0x248] sm:$0xff] %v654_v9  ;;  %v658_v11 = vld [vmem:[%s2808_s29 + $0x4b0] sm:$0xff] }
  0x3a   : > { %657 = vst [vmem:[%s2816_s30 + $0x250] sm:$0xff] %v656_v10  ;;  %v660_v12 = vld [vmem:[%s2808_s29 + $0x4c0] sm:$0xff]  ;;  %v662_v13 = vld [vmem:[%s2808_s29 + $0x4d0] sm:$0xff]  ;;  %659 = vst [vmem:[%s2816_s30 + $0x258] sm:$0xff] %v658_v11 }
  0x3b   : > { %661 = vst [vmem:[%s2816_s30 + $0x260] sm:$0xff] %v660_v12  ;;  %663 = vst [vmem:[%s2816_s30 + $0x268] sm:$0xff] %v662_v13  ;;  %v664_v14 = vld [vmem:[%s2808_s29 + $0x4e0] sm:$0xff]  ;;  %v666_v15 = vld [vmem:[%s2808_s29 + $0x4f0] sm:$0xff] }
  0x3c   : > { %v668_v16 = vld [vmem:[%s2808_s29 + $0x500] sm:$0xff]  ;;  %665 = vst [vmem:[%s2816_s30 + $0x270] sm:$0xff] %v664_v14  ;;  %667 = vst [vmem:[%s2816_s30 + $0x278] sm:$0xff] %v666_v15  ;;  %v670_v17 = vld [vmem:[%s2808_s29 + $0x510] sm:$0xff] }
  0x3d   : > { %669 = vst [vmem:[%s2816_s30 + $0x280] sm:$0xff] %v668_v16  ;;  %v672_v18 = vld [vmem:[%s2808_s29 + $0x520] sm:$0xff]  ;;  %v674_v19 = vld [vmem:[%s2808_s29 + $0x530] sm:$0xff]  ;;  %671 = vst [vmem:[%s2816_s30 + $0x288] sm:$0xff] %v670_v17 }
  0x3e   : > { %673 = vst [vmem:[%s2816_s30 + $0x290] sm:$0xff] %v672_v18  ;;  %675 = vst [vmem:[%s2816_s30 + $0x298] sm:$0xff] %v674_v19  ;;  %v676_v20 = vld [vmem:[%s2808_s29 + $0x540] sm:$0xff]  ;;  %v678_v21 = vld [vmem:[%s2808_s29 + $0x550] sm:$0xff] }
  0x3f   : > { %v680_v22 = vld [vmem:[%s2808_s29 + $0x560] sm:$0xff]  ;;  %677 = vst [vmem:[%s2816_s30 + $0x2a0] sm:$0xff] %v676_v20  ;;  %679 = vst [vmem:[%s2816_s30 + $0x2a8] sm:$0xff] %v678_v21  ;;  %v682_v23 = vld [vmem:[%s2808_s29 + $0x570] sm:$0xff] }
  0x40   : > { %681 = vst [vmem:[%s2816_s30 + $0x2b0] sm:$0xff] %v680_v22  ;;  %v684_v24 = vld [vmem:[%s2808_s29 + $0x580] sm:$0xff]  ;;  %v686_v25 = vld [vmem:[%s2808_s29 + $0x590] sm:$0xff]  ;;  %683 = vst [vmem:[%s2816_s30 + $0x2b8] sm:$0xff] %v682_v23 }
  0x41   : > { %685 = vst [vmem:[%s2816_s30 + $0x2c0] sm:$0xff] %v684_v24  ;;  %687 = vst [vmem:[%s2816_s30 + $0x2c8] sm:$0xff] %v686_v25  ;;  %v688_v26 = vld [vmem:[%s2808_s29 + $0x5a0] sm:$0xff]  ;;  %v690_v27 = vld [vmem:[%s2808_s29 + $0x5b0] sm:$0xff] }
  0x42   : > { %v692_v28 = vld [vmem:[%s2808_s29 + $0x5c0] sm:$0xff]  ;;  %689 = vst [vmem:[%s2816_s30 + $0x2d0] sm:$0xff] %v688_v26  ;;  %691 = vst [vmem:[%s2816_s30 + $0x2d8] sm:$0xff] %v690_v27  ;;  %v694_v29 = vld [vmem:[%s2808_s29 + $0x5d0] sm:$0xff] }
  0x43   : > { %693 = vst [vmem:[%s2816_s30 + $0x2e0] sm:$0xff] %v692_v28  ;;  %v696_v30 = vld [vmem:[%s2808_s29 + $0x5e0] sm:$0xff]  ;;  %v698_v31 = vld [vmem:[%s2808_s29 + $0x5f0] sm:$0xff]  ;;  %695 = vst [vmem:[%s2816_s30 + $0x2e8] sm:$0xff] %v694_v29 }
  0x44   : > { %697 = vst [vmem:[%s2816_s30 + $0x2f0] sm:$0xff] %v696_v30  ;;  %699 = vst [vmem:[%s2816_s30 + $0x2f8] sm:$0xff] %v698_v31  ;;  %v700_v32 = vld [vmem:[%s2808_s29 + $0x600] sm:$0xff]  ;;  %v702_v33 = vld [vmem:[%s2808_s29 + $0x610] sm:$0xff] }
  0x45   : > { %v704_v34 = vld [vmem:[%s2808_s29 + $0x620] sm:$0xff]  ;;  %701 = vst [vmem:[%s2816_s30 + $0x300] sm:$0xff] %v700_v32  ;;  %703 = vst [vmem:[%s2816_s30 + $0x308] sm:$0xff] %v702_v33  ;;  %v706_v35 = vld [vmem:[%s2808_s29 + $0x630] sm:$0xff] }
  0x46   : > { %705 = vst [vmem:[%s2816_s30 + $0x310] sm:$0xff] %v704_v34  ;;  %v708_v36 = vld [vmem:[%s2808_s29 + $0x640] sm:$0xff]  ;;  %v710_v37 = vld [vmem:[%s2808_s29 + $0x650] sm:$0xff]  ;;  %707 = vst [vmem:[%s2816_s30 + $0x318] sm:$0xff] %v706_v35 }
  0x47   : > { %709 = vst [vmem:[%s2816_s30 + $0x320] sm:$0xff] %v708_v36  ;;  %711 = vst [vmem:[%s2816_s30 + $0x328] sm:$0xff] %v710_v37  ;;  %v712_v38 = vld [vmem:[%s2808_s29 + $0x660] sm:$0xff]  ;;  %v714_v39 = vld [vmem:[%s2808_s29 + $0x670] sm:$0xff] }
  0x48   : > { %v716_v40 = vld [vmem:[%s2808_s29 + $0x680] sm:$0xff]  ;;  %713 = vst [vmem:[%s2816_s30 + $0x330] sm:$0xff] %v712_v38  ;;  %715 = vst [vmem:[%s2816_s30 + $0x338] sm:$0xff] %v714_v39  ;;  %v718_v41 = vld [vmem:[%s2808_s29 + $0x690] sm:$0xff] }
  0x49   : > { %717 = vst [vmem:[%s2816_s30 + $0x340] sm:$0xff] %v716_v40  ;;  %v720_v42 = vld [vmem:[%s2808_s29 + $0x6a0] sm:$0xff]  ;;  %v722_v43 = vld [vmem:[%s2808_s29 + $0x6b0] sm:$0xff]  ;;  %719 = vst [vmem:[%s2816_s30 + $0x348] sm:$0xff] %v718_v41 }
  0x4a   : > { %721 = vst [vmem:[%s2816_s30 + $0x350] sm:$0xff] %v720_v42  ;;  %723 = vst [vmem:[%s2816_s30 + $0x358] sm:$0xff] %v722_v43  ;;  %v724_v44 = vld [vmem:[%s2808_s29 + $0x6c0] sm:$0xff]  ;;  %v726_v45 = vld [vmem:[%s2808_s29 + $0x6d0] sm:$0xff] }
  0x4b   : > { %v728_v46 = vld [vmem:[%s2808_s29 + $0x6e0] sm:$0xff]  ;;  %725 = vst [vmem:[%s2816_s30 + $0x360] sm:$0xff] %v724_v44  ;;  %727 = vst [vmem:[%s2816_s30 + $0x368] sm:$0xff] %v726_v45  ;;  %v730_v47 = vld [vmem:[%s2808_s29 + $0x6f0] sm:$0xff] }
  0x4c   : > { %729 = vst [vmem:[%s2816_s30 + $0x370] sm:$0xff] %v728_v46  ;;  %v732_v48 = vld [vmem:[%s2808_s29 + $0x700] sm:$0xff]  ;;  %v734_v49 = vld [vmem:[%s2808_s29 + $0x710] sm:$0xff]  ;;  %731 = vst [vmem:[%s2816_s30 + $0x378] sm:$0xff] %v730_v47 }
  0x4d   : > { %733 = vst [vmem:[%s2816_s30 + $0x380] sm:$0xff] %v732_v48  ;;  %735 = vst [vmem:[%s2816_s30 + $0x388] sm:$0xff] %v734_v49  ;;  %v736_v50 = vld [vmem:[%s2808_s29 + $0x720] sm:$0xff]  ;;  %v738_v51 = vld [vmem:[%s2808_s29 + $0x730] sm:$0xff] }
  0x4e   : > { %v740_v52 = vld [vmem:[%s2808_s29 + $0x740] sm:$0xff]  ;;  %737 = vst [vmem:[%s2816_s30 + $0x390] sm:$0xff] %v736_v50  ;;  %739 = vst [vmem:[%s2816_s30 + $0x398] sm:$0xff] %v738_v51  ;;  %v742_v53 = vld [vmem:[%s2808_s29 + $0x750] sm:$0xff] }
  0x4f   : > { %741 = vst [vmem:[%s2816_s30 + $0x3a0] sm:$0xff] %v740_v52  ;;  %v744_v54 = vld [vmem:[%s2808_s29 + $0x760] sm:$0xff]  ;;  %v746_v55 = vld [vmem:[%s2808_s29 + $0x770] sm:$0xff]  ;;  %743 = vst [vmem:[%s2816_s30 + $0x3a8] sm:$0xff] %v742_v53 }
  0x50   : > { %745 = vst [vmem:[%s2816_s30 + $0x3b0] sm:$0xff] %v744_v54  ;;  %747 = vst [vmem:[%s2816_s30 + $0x3b8] sm:$0xff] %v746_v55  ;;  %v748_v56 = vld [vmem:[%s2808_s29 + $0x780] sm:$0xff]  ;;  %v750_v57 = vld [vmem:[%s2808_s29 + $0x790] sm:$0xff] }
  0x51   : > { %v752_v58 = vld [vmem:[%s2808_s29 + $0x7a0] sm:$0xff]  ;;  %749 = vst [vmem:[%s2816_s30 + $0x3c0] sm:$0xff] %v748_v56  ;;  %751 = vst [vmem:[%s2816_s30 + $0x3c8] sm:$0xff] %v750_v57  ;;  %v754_v59 = vld [vmem:[%s2808_s29 + $0x7b0] sm:$0xff] }
  0x52   : > { %753 = vst [vmem:[%s2816_s30 + $0x3d0] sm:$0xff] %v752_v58  ;;  %v756_v60 = vld [vmem:[%s2808_s29 + $0x7c0] sm:$0xff]  ;;  %v758_v61 = vld [vmem:[%s2808_s29 + $0x7d0] sm:$0xff]  ;;  %755 = vst [vmem:[%s2816_s30 + $0x3d8] sm:$0xff] %v754_v59 }
  0x53   : > { %757 = vst [vmem:[%s2816_s30 + $0x3e0] sm:$0xff] %v756_v60  ;;  %759 = vst [vmem:[%s2816_s30 + $0x3e8] sm:$0xff] %v758_v61  ;;  %v760_v62 = vld [vmem:[%s2808_s29 + $0x7e0] sm:$0xff]  ;;  %v762_v63 = vld [vmem:[%s2808_s29 + $0x7f0] sm:$0xff] }
  0x54   : > { %v764_v0 = vld [vmem:[%s2808_s29 + $0x800] sm:$0xff]  ;;  %761 = vst [vmem:[%s2816_s30 + $0x3f0] sm:$0xff] %v760_v62  ;;  %763 = vst [vmem:[%s2816_s30 + $0x3f8] sm:$0xff] %v762_v63  ;;  %v766_v1 = vld [vmem:[%s2808_s29 + $0x810] sm:$0xff] }
  0x55   : > { %765 = vst [vmem:[%s2816_s30 + $0x400] sm:$0xff] %v764_v0  ;;  %v768_v2 = vld [vmem:[%s2808_s29 + $0x820] sm:$0xff]  ;;  %v770_v3 = vld [vmem:[%s2808_s29 + $0x830] sm:$0xff]  ;;  %767 = vst [vmem:[%s2816_s30 + $0x408] sm:$0xff] %v766_v1 }
  0x56   : > { %769 = vst [vmem:[%s2816_s30 + $0x410] sm:$0xff] %v768_v2  ;;  %771 = vst [vmem:[%s2816_s30 + $0x418] sm:$0xff] %v770_v3  ;;  %v772_v4 = vld [vmem:[%s2808_s29 + $0x840] sm:$0xff]  ;;  %v774_v5 = vld [vmem:[%s2808_s29 + $0x850] sm:$0xff] }
  0x57   : > { %v776_v6 = vld [vmem:[%s2808_s29 + $0x860] sm:$0xff]  ;;  %773 = vst [vmem:[%s2816_s30 + $0x420] sm:$0xff] %v772_v4  ;;  %775 = vst [vmem:[%s2816_s30 + $0x428] sm:$0xff] %v774_v5  ;;  %v778_v7 = vld [vmem:[%s2808_s29 + $0x870] sm:$0xff] }
  0x58   : > { %777 = vst [vmem:[%s2816_s30 + $0x430] sm:$0xff] %v776_v6  ;;  %v780_v8 = vld [vmem:[%s2808_s29 + $0x880] sm:$0xff]  ;;  %v782_v9 = vld [vmem:[%s2808_s29 + $0x890] sm:$0xff]  ;;  %779 = vst [vmem:[%s2816_s30 + $0x438] sm:$0xff] %v778_v7 }
  0x59   : > { %781 = vst [vmem:[%s2816_s30 + $0x440] sm:$0xff] %v780_v8  ;;  %783 = vst [vmem:[%s2816_s30 + $0x448] sm:$0xff] %v782_v9  ;;  %v784_v10 = vld [vmem:[%s2808_s29 + $0x8a0] sm:$0xff]  ;;  %v786_v11 = vld [vmem:[%s2808_s29 + $0x8b0] sm:$0xff] }
  0x5a   : > { %v788_v12 = vld [vmem:[%s2808_s29 + $0x8c0] sm:$0xff]  ;;  %785 = vst [vmem:[%s2816_s30 + $0x450] sm:$0xff] %v784_v10  ;;  %787 = vst [vmem:[%s2816_s30 + $0x458] sm:$0xff] %v786_v11  ;;  %v790_v13 = vld [vmem:[%s2808_s29 + $0x8d0] sm:$0xff] }
  0x5b   : > { %789 = vst [vmem:[%s2816_s30 + $0x460] sm:$0xff] %v788_v12  ;;  %v792_v14 = vld [vmem:[%s2808_s29 + $0x8e0] sm:$0xff]  ;;  %v794_v15 = vld [vmem:[%s2808_s29 + $0x8f0] sm:$0xff]  ;;  %791 = vst [vmem:[%s2816_s30 + $0x468] sm:$0xff] %v790_v13 }
  0x5c   : > { %793 = vst [vmem:[%s2816_s30 + $0x470] sm:$0xff] %v792_v14  ;;  %795 = vst [vmem:[%s2816_s30 + $0x478] sm:$0xff] %v794_v15  ;;  %v796_v16 = vld [vmem:[%s2808_s29 + $0x900] sm:$0xff]  ;;  %v798_v17 = vld [vmem:[%s2808_s29 + $0x910] sm:$0xff] }
  0x5d   : > { %v800_v18 = vld [vmem:[%s2808_s29 + $0x920] sm:$0xff]  ;;  %797 = vst [vmem:[%s2816_s30 + $0x480] sm:$0xff] %v796_v16  ;;  %799 = vst [vmem:[%s2816_s30 + $0x488] sm:$0xff] %v798_v17  ;;  %v802_v19 = vld [vmem:[%s2808_s29 + $0x930] sm:$0xff] }
  0x5e   : > { %801 = vst [vmem:[%s2816_s30 + $0x490] sm:$0xff] %v800_v18  ;;  %v804_v20 = vld [vmem:[%s2808_s29 + $0x940] sm:$0xff]  ;;  %v806_v21 = vld [vmem:[%s2808_s29 + $0x950] sm:$0xff]  ;;  %803 = vst [vmem:[%s2816_s30 + $0x498] sm:$0xff] %v802_v19 }
  0x5f   : > { %805 = vst [vmem:[%s2816_s30 + $0x4a0] sm:$0xff] %v804_v20  ;;  %807 = vst [vmem:[%s2816_s30 + $0x4a8] sm:$0xff] %v806_v21  ;;  %v808_v22 = vld [vmem:[%s2808_s29 + $0x960] sm:$0xff]  ;;  %v810_v23 = vld [vmem:[%s2808_s29 + $0x970] sm:$0xff] }
  0x60   : > { %v812_v24 = vld [vmem:[%s2808_s29 + $0x980] sm:$0xff]  ;;  %809 = vst [vmem:[%s2816_s30 + $0x4b0] sm:$0xff] %v808_v22  ;;  %811 = vst [vmem:[%s2816_s30 + $0x4b8] sm:$0xff] %v810_v23  ;;  %v814_v25 = vld [vmem:[%s2808_s29 + $0x990] sm:$0xff] }
  0x61   : > { %813 = vst [vmem:[%s2816_s30 + $0x4c0] sm:$0xff] %v812_v24  ;;  %v816_v26 = vld [vmem:[%s2808_s29 + $0x9a0] sm:$0xff]  ;;  %v818_v27 = vld [vmem:[%s2808_s29 + $0x9b0] sm:$0xff]  ;;  %815 = vst [vmem:[%s2816_s30 + $0x4c8] sm:$0xff] %v814_v25 }
  0x62   : > { %817 = vst [vmem:[%s2816_s30 + $0x4d0] sm:$0xff] %v816_v26  ;;  %819 = vst [vmem:[%s2816_s30 + $0x4d8] sm:$0xff] %v818_v27  ;;  %v820_v28 = vld [vmem:[%s2808_s29 + $0x9c0] sm:$0xff]  ;;  %v822_v29 = vld [vmem:[%s2808_s29 + $0x9d0] sm:$0xff] }
  0x63   : > { %v824_v30 = vld [vmem:[%s2808_s29 + $0x9e0] sm:$0xff]  ;;  %821 = vst [vmem:[%s2816_s30 + $0x4e0] sm:$0xff] %v820_v28  ;;  %823 = vst [vmem:[%s2816_s30 + $0x4e8] sm:$0xff] %v822_v29  ;;  %v826_v31 = vld [vmem:[%s2808_s29 + $0x9f0] sm:$0xff] }
  0x64   : > { %825 = vst [vmem:[%s2816_s30 + $0x4f0] sm:$0xff] %v824_v30  ;;  %827 = vst [vmem:[%s2816_s30 + $0x4f8] sm:$0xff] %v826_v31 }
  0x65 PF: > { %p2235_p7 = scmp.ge.s32.totalorder %s2740_s17, 1  ;;  %p832_p8 = scmp.lt.s32.totalorder %s2740_s17, 3 }
  0x67   : > { %p833_p9 = pnand %p2235_p7, %p832_p8 }
  0x68   : > { %s839_s5 = sand.u32 (!%p833_p9), 1, %s2732_s15   ;;  %v2561_v32 = vld [vmem:[%s3360_s0 + $0x4] ss:$40 sps:$4 sm:$0xff] (!%p833_p9)   ;;  %v2567_v33 = vld [vmem:[%s3360_s0 + $0x14] ss:$40 sps:$4 sm:$0xff] (!%p833_p9)  }
  0x69   : > { %836 = sbr.rel (%p833_p9) target bundleno = 532 (0x214), region = 70  ;;  %1929 = vmatprep.mubr.bf16.mxu1 (!%p833_p9), %v2561_v32  ;;  %2015 = vmatprep.mubr.bf16.mxu0 (!%p833_p9), %v2567_v33  ;;  %s2236_s26 = sshll.u32 (!%p833_p9), %s839_s5, 5 }
  0x6a   : > { %s2435_s6 = smul.u32 (!%p833_p9), 1280, %s839_s5  ;;  %s862_s15 = scalar_lea.vmem (!%p833_p9), [#allocation3], %s2236_s26 }
  0x6c   : > { %s3143_s11 = scalar_lea.vmem (!%p833_p9), [#allocation2], %s2435_s6 }
  0x6d   : > { %v2463_v34 = vld [vmem:[%s3143_s11 + $0x4] ss:$8 sps:$4 sm:$0xff] (!%p833_p9)   ;;  %v2467_v36 = vld [vmem:[%s3143_s11] ss:$8 sps:$4 sm:$0xff] (!%p833_p9)   ;;  %v2469_v38 = vld [vmem:[%s3143_s11 + $0x14] ss:$8 sps:$4 sm:$0xff] (!%p833_p9)  }
  0x6e   : > { %v2465_v35 = vld [vmem:[%s3143_s11 + $0x204] ss:$8 sps:$4 sm:$0xff] (!%p833_p9)   ;;  %1897 = vmatprep.subr.bf16.mxu1 (!%p833_p9), %v2463_v34  ;;  %v2468_v37 = vld [vmem:[%s3143_s11 + $0x200] ss:$8 sps:$4 sm:$0xff] (!%p833_p9)   ;;  %v2471_v39 = vld [vmem:[%s3143_s11 + $0x214] ss:$8 sps:$4 sm:$0xff] (!%p833_p9)  }
  0x6f   : > { %1983 = vmatprep.subr.bf16.mxu0 (!%p833_p9), %v2465_v35  ;;  %1898 = vmatpush1.bf16.msra.mxu1 (!%p833_p9), %v2467_v36  ;;  %v2473_v40 = vld [vmem:[%s3143_s11 + $0x10] ss:$8 sps:$4 sm:$0xff] (!%p833_p9)   ;;  %v2475_v42 = vld [vmem:[%s3143_s11 + $0x24] ss:$8 sps:$4 sm:$0xff] (!%p833_p9)   ;;  %v2479_v44 = vld [vmem:[%s3143_s11 + $0x20] ss:$8 sps:$4 sm:$0xff] (!%p833_p9)  }
  0x70   : > { %1984 = vmatpush1.bf16.msra.mxu0 %v2468_v37  ;;  %1899 = vmatprep.subr.bf16.mxu1 %v2469_v38  ;;  %v2474_v41 = vld [vmem:[%s3143_s11 + $0x210] ss:$8 sps:$4 sm:$0xff]   ;;  %v2477_v43 = vld [vmem:[%s3143_s11 + $0x224] ss:$8 sps:$4 sm:$0xff]   ;;  %v2480_v45 = vld [vmem:[%s3143_s11 + $0x220] ss:$8 sps:$4 sm:$0xff]  }
  0x71   : > { %1985 = vmatprep.subr.bf16.mxu0 %v2471_v39  ;;  %v2481_v46 = vld [vmem:[%s3143_s11 + $0x34] ss:$8 sps:$4 sm:$0xff]   ;;  %v2485_v48 = vld [vmem:[%s3143_s11 + $0x30] ss:$8 sps:$4 sm:$0xff]   ;;  %v2487_v50 = vld [vmem:[%s3143_s11 + $0x44] ss:$8 sps:$4 sm:$0xff]  }
  0x72   : > { %v2483_v47 = vld [vmem:[%s3143_s11 + $0x234] ss:$8 sps:$4 sm:$0xff]   ;;  %v2486_v49 = vld [vmem:[%s3143_s11 + $0x230] ss:$8 sps:$4 sm:$0xff]   ;;  %v2489_v51 = vld [vmem:[%s3143_s11 + $0x244] ss:$8 sps:$4 sm:$0xff]  }
  0x73   : > { %1900 = vmatpush1.bf16.msra.mxu1 %v2473_v40  ;;  %v2491_v52 = vld [vmem:[%s3143_s11 + $0x40] ss:$8 sps:$4 sm:$0xff]   ;;  %v2493_v54 = vld [vmem:[%s3143_s11 + $0x54] ss:$8 sps:$4 sm:$0xff]   ;;  %v2497_v56 = vld [vmem:[%s3143_s11 + $0x50] ss:$8 sps:$4 sm:$0xff]  }
  0x74   : > { %1986 = vmatpush1.bf16.msra.mxu0 %v2474_v41  ;;  %1901 = vmatprep.subr.bf16.mxu1 %v2475_v42  ;;  %v2492_v53 = vld [vmem:[%s3143_s11 + $0x240] ss:$8 sps:$4 sm:$0xff]   ;;  %v2495_v55 = vld [vmem:[%s3143_s11 + $0x254] ss:$8 sps:$4 sm:$0xff]   ;;  %v2498_v57 = vld [vmem:[%s3143_s11 + $0x250] ss:$8 sps:$4 sm:$0xff]  }
  0x75   : > { %1987 = vmatprep.subr.bf16.mxu0 %v2477_v43  ;;  %v2499_v58 = vld [vmem:[%s3143_s11 + $0x64] ss:$8 sps:$4 sm:$0xff]   ;;  %v2503_v60 = vld [vmem:[%s3143_s11 + $0x60] ss:$8 sps:$4 sm:$0xff]   ;;  %v2505_v62 = vld [vmem:[%s3143_s11 + $0x74] ss:$8 sps:$4 sm:$0xff]  }
  0x76   : > { %v2501_v59 = vld [vmem:[%s3143_s11 + $0x264] ss:$8 sps:$4 sm:$0xff]   ;;  %v2504_v61 = vld [vmem:[%s3143_s11 + $0x260] ss:$8 sps:$4 sm:$0xff]   ;;  %v2507_v63 = vld [vmem:[%s3143_s11 + $0x274] ss:$8 sps:$4 sm:$0xff]  }
  0x77   : > { %1902 = vmatpush1.bf16.msra.mxu1 %v2479_v44  ;;  %v2509_v0 = vld [vmem:[%s3143_s11 + $0x70] ss:$8 sps:$4 sm:$0xff]   ;;  %v2511_v2 = vld [vmem:[%s3143_s11 + $0x84] ss:$8 sps:$4 sm:$0xff]   ;;  %v2515_v4 = vld [vmem:[%s3143_s11 + $0x80] ss:$8 sps:$4 sm:$0xff]  }
  0x78   : > { %1988 = vmatpush1.bf16.msra.mxu0 %v2480_v45  ;;  %1903 = vmatprep.subr.bf16.mxu1 %v2481_v46  ;;  %v2510_v1 = vld [vmem:[%s3143_s11 + $0x270] ss:$8 sps:$4 sm:$0xff]   ;;  %v2513_v3 = vld [vmem:[%s3143_s11 + $0x284] ss:$8 sps:$4 sm:$0xff]   ;;  %v2516_v5 = vld [vmem:[%s3143_s11 + $0x280] ss:$8 sps:$4 sm:$0xff]  }
  0x79   : > { %1989 = vmatprep.subr.bf16.mxu0 %v2483_v47  ;;  %v2517_v6 = vld [vmem:[%s3143_s11 + $0x94] ss:$8 sps:$4 sm:$0xff]   ;;  %v2521_v8 = vld [vmem:[%s3143_s11 + $0x90] ss:$8 sps:$4 sm:$0xff]   ;;  %v2523_v10 = vld [vmem:[%s3143_s11 + $0xa4] ss:$8 sps:$4 sm:$0xff]  }
  0x7a   : > { %v2519_v7 = vld [vmem:[%s3143_s11 + $0x294] ss:$8 sps:$4 sm:$0xff]   ;;  %v2522_v9 = vld [vmem:[%s3143_s11 + $0x290] ss:$8 sps:$4 sm:$0xff]   ;;  %v2525_v11 = vld [vmem:[%s3143_s11 + $0x2a4] ss:$8 sps:$4 sm:$0xff]  }
  0x7b   : > { %1904 = vmatpush1.bf16.msra.mxu1 %v2485_v48  ;;  %v2527_v12 = vld [vmem:[%s3143_s11 + $0xa0] ss:$8 sps:$4 sm:$0xff]   ;;  %v2529_v14 = vld [vmem:[%s3143_s11 + $0xb4] ss:$8 sps:$4 sm:$0xff]   ;;  %v2533_v16 = vld [vmem:[%s3143_s11 + $0xb0] ss:$8 sps:$4 sm:$0xff]  }
  0x7c   : > { %1990 = vmatpush1.bf16.msra.mxu0 %v2486_v49  ;;  %1905 = vmatprep.subr.bf16.mxu1 %v2487_v50  ;;  %v2528_v13 = vld [vmem:[%s3143_s11 + $0x2a0] ss:$8 sps:$4 sm:$0xff]   ;;  %v2531_v15 = vld [vmem:[%s3143_s11 + $0x2b4] ss:$8 sps:$4 sm:$0xff]   ;;  %v2534_v17 = vld [vmem:[%s3143_s11 + $0x2b0] ss:$8 sps:$4 sm:$0xff]  }
  0x7d   : > { %1991 = vmatprep.subr.bf16.mxu0 %v2489_v51  ;;  %v2535_v18 = vld [vmem:[%s3143_s11 + $0xc4] ss:$8 sps:$4 sm:$0xff]   ;;  %v2539_v20 = vld [vmem:[%s3143_s11 + $0xc0] ss:$8 sps:$4 sm:$0xff]   ;;  %v2541_v22 = vld [vmem:[%s3143_s11 + $0xd4] ss:$8 sps:$4 sm:$0xff]  }
  0x7e   : > { %v2537_v19 = vld [vmem:[%s3143_s11 + $0x2c4] ss:$8 sps:$4 sm:$0xff]   ;;  %v2540_v21 = vld [vmem:[%s3143_s11 + $0x2c0] ss:$8 sps:$4 sm:$0xff]   ;;  %v2543_v23 = vld [vmem:[%s3143_s11 + $0x2d4] ss:$8 sps:$4 sm:$0xff]  }
  0x7f   : > { %1906 = vmatpush1.bf16.msra.mxu1 %v2491_v52  ;;  %v2545_v24 = vld [vmem:[%s3143_s11 + $0xd0] ss:$8 sps:$4 sm:$0xff]   ;;  %v2547_v26 = vld [vmem:[%s3143_s11 + $0xe4] ss:$8 sps:$4 sm:$0xff]   ;;  %v2551_v28 = vld [vmem:[%s3143_s11 + $0xe0] ss:$8 sps:$4 sm:$0xff]  }
  0x80   : > { %1992 = vmatpush1.bf16.msra.mxu0 %v2492_v53  ;;  %1907 = vmatprep.subr.bf16.mxu1 %v2493_v54  ;;  %v2546_v25 = vld [vmem:[%s3143_s11 + $0x2d0] ss:$8 sps:$4 sm:$0xff]   ;;  %v2549_v27 = vld [vmem:[%s3143_s11 + $0x2e4] ss:$8 sps:$4 sm:$0xff]   ;;  %v2552_v29 = vld [vmem:[%s3143_s11 + $0x2e0] ss:$8 sps:$4 sm:$0xff]  }
  0x81   : > { %1993 = vmatprep.subr.bf16.mxu0 %v2495_v55  ;;  %v2553_v30 = vld [vmem:[%s3143_s11 + $0xf4] ss:$8 sps:$4 sm:$0xff]   ;;  %v2557_v32 = vld [vmem:[%s3143_s11 + $0xf0] ss:$8 sps:$4 sm:$0xff]   ;;  %v2564_v34 = vld [vmem:[%s3143_s11 + $0x104] ss:$8 sps:$4 sm:$0xff]  }
  0x82   : > { %v2555_v31 = vld [vmem:[%s3143_s11 + $0x2f4] ss:$8 sps:$4 sm:$0xff]   ;;  %v2558_v33 = vld [vmem:[%s3143_s11 + $0x2f0] ss:$8 sps:$4 sm:$0xff]   ;;  %v2570_v35 = vld [vmem:[%s3143_s11 + $0x304] ss:$8 sps:$4 sm:$0xff]  }
  0x83   : > { %1908 = vmatpush1.bf16.msra.mxu1 %v2497_v56  ;;  %v2559_v36 = vld [vmem:[%s3360_s0] ss:$40 sps:$4 sm:$0xff]   ;;  %v2565_v37 = vld [vmem:[%s3360_s0 + $0x10] ss:$40 sps:$4 sm:$0xff]   ;;  %v2573_v40 = vld [vmem:[%s3143_s11 + $0x114] ss:$8 sps:$4 sm:$0xff]  }
  0x84   : > { %1994 = vmatpush1.bf16.msra.mxu0 %v2498_v57  ;;  %1909 = vmatprep.subr.bf16.mxu1 %v2499_v58  ;;  %v2562_v38 = vld [vmem:[%s3143_s11 + $0x100] ss:$8 sps:$4 sm:$0xff]   ;;  %v2576_v41 = vld [vmem:[%s3143_s11 + $0x314] ss:$8 sps:$4 sm:$0xff]   ;;  %v2571_v42 = vld [vmem:[%s3143_s11 + $0x110] ss:$8 sps:$4 sm:$0xff]  }
  0x85   : > { %1995 = vmatprep.subr.bf16.mxu0 %v2501_v59  ;;  %v2568_v39 = vld [vmem:[%s3143_s11 + $0x300] ss:$8 sps:$4 sm:$0xff]   ;;  %v2574_v43 = vld [vmem:[%s3143_s11 + $0x310] ss:$8 sps:$4 sm:$0xff]   ;;  %v2579_v44 = vld [vmem:[%s3143_s11 + $0x124] ss:$8 sps:$4 sm:$0xff]  }
  0x86   : > { %v2582_v45 = vld [vmem:[%s3143_s11 + $0x324] ss:$8 sps:$4 sm:$0xff]   ;;  %v2742_v46 = vmov 0   ;;  %v2577_v47 = vld [vmem:[%s3143_s11 + $0x120] ss:$8 sps:$4 sm:$0xff]   ;;  %s2413_s5 = sshll.u32 (%p2798_p5), %s2229_s18, 4 }
  0x87   : > { %1910 = vmatpush1.bf16.msra.mxu1 %v2503_v60  ;;  %2461 = vset.pattern.permute.xlu0 %v2742_v46  ;;  %v2580_v48 = vld [vmem:[%s3143_s11 + $0x320] ss:$8 sps:$4 sm:$0xff]   ;;  %v2585_v49 = vld [vmem:[%s3143_s11 + $0x134] ss:$8 sps:$4 sm:$0xff]   ;;  %v2583_v51 = vld [vmem:[%s3143_s11 + $0x130] ss:$8 sps:$4 sm:$0xff]   ;;  %s2149_s28 = scalar_lea.vmem (%p2798_p5), %s3364_s4, %s2413_s5 }
  0x88   : > { %1996 = vmatpush1.bf16.msra.mxu0 %v2504_v61  ;;  %1911 = vmatprep.subr.bf16.mxu1 %v2505_v62  ;;  %v2588_v50 = vld [vmem:[%s3143_s11 + $0x334] ss:$8 sps:$4 sm:$0xff]   ;;  %v2586_v52 = vld [vmem:[%s3143_s11 + $0x330] ss:$8 sps:$4 sm:$0xff]   ;;  %v2591_v53 = vld [vmem:[%s3143_s11 + $0x144] ss:$8 sps:$4 sm:$0xff]  }
  0x89   : > { %1997 = vmatprep.subr.bf16.mxu0 %v2507_v63  ;;  %2462 = vset.pattern.permute.xlu1 %v2742_v46  ;;  %v2594_v54 = vld [vmem:[%s3143_s11 + $0x344] ss:$8 sps:$4 sm:$0xff]   ;;  %v2589_v55 = vld [vmem:[%s3143_s11 + $0x140] ss:$8 sps:$4 sm:$0xff]   ;;  %v2597_v57 = vld [vmem:[%s3143_s11 + $0x154] ss:$8 sps:$4 sm:$0xff]  }
  0x8a   : > { %v2592_v56 = vld [vmem:[%s3143_s11 + $0x340] ss:$8 sps:$4 sm:$0xff]   ;;  %v2600_v58 = vld [vmem:[%s3143_s11 + $0x354] ss:$8 sps:$4 sm:$0xff]   ;;  %v2595_v59 = vld [vmem:[%s3143_s11 + $0x150] ss:$8 sps:$4 sm:$0xff]  }
  0x8b   : > { %1912 = vmatpush1.bf16.msra.mxu1 %v2509_v0  ;;  %v2598_v60 = vld [vmem:[%s3143_s11 + $0x350] ss:$8 sps:$4 sm:$0xff]   ;;  %v2603_v61 = vld [vmem:[%s3143_s11 + $0x164] ss:$8 sps:$4 sm:$0xff]   ;;  %v2667_v46 = vld [vmem:[%s3143_s11 + $0x400] ss:$8 sps:$4 sm:$0xff]  }
  0x8c   : > { %1998 = vmatpush1.bf16.msra.mxu0 %v2510_v1  ;;  %1913 = vmatprep.subr.bf16.mxu1 %v2511_v2  ;;  %v2606_v62 = vld [vmem:[%s3143_s11 + $0x364] ss:$8 sps:$4 sm:$0xff]   ;;  %v2601_v1 = vld [vmem:[%s3143_s11 + $0x160] ss:$8 sps:$4 sm:$0xff]  }
  0x8d   : > { %1999 = vmatprep.subr.bf16.mxu0 %v2513_v3  ;;  %v2663_v63 = vld [vmem:[%s3360_s0 + $0xc] ss:$40 sps:$4 sm:$0xff]   ;;  %v2666_v0 = vld [vmem:[%s3360_s0 + $0x1c] ss:$40 sps:$4 sm:$0xff]   ;;  %v2604_v2 = vld [vmem:[%s3143_s11 + $0x360] ss:$8 sps:$4 sm:$0xff]  }
  0x8e   : > { %v2609_v3 = vld [vmem:[%s3143_s11 + $0x174] ss:$8 sps:$4 sm:$0xff]  }
  0x8f   : > { %1914 = vmatpush1.bf16.msra.mxu1 %v2515_v4  ;;  %v2612_v4 = vld [vmem:[%s3143_s11 + $0x374] ss:$8 sps:$4 sm:$0xff]  }
  0x90   : > { %2000 = vmatpush1.bf16.msra.mxu0 %v2516_v5  ;;  %1915 = vmatprep.subr.bf16.mxu1 %v2517_v6  ;;  %v2607_v5 = vld [vmem:[%s3143_s11 + $0x170] ss:$8 sps:$4 sm:$0xff]  }
  0x91   : > { %2001 = vmatprep.subr.bf16.mxu0 %v2519_v7  ;;  %v2610_v6 = vld [vmem:[%s3143_s11 + $0x370] ss:$8 sps:$4 sm:$0xff]   ;;  %v2615_v7 = vld [vmem:[%s3143_s11 + $0x184] ss:$8 sps:$4 sm:$0xff]  }
  0x93   : > { %1916 = vmatpush1.bf16.msra.mxu1 %v2521_v8  ;;  %v2618_v8 = vld [vmem:[%s3143_s11 + $0x384] ss:$8 sps:$4 sm:$0xff]  }
  0x94   : > { %2002 = vmatpush1.bf16.msra.mxu0 %v2522_v9  ;;  %1917 = vmatprep.subr.bf16.mxu1 %v2523_v10  ;;  %v2613_v9 = vld [vmem:[%s3143_s11 + $0x180] ss:$8 sps:$4 sm:$0xff]  }
  0x95   : > { %2003 = vmatprep.subr.bf16.mxu0 %v2525_v11  ;;  %v2616_v10 = vld [vmem:[%s3143_s11 + $0x380] ss:$8 sps:$4 sm:$0xff]   ;;  %v2621_v11 = vld [vmem:[%s3143_s11 + $0x194] ss:$8 sps:$4 sm:$0xff]  }
  0x97   : > { %1918 = vmatpush1.bf16.msra.mxu1 %v2527_v12  ;;  %v2624_v12 = vld [vmem:[%s3143_s11 + $0x394] ss:$8 sps:$4 sm:$0xff]  }
  0x98   : > { %2004 = vmatpush1.bf16.msra.mxu0 %v2528_v13  ;;  %1919 = vmatprep.subr.bf16.mxu1 %v2529_v14  ;;  %v2619_v13 = vld [vmem:[%s3143_s11 + $0x190] ss:$8 sps:$4 sm:$0xff]  }
  0x99   : > { %2005 = vmatprep.subr.bf16.mxu0 %v2531_v15  ;;  %v2622_v14 = vld [vmem:[%s3143_s11 + $0x390] ss:$8 sps:$4 sm:$0xff]   ;;  %v2627_v15 = vld [vmem:[%s3143_s11 + $0x1a4] ss:$8 sps:$4 sm:$0xff]  }
  0x9b   : > { %1920 = vmatpush1.bf16.msra.mxu1 %v2533_v16  ;;  %v2630_v16 = vld [vmem:[%s3143_s11 + $0x3a4] ss:$8 sps:$4 sm:$0xff]  }
  0x9c   : > { %2006 = vmatpush1.bf16.msra.mxu0 %v2534_v17  ;;  %1921 = vmatprep.subr.bf16.mxu1 %v2535_v18  ;;  %v2625_v17 = vld [vmem:[%s3143_s11 + $0x1a0] ss:$8 sps:$4 sm:$0xff]  }
  0x9d   : > { %2007 = vmatprep.subr.bf16.mxu0 %v2537_v19  ;;  %v2628_v18 = vld [vmem:[%s3143_s11 + $0x3a0] ss:$8 sps:$4 sm:$0xff]   ;;  %v2633_v19 = vld [vmem:[%s3143_s11 + $0x1b4] ss:$8 sps:$4 sm:$0xff]  }
  0x9f   : > { %1922 = vmatpush1.bf16.msra.mxu1 %v2539_v20  ;;  %v2636_v20 = vld [vmem:[%s3143_s11 + $0x3b4] ss:$8 sps:$4 sm:$0xff]  }
  0xa0   : > { %2008 = vmatpush1.bf16.msra.mxu0 %v2540_v21  ;;  %1923 = vmatprep.subr.bf16.mxu1 %v2541_v22  ;;  %v2631_v21 = vld [vmem:[%s3143_s11 + $0x1b0] ss:$8 sps:$4 sm:$0xff]  }
  0xa1   : > { %2009 = vmatprep.subr.bf16.mxu0 %v2543_v23  ;;  %v2634_v22 = vld [vmem:[%s3143_s11 + $0x3b0] ss:$8 sps:$4 sm:$0xff]   ;;  %v2639_v23 = vld [vmem:[%s3143_s11 + $0x1c4] ss:$8 sps:$4 sm:$0xff]  }
  0xa3   : > { %1924 = vmatpush1.bf16.msra.mxu1 %v2545_v24  ;;  %v2642_v24 = vld [vmem:[%s3143_s11 + $0x3c4] ss:$8 sps:$4 sm:$0xff]  }
  0xa4   : > { %2010 = vmatpush1.bf16.msra.mxu0 %v2546_v25  ;;  %1925 = vmatprep.subr.bf16.mxu1 %v2547_v26  ;;  %v1035_v25 = vld [vmem:[%s3361_s1] sm:$0xff] }
  0xa5   : > { %2011 = vmatprep.subr.bf16.mxu0 %v2549_v27  ;;  %1039 = vperm.xlu0 %2461, %v1035_v25   ;;  %v2116_v26 = vld [vmem:[%s3362_s2] sm:$0xff]  ;;  %v1036_v27 = vld [vmem:[%s3361_s1 + $0x8] sm:$0xff] }
  0xa6   : > { %2120 = vperm.xlu1 %2462, %v2116_v26  }
  0xa7   : > { %1926 = vmatpush1.bf16.msra.mxu1 %v2551_v28  ;;  %v2637_v28 = vld [vmem:[%s3143_s11 + $0x1c0] ss:$8 sps:$4 sm:$0xff]  }
  0xa8   : > { %2012 = vmatpush1.bf16.msra.mxu0 %v2552_v29  ;;  %1927 = vmatprep.subr.bf16.mxu1 %v2553_v30  ;;  %v2640_v29 = vld [vmem:[%s3143_s11 + $0x3c0] ss:$8 sps:$4 sm:$0xff]  }
  0xa9   : > { %2013 = vmatprep.subr.bf16.mxu0 %v2555_v31  ;;  %v2117_v30 = vld [vmem:[%s3362_s2 + $0x8] sm:$0xff]  ;;  %v2645_v31 = vld [vmem:[%s3143_s11 + $0x1d4] ss:$8 sps:$4 sm:$0xff]   ;;  %1044 = vperm.xlu0 %2461, %v1036_v27  }
  0xaa   : > { %2125 = vperm.xlu1 %2462, %v2117_v30  }
  0xab   : > { %1928 = vmatpush1.bf16.msra.mxu1 %v2557_v32  ;;  %v2648_v32 = vld [vmem:[%s3143_s11 + $0x3d4] ss:$8 sps:$4 sm:$0xff]  }
  0xac   : > { %2014 = vmatpush1.bf16.msra.mxu0 %v2558_v33  ;;  %1940 = vmatprep.subr.bf16.mxu1 %v2564_v34  ;;  %v2643_v33 = vld [vmem:[%s3143_s11 + $0x1d0] ss:$8 sps:$4 sm:$0xff]  }
  0xad   : > { %2026 = vmatprep.subr.bf16.mxu0 %v2570_v35  ;;  %v2646_v34 = vld [vmem:[%s3143_s11 + $0x3d0] ss:$8 sps:$4 sm:$0xff]   ;;  %v2651_v35 = vld [vmem:[%s3143_s11 + $0x1e4] ss:$8 sps:$4 sm:$0xff]  }
  0xae   : > { %1930 = vmatmul.mubr.bf16.vlgmr.msra.gmra.mrb[0].mxu1 %v2559_v36  ;;  %v2654_v36 = vld [vmem:[%s3143_s11 + $0x3e4] ss:$8 sps:$4 sm:$0xff]  }
  0xaf   : > { %2016 = vmatmul.mubr.bf16.vlgmr.msra.gmra.mrb[0].mxu0 %v2565_v37  ;;  %1941 = vmatpush1.bf16.msra.mxu1 %v2562_v38  ;;  %v2649_v37 = vld [vmem:[%s3143_s11 + $0x1e0] ss:$8 sps:$4 sm:$0xff]  }
  0xb0   : > { %2027 = vmatpush1.bf16.msra.mxu0 %v2568_v39  ;;  %1942 = vmatprep.subr.bf16.mxu1 %v2573_v40  ;;  %v2652_v38 = vld [vmem:[%s3143_s11 + $0x3e0] ss:$8 sps:$4 sm:$0xff]   ;;  %v2657_v39 = vld [vmem:[%s3143_s11 + $0x1f4] ss:$8 sps:$4 sm:$0xff]  }
  0xb1   : > { %2028 = vmatprep.subr.bf16.mxu0 %v2576_v41  ;;  %1972 = vmatprep.mubr.bf16.mxu1 %v2663_v63  ;;  %v2660_v40 = vld [vmem:[%s3143_s11 + $0x3f4] ss:$8 sps:$4 sm:$0xff]   ;;  %v2655_v41 = vld [vmem:[%s3143_s11 + $0x1f0] ss:$8 sps:$4 sm:$0xff]   ;;  %v2691_v63 = vld [vmem:[%s3143_s11 + $0x480] ss:$8 sps:$4 sm:$0xff]  }
  0xb2   : > { %2058 = vmatprep.mubr.bf16.mxu0 %v2666_v0  ;;  %v2696_v0 = vld [vmem:[%s3143_s11 + $0x494] ss:$8 sps:$4 sm:$0xff]  }
  0xb3   : > { %1943 = vmatpush1.bf16.msra.mxu1 %v2571_v42  ;;  %v2658_v42 = vld [vmem:[%s3143_s11 + $0x3f0] ss:$8 sps:$4 sm:$0xff]  }
  0xb4   : > { %2029 = vmatpush1.bf16.msra.mxu0 %v2574_v43  ;;  %1944 = vmatprep.subr.bf16.mxu1 %v2579_v44  ;;  %v2669_v43 = vld [vmem:[%s3143_s11 + $0x404] ss:$8 sps:$4 sm:$0xff]   ;;  %v2661_v44 = vld [vmem:[%s3360_s0 + $0x8] ss:$40 sps:$4 sm:$0xff]  }
  0xb5   : > { %2030 = vmatprep.subr.bf16.mxu0 %v2582_v45  ;;  %v2664_v45 = vld [vmem:[%s3360_s0 + $0x18] ss:$40 sps:$4 sm:$0xff]  }
  0xb7   : > { %1945 = vmatpush1.bf16.msra.mxu1 %v2577_v47  ;;  %v2717_v47 = vld [vmem:[%s3360_s0 + $0x24] ss:$40 sps:$4 sm:$0xff]  }
  0xb8   : > { %2031 = vmatpush1.bf16.msra.mxu0 %v2580_v48  ;;  %1946 = vmatprep.subr.bf16.mxu1 %v2585_v49  ;;  %v2672_v48 = vld [vmem:[%s3143_s11 + $0x414] ss:$8 sps:$4 sm:$0xff]   ;;  %v2670_v49 = vld [vmem:[%s3143_s11 + $0x410] ss:$8 sps:$4 sm:$0xff]  }
  0xb9   : > { %2032 = vmatprep.subr.bf16.mxu0 %v2588_v50  ;;  %v2675_v50 = vld [vmem:[%s3143_s11 + $0x424] ss:$8 sps:$4 sm:$0xff]  }
  0xbb   : > { %1947 = vmatpush1.bf16.msra.mxu1 %v2583_v51  ;;  %v2673_v51 = vld [vmem:[%s3143_s11 + $0x420] ss:$8 sps:$4 sm:$0xff]  }
  0xbc   : > { %2033 = vmatpush1.bf16.msra.mxu0 %v2586_v52  ;;  %1948 = vmatprep.subr.bf16.mxu1 %v2591_v53  ;;  %v2678_v52 = vld [vmem:[%s3143_s11 + $0x434] ss:$8 sps:$4 sm:$0xff]   ;;  %v2676_v53 = vld [vmem:[%s3143_s11 + $0x430] ss:$8 sps:$4 sm:$0xff]  }
  0xbd   : > { %2034 = vmatprep.subr.bf16.mxu0 %v2594_v54  ;;  %v2681_v54 = vld [vmem:[%s3143_s11 + $0x444] ss:$8 sps:$4 sm:$0xff]  }
  0xbf   : > { %1949 = vmatpush1.bf16.msra.mxu1 %v2589_v55  ;;  %v2679_v55 = vld [vmem:[%s3143_s11 + $0x440] ss:$8 sps:$4 sm:$0xff]  }
  0xc0   : > { %2035 = vmatpush1.bf16.msra.mxu0 %v2592_v56  ;;  %1950 = vmatprep.subr.bf16.mxu1 %v2597_v57  ;;  %v2684_v56 = vld [vmem:[%s3143_s11 + $0x454] ss:$8 sps:$4 sm:$0xff]   ;;  %v2682_v57 = vld [vmem:[%s3143_s11 + $0x450] ss:$8 sps:$4 sm:$0xff]  }
  0xc1   : > { %2036 = vmatprep.subr.bf16.mxu0 %v2600_v58  ;;  %v2687_v58 = vld [vmem:[%s3143_s11 + $0x464] ss:$8 sps:$4 sm:$0xff]  }
  0xc3   : > { %1951 = vmatpush1.bf16.msra.mxu1 %v2595_v59  ;;  %v2685_v59 = vld [vmem:[%s3143_s11 + $0x460] ss:$8 sps:$4 sm:$0xff]  }
  0xc4   : > { %2037 = vmatpush1.bf16.msra.mxu0 %v2598_v60  ;;  %1952 = vmatprep.subr.bf16.mxu1 %v2603_v61  ;;  %v2690_v60 = vld [vmem:[%s3143_s11 + $0x474] ss:$8 sps:$4 sm:$0xff]   ;;  %v2688_v61 = vld [vmem:[%s3143_s11 + $0x470] ss:$8 sps:$4 sm:$0xff]  }
  0xc5   : > { %2038 = vmatprep.subr.bf16.mxu0 %v2606_v62  ;;  %v2693_v62 = vld [vmem:[%s3143_s11 + $0x484] ss:$8 sps:$4 sm:$0xff]  }
  0xc7   : > { %1953 = vmatpush1.bf16.msra.mxu1 %v2601_v1  ;;  %v2694_v1 = vld [vmem:[%s3143_s11 + $0x490] ss:$8 sps:$4 sm:$0xff]  }
  0xc8   : > { %2039 = vmatpush1.bf16.msra.mxu0 %v2604_v2  ;;  %1954 = vmatprep.subr.bf16.mxu1 %v2609_v3  ;;  %v2699_v2 = vld [vmem:[%s3143_s11 + $0x4a4] ss:$8 sps:$4 sm:$0xff]   ;;  %v2697_v3 = vld [vmem:[%s3143_s11 + $0x4a0] ss:$8 sps:$4 sm:$0xff]  }
  0xc9   : > { %2040 = vmatprep.subr.bf16.mxu0 %v2612_v4  ;;  %v2702_v4 = vld [vmem:[%s3143_s11 + $0x4b4] ss:$8 sps:$4 sm:$0xff]  }
  0xcb   : > { %1955 = vmatpush1.bf16.msra.mxu1 %v2607_v5  ;;  %v2700_v5 = vld [vmem:[%s3143_s11 + $0x4b0] ss:$8 sps:$4 sm:$0xff]  }
  0xcc   : > { %2041 = vmatpush1.bf16.msra.mxu0 %v2610_v6  ;;  %1956 = vmatprep.subr.bf16.mxu1 %v2615_v7  ;;  %v2705_v6 = vld [vmem:[%s3143_s11 + $0x4c4] ss:$8 sps:$4 sm:$0xff]   ;;  %v2703_v7 = vld [vmem:[%s3143_s11 + $0x4c0] ss:$8 sps:$4 sm:$0xff]  }
  0xcd   : > { %2042 = vmatprep.subr.bf16.mxu0 %v2618_v8  ;;  %v2708_v8 = vld [vmem:[%s3143_s11 + $0x4d4] ss:$8 sps:$4 sm:$0xff]  }
  0xcf   : > { %1957 = vmatpush1.bf16.msra.mxu1 %v2613_v9  ;;  %v2706_v9 = vld [vmem:[%s3143_s11 + $0x4d0] ss:$8 sps:$4 sm:$0xff]  }
  0xd0   : > { %2043 = vmatpush1.bf16.msra.mxu0 %v2616_v10  ;;  %1958 = vmatprep.subr.bf16.mxu1 %v2621_v11  ;;  %v2711_v10 = vld [vmem:[%s3143_s11 + $0x4e4] ss:$8 sps:$4 sm:$0xff]   ;;  %v2709_v11 = vld [vmem:[%s3143_s11 + $0x4e0] ss:$8 sps:$4 sm:$0xff]  }
  0xd1   : > { %2044 = vmatprep.subr.bf16.mxu0 %v2624_v12  ;;  %v2714_v12 = vld [vmem:[%s3143_s11 + $0x4f4] ss:$8 sps:$4 sm:$0xff]  }
  0xd3   : > { %1959 = vmatpush1.bf16.msra.mxu1 %v2619_v13  ;;  %v2712_v13 = vld [vmem:[%s3143_s11 + $0x4f0] ss:$8 sps:$4 sm:$0xff]  }
  0xd4   : > { %2045 = vmatpush1.bf16.msra.mxu0 %v2622_v14  ;;  %1960 = vmatprep.subr.bf16.mxu1 %v2627_v15  ;;  %v2715_v14 = vld [vmem:[%s3360_s0 + $0x20] ss:$40 sps:$4 sm:$0xff]  }
  0xd5   : > { %2046 = vmatprep.subr.bf16.mxu0 %v2630_v16 }
  0xd7   : > { %1961 = vmatpush1.bf16.msra.mxu1 %v2625_v17 }
  0xd8   : > { %2047 = vmatpush1.bf16.msra.mxu0 %v2628_v18  ;;  %1962 = vmatprep.subr.bf16.mxu1 %v2633_v19 }
  0xd9   : > { %2048 = vmatprep.subr.bf16.mxu0 %v2636_v20 }
  0xdb   : > { %1963 = vmatpush1.bf16.msra.mxu1 %v2631_v21 }
  0xdc   : > { %2049 = vmatpush1.bf16.msra.mxu0 %v2634_v22  ;;  %1964 = vmatprep.subr.bf16.mxu1 %v2639_v23 }
  0xdd   : > { %2050 = vmatprep.subr.bf16.mxu0 %v2642_v24 }
  0xdf   : > { %1965 = vmatpush1.bf16.msra.mxu1 %v2637_v28 }
  0xe0   : > { %2051 = vmatpush1.bf16.msra.mxu0 %v2640_v29  ;;  %1966 = vmatprep.subr.bf16.mxu1 %v2645_v31 }
  0xe1   : > { %2052 = vmatprep.subr.bf16.mxu0 %v2648_v32 }
  0xe3   : > { %1967 = vmatpush1.bf16.msra.mxu1 %v2643_v33 }
  0xe4   : > { %2053 = vmatpush1.bf16.msra.mxu0 %v2646_v34  ;;  %1968 = vmatprep.subr.bf16.mxu1 %v2651_v35 }
  0xe5   : > { %2054 = vmatprep.subr.bf16.mxu0 %v2654_v36 }
  0xe7   : > { %1969 = vmatpush1.bf16.msra.mxu1 %v2649_v37 }
  0xe8   : > { %2055 = vmatpush1.bf16.msra.mxu0 %v2652_v38  ;;  %1970 = vmatprep.subr.bf16.mxu1 %v2657_v39 }
  0xe9   : > { %2056 = vmatprep.subr.bf16.mxu0 %v2660_v40 }
  0xeb   : > { %1971 = vmatpush1.bf16.msra.mxu1 %v2655_v41 }
  0xec   : > { %2057 = vmatpush1.bf16.msra.mxu0 %v2658_v42 }
  0xed   : > { %2069 = vmatprep.subr.bf16.mxu0 %v2669_v43 }
  0xee   : > { %1973 = vmatmul.mubr.bf16.vlgmr.msra.gmra.mrb[0].mxu1 %v2661_v44 }
  0xef   : > { %2059 = vmatmul.mubr.bf16.vlgmr.msra.gmra.mrb[0].mxu0 %v2664_v45 }
  0xf0   : > { %2070 = vmatpush1.bf16.msra.mxu0 %v2667_v46  ;;  %2101 = vmatprep.mubr.bf16.mxu0 %v2717_v47 }
  0xf1   : > { %2071 = vmatprep.subr.bf16.mxu0 %v2672_v48 }
  0xf4   : > { %2072 = vmatpush1.bf16.msra.mxu0 %v2670_v49 }
  0xf5   : > { %2073 = vmatprep.subr.bf16.mxu0 %v2675_v50 }
  0xf8   : > { %2074 = vmatpush1.bf16.msra.mxu0 %v2673_v51 }
  0xf9   : > { %2075 = vmatprep.subr.bf16.mxu0 %v2678_v52 }
  0xfc   : > { %2076 = vmatpush1.bf16.msra.mxu0 %v2676_v53 }
  0xfd   : > { %2077 = vmatprep.subr.bf16.mxu0 %v2681_v54 }
 0x100   : > { %2078 = vmatpush1.bf16.msra.mxu0 %v2679_v55 }
 0x101   : > { %2079 = vmatprep.subr.bf16.mxu0 %v2684_v56 }
 0x104   : > { %2080 = vmatpush1.bf16.msra.mxu0 %v2682_v57 }
 0x105   : > { %2081 = vmatprep.subr.bf16.mxu0 %v2687_v58 }
 0x108   : > { %2082 = vmatpush1.bf16.msra.mxu0 %v2685_v59 }
 0x109   : > { %2083 = vmatprep.subr.bf16.mxu0 %v2690_v60 }
 0x10c   : > { %2084 = vmatpush1.bf16.msra.mxu0 %v2688_v61 }
 0x10d   : > { %2085 = vmatprep.subr.bf16.mxu0 %v2693_v62 }
 0x110   : > { %2086 = vmatpush1.bf16.msra.mxu0 %v2691_v63 }
 0x111   : > { %2087 = vmatprep.subr.bf16.mxu0 %v2696_v0 }
 0x114   : > { %2088 = vmatpush1.bf16.msra.mxu0 %v2694_v1 }
 0x115   : > { %2089 = vmatprep.subr.bf16.mxu0 %v2699_v2 }
 0x118   : > { %2090 = vmatpush1.bf16.msra.mxu0 %v2697_v3 }
 0x119   : > { %2091 = vmatprep.subr.bf16.mxu0 %v2702_v4 }
 0x11c   : > { %2092 = vmatpush1.bf16.msra.mxu0 %v2700_v5 }
 0x11d   : > { %2093 = vmatprep.subr.bf16.mxu0 %v2705_v6 }
 0x120   : > { %2094 = vmatpush1.bf16.msra.mxu0 %v2703_v7 }
 0x121   : > { %2095 = vmatprep.subr.bf16.mxu0 %v2708_v8 }
 0x124   : > { %2096 = vmatpush1.bf16.msra.mxu0 %v2706_v9  ;;  %v1040_v19 = vpop.permute.xlu0 %1039 }
 0x125   : > { %2097 = vmatprep.subr.bf16.mxu0 %v2711_v10  ;;  %v2121_v21 = vpop.permute.xlu1 %2120 }
 0x128   : > { %2098 = vmatpush1.bf16.msra.mxu0 %v2709_v11  ;;  %v1045_v20 = vpop.permute.xlu0 %1044 }
 0x129   : > { %2099 = vmatprep.subr.bf16.mxu0 %v2714_v12  ;;  %v2126_v34 = vpop.permute.xlu1 %2125 }
 0x12c   : > { %2100 = vmatpush1.bf16.msra.mxu0 %v2712_v13 }
 0x12f   : > { %2102 = vmatmul.mubr.bf16.vlgmr.msra.gmra.mrb[0].mxu0 %v2715_v14 }
 0x1c1   : > { %v1974_v15 = vpop.f32.mrb[0].mxu1 }
 0x1c2   : > { %v1976_v16 = vpop.f32.mrb[1].mxu1  ;;  %v2414_v22 = vadd.f32 %v1974_v15, %v1040_v19 }
 0x1c3   : > { %v1978_v17 = vpop.f32.mrb[2].mxu1  ;;  %v2416_v23 = vadd.f32 %v1976_v16, %v1040_v19 }
 0x1c4   : > { %v1980_v18 = vpop.f32.mrb[3].mxu1  ;;  %v2418_v25 = vadd.f32 %v1978_v17, %v1045_v20 }
 0x1c5   : > { %v2420_v28 = vadd.f32 %v1980_v18, %v1045_v20 }
 0x202   : > { %v2103_v24 = vpop.f32.mrb[0].mxu0 }
 0x203   : > { %v2415_v26 = vadd.f32 %v2414_v22, %v2103_v24  ;;  %v2105_v27 = vpop.f32.mrb[1].mxu0 }
 0x204   : > { %v2417_v29 = vadd.f32 %v2416_v23, %v2105_v27  ;;  %v2107_v30 = vpop.f32.mrb[2].mxu0 }
 0x205   : > { %vm2112_vm0 = vcmp.ge.f32.partialorder %v2415_v26, 0.0  ;;  %v2128_v31 = vmul.f32 %v2415_v26, %v2121_v21  ;;  %v2419_v32 = vadd.f32 %v2418_v25, %v2107_v30  ;;  %v2109_v33 = vpop.f32.mrb[3].mxu0  ;;  %2146 = sbr.rel (!%p2798_p5) target bundleno = 532 (0x214), region = 78 }
 0x206   : > { %vm2113_vm1 = vcmp.ge.f32.partialorder %v2417_v29, 0.0  ;;  %v2129_v35 = vmul.f32 %v2417_v29, %v2121_v21  ;;  %v2421_v36 = vadd.f32 %v2420_v28, %v2109_v33 }
 0x207   : > { %v2132_v37 = vsel %vm2112_vm0, %v2415_v26, %v2128_v31  ;;  %vm2114_vm2 = vcmp.ge.f32.partialorder %v2419_v32, 0.0  ;;  %v2130_v38 = vmul.f32 %v2419_v32, %v2126_v34 }
 0x208   : > { %2136 = vst [vmem:[%s862_s15] sm:$0xff] %v2132_v37  ;;  %v2133_v39 = vsel %vm2113_vm1, %v2417_v29, %v2129_v35  ;;  %vm2115_vm3 = vcmp.ge.f32.partialorder %v2421_v36, 0.0  ;;  %v2131_v40 = vmul.f32 %v2421_v36, %v2126_v34 }
 0x209   : > { %2137 = vst [vmem:[%s862_s15 + $0x8] sm:$0xff] %v2133_v39  ;;  %v2134_v41 = vsel %vm2114_vm2, %v2419_v32, %v2130_v38 }
 0x20a   : > { %2138 = vst [vmem:[%s862_s15 + $0x10] sm:$0xff] %v2134_v41  ;;  %v2135_v42 = vsel %vm2115_vm3, %v2421_v36, %v2131_v40 }
 0x20b   : > { %2139 = vst [vmem:[%s862_s15 + $0x18] sm:$0xff] %v2135_v42 }
 0x20f   : > { %v2162_v43 = vld [vmem:[%s862_s15] sm:$0xff] }
 0x210   : > { %v2164_v44 = vld [vmem:[%s862_s15 + $0x8] sm:$0xff]  ;;  %2163 = vst [vmem:[%s2149_s28] sm:$0xff] %v2162_v43 }
 0x211   : > { %v2166_v45 = vld [vmem:[%s862_s15 + $0x10] sm:$0xff]  ;;  %2165 = vst [vmem:[%s2149_s28 + $0x8] sm:$0xff] %v2164_v44 }
 0x212   : > { %v2168_v46 = vld [vmem:[%s862_s15 + $0x18] sm:$0xff]  ;;  %2167 = vst [vmem:[%s2149_s28 + $0x20] sm:$0xff] %v2166_v45 }
 0x213   : > { %2169 = vst [vmem:[%s2149_s28 + $0x28] sm:$0xff] %v2168_v46 }
 0x214 PF: > { %p11_p10 = scmp.ge.s32.totalorder %s2785_s19, 4   ;;  %s3366_s15 = smov %s2736_s16 }
 0x215   : > { %s3367_s16 = smov %s2796_s22  ;;  %s3368_s17 = smov %s2785_s19 }
 0x216   :  { %13 = sbr.rel (!%p11_p10) target bundleno = 2 (0x2), region = 132 }

</bundles_post_ra>
